<compile_context>
chip_gen: v5e
topology: v5e:2x2
jax: 0.10.0
libtpu: 0.0.40
codegen_flags: <defaults>
</compile_context>

<pallas_src>
import functools
import math

import jax
import jax.numpy as jnp
from jax import lax
from jax.experimental import pallas as pl
from jax.experimental.pallas import tpu as pltpu


def _round_up(x, m):
    return ((x + m - 1) // m) * m


# ----------------------------------------------------------------------------
# Kernel 1: tiled matmul + bias + optional LeakyReLU(0.2)   (MXU)
# ----------------------------------------------------------------------------
def _mm_bias_act_kernel(x_ref, w_ref, b_ref, o_ref, acc_ref, *, leaky):
    @pl.when(pl.program_id(2) == 0)
    def _init():
        acc_ref[...] = jnp.zeros_like(acc_ref)

    acc_ref[...] += jnp.dot(x_ref[...], w_ref[...],
                            preferred_element_type=jnp.float32)

    @pl.when(pl.program_id(2) == pl.num_programs(2) - 1)
    def _finalize():
        acc = acc_ref[...] + b_ref[...]            # f32 epilogue (v5e-safe)
        if leaky:
            acc = jnp.where(acc >= 0.0, acc, 0.2 * acc)   # LeakyReLU(0.2)
        o_ref[...] = acc.astype(o_ref.dtype)


def matmul_bias_act(x, w, b, *, leaky=False, out_dtype=jnp.bfloat16,
                    tm=512, tn=128, tk=512):
    """act(x @ w + b); x:(M,K) w:(K,N) b:(N,).  bf16 MXU operands, f32 accum.

    M/K/N are zero-padded to tile multiples; N is padded to >=128 so stores are
    lane-dense (unmasked vst).  Worst-case double-buffered VMEM for (512,128,512)
    tiles is ~2 MiB — far below v7x's 64 MiB physical / 32 MiB scoped budget.
    """
    M, K = x.shape
    K2, N = w.shape
    assert K == K2
    tm = min(tm, _round_up(M, 16))
    tn = min(tn, _round_up(N, 128))
    tk = min(tk, _round_up(K, 128))
    Mp, Kp, Np = _round_up(M, tm), _round_up(K, tk), _round_up(N, tn)

    xp = jnp.pad(x.astype(jnp.bfloat16), ((0, Mp - M), (0, Kp - K)))
    wp = jnp.pad(w.astype(jnp.bfloat16), ((0, Kp - K), (0, Np - N)))
    bp = jnp.pad(b.astype(jnp.float32).reshape(1, N), ((0, 0), (0, Np - N)))

    out = pl.pallas_call(
        functools.partial(_mm_bias_act_kernel, leaky=leaky),
        out_shape=jax.ShapeDtypeStruct((Mp, Np), out_dtype),
        grid_spec=pltpu.PrefetchScalarGridSpec(
            num_scalar_prefetch=0,
            grid=(Mp // tm, Np // tn, Kp // tk),
            in_specs=[
                pl.BlockSpec((tm, tk), lambda i, j, k: (i, k)),
                pl.BlockSpec((tk, tn), lambda i, j, k: (k, j)),
                pl.BlockSpec((1, tn), lambda i, j, k: (0, j)),
            ],
            out_specs=pl.BlockSpec((tm, tn), lambda i, j, k: (i, j)),
            scratch_shapes=[pltpu.VMEM((tm, tn), jnp.float32)],
        ),
        compiler_params=pltpu.CompilerParams(
            dimension_semantics=("parallel", "parallel", "arbitrary"),
            vmem_limit_bytes=32 * 1024 * 1024,
        ),
    )(xp, wp, bp)
    if Mp != M or Np != N:
        out = out[:M, :N]
    return out


# ----------------------------------------------------------------------------
# Kernel 2: BlurLayer [1,2,1]x[1,2,1]/16, depthwise, pad=1   (VPU, separable)
# ----------------------------------------------------------------------------
def _blur_kernel(x_ref, o_ref):
    H, W = o_ref.shape[1], o_ref.shape[2]
    x = x_ref[0].astype(jnp.float32)                         # (H+2, W+2, C)
    v = x[0:H] + 2.0 * x[1:H + 1] + x[2:H + 2]               # vertical [1,2,1]
    hb = v[:, 0:W] + 2.0 * v[:, 1:W + 1] + v[:, 2:W + 2]     # horizontal [1,2,1]
    o_ref[0] = (hb * (1.0 / 16.0)).astype(o_ref.dtype)


def blur3x3(x_nhwc):
    B, H, W, C = x_nhwc.shape
    xp = jnp.pad(x_nhwc, ((0, 0), (1, 1), (1, 1), (0, 0)))
    return pl.pallas_call(
        _blur_kernel,
        out_shape=jax.ShapeDtypeStruct((B, H, W, C), x_nhwc.dtype),
        grid=(B,),
        in_specs=[pl.BlockSpec((1, H + 2, W + 2, C), lambda b: (b, 0, 0, 0))],
        out_specs=pl.BlockSpec((1, H, W, C), lambda b: (b, 0, 0, 0)),
        compiler_params=pltpu.CompilerParams(dimension_semantics=("parallel",)),
    )(xp)
    # TODO(synk): at real StyleGAN resolutions this per-image block needs
    # spatial tiling with halos; fine at these sizes.


# ----------------------------------------------------------------------------
# Kernel 3: progressive-growing fade-in mix, alpha via SMEM (no recompiles)
# ----------------------------------------------------------------------------
def _mix_kernel(alpha_ref, a_ref, b_ref, o_ref):
    alpha = alpha_ref[0]
    a = a_ref[...].astype(jnp.float32)
    b = b_ref[...].astype(jnp.float32)
    o_ref[...] = (alpha * a + (1.0 - alpha) * b).astype(o_ref.dtype)


def fade_mix(straight, residual, alpha):
    B, H, W, C = straight.shape
    M, N = B * H, W * C                                      # lane-dense last dim
    a2 = straight.reshape(M, N)
    b2 = residual.reshape(M, N)
    tm = min(256, _round_up(M, 16))
    Mp = _round_up(M, tm)
    if Mp != M:
        a2 = jnp.pad(a2, ((0, Mp - M), (0, 0)))
        b2 = jnp.pad(b2, ((0, Mp - M), (0, 0)))
    alpha_arr = jnp.asarray(alpha, jnp.float32).reshape(1)
    out = pl.pallas_call(
        _mix_kernel,
        out_shape=jax.ShapeDtypeStruct((Mp, N), straight.dtype),
        grid=(Mp // tm,),
        in_specs=[
            pl.BlockSpec(memory_space=pltpu.MemorySpace.SMEM),
            pl.BlockSpec((tm, N), lambda i: (i, 0)),
            pl.BlockSpec((tm, N), lambda i: (i, 0)),
        ],
        out_specs=pl.BlockSpec((tm, N), lambda i: (i, 0)),
        compiler_params=pltpu.CompilerParams(dimension_semantics=("parallel",)),
    )(alpha_arr, a2, b2)
    return out[:M].reshape(B, H, W, C)


# ----------------------------------------------------------------------------
# Kernel 4: minibatch-stddev statistic (computed straight from NHWC)
# ----------------------------------------------------------------------------
def _mbstd_kernel(x_ref, o_ref):
    x = x_ref[...]                                  # (group, m, H*W*C), f32
    mu = jnp.mean(x, axis=0, keepdims=True)
    var = jnp.mean((x - mu) ** 2, axis=0, keepdims=True)
    sd = jnp.sqrt(var + 1e-8)
    o_ref[...] = jnp.mean(sd, axis=2, keepdims=True)          # (1, m, 1)


def mbstd_stat(x_gmf):
    g, m, F = x_gmf.shape
    return pl.pallas_call(
        _mbstd_kernel,
        out_shape=jax.ShapeDtypeStruct((1, m, 1), jnp.float32),
        grid=(1,),
        in_specs=[pl.BlockSpec((g, m, F), lambda i: (0, 0, 0))],
        out_specs=pl.BlockSpec((1, m, 1), lambda i: (0, 0, 0)),
    )(x_gmf.astype(jnp.float32))


# ----------------------------------------------------------------------------
# Kernel 5: fused head = dense0 + LeakyReLU + dense1
# ----------------------------------------------------------------------------
def _head_kernel(x_ref, w0_ref, b0_ref, w1_ref, b1_ref, o_ref):
    h = jnp.dot(x_ref[...], w0_ref[...], preferred_element_type=jnp.float32)
    h = h + b0_ref[...]
    h = jnp.where(h >= 0.0, h, 0.2 * h)
    s = jnp.sum(h * w1_ref[...], axis=1, keepdims=True) + b1_ref[...]
    o_ref[...] = s.astype(o_ref.dtype)


def dense_head(x, w0, b0, w1_row, b1):
    B, K0 = x.shape
    C = w0.shape[1]
    Bp = _round_up(B, 16)
    xp = jnp.pad(x.astype(jnp.bfloat16), ((0, Bp - B), (0, 0)))
    out = pl.pallas_call(
        _head_kernel,
        out_shape=jax.ShapeDtypeStruct((Bp, 1), jnp.float32),
        grid=(1,),
        in_specs=[
            pl.BlockSpec((Bp, K0), lambda i: (0, 0)),
            pl.BlockSpec((K0, C), lambda i: (0, 0)),
            pl.BlockSpec((1, C), lambda i: (0, 0)),
            pl.BlockSpec((1, C), lambda i: (0, 0)),
            pl.BlockSpec((1, 1), lambda i: (0, 0)),
        ],
        out_specs=pl.BlockSpec((Bp, 1), lambda i: (0, 0)),
    )(xp, w0, b0.reshape(1, C), w1_row, b1.reshape(1, 1))
    return out[:B]


# ----------------------------------------------------------------------------
# Plain-JAX glue: im2col (bf16), conv wrapper
# ----------------------------------------------------------------------------
def im2col(x_nhwc, kh, kw, stride=1, pad=0):
    B, H, W, C = x_nhwc.shape
    if pad:
        x_nhwc = jnp.pad(x_nhwc, ((0, 0), (pad, pad), (pad, pad), (0, 0)))
    Ho = (H + 2 * pad - kh) // stride + 1
    Wo = (W + 2 * pad - kw) // stride + 1
    cols = []
    for dy in range(kh):
        for dx in range(kw):
            patch = lax.slice(
                x_nhwc,
                (0, dy, dx, 0),
                (B, dy + (Ho - 1) * stride + 1, dx + (Wo - 1) * stride + 1, C),
                (1, stride, stride, 1))
            cols.append(patch.reshape(B * Ho * Wo, C))
    return jnp.concatenate(cols, axis=1), (B, Ho, Wo)


def conv2d(x_nhwc, w_mat, b, *, k, stride, pad, leaky, out_dtype=jnp.bfloat16):
    # TODO(synk): cols are still materialized (in bf16); in-kernel tap
    # accumulation with halo DMAs would cut HBM reads another ~4-9x.
    cols, (B, Ho, Wo) = im2col(x_nhwc, k, k, stride=stride, pad=pad)
    y = matmul_bias_act(cols, w_mat, b, leaky=leaky, out_dtype=out_dtype)
    return y.reshape(B, Ho, Wo, w_mat.shape[1])


# ---- deterministic parameter construction (use_wscale=True, lrmul=1) --------
def _conv_weight_eff(key, cin, cout, k, gain):
    w = jax.random.normal(key, (cout, cin, k, k), jnp.float32)    # init_std = 1
    return w * (gain * (cin * k * k) ** -0.5)                     # he-std multiplier


def conv_weight_matrix(key, cin, cout, k, gain):
    w_eff = _conv_weight_eff(key, cin, cout, k, gain)
    # rows ordered (dy, dx, cin) to match im2col column layout
    return jnp.transpose(w_eff, (2, 3, 1, 0)).reshape(k * k * cin, cout)


def conv_down_weight_matrix(key, cin, cout, gain):
    """conv3x3(stride1,pad1) -> AvgPool2d(2) precomposed into one 4x4 stride-2
    pad-1 conv (identical math to EqualizedConv2d(downscale=True))."""
    w_eff = _conv_weight_eff(key, cin, cout, 3, gain)
    wp = jnp.pad(w_eff, ((0, 0), (0, 0), (1, 1), (1, 1)))
    w4 = (wp[:, :, 1:, 1:] + wp[:, :, :-1, 1:] +
          wp[:, :, 1:, :-1] + wp[:, :, :-1, :-1]) * 0.25
    return jnp.transpose(w4, (2, 3, 1, 0)).reshape(16 * cin, cout)


# ----------------------------------------------------------------------------
# Discriminator
# ----------------------------------------------------------------------------
class DiscriminatorPallas:
    def __init__(self, resolution, num_channels=3, fmap_base=8192, fmap_decay=1.0,
                 fmap_max=32, mbstd_group_size=4, mbstd_num_features=1,
                 structure="linear", seed=0):
        gain = math.sqrt(2.0)
        bf16 = jnp.bfloat16

        def nf(stage):
            return min(int(fmap_base / 2.0 ** (stage * fmap_decay)), fmap_max)

        rlog2 = int(math.log2(resolution))
        assert resolution == 2 ** rlog2 and resolution >= 4
        self.depth = rlog2 - 1
        self.structure = structure
        self.mbstd_group_size = mbstd_group_size
        self.mbstd_num_features = mbstd_num_features

        key = jax.random.PRNGKey(seed)
        keys = iter(jax.random.split(key, 64))

        self.blocks = []
        self.from_rgb = []
        for res in range(rlog2, 2, -1):
            cin, cout = nf(res - 1), nf(res - 2)
            self.blocks.append(dict(
                conv0_w=conv_weight_matrix(next(keys), cin, cin, 3, gain).astype(bf16),
                conv0_b=jnp.zeros((cin,), jnp.float32),
                conv1_w=conv_down_weight_matrix(next(keys), cin, cout, gain).astype(bf16),
                conv1_b=jnp.zeros((cout,), jnp.float32),
            ))
            w_rgb = conv_weight_matrix(next(keys), num_channels, cin, 1, gain)
            self.from_rgb.append(dict(
                w=w_rgb.astype(bf16),
                # AvgPool2d(2) then 1x1 conv == single 2x2 stride-2 conv (w/4 per tap)
                w_pool=jnp.tile(0.25 * w_rgb, (4, 1)).astype(bf16),
                b=jnp.zeros((cin,), jnp.float32)))
        w_rgb = conv_weight_matrix(next(keys), num_channels, nf(2), 1, gain)
        self.from_rgb.append(dict(
            w=w_rgb.astype(bf16),
            w_pool=jnp.tile(0.25 * w_rgb, (4, 1)).astype(bf16),
            b=jnp.zeros((nf(2),), jnp.float32)))

        # DiscriminatorTop
        c_top = nf(2)
        self.top_conv_w = conv_weight_matrix(
            next(keys), c_top + mbstd_num_features, c_top, 3, gain).astype(bf16)
        self.top_conv_b = jnp.zeros((c_top,), jnp.float32)
        # dense0 weight generated in PyTorch's (cout, C*H*W) NCHW-flatten layout,
        # then its input rows permuted ONCE to NHWC order -> no runtime transpose.
        cin0 = c_top * 4 * 4
        w0 = jax.random.normal(next(keys), (c_top, cin0), jnp.float32) * (gain * cin0 ** -0.5)
        w0 = w0.reshape(c_top, c_top, 4, 4).transpose(0, 2, 3, 1).reshape(c_top, cin0)
        self.dense0_w = w0.T.astype(bf16)                      # (H*W*C, c_top)
        self.dense0_b = jnp.zeros((c_top,), jnp.float32)
        w1 = jax.random.normal(next(keys), (1, c_top), jnp.float32) * (1.0 * c_top ** -0.5)
        self.dense1_w = w1                                     # (1, c_top), last_gain = 1
        self.dense1_b = jnp.zeros((1,), jnp.float32)

        self._forward_jit = jax.jit(self._forward, static_argnums=(1,))

    # -- building blocks -------------------------------------------------
    def _from_rgb_layer(self, idx, x):
        p = self.from_rgb[idx]
        return conv2d(x, p["w"], p["b"], k=1, stride=1, pad=0, leaky=False)

    def _from_rgb_pooled(self, idx, x):
        p = self.from_rgb[idx]
        return conv2d(x, p["w_pool"], p["b"], k=2, stride=2, pad=0, leaky=False)

    def _block(self, idx, x):
        p = self.blocks[idx]
        x = conv2d(x, p["conv0_w"], p["conv0_b"], k=3, stride=1, pad=1, leaky=True)
        x = blur3x3(x)
        x = conv2d(x, p["conv1_w"], p["conv1_b"], k=4, stride=2, pad=1, leaky=True)
        return x

    def _final_block(self, x):
        B, H, W, C = x.shape
        g = min(self.mbstd_group_size, B)
        m = B // g
        # TODO(synk): mbstd_num_features > 1 path not implemented.
        stat = mbstd_stat(x.astype(jnp.float32).reshape(g, m, H * W * C))   # (1,m,1)
        per_sample = stat[0, jnp.arange(B) % m, 0]                          # (B,)
        feat = jnp.broadcast_to(per_sample[:, None, None, None],
                                (B, H, W, 1)).astype(x.dtype)
        x = jnp.concatenate([x, feat], axis=-1)                             # (B,H,W,C+1)
        x = conv2d(x, self.top_conv_w, self.top_conv_b, k=3, stride=1, pad=1, leaky=True)
        x_flat = x.reshape(B, H * W * x.shape[-1])
        return dense_head(x_flat, self.dense0_w, self.dense0_b,
                          self.dense1_w, self.dense1_b)                      # (B, 1)

    # -- forward ----------------------------------------------------------
    def _forward(self, images_nchw, depth, alpha):
        x_img = jnp.transpose(images_nchw, (0, 2, 3, 1)).astype(jnp.bfloat16)  # NHWC

        if self.structure == "fixed":
            x = self._from_rgb_layer(0, x_img)
            for i in range(len(self.blocks)):
                x = self._block(i, x)
            return self._final_block(x)

        if self.structure == "linear":
            if depth > 0:
                idx = self.depth - depth
                residual = self._from_rgb_pooled(idx, x_img)
                straight = self._block(idx - 1, self._from_rgb_layer(idx - 1, x_img))
                x = fade_mix(straight, residual, alpha)
                for i in range(idx, len(self.blocks)):
                    x = self._block(i, x)
            else:
                x = self._from_rgb_layer(-1, x_img)
            return self._final_block(x)

        raise KeyError("Unknown structure: ", self.structure)

    def __call__(self, images_nchw, depth, alpha=1.0):
        assert depth < self.depth, "Requested output depth cannot be produced"
        return self._forward_jit(images_nchw.astype(jnp.float32), int(depth),
                                 jnp.float32(alpha))


# ----------------------------------------------------------------------------
if __name__ == "__main__":
    key = jax.random.PRNGKey(0)
    k_img, k_img0 = jax.random.split(key)

    # resolution=16 -> depth_total=3 (2 DiscriminatorBlocks); fmap_max=32 keeps
    # all feature-map counts equal (as in the real model where fmap_max caps them).
    disc = DiscriminatorPallas(resolution=16, num_channels=3, fmap_max=32,
                               mbstd_group_size=4, mbstd_num_features=1,
                               structure="linear", seed=0)

    # full-resolution input, progressive depth=2 with fade-in alpha=0.7
    images = jax.random.normal(k_img, (4, 3, 16, 16), jnp.float32)
    scores = disc(images, depth=2, alpha=0.7)
    # a different alpha reuses the same executable (alpha flows through SMEM)
    scores_b = disc(images, depth=2, alpha=0.3)

    # lowest-resolution branch (depth=0) on 4x4 images
    images0 = jax.random.normal(k_img0, (4, 3, 4, 4), jnp.float32)
    scores0 = disc(images0, depth=0)

    scores, scores_b, scores0 = jax.block_until_ready((scores, scores_b, scores0))
    assert scores.shape == (4, 1) and scores_b.shape == (4, 1) and scores0.shape == (4, 1)
    assert bool(jnp.all(jnp.isfinite(scores)))
    assert bool(jnp.all(jnp.isfinite(scores_b)))
    assert bool(jnp.all(jnp.isfinite(scores0)))
    print("KERNEL_OK")
</pallas_src>

<mosaic_0001>
module attributes {stable_mosaic.version = 11 : i64} {
  func.func @_mm_bias_act_kernel(%arg0: i32, %arg1: i32, %arg2: i32, %arg3: memref<256x128xbf16, #tpu.memory_space<vmem>>, %arg4: memref<128x128xbf16, #tpu.memory_space<vmem>>, %arg5: memref<1x128xf32, #tpu.memory_space<vmem>>, %arg6: memref<256x128xbf16, #tpu.memory_space<vmem>>, %arg7: memref<256x128xf32, #tpu.memory_space<vmem>>) attributes {dimension_semantics = [#tpu.dimension_semantics<parallel>, #tpu.dimension_semantics<parallel>, #tpu.dimension_semantics<arbitrary>], iteration_bounds = array<i64: 1, 1, 1>, scalar_prefetch = 0 : i64, scratch_operands = 1 : i64, tpu.core_type = #tpu.core_type<tc>, window_params = [{transform_indices = @transform_0, window_bounds = array<i64: 256, 128>}, {transform_indices = @transform_1, window_bounds = array<i64: 128, 128>}, {transform_indices = @transform_2, window_bounds = array<i64: 1, 128>}, {transform_indices = @transform_3, window_bounds = array<i64: 256, 128>}]} {
    %c0_i32 = arith.constant 0 : i32
    %0 = arith.cmpi eq, %arg2, %c0_i32 : i32
    %1 = arith.extui %0 : i1 to i32
    %c0_i32_0 = arith.constant 0 : i32
    %2 = arith.cmpi ne, %1, %c0_i32_0 : i32
    scf.if %2 {
      %cst_10 = arith.constant 0.000000e+00 : f32
      %12 = vector.broadcast %cst_10 : f32 to vector<256x128xf32>
      %c0_11 = arith.constant 0 : index
      %c0_12 = arith.constant 0 : index
      %13 = vector.load %arg7[%c0_11, %c0_12] : memref<256x128xf32, #tpu.memory_space<vmem>>, vector<256x128xf32>
      tpu.vector_store %arg7[%c0_11, %c0_12], %12 {strides = array<i32>} : memref<256x128xf32, #tpu.memory_space<vmem>>, vector<256x128xf32>,
    } else {
    }
    %c0 = arith.constant 0 : index
    %c0_1 = arith.constant 0 : index
    %3 = vector.load %arg7[%c0, %c0_1] : memref<256x128xf32, #tpu.memory_space<vmem>>, vector<256x128xf32>
    %c0_2 = arith.constant 0 : index
    %c0_3 = arith.constant 0 : index
    %4 = vector.load %arg3[%c0_2, %c0_3] : memref<256x128xbf16, #tpu.memory_space<vmem>>, vector<256x128xbf16>
    %c0_4 = arith.constant 0 : index
    %c0_5 = arith.constant 0 : index
    %5 = vector.load %arg4[%c0_4, %c0_5] : memref<128x128xbf16, #tpu.memory_space<vmem>>, vector<128x128xbf16>
    %cst = arith.constant dense<0.000000e+00> : vector<256x128xf32>
    %6 = tpu.matmul %4, %5, %cst {dimension_numbers = #tpu.dot_dimension_numbers<[1], [0], [0], [1], [0, 0, 1, 1], [], []>} : vector<256x128xbf16>, vector<128x128xbf16>, vector<256x128xf32> -> vector<256x128xf32>
    %7 = arith.addf %3, %6 : vector<256x128xf32>
    %c0_6 = arith.constant 0 : index
    %c0_7 = arith.constant 0 : index
    %8 = vector.load %arg7[%c0_6, %c0_7] : memref<256x128xf32, #tpu.memory_space<vmem>>, vector<256x128xf32>
    tpu.vector_store %arg7[%c0_6, %c0_7], %7 {strides = array<i32>} : memref<256x128xf32, #tpu.memory_space<vmem>>, vector<256x128xf32>,
    %c0_i32_8 = arith.constant 0 : i32
    %9 = arith.cmpi eq, %arg2, %c0_i32_8 : i32
    %10 = arith.extui %9 : i1 to i32
    %c0_i32_9 = arith.constant 0 : i32
    %11 = arith.cmpi ne, %10, %c0_i32_9 : i32
    scf.if %11 {
      %c0_10 = arith.constant 0 : index
      %c0_11 = arith.constant 0 : index
      %12 = vector.load %arg7[%c0_10, %c0_11] : memref<256x128xf32, #tpu.memory_space<vmem>>, vector<256x128xf32>
      %c0_12 = arith.constant 0 : index
      %c0_13 = arith.constant 0 : index
      %13 = vector.load %arg5[%c0_12, %c0_13] : memref<1x128xf32, #tpu.memory_space<vmem>>, vector<1x128xf32>
      %14 = vector.broadcast %13 : vector<1x128xf32> to vector<256x128xf32>
      %15 = arith.addf %12, %14 : vector<256x128xf32>
      %16 = arith.truncf %15 : vector<256x128xf32> to vector<256x128xbf16>
      %c0_14 = arith.constant 0 : index
      %c0_15 = arith.constant 0 : index
      %17 = vector.load %arg6[%c0_14, %c0_15] : memref<256x128xbf16, #tpu.memory_space<vmem>>, vector<256x128xbf16>
      tpu.vector_store %arg6[%c0_14, %c0_15], %16 {strides = array<i32>} : memref<256x128xbf16, #tpu.memory_space<vmem>>, vector<256x128xbf16>,
    } else {
    }
    return
  }
  func.func @transform_0(%arg0: i32, %arg1: i32, %arg2: i32) -> (i32, i32) {
    %c0_i32 = arith.constant 0 : i32
    return %arg0, %arg2 : i32, i32
  }
  func.func @transform_1(%arg0: i32, %arg1: i32, %arg2: i32) -> (i32, i32) {
    %c0_i32 = arith.constant 0 : i32
    return %arg2, %arg1 : i32, i32
  }
  func.func @transform_2(%arg0: i32, %arg1: i32, %arg2: i32) -> (i32, i32) {
    %c0_i32 = arith.constant 0 : i32
    %c0_i32_0 = arith.constant 0 : i32
    return %c0_i32, %arg1 : i32, i32
  }
  func.func @transform_3(%arg0: i32, %arg1: i32, %arg2: i32) -> (i32, i32) {
    %c0_i32 = arith.constant 0 : i32
    return %arg0, %arg1 : i32, i32
  }
}

module attributes {stable_mosaic.version = 11 : i64} {
  func.func @_mm_bias_act_kernel(%arg0: i32, %arg1: i32, %arg2: i32, %arg3: memref<512x128xbf16, #tpu.memory_space<vmem>>, %arg4: memref<128x128xbf16, #tpu.memory_space<vmem>>, %arg5: memref<1x128xf32, #tpu.memory_space<vmem>>, %arg6: memref<512x128xbf16, #tpu.memory_space<vmem>>, %arg7: memref<512x128xf32, #tpu.memory_space<vmem>>) attributes {dimension_semantics = [#tpu.dimension_semantics<parallel>, #tpu.dimension_semantics<parallel>, #tpu.dimension_semantics<arbitrary>], iteration_bounds = array<i64: 2, 1, 1>, scalar_prefetch = 0 : i64, scratch_operands = 1 : i64, tpu.core_type = #tpu.core_type<tc>, window_params = [{transform_indices = @transform_0, window_bounds = array<i64: 512, 128>}, {transform_indices = @transform_1, window_bounds = array<i64: 128, 128>}, {transform_indices = @transform_2, window_bounds = array<i64: 1, 128>}, {transform_indices = @transform_3, window_bounds = array<i64: 512, 128>}]} {
    %c0_i32 = arith.constant 0 : i32
    %0 = arith.cmpi eq, %arg2, %c0_i32 : i32
    %1 = arith.extui %0 : i1 to i32
    %c0_i32_0 = arith.constant 0 : i32
    %2 = arith.cmpi ne, %1, %c0_i32_0 : i32
    scf.if %2 {
      %cst_10 = arith.constant 0.000000e+00 : f32
      %12 = vector.broadcast %cst_10 : f32 to vector<512x128xf32>
      %c0_11 = arith.constant 0 : index
      %c0_12 = arith.constant 0 : index
      %13 = vector.load %arg7[%c0_11, %c0_12] : memref<512x128xf32, #tpu.memory_space<vmem>>, vector<512x128xf32>
      tpu.vector_store %arg7[%c0_11, %c0_12], %12 {strides = array<i32>} : memref<512x128xf32, #tpu.memory_space<vmem>>, vector<512x128xf32>,
    } else {
    }
    %c0 = arith.constant 0 : index
    %c0_1 = arith.constant 0 : index
    %3 = vector.load %arg7[%c0, %c0_1] : memref<512x128xf32, #tpu.memory_space<vmem>>, vector<512x128xf32>
    %c0_2 = arith.constant 0 : index
    %c0_3 = arith.constant 0 : index
    %4 = vector.load %arg3[%c0_2, %c0_3] : memref<512x128xbf16, #tpu.memory_space<vmem>>, vector<512x128xbf16>
    %c0_4 = arith.constant 0 : index
    %c0_5 = arith.constant 0 : index
    %5 = vector.load %arg4[%c0_4, %c0_5] : memref<128x128xbf16, #tpu.memory_space<vmem>>, vector<128x128xbf16>
    %cst = arith.constant dense<0.000000e+00> : vector<512x128xf32>
    %6 = tpu.matmul %4, %5, %cst {dimension_numbers = #tpu.dot_dimension_numbers<[1], [0], [0], [1], [0, 0, 1, 1], [], []>} : vector<512x128xbf16>, vector<128x128xbf16>, vector<512x128xf32> -> vector<512x128xf32>
    %7 = arith.addf %3, %6 : vector<512x128xf32>
    %c0_6 = arith.constant 0 : index
    %c0_7 = arith.constant 0 : index
    %8 = vector.load %arg7[%c0_6, %c0_7] : memref<512x128xf32, #tpu.memory_space<vmem>>, vector<512x128xf32>
    tpu.vector_store %arg7[%c0_6, %c0_7], %7 {strides = array<i32>} : memref<512x128xf32, #tpu.memory_space<vmem>>, vector<512x128xf32>,
    %c0_i32_8 = arith.constant 0 : i32
    %9 = arith.cmpi eq, %arg2, %c0_i32_8 : i32
    %10 = arith.extui %9 : i1 to i32
    %c0_i32_9 = arith.constant 0 : i32
    %11 = arith.cmpi ne, %10, %c0_i32_9 : i32
    scf.if %11 {
      %c0_10 = arith.constant 0 : index
      %c0_11 = arith.constant 0 : index
      %12 = vector.load %arg7[%c0_10, %c0_11] : memref<512x128xf32, #tpu.memory_space<vmem>>, vector<512x128xf32>
      %c0_12 = arith.constant 0 : index
      %c0_13 = arith.constant 0 : index
      %13 = vector.load %arg5[%c0_12, %c0_13] : memref<1x128xf32, #tpu.memory_space<vmem>>, vector<1x128xf32>
      %14 = vector.broadcast %13 : vector<1x128xf32> to vector<512x128xf32>
      %15 = arith.addf %12, %14 : vector<512x128xf32>
      %16 = arith.truncf %15 : vector<512x128xf32> to vector<512x128xbf16>
      %c0_14 = arith.constant 0 : index
      %c0_15 = arith.constant 0 : index
      %17 = vector.load %arg6[%c0_14, %c0_15] : memref<512x128xbf16, #tpu.memory_space<vmem>>, vector<512x128xbf16>
      tpu.vector_store %arg6[%c0_14, %c0_15], %16 {strides = array<i32>} : memref<512x128xbf16, #tpu.memory_space<vmem>>, vector<512x128xbf16>,
    } else {
    }
    return
  }
  func.func @transform_0(%arg0: i32, %arg1: i32, %arg2: i32) -> (i32, i32) {
    %c0_i32 = arith.constant 0 : i32
    return %arg0, %arg2 : i32, i32
  }
  func.func @transform_1(%arg0: i32, %arg1: i32, %arg2: i32) -> (i32, i32) {
    %c0_i32 = arith.constant 0 : i32
    return %arg2, %arg1 : i32, i32
  }
  func.func @transform_2(%arg0: i32, %arg1: i32, %arg2: i32) -> (i32, i32) {
    %c0_i32 = arith.constant 0 : i32
    %c0_i32_0 = arith.constant 0 : i32
    return %c0_i32, %arg1 : i32, i32
  }
  func.func @transform_3(%arg0: i32, %arg1: i32, %arg2: i32) -> (i32, i32) {
    %c0_i32 = arith.constant 0 : i32
    return %arg0, %arg1 : i32, i32
  }
}

module attributes {stable_mosaic.version = 11 : i64} {
  func.func @_mm_bias_act_kernel(%arg0: i32, %arg1: i32, %arg2: i32, %arg3: memref<512x384xbf16, #tpu.memory_space<vmem>>, %arg4: memref<384x128xbf16, #tpu.memory_space<vmem>>, %arg5: memref<1x128xf32, #tpu.memory_space<vmem>>, %arg6: memref<512x128xbf16, #tpu.memory_space<vmem>>, %arg7: memref<512x128xf32, #tpu.memory_space<vmem>>) attributes {dimension_semantics = [#tpu.dimension_semantics<parallel>, #tpu.dimension_semantics<parallel>, #tpu.dimension_semantics<arbitrary>], iteration_bounds = array<i64: 2, 1, 1>, scalar_prefetch = 0 : i64, scratch_operands = 1 : i64, tpu.core_type = #tpu.core_type<tc>, window_params = [{transform_indices = @transform_0, window_bounds = array<i64: 512, 384>}, {transform_indices = @transform_1, window_bounds = array<i64: 384, 128>}, {transform_indices = @transform_2, window_bounds = array<i64: 1, 128>}, {transform_indices = @transform_3, window_bounds = array<i64: 512, 128>}]} {
    %c0_i32 = arith.constant 0 : i32
    %0 = arith.cmpi eq, %arg2, %c0_i32 : i32
    %1 = arith.extui %0 : i1 to i32
    %c0_i32_0 = arith.constant 0 : i32
    %2 = arith.cmpi ne, %1, %c0_i32_0 : i32
    scf.if %2 {
      %cst_10 = arith.constant 0.000000e+00 : f32
      %12 = vector.broadcast %cst_10 : f32 to vector<512x128xf32>
      %c0_11 = arith.constant 0 : index
      %c0_12 = arith.constant 0 : index
      %13 = vector.load %arg7[%c0_11, %c0_12] : memref<512x128xf32, #tpu.memory_space<vmem>>, vector<512x128xf32>
      tpu.vector_store %arg7[%c0_11, %c0_12], %12 {strides = array<i32>} : memref<512x128xf32, #tpu.memory_space<vmem>>, vector<512x128xf32>,
    } else {
    }
    %c0 = arith.constant 0 : index
    %c0_1 = arith.constant 0 : index
    %3 = vector.load %arg7[%c0, %c0_1] : memref<512x128xf32, #tpu.memory_space<vmem>>, vector<512x128xf32>
    %c0_2 = arith.constant 0 : index
    %c0_3 = arith.constant 0 : index
    %4 = vector.load %arg3[%c0_2, %c0_3] : memref<512x384xbf16, #tpu.memory_space<vmem>>, vector<512x384xbf16>
    %c0_4 = arith.constant 0 : index
    %c0_5 = arith.constant 0 : index
    %5 = vector.load %arg4[%c0_4, %c0_5] : memref<384x128xbf16, #tpu.memory_space<vmem>>, vector<384x128xbf16>
    %cst = arith.constant dense<0.000000e+00> : vector<512x128xf32>
    %6 = tpu.matmul %4, %5, %cst {dimension_numbers = #tpu.dot_dimension_numbers<[1], [0], [0], [1], [0, 0, 1, 1], [], []>} : vector<512x384xbf16>, vector<384x128xbf16>, vector<512x128xf32> -> vector<512x128xf32>
    %7 = arith.addf %3, %6 : vector<512x128xf32>
    %c0_6 = arith.constant 0 : index
    %c0_7 = arith.constant 0 : index
    %8 = vector.load %arg7[%c0_6, %c0_7] : memref<512x128xf32, #tpu.memory_space<vmem>>, vector<512x128xf32>
    tpu.vector_store %arg7[%c0_6, %c0_7], %7 {strides = array<i32>} : memref<512x128xf32, #tpu.memory_space<vmem>>, vector<512x128xf32>,
    %c0_i32_8 = arith.constant 0 : i32
    %9 = arith.cmpi eq, %arg2, %c0_i32_8 : i32
    %10 = arith.extui %9 : i1 to i32
    %c0_i32_9 = arith.constant 0 : i32
    %11 = arith.cmpi ne, %10, %c0_i32_9 : i32
    scf.if %11 {
      %c0_10 = arith.constant 0 : index
      %c0_11 = arith.constant 0 : index
      %12 = vector.load %arg7[%c0_10, %c0_11] : memref<512x128xf32, #tpu.memory_space<vmem>>, vector<512x128xf32>
      %c0_12 = arith.constant 0 : index
      %c0_13 = arith.constant 0 : index
      %13 = vector.load %arg5[%c0_12, %c0_13] : memref<1x128xf32, #tpu.memory_space<vmem>>, vector<1x128xf32>
      %14 = vector.broadcast %13 : vector<1x128xf32> to vector<512x128xf32>
      %15 = arith.addf %12, %14 : vector<512x128xf32>
      %cst_14 = arith.constant 0.000000e+00 : f32
      %16 = vector.broadcast %cst_14 : f32 to vector<512x128xf32>
      %17 = arith.cmpf oge, %15, %16 : vector<512x128xf32>
      %cst_15 = arith.constant 2.000000e-01 : f32
      %18 = vector.broadcast %cst_15 : f32 to vector<512x128xf32>
      %19 = arith.mulf %18, %15 : vector<512x128xf32>
      %20 = arith.select %17, %15, %19 : vector<512x128xi1>, vector<512x128xf32>
      %21 = arith.truncf %20 : vector<512x128xf32> to vector<512x128xbf16>
      %c0_16 = arith.constant 0 : index
      %c0_17 = arith.constant 0 : index
      %22 = vector.load %arg6[%c0_16, %c0_17] : memref<512x128xbf16, #tpu.memory_space<vmem>>, vector<512x128xbf16>
      tpu.vector_store %arg6[%c0_16, %c0_17], %21 {strides = array<i32>} : memref<512x128xbf16, #tpu.memory_space<vmem>>, vector<512x128xbf16>,
    } else {
    }
    return
  }
  func.func @transform_0(%arg0: i32, %arg1: i32, %arg2: i32) -> (i32, i32) {
    %c0_i32 = arith.constant 0 : i32
    return %arg0, %arg2 : i32, i32
  }
  func.func @transform_1(%arg0: i32, %arg1: i32, %arg2: i32) -> (i32, i32) {
    %c0_i32 = arith.constant 0 : i32
    return %arg2, %arg1 : i32, i32
  }
  func.func @transform_2(%arg0: i32, %arg1: i32, %arg2: i32) -> (i32, i32) {
    %c0_i32 = arith.constant 0 : i32
    %c0_i32_0 = arith.constant 0 : i32
    return %c0_i32, %arg1 : i32, i32
  }
  func.func @transform_3(%arg0: i32, %arg1: i32, %arg2: i32) -> (i32, i32) {
    %c0_i32 = arith.constant 0 : i32
    return %arg0, %arg1 : i32, i32
  }
}

module attributes {stable_mosaic.version = 11 : i64} {
  func.func @_blur_kernel(%arg0: i32, %arg1: memref<1x18x18x32xbf16, #tpu.memory_space<vmem>>, %arg2: memref<1x16x16x32xbf16, #tpu.memory_space<vmem>>) attributes {dimension_semantics = [#tpu.dimension_semantics<parallel>], iteration_bounds = array<i64: 4>, scalar_prefetch = 0 : i64, scratch_operands = 0 : i64, tpu.core_type = #tpu.core_type<tc>, window_params = [{transform_indices = @transform_0, window_bounds = array<i64: 1, 18, 18, 32>}, {transform_indices = @transform_1, window_bounds = array<i64: 1, 16, 16, 32>}]} {
    %c0 = arith.constant 0 : index
    %c0_0 = arith.constant 0 : index
    %c0_1 = arith.constant 0 : index
    %c0_2 = arith.constant 0 : index
    %0 = vector.load %arg1[%c0, %c0_0, %c0_1, %c0_2] : memref<1x18x18x32xbf16, #tpu.memory_space<vmem>>, vector<1x18x18x32xbf16>
    %1 = vector.shape_cast %0 : vector<1x18x18x32xbf16> to vector<18x18x32xbf16>
    %2 = arith.extf %1 : vector<18x18x32xbf16> to vector<18x18x32xf32>
    %3 = vector.extract_strided_slice %2 {offsets = [0, 0, 0], sizes = [16, 18, 32], strides = [1, 1, 1]} : vector<18x18x32xf32> to vector<16x18x32xf32>
    %4 = vector.extract_strided_slice %2 {offsets = [1, 0, 0], sizes = [16, 18, 32], strides = [1, 1, 1]} : vector<18x18x32xf32> to vector<16x18x32xf32>
    %cst = arith.constant 2.000000e+00 : f32
    %5 = vector.broadcast %cst : f32 to vector<16x18x32xf32>
    %6 = arith.mulf %5, %4 : vector<16x18x32xf32>
    %7 = arith.addf %3, %6 : vector<16x18x32xf32>
    %8 = vector.extract_strided_slice %2 {offsets = [2, 0, 0], sizes = [16, 18, 32], strides = [1, 1, 1]} : vector<18x18x32xf32> to vector<16x18x32xf32>
    %9 = arith.addf %7, %8 : vector<16x18x32xf32>
    %10 = vector.extract_strided_slice %9 {offsets = [0, 0, 0], sizes = [16, 16, 32], strides = [1, 1, 1]} : vector<16x18x32xf32> to vector<16x16x32xf32>
    %11 = vector.extract_strided_slice %9 {offsets = [0, 1, 0], sizes = [16, 16, 32], strides = [1, 1, 1]} : vector<16x18x32xf32> to vector<16x16x32xf32>
    %cst_3 = arith.constant 2.000000e+00 : f32
    %12 = vector.broadcast %cst_3 : f32 to vector<16x16x32xf32>
    %13 = arith.mulf %12, %11 : vector<16x16x32xf32>
    %14 = arith.addf %10, %13 : vector<16x16x32xf32>
    %15 = vector.extract_strided_slice %9 {offsets = [0, 2, 0], sizes = [16, 16, 32], strides = [1, 1, 1]} : vector<16x18x32xf32> to vector<16x16x32xf32>
    %16 = arith.addf %14, %15 : vector<16x16x32xf32>
    %cst_4 = arith.constant 6.250000e-02 : f32
    %17 = vector.broadcast %cst_4 : f32 to vector<16x16x32xf32>
    %18 = arith.mulf %16, %17 : vector<16x16x32xf32>
    %19 = arith.truncf %18 : vector<16x16x32xf32> to vector<16x16x32xbf16>
    %c0_5 = arith.constant 0 : index
    %c0_6 = arith.constant 0 : index
    %c0_7 = arith.constant 0 : index
    %c0_8 = arith.constant 0 : index
    %20 = vector.load %arg2[%c0_5, %c0_6, %c0_7, %c0_8] : memref<1x16x16x32xbf16, #tpu.memory_space<vmem>>, vector<1x16x16x32xbf16>
    %21 = vector.shape_cast %20 : vector<1x16x16x32xbf16> to vector<16x16x32xbf16>
    %22 = vector.shape_cast %19 : vector<16x16x32xbf16> to vector<1x16x16x32xbf16>
    tpu.vector_store %arg2[%c0_5, %c0_6, %c0_7, %c0_8], %22 {strides = array<i32>} : memref<1x16x16x32xbf16, #tpu.memory_space<vmem>>, vector<1x16x16x32xbf16>,
    return
  }
  func.func @transform_0(%arg0: i32) -> (i32, i32, i32, i32) {
    %c0_i32 = arith.constant 0 : i32
    %c0_i32_0 = arith.constant 0 : i32
    %c0_i32_1 = arith.constant 0 : i32
    %c0_i32_2 = arith.constant 0 : i32
    return %arg0, %c0_i32, %c0_i32_0, %c0_i32_1 : i32, i32, i32, i32
  }
  func.func @transform_1(%arg0: i32) -> (i32, i32, i32, i32) {
    %c0_i32 = arith.constant 0 : i32
    %c0_i32_0 = arith.constant 0 : i32
    %c0_i32_1 = arith.constant 0 : i32
    %c0_i32_2 = arith.constant 0 : i32
    return %arg0, %c0_i32, %c0_i32_0, %c0_i32_1 : i32, i32, i32, i32
  }
}

module attributes {stable_mosaic.version = 11 : i64} {
  func.func @_mix_kernel(%arg0: i32, %arg1: memref<1xf32, #tpu.memory_space<smem>>, %arg2: memref<32x256xbf16, #tpu.memory_space<vmem>>, %arg3: memref<32x256xbf16, #tpu.memory_space<vmem>>, %arg4: memref<32x256xbf16, #tpu.memory_space<vmem>>) attributes {dimension_semantics = [#tpu.dimension_semantics<parallel>], iteration_bounds = array<i64: 1>, scalar_prefetch = 0 : i64, scratch_operands = 0 : i64, tpu.core_type = #tpu.core_type<tc>, window_params = [{transform_indices = @transform_0, window_bounds = array<i64: 1>}, {transform_indices = @transform_1, window_bounds = array<i64: 32, 256>}, {transform_indices = @transform_2, window_bounds = array<i64: 32, 256>}, {transform_indices = @transform_3, window_bounds = array<i64: 32, 256>}]} {
    %c0 = arith.constant 0 : index
    %0 = memref.load %arg1[%c0] : memref<1xf32, #tpu.memory_space<smem>>
    %c0_0 = arith.constant 0 : index
    %c0_1 = arith.constant 0 : index
    %1 = vector.load %arg2[%c0_0, %c0_1] : memref<32x256xbf16, #tpu.memory_space<vmem>>, vector<32x256xbf16>
    %2 = arith.extf %1 : vector<32x256xbf16> to vector<32x256xf32>
    %c0_2 = arith.constant 0 : index
    %c0_3 = arith.constant 0 : index
    %3 = vector.load %arg3[%c0_2, %c0_3] : memref<32x256xbf16, #tpu.memory_space<vmem>>, vector<32x256xbf16>
    %4 = arith.extf %3 : vector<32x256xbf16> to vector<32x256xf32>
    %5 = vector.broadcast %0 : f32 to vector<32x256xf32>
    %6 = arith.mulf %5, %2 : vector<32x256xf32>
    %cst = arith.constant 1.000000e+00 : f32
    %7 = arith.subf %cst, %0 : f32
    %8 = vector.broadcast %7 : f32 to vector<32x256xf32>
    %9 = arith.mulf %8, %4 : vector<32x256xf32>
    %10 = arith.addf %6, %9 : vector<32x256xf32>
    %11 = arith.truncf %10 : vector<32x256xf32> to vector<32x256xbf16>
    %c0_4 = arith.constant 0 : index
    %c0_5 = arith.constant 0 : index
    %12 = vector.load %arg4[%c0_4, %c0_5] : memref<32x256xbf16, #tpu.memory_space<vmem>>, vector<32x256xbf16>
    tpu.vector_store %arg4[%c0_4, %c0_5], %11 {strides = array<i32>} : memref<32x256xbf16, #tpu.memory_space<vmem>>, vector<32x256xbf16>,
    return
  }
  func.func @transform_0(%arg0: i32) -> i32 {
    %c0_i32 = arith.constant 0 : i32
    %c0_i32_0 = arith.constant 0 : i32
    return %c0_i32 : i32
  }
  func.func @transform_1(%arg0: i32) -> (i32, i32) {
    %c0_i32 = arith.constant 0 : i32
    %c0_i32_0 = arith.constant 0 : i32
    return %arg0, %c0_i32 : i32, i32
  }
  func.func @transform_2(%arg0: i32) -> (i32, i32) {
    %c0_i32 = arith.constant 0 : i32
    %c0_i32_0 = arith.constant 0 : i32
    return %arg0, %c0_i32 : i32, i32
  }
  func.func @transform_3(%arg0: i32) -> (i32, i32) {
    %c0_i32 = arith.constant 0 : i32
    %c0_i32_0 = arith.constant 0 : i32
    return %arg0, %c0_i32 : i32, i32
  }
}

module attributes {stable_mosaic.version = 11 : i64} {
  func.func @_mm_bias_act_kernel(%arg0: i32, %arg1: i32, %arg2: i32, %arg3: memref<256x512xbf16, #tpu.memory_space<vmem>>, %arg4: memref<512x128xbf16, #tpu.memory_space<vmem>>, %arg5: memref<1x128xf32, #tpu.memory_space<vmem>>, %arg6: memref<256x128xbf16, #tpu.memory_space<vmem>>, %arg7: memref<256x128xf32, #tpu.memory_space<vmem>>) attributes {dimension_semantics = [#tpu.dimension_semantics<parallel>, #tpu.dimension_semantics<parallel>, #tpu.dimension_semantics<arbitrary>], iteration_bounds = array<i64: 1, 1, 1>, scalar_prefetch = 0 : i64, scratch_operands = 1 : i64, tpu.core_type = #tpu.core_type<tc>, window_params = [{transform_indices = @transform_0, window_bounds = array<i64: 256, 512>}, {transform_indices = @transform_1, window_bounds = array<i64: 512, 128>}, {transform_indices = @transform_2, window_bounds = array<i64: 1, 128>}, {transform_indices = @transform_3, window_bounds = array<i64: 256, 128>}]} {
    %c0_i32 = arith.constant 0 : i32
    %0 = arith.cmpi eq, %arg2, %c0_i32 : i32
    %1 = arith.extui %0 : i1 to i32
    %c0_i32_0 = arith.constant 0 : i32
    %2 = arith.cmpi ne, %1, %c0_i32_0 : i32
    scf.if %2 {
      %cst_10 = arith.constant 0.000000e+00 : f32
      %12 = vector.broadcast %cst_10 : f32 to vector<256x128xf32>
      %c0_11 = arith.constant 0 : index
      %c0_12 = arith.constant 0 : index
      %13 = vector.load %arg7[%c0_11, %c0_12] : memref<256x128xf32, #tpu.memory_space<vmem>>, vector<256x128xf32>
      tpu.vector_store %arg7[%c0_11, %c0_12], %12 {strides = array<i32>} : memref<256x128xf32, #tpu.memory_space<vmem>>, vector<256x128xf32>,
    } else {
    }
    %c0 = arith.constant 0 : index
    %c0_1 = arith.constant 0 : index
    %3 = vector.load %arg7[%c0, %c0_1] : memref<256x128xf32, #tpu.memory_space<vmem>>, vector<256x128xf32>
    %c0_2 = arith.constant 0 : index
    %c0_3 = arith.constant 0 : index
    %4 = vector.load %arg3[%c0_2, %c0_3] : memref<256x512xbf16, #tpu.memory_space<vmem>>, vector<256x512xbf16>
    %c0_4 = arith.constant 0 : index
    %c0_5 = arith.constant 0 : index
    %5 = vector.load %arg4[%c0_4, %c0_5] : memref<512x128xbf16, #tpu.memory_space<vmem>>, vector<512x128xbf16>
    %cst = arith.constant dense<0.000000e+00> : vector<256x128xf32>
    %6 = tpu.matmul %4, %5, %cst {dimension_numbers = #tpu.dot_dimension_numbers<[1], [0], [0], [1], [0, 0, 1, 1], [], []>} : vector<256x512xbf16>, vector<512x128xbf16>, vector<256x128xf32> -> vector<256x128xf32>
    %7 = arith.addf %3, %6 : vector<256x128xf32>
    %c0_6 = arith.constant 0 : index
    %c0_7 = arith.constant 0 : index
    %8 = vector.load %arg7[%c0_6, %c0_7] : memref<256x128xf32, #tpu.memory_space<vmem>>, vector<256x128xf32>
    tpu.vector_store %arg7[%c0_6, %c0_7], %7 {strides = array<i32>} : memref<256x128xf32, #tpu.memory_space<vmem>>, vector<256x128xf32>,
    %c0_i32_8 = arith.constant 0 : i32
    %9 = arith.cmpi eq, %arg2, %c0_i32_8 : i32
    %10 = arith.extui %9 : i1 to i32
    %c0_i32_9 = arith.constant 0 : i32
    %11 = arith.cmpi ne, %10, %c0_i32_9 : i32
    scf.if %11 {
      %c0_10 = arith.constant 0 : index
      %c0_11 = arith.constant 0 : index
      %12 = vector.load %arg7[%c0_10, %c0_11] : memref<256x128xf32, #tpu.memory_space<vmem>>, vector<256x128xf32>
      %c0_12 = arith.constant 0 : index
      %c0_13 = arith.constant 0 : index
      %13 = vector.load %arg5[%c0_12, %c0_13] : memref<1x128xf32, #tpu.memory_space<vmem>>, vector<1x128xf32>
      %14 = vector.broadcast %13 : vector<1x128xf32> to vector<256x128xf32>
      %15 = arith.addf %12, %14 : vector<256x128xf32>
      %cst_14 = arith.constant 0.000000e+00 : f32
      %16 = vector.broadcast %cst_14 : f32 to vector<256x128xf32>
      %17 = arith.cmpf oge, %15, %16 : vector<256x128xf32>
      %cst_15 = arith.constant 2.000000e-01 : f32
      %18 = vector.broadcast %cst_15 : f32 to vector<256x128xf32>
      %19 = arith.mulf %18, %15 : vector<256x128xf32>
      %20 = arith.select %17, %15, %19 : vector<256x128xi1>, vector<256x128xf32>
      %21 = arith.truncf %20 : vector<256x128xf32> to vector<256x128xbf16>
      %c0_16 = arith.constant 0 : index
      %c0_17 = arith.constant 0 : index
      %22 = vector.load %arg6[%c0_16, %c0_17] : memref<256x128xbf16, #tpu.memory_space<vmem>>, vector<256x128xbf16>
      tpu.vector_store %arg6[%c0_16, %c0_17], %21 {strides = array<i32>} : memref<256x128xbf16, #tpu.memory_space<vmem>>, vector<256x128xbf16>,
    } else {
    }
    return
  }
  func.func @transform_0(%arg0: i32, %arg1: i32, %arg2: i32) -> (i32, i32) {
    %c0_i32 = arith.constant 0 : i32
    return %arg0, %arg2 : i32, i32
  }
  func.func @transform_1(%arg0: i32, %arg1: i32, %arg2: i32) -> (i32, i32) {
    %c0_i32 = arith.constant 0 : i32
    return %arg2, %arg1 : i32, i32
  }
  func.func @transform_2(%arg0: i32, %arg1: i32, %arg2: i32) -> (i32, i32) {
    %c0_i32 = arith.constant 0 : i32
    %c0_i32_0 = arith.constant 0 : i32
    return %c0_i32, %arg1 : i32, i32
  }
  func.func @transform_3(%arg0: i32, %arg1: i32, %arg2: i32) -> (i32, i32) {
    %c0_i32 = arith.constant 0 : i32
    return %arg0, %arg1 : i32, i32
  }
}

module attributes {stable_mosaic.version = 11 : i64} {
  func.func @_mm_bias_act_kernel(%arg0: i32, %arg1: i32, %arg2: i32, %arg3: memref<256x384xbf16, #tpu.memory_space<vmem>>, %arg4: memref<384x128xbf16, #tpu.memory_space<vmem>>, %arg5: memref<1x128xf32, #tpu.memory_space<vmem>>, %arg6: memref<256x128xbf16, #tpu.memory_space<vmem>>, %arg7: memref<256x128xf32, #tpu.memory_space<vmem>>) attributes {dimension_semantics = [#tpu.dimension_semantics<parallel>, #tpu.dimension_semantics<parallel>, #tpu.dimension_semantics<arbitrary>], iteration_bounds = array<i64: 1, 1, 1>, scalar_prefetch = 0 : i64, scratch_operands = 1 : i64, tpu.core_type = #tpu.core_type<tc>, window_params = [{transform_indices = @transform_0, window_bounds = array<i64: 256, 384>}, {transform_indices = @transform_1, window_bounds = array<i64: 384, 128>}, {transform_indices = @transform_2, window_bounds = array<i64: 1, 128>}, {transform_indices = @transform_3, window_bounds = array<i64: 256, 128>}]} {
    %c0_i32 = arith.constant 0 : i32
    %0 = arith.cmpi eq, %arg2, %c0_i32 : i32
    %1 = arith.extui %0 : i1 to i32
    %c0_i32_0 = arith.constant 0 : i32
    %2 = arith.cmpi ne, %1, %c0_i32_0 : i32
    scf.if %2 {
      %cst_10 = arith.constant 0.000000e+00 : f32
      %12 = vector.broadcast %cst_10 : f32 to vector<256x128xf32>
      %c0_11 = arith.constant 0 : index
      %c0_12 = arith.constant 0 : index
      %13 = vector.load %arg7[%c0_11, %c0_12] : memref<256x128xf32, #tpu.memory_space<vmem>>, vector<256x128xf32>
      tpu.vector_store %arg7[%c0_11, %c0_12], %12 {strides = array<i32>} : memref<256x128xf32, #tpu.memory_space<vmem>>, vector<256x128xf32>,
    } else {
    }
    %c0 = arith.constant 0 : index
    %c0_1 = arith.constant 0 : index
    %3 = vector.load %arg7[%c0, %c0_1] : memref<256x128xf32, #tpu.memory_space<vmem>>, vector<256x128xf32>
    %c0_2 = arith.constant 0 : index
    %c0_3 = arith.constant 0 : index
    %4 = vector.load %arg3[%c0_2, %c0_3] : memref<256x384xbf16, #tpu.memory_space<vmem>>, vector<256x384xbf16>
    %c0_4 = arith.constant 0 : index
    %c0_5 = arith.constant 0 : index
    %5 = vector.load %arg4[%c0_4, %c0_5] : memref<384x128xbf16, #tpu.memory_space<vmem>>, vector<384x128xbf16>
    %cst = arith.constant dense<0.000000e+00> : vector<256x128xf32>
    %6 = tpu.matmul %4, %5, %cst {dimension_numbers = #tpu.dot_dimension_numbers<[1], [0], [0], [1], [0, 0, 1, 1], [], []>} : vector<256x384xbf16>, vector<384x128xbf16>, vector<256x128xf32> -> vector<256x128xf32>
    %7 = arith.addf %3, %6 : vector<256x128xf32>
    %c0_6 = arith.constant 0 : index
    %c0_7 = arith.constant 0 : index
    %8 = vector.load %arg7[%c0_6, %c0_7] : memref<256x128xf32, #tpu.memory_space<vmem>>, vector<256x128xf32>
    tpu.vector_store %arg7[%c0_6, %c0_7], %7 {strides = array<i32>} : memref<256x128xf32, #tpu.memory_space<vmem>>, vector<256x128xf32>,
    %c0_i32_8 = arith.constant 0 : i32
    %9 = arith.cmpi eq, %arg2, %c0_i32_8 : i32
    %10 = arith.extui %9 : i1 to i32
    %c0_i32_9 = arith.constant 0 : i32
    %11 = arith.cmpi ne, %10, %c0_i32_9 : i32
    scf.if %11 {
      %c0_10 = arith.constant 0 : index
      %c0_11 = arith.constant 0 : index
      %12 = vector.load %arg7[%c0_10, %c0_11] : memref<256x128xf32, #tpu.memory_space<vmem>>, vector<256x128xf32>
      %c0_12 = arith.constant 0 : index
      %c0_13 = arith.constant 0 : index
      %13 = vector.load %arg5[%c0_12, %c0_13] : memref<1x128xf32, #tpu.memory_space<vmem>>, vector<1x128xf32>
      %14 = vector.broadcast %13 : vector<1x128xf32> to vector<256x128xf32>
      %15 = arith.addf %12, %14 : vector<256x128xf32>
      %cst_14 = arith.constant 0.000000e+00 : f32
      %16 = vector.broadcast %cst_14 : f32 to vector<256x128xf32>
      %17 = arith.cmpf oge, %15, %16 : vector<256x128xf32>
      %cst_15 = arith.constant 2.000000e-01 : f32
      %18 = vector.broadcast %cst_15 : f32 to vector<256x128xf32>
      %19 = arith.mulf %18, %15 : vector<256x128xf32>
      %20 = arith.select %17, %15, %19 : vector<256x128xi1>, vector<256x128xf32>
      %21 = arith.truncf %20 : vector<256x128xf32> to vector<256x128xbf16>
      %c0_16 = arith.constant 0 : index
      %c0_17 = arith.constant 0 : index
      %22 = vector.load %arg6[%c0_16, %c0_17] : memref<256x128xbf16, #tpu.memory_space<vmem>>, vector<256x128xbf16>
      tpu.vector_store %arg6[%c0_16, %c0_17], %21 {strides = array<i32>} : memref<256x128xbf16, #tpu.memory_space<vmem>>, vector<256x128xbf16>,
    } else {
    }
    return
  }
  func.func @transform_0(%arg0: i32, %arg1: i32, %arg2: i32) -> (i32, i32) {
    %c0_i32 = arith.constant 0 : i32
    return %arg0, %arg2 : i32, i32
  }
  func.func @transform_1(%arg0: i32, %arg1: i32, %arg2: i32) -> (i32, i32) {
    %c0_i32 = arith.constant 0 : i32
    return %arg2, %arg1 : i32, i32
  }
  func.func @transform_2(%arg0: i32, %arg1: i32, %arg2: i32) -> (i32, i32) {
    %c0_i32 = arith.constant 0 : i32
    %c0_i32_0 = arith.constant 0 : i32
    return %c0_i32, %arg1 : i32, i32
  }
  func.func @transform_3(%arg0: i32, %arg1: i32, %arg2: i32) -> (i32, i32) {
    %c0_i32 = arith.constant 0 : i32
    return %arg0, %arg1 : i32, i32
  }
}

module attributes {stable_mosaic.version = 11 : i64} {
  func.func @_blur_kernel(%arg0: i32, %arg1: memref<1x10x10x32xbf16, #tpu.memory_space<vmem>>, %arg2: memref<1x8x8x32xbf16, #tpu.memory_space<vmem>>) attributes {dimension_semantics = [#tpu.dimension_semantics<parallel>], iteration_bounds = array<i64: 4>, scalar_prefetch = 0 : i64, scratch_operands = 0 : i64, tpu.core_type = #tpu.core_type<tc>, window_params = [{transform_indices = @transform_0, window_bounds = array<i64: 1, 10, 10, 32>}, {transform_indices = @transform_1, window_bounds = array<i64: 1, 8, 8, 32>}]} {
    %c0 = arith.constant 0 : index
    %c0_0 = arith.constant 0 : index
    %c0_1 = arith.constant 0 : index
    %c0_2 = arith.constant 0 : index
    %0 = vector.load %arg1[%c0, %c0_0, %c0_1, %c0_2] : memref<1x10x10x32xbf16, #tpu.memory_space<vmem>>, vector<1x10x10x32xbf16>
    %1 = vector.shape_cast %0 : vector<1x10x10x32xbf16> to vector<10x10x32xbf16>
    %2 = arith.extf %1 : vector<10x10x32xbf16> to vector<10x10x32xf32>
    %3 = vector.extract_strided_slice %2 {offsets = [0, 0, 0], sizes = [8, 10, 32], strides = [1, 1, 1]} : vector<10x10x32xf32> to vector<8x10x32xf32>
    %4 = vector.extract_strided_slice %2 {offsets = [1, 0, 0], sizes = [8, 10, 32], strides = [1, 1, 1]} : vector<10x10x32xf32> to vector<8x10x32xf32>
    %cst = arith.constant 2.000000e+00 : f32
    %5 = vector.broadcast %cst : f32 to vector<8x10x32xf32>
    %6 = arith.mulf %5, %4 : vector<8x10x32xf32>
    %7 = arith.addf %3, %6 : vector<8x10x32xf32>
    %8 = vector.extract_strided_slice %2 {offsets = [2, 0, 0], sizes = [8, 10, 32], strides = [1, 1, 1]} : vector<10x10x32xf32> to vector<8x10x32xf32>
    %9 = arith.addf %7, %8 : vector<8x10x32xf32>
    %10 = vector.extract_strided_slice %9 {offsets = [0, 0, 0], sizes = [8, 8, 32], strides = [1, 1, 1]} : vector<8x10x32xf32> to vector<8x8x32xf32>
    %11 = vector.extract_strided_slice %9 {offsets = [0, 1, 0], sizes = [8, 8, 32], strides = [1, 1, 1]} : vector<8x10x32xf32> to vector<8x8x32xf32>
    %cst_3 = arith.constant 2.000000e+00 : f32
    %12 = vector.broadcast %cst_3 : f32 to vector<8x8x32xf32>
    %13 = arith.mulf %12, %11 : vector<8x8x32xf32>
    %14 = arith.addf %10, %13 : vector<8x8x32xf32>
    %15 = vector.extract_strided_slice %9 {offsets = [0, 2, 0], sizes = [8, 8, 32], strides = [1, 1, 1]} : vector<8x10x32xf32> to vector<8x8x32xf32>
    %16 = arith.addf %14, %15 : vector<8x8x32xf32>
    %cst_4 = arith.constant 6.250000e-02 : f32
    %17 = vector.broadcast %cst_4 : f32 to vector<8x8x32xf32>
    %18 = arith.mulf %16, %17 : vector<8x8x32xf32>
    %19 = arith.truncf %18 : vector<8x8x32xf32> to vector<8x8x32xbf16>
    %c0_5 = arith.constant 0 : index
    %c0_6 = arith.constant 0 : index
    %c0_7 = arith.constant 0 : index
    %c0_8 = arith.constant 0 : index
    %20 = vector.load %arg2[%c0_5, %c0_6, %c0_7, %c0_8] : memref<1x8x8x32xbf16, #tpu.memory_space<vmem>>, vector<1x8x8x32xbf16>
    %21 = vector.shape_cast %20 : vector<1x8x8x32xbf16> to vector<8x8x32xbf16>
    %22 = vector.shape_cast %19 : vector<8x8x32xbf16> to vector<1x8x8x32xbf16>
    tpu.vector_store %arg2[%c0_5, %c0_6, %c0_7, %c0_8], %22 {strides = array<i32>} : memref<1x8x8x32xbf16, #tpu.memory_space<vmem>>, vector<1x8x8x32xbf16>,
    return
  }
  func.func @transform_0(%arg0: i32) -> (i32, i32, i32, i32) {
    %c0_i32 = arith.constant 0 : i32
    %c0_i32_0 = arith.constant 0 : i32
    %c0_i32_1 = arith.constant 0 : i32
    %c0_i32_2 = arith.constant 0 : i32
    return %arg0, %c0_i32, %c0_i32_0, %c0_i32_1 : i32, i32, i32, i32
  }
  func.func @transform_1(%arg0: i32) -> (i32, i32, i32, i32) {
    %c0_i32 = arith.constant 0 : i32
    %c0_i32_0 = arith.constant 0 : i32
    %c0_i32_1 = arith.constant 0 : i32
    %c0_i32_2 = arith.constant 0 : i32
    return %arg0, %c0_i32, %c0_i32_0, %c0_i32_1 : i32, i32, i32, i32
  }
}

module attributes {stable_mosaic.version = 11 : i64} {
  func.func @_mm_bias_act_kernel(%arg0: i32, %arg1: i32, %arg2: i32, %arg3: memref<64x512xbf16, #tpu.memory_space<vmem>>, %arg4: memref<512x128xbf16, #tpu.memory_space<vmem>>, %arg5: memref<1x128xf32, #tpu.memory_space<vmem>>, %arg6: memref<64x128xbf16, #tpu.memory_space<vmem>>, %arg7: memref<64x128xf32, #tpu.memory_space<vmem>>) attributes {dimension_semantics = [#tpu.dimension_semantics<parallel>, #tpu.dimension_semantics<parallel>, #tpu.dimension_semantics<arbitrary>], iteration_bounds = array<i64: 1, 1, 1>, scalar_prefetch = 0 : i64, scratch_operands = 1 : i64, tpu.core_type = #tpu.core_type<tc>, window_params = [{transform_indices = @transform_0, window_bounds = array<i64: 64, 512>}, {transform_indices = @transform_1, window_bounds = array<i64: 512, 128>}, {transform_indices = @transform_2, window_bounds = array<i64: 1, 128>}, {transform_indices = @transform_3, window_bounds = array<i64: 64, 128>}]} {
    %c0_i32 = arith.constant 0 : i32
    %0 = arith.cmpi eq, %arg2, %c0_i32 : i32
    %1 = arith.extui %0 : i1 to i32
    %c0_i32_0 = arith.constant 0 : i32
    %2 = arith.cmpi ne, %1, %c0_i32_0 : i32
    scf.if %2 {
      %cst_10 = arith.constant 0.000000e+00 : f32
      %12 = vector.broadcast %cst_10 : f32 to vector<64x128xf32>
      %c0_11 = arith.constant 0 : index
      %c0_12 = arith.constant 0 : index
      %13 = vector.load %arg7[%c0_11, %c0_12] : memref<64x128xf32, #tpu.memory_space<vmem>>, vector<64x128xf32>
      tpu.vector_store %arg7[%c0_11, %c0_12], %12 {strides = array<i32>} : memref<64x128xf32, #tpu.memory_space<vmem>>, vector<64x128xf32>,
    } else {
    }
    %c0 = arith.constant 0 : index
    %c0_1 = arith.constant 0 : index
    %3 = vector.load %arg7[%c0, %c0_1] : memref<64x128xf32, #tpu.memory_space<vmem>>, vector<64x128xf32>
    %c0_2 = arith.constant 0 : index
    %c0_3 = arith.constant 0 : index
    %4 = vector.load %arg3[%c0_2, %c0_3] : memref<64x512xbf16, #tpu.memory_space<vmem>>, vector<64x512xbf16>
    %c0_4 = arith.constant 0 : index
    %c0_5 = arith.constant 0 : index
    %5 = vector.load %arg4[%c0_4, %c0_5] : memref<512x128xbf16, #tpu.memory_space<vmem>>, vector<512x128xbf16>
    %cst = arith.constant dense<0.000000e+00> : vector<64x128xf32>
    %6 = tpu.matmul %4, %5, %cst {dimension_numbers = #tpu.dot_dimension_numbers<[1], [0], [0], [1], [0, 0, 1, 1], [], []>} : vector<64x512xbf16>, vector<512x128xbf16>, vector<64x128xf32> -> vector<64x128xf32>
    %7 = arith.addf %3, %6 : vector<64x128xf32>
    %c0_6 = arith.constant 0 : index
    %c0_7 = arith.constant 0 : index
    %8 = vector.load %arg7[%c0_6, %c0_7] : memref<64x128xf32, #tpu.memory_space<vmem>>, vector<64x128xf32>
    tpu.vector_store %arg7[%c0_6, %c0_7], %7 {strides = array<i32>} : memref<64x128xf32, #tpu.memory_space<vmem>>, vector<64x128xf32>,
    %c0_i32_8 = arith.constant 0 : i32
    %9 = arith.cmpi eq, %arg2, %c0_i32_8 : i32
    %10 = arith.extui %9 : i1 to i32
    %c0_i32_9 = arith.constant 0 : i32
    %11 = arith.cmpi ne, %10, %c0_i32_9 : i32
    scf.if %11 {
      %c0_10 = arith.constant 0 : index
      %c0_11 = arith.constant 0 : index
      %12 = vector.load %arg7[%c0_10, %c0_11] : memref<64x128xf32, #tpu.memory_space<vmem>>, vector<64x128xf32>
      %c0_12 = arith.constant 0 : index
      %c0_13 = arith.constant 0 : index
      %13 = vector.load %arg5[%c0_12, %c0_13] : memref<1x128xf32, #tpu.memory_space<vmem>>, vector<1x128xf32>
      %14 = vector.broadcast %13 : vector<1x128xf32> to vector<64x128xf32>
      %15 = arith.addf %12, %14 : vector<64x128xf32>
      %cst_14 = arith.constant 0.000000e+00 : f32
      %16 = vector.broadcast %cst_14 : f32 to vector<64x128xf32>
      %17 = arith.cmpf oge, %15, %16 : vector<64x128xf32>
      %cst_15 = arith.constant 2.000000e-01 : f32
      %18 = vector.broadcast %cst_15 : f32 to vector<64x128xf32>
      %19 = arith.mulf %18, %15 : vector<64x128xf32>
      %20 = arith.select %17, %15, %19 : vector<64x128xi1>, vector<64x128xf32>
      %21 = arith.truncf %20 : vector<64x128xf32> to vector<64x128xbf16>
      %c0_16 = arith.constant 0 : index
      %c0_17 = arith.constant 0 : index
      %22 = vector.load %arg6[%c0_16, %c0_17] : memref<64x128xbf16, #tpu.memory_space<vmem>>, vector<64x128xbf16>
      tpu.vector_store %arg6[%c0_16, %c0_17], %21 {strides = array<i32>} : memref<64x128xbf16, #tpu.memory_space<vmem>>, vector<64x128xbf16>,
    } else {
    }
    return
  }
  func.func @transform_0(%arg0: i32, %arg1: i32, %arg2: i32) -> (i32, i32) {
    %c0_i32 = arith.constant 0 : i32
    return %arg0, %arg2 : i32, i32
  }
  func.func @transform_1(%arg0: i32, %arg1: i32, %arg2: i32) -> (i32, i32) {
    %c0_i32 = arith.constant 0 : i32
    return %arg2, %arg1 : i32, i32
  }
  func.func @transform_2(%arg0: i32, %arg1: i32, %arg2: i32) -> (i32, i32) {
    %c0_i32 = arith.constant 0 : i32
    %c0_i32_0 = arith.constant 0 : i32
    return %c0_i32, %arg1 : i32, i32
  }
  func.func @transform_3(%arg0: i32, %arg1: i32, %arg2: i32) -> (i32, i32) {
    %c0_i32 = arith.constant 0 : i32
    return %arg0, %arg1 : i32, i32
  }
}

module attributes {stable_mosaic.version = 11 : i64} {
  func.func @_mbstd_kernel(%arg0: i32, %arg1: memref<4x1x512xf32, #tpu.memory_space<vmem>>, %arg2: memref<1x1x1xf32, #tpu.memory_space<vmem>>) attributes {dimension_semantics = [#tpu.dimension_semantics<arbitrary>], iteration_bounds = array<i64: 1>, scalar_prefetch = 0 : i64, scratch_operands = 0 : i64, tpu.core_type = #tpu.core_type<tc>, window_params = [{pipeline_mode = #tpu.pipeline_mode<synchronous>, transform_indices = @transform_0, window_bounds = array<i64: 4, 1, 512>}, {pipeline_mode = #tpu.pipeline_mode<synchronous>, transform_indices = @transform_1, window_bounds = array<i64: 1, 1, 1>}]} {
    %c0 = arith.constant 0 : index
    %c0_0 = arith.constant 0 : index
    %c0_1 = arith.constant 0 : index
    %0 = vector.load %arg1[%c0, %c0_0, %c0_1] : memref<4x1x512xf32, #tpu.memory_space<vmem>>, vector<4x1x512xf32>
    %cst = arith.constant dense<0.000000e+00> : vector<1x512xf32>
    %1 = vector.multi_reduction <add>, %0, %cst [0] : vector<4x1x512xf32> to vector<1x512xf32>
    %2 = vector.shape_cast %1 : vector<1x512xf32> to vector<1x1x512xf32>
    %cst_2 = arith.constant 4.000000e+00 : f32
    %3 = vector.broadcast %cst_2 : f32 to vector<1x1x512xf32>
    %4 = arith.divf %2, %3 : vector<1x1x512xf32>
    %5 = vector.broadcast %4 : vector<1x1x512xf32> to vector<4x1x512xf32>
    %6 = arith.subf %0, %5 : vector<4x1x512xf32>
    %7 = arith.mulf %6, %6 : vector<4x1x512xf32>
    %cst_3 = arith.constant dense<0.000000e+00> : vector<1x512xf32>
    %8 = vector.multi_reduction <add>, %7, %cst_3 [0] : vector<4x1x512xf32> to vector<1x512xf32>
    %9 = vector.shape_cast %8 : vector<1x512xf32> to vector<1x1x512xf32>
    %cst_4 = arith.constant 4.000000e+00 : f32
    %10 = vector.broadcast %cst_4 : f32 to vector<1x1x512xf32>
    %11 = arith.divf %9, %10 : vector<1x1x512xf32>
    %cst_5 = arith.constant 9.99999993E-9 : f32
    %12 = vector.broadcast %cst_5 : f32 to vector<1x1x512xf32>
    %13 = arith.addf %11, %12 : vector<1x1x512xf32>
    %14 = math.sqrt %13 : vector<1x1x512xf32>
    %cst_6 = arith.constant dense<0.000000e+00> : vector<1x1xf32>
    %15 = vector.multi_reduction <add>, %14, %cst_6 [2] : vector<1x1x512xf32> to vector<1x1xf32>
    %16 = vector.shape_cast %15 : vector<1x1xf32> to vector<1x1x1xf32>
    %cst_7 = arith.constant 5.120000e+02 : f32
    %17 = vector.broadcast %cst_7 : f32 to vector<1x1x1xf32>
    %18 = arith.divf %16, %17 : vector<1x1x1xf32>
    %c0_8 = arith.constant 0 : index
    %c0_9 = arith.constant 0 : index
    %c0_10 = arith.constant 0 : index
    %19 = vector.load %arg2[%c0_8, %c0_9, %c0_10] : memref<1x1x1xf32, #tpu.memory_space<vmem>>, vector<1x1x1xf32>
    tpu.vector_store %arg2[%c0_8, %c0_9, %c0_10], %18 {strides = array<i32>} : memref<1x1x1xf32, #tpu.memory_space<vmem>>, vector<1x1x1xf32>,
    return
  }
  func.func @transform_0(%arg0: i32) -> (i32, i32, i32) {
    %c0_i32 = arith.constant 0 : i32
    %c0_i32_0 = arith.constant 0 : i32
    %c0_i32_1 = arith.constant 0 : i32
    %c0_i32_2 = arith.constant 0 : i32
    return %c0_i32, %c0_i32_0, %c0_i32_1 : i32, i32, i32
  }
  func.func @transform_1(%arg0: i32) -> (i32, i32, i32) {
    %c0_i32 = arith.constant 0 : i32
    %c0_i32_0 = arith.constant 0 : i32
    %c0_i32_1 = arith.constant 0 : i32
    %c0_i32_2 = arith.constant 0 : i32
    return %c0_i32, %c0_i32_0, %c0_i32_1 : i32, i32, i32
  }
}

module attributes {stable_mosaic.version = 11 : i64} {
  func.func @_mm_bias_act_kernel(%arg0: i32, %arg1: i32, %arg2: i32, %arg3: memref<64x384xbf16, #tpu.memory_space<vmem>>, %arg4: memref<384x128xbf16, #tpu.memory_space<vmem>>, %arg5: memref<1x128xf32, #tpu.memory_space<vmem>>, %arg6: memref<64x128xbf16, #tpu.memory_space<vmem>>, %arg7: memref<64x128xf32, #tpu.memory_space<vmem>>) attributes {dimension_semantics = [#tpu.dimension_semantics<parallel>, #tpu.dimension_semantics<parallel>, #tpu.dimension_semantics<arbitrary>], iteration_bounds = array<i64: 1, 1, 1>, scalar_prefetch = 0 : i64, scratch_operands = 1 : i64, tpu.core_type = #tpu.core_type<tc>, window_params = [{transform_indices = @transform_0, window_bounds = array<i64: 64, 384>}, {transform_indices = @transform_1, window_bounds = array<i64: 384, 128>}, {transform_indices = @transform_2, window_bounds = array<i64: 1, 128>}, {transform_indices = @transform_3, window_bounds = array<i64: 64, 128>}]} {
    %c0_i32 = arith.constant 0 : i32
    %0 = arith.cmpi eq, %arg2, %c0_i32 : i32
    %1 = arith.extui %0 : i1 to i32
    %c0_i32_0 = arith.constant 0 : i32
    %2 = arith.cmpi ne, %1, %c0_i32_0 : i32
    scf.if %2 {
      %cst_10 = arith.constant 0.000000e+00 : f32
      %12 = vector.broadcast %cst_10 : f32 to vector<64x128xf32>
      %c0_11 = arith.constant 0 : index
      %c0_12 = arith.constant 0 : index
      %13 = vector.load %arg7[%c0_11, %c0_12] : memref<64x128xf32, #tpu.memory_space<vmem>>, vector<64x128xf32>
      tpu.vector_store %arg7[%c0_11, %c0_12], %12 {strides = array<i32>} : memref<64x128xf32, #tpu.memory_space<vmem>>, vector<64x128xf32>,
    } else {
    }
    %c0 = arith.constant 0 : index
    %c0_1 = arith.constant 0 : index
    %3 = vector.load %arg7[%c0, %c0_1] : memref<64x128xf32, #tpu.memory_space<vmem>>, vector<64x128xf32>
    %c0_2 = arith.constant 0 : index
    %c0_3 = arith.constant 0 : index
    %4 = vector.load %arg3[%c0_2, %c0_3] : memref<64x384xbf16, #tpu.memory_space<vmem>>, vector<64x384xbf16>
    %c0_4 = arith.constant 0 : index
    %c0_5 = arith.constant 0 : index
    %5 = vector.load %arg4[%c0_4, %c0_5] : memref<384x128xbf16, #tpu.memory_space<vmem>>, vector<384x128xbf16>
    %cst = arith.constant dense<0.000000e+00> : vector<64x128xf32>
    %6 = tpu.matmul %4, %5, %cst {dimension_numbers = #tpu.dot_dimension_numbers<[1], [0], [0], [1], [0, 0, 1, 1], [], []>} : vector<64x384xbf16>, vector<384x128xbf16>, vector<64x128xf32> -> vector<64x128xf32>
    %7 = arith.addf %3, %6 : vector<64x128xf32>
    %c0_6 = arith.constant 0 : index
    %c0_7 = arith.constant 0 : index
    %8 = vector.load %arg7[%c0_6, %c0_7] : memref<64x128xf32, #tpu.memory_space<vmem>>, vector<64x128xf32>
    tpu.vector_store %arg7[%c0_6, %c0_7], %7 {strides = array<i32>} : memref<64x128xf32, #tpu.memory_space<vmem>>, vector<64x128xf32>,
    %c0_i32_8 = arith.constant 0 : i32
    %9 = arith.cmpi eq, %arg2, %c0_i32_8 : i32
    %10 = arith.extui %9 : i1 to i32
    %c0_i32_9 = arith.constant 0 : i32
    %11 = arith.cmpi ne, %10, %c0_i32_9 : i32
    scf.if %11 {
      %c0_10 = arith.constant 0 : index
      %c0_11 = arith.constant 0 : index
      %12 = vector.load %arg7[%c0_10, %c0_11] : memref<64x128xf32, #tpu.memory_space<vmem>>, vector<64x128xf32>
      %c0_12 = arith.constant 0 : index
      %c0_13 = arith.constant 0 : index
      %13 = vector.load %arg5[%c0_12, %c0_13] : memref<1x128xf32, #tpu.memory_space<vmem>>, vector<1x128xf32>
      %14 = vector.broadcast %13 : vector<1x128xf32> to vector<64x128xf32>
      %15 = arith.addf %12, %14 : vector<64x128xf32>
      %cst_14 = arith.constant 0.000000e+00 : f32
      %16 = vector.broadcast %cst_14 : f32 to vector<64x128xf32>
      %17 = arith.cmpf oge, %15, %16 : vector<64x128xf32>
      %cst_15 = arith.constant 2.000000e-01 : f32
      %18 = vector.broadcast %cst_15 : f32 to vector<64x128xf32>
      %19 = arith.mulf %18, %15 : vector<64x128xf32>
      %20 = arith.select %17, %15, %19 : vector<64x128xi1>, vector<64x128xf32>
      %21 = arith.truncf %20 : vector<64x128xf32> to vector<64x128xbf16>
      %c0_16 = arith.constant 0 : index
      %c0_17 = arith.constant 0 : index
      %22 = vector.load %arg6[%c0_16, %c0_17] : memref<64x128xbf16, #tpu.memory_space<vmem>>, vector<64x128xbf16>
      tpu.vector_store %arg6[%c0_16, %c0_17], %21 {strides = array<i32>} : memref<64x128xbf16, #tpu.memory_space<vmem>>, vector<64x128xbf16>,
    } else {
    }
    return
  }
  func.func @transform_0(%arg0: i32, %arg1: i32, %arg2: i32) -> (i32, i32) {
    %c0_i32 = arith.constant 0 : i32
    return %arg0, %arg2 : i32, i32
  }
  func.func @transform_1(%arg0: i32, %arg1: i32, %arg2: i32) -> (i32, i32) {
    %c0_i32 = arith.constant 0 : i32
    return %arg2, %arg1 : i32, i32
  }
  func.func @transform_2(%arg0: i32, %arg1: i32, %arg2: i32) -> (i32, i32) {
    %c0_i32 = arith.constant 0 : i32
    %c0_i32_0 = arith.constant 0 : i32
    return %c0_i32, %arg1 : i32, i32
  }
  func.func @transform_3(%arg0: i32, %arg1: i32, %arg2: i32) -> (i32, i32) {
    %c0_i32 = arith.constant 0 : i32
    return %arg0, %arg1 : i32, i32
  }
}

module attributes {stable_mosaic.version = 11 : i64} {
  func.func @_head_kernel(%arg0: i32, %arg1: memref<16x512xbf16, #tpu.memory_space<vmem>>, %arg2: memref<512x32xbf16, #tpu.memory_space<vmem>>, %arg3: memref<1x32xf32, #tpu.memory_space<vmem>>, %arg4: memref<1x32xf32, #tpu.memory_space<vmem>>, %arg5: memref<1x1xf32, #tpu.memory_space<vmem>>, %arg6: memref<16x1xf32, #tpu.memory_space<vmem>>) attributes {dimension_semantics = [#tpu.dimension_semantics<arbitrary>], iteration_bounds = array<i64: 1>, scalar_prefetch = 0 : i64, scratch_operands = 0 : i64, tpu.core_type = #tpu.core_type<tc>, window_params = [{pipeline_mode = #tpu.pipeline_mode<synchronous>, transform_indices = @transform_0, window_bounds = array<i64: 16, 512>}, {pipeline_mode = #tpu.pipeline_mode<synchronous>, transform_indices = @transform_1, window_bounds = array<i64: 512, 32>}, {pipeline_mode = #tpu.pipeline_mode<synchronous>, transform_indices = @transform_2, window_bounds = array<i64: 1, 32>}, {pipeline_mode = #tpu.pipeline_mode<synchronous>, transform_indices = @transform_3, window_bounds = array<i64: 1, 32>}, {pipeline_mode = #tpu.pipeline_mode<synchronous>, transform_indices = @transform_4, window_bounds = array<i64: 1, 1>}, {pipeline_mode = #tpu.pipeline_mode<synchronous>, transform_indices = @transform_5, window_bounds = array<i64: 16, 1>}]} {
    %c0 = arith.constant 0 : index
    %c0_0 = arith.constant 0 : index
    %0 = vector.load %arg1[%c0, %c0_0] : memref<16x512xbf16, #tpu.memory_space<vmem>>, vector<16x512xbf16>
    %c0_1 = arith.constant 0 : index
    %c0_2 = arith.constant 0 : index
    %1 = vector.load %arg2[%c0_1, %c0_2] : memref<512x32xbf16, #tpu.memory_space<vmem>>, vector<512x32xbf16>
    %cst = arith.constant dense<0.000000e+00> : vector<16x32xf32>
    %2 = tpu.matmul %0, %1, %cst {dimension_numbers = #tpu.dot_dimension_numbers<[1], [0], [0], [1], [0, 0, 1, 1], [], []>} : vector<16x512xbf16>, vector<512x32xbf16>, vector<16x32xf32> -> vector<16x32xf32>
    %c0_3 = arith.constant 0 : index
    %c0_4 = arith.constant 0 : index
    %3 = vector.load %arg3[%c0_3, %c0_4] : memref<1x32xf32, #tpu.memory_space<vmem>>, vector<1x32xf32>
    %4 = vector.broadcast %3 : vector<1x32xf32> to vector<16x32xf32>
    %5 = arith.addf %2, %4 : vector<16x32xf32>
    %cst_5 = arith.constant 0.000000e+00 : f32
    %6 = vector.broadcast %cst_5 : f32 to vector<16x32xf32>
    %7 = arith.cmpf oge, %5, %6 : vector<16x32xf32>
    %cst_6 = arith.constant 2.000000e-01 : f32
    %8 = vector.broadcast %cst_6 : f32 to vector<16x32xf32>
    %9 = arith.mulf %8, %5 : vector<16x32xf32>
    %10 = arith.select %7, %5, %9 : vector<16x32xi1>, vector<16x32xf32>
    %c0_7 = arith.constant 0 : index
    %c0_8 = arith.constant 0 : index
    %11 = vector.load %arg4[%c0_7, %c0_8] : memref<1x32xf32, #tpu.memory_space<vmem>>, vector<1x32xf32>
    %12 = vector.broadcast %11 : vector<1x32xf32> to vector<16x32xf32>
    %13 = arith.mulf %10, %12 : vector<16x32xf32>
    %cst_9 = arith.constant dense<0.000000e+00> : vector<16xf32>
    %14 = vector.multi_reduction <add>, %13, %cst_9 [1] : vector<16x32xf32> to vector<16xf32>
    %15 = vector.shape_cast %14 : vector<16xf32> to vector<16x1xf32>
    %c0_10 = arith.constant 0 : index
    %c0_11 = arith.constant 0 : index
    %16 = vector.load %arg5[%c0_10, %c0_11] : memref<1x1xf32, #tpu.memory_space<vmem>>, vector<1x1xf32>
    %17 = vector.broadcast %16 : vector<1x1xf32> to vector<16x1xf32>
    %18 = arith.addf %15, %17 : vector<16x1xf32>
    %c0_12 = arith.constant 0 : index
    %c0_13 = arith.constant 0 : index
    %19 = vector.load %arg6[%c0_12, %c0_13] : memref<16x1xf32, #tpu.memory_space<vmem>>, vector<16x1xf32>
    tpu.vector_store %arg6[%c0_12, %c0_13], %18 {strides = array<i32>} : memref<16x1xf32, #tpu.memory_space<vmem>>, vector<16x1xf32>,
    return
  }
  func.func @transform_0(%arg0: i32) -> (i32, i32) {
    %c0_i32 = arith.constant 0 : i32
    %c0_i32_0 = arith.constant 0 : i32
    %c0_i32_1 = arith.constant 0 : i32
    return %c0_i32, %c0_i32_0 : i32, i32
  }
  func.func @transform_1(%arg0: i32) -> (i32, i32) {
    %c0_i32 = arith.constant 0 : i32
    %c0_i32_0 = arith.constant 0 : i32
    %c0_i32_1 = arith.constant 0 : i32
    return %c0_i32, %c0_i32_0 : i32, i32
  }
  func.func @transform_2(%arg0: i32) -> (i32, i32) {
    %c0_i32 = arith.constant 0 : i32
    %c0_i32_0 = arith.constant 0 : i32
    %c0_i32_1 = arith.constant 0 : i32
    return %c0_i32, %c0_i32_0 : i32, i32
  }
  func.func @transform_3(%arg0: i32) -> (i32, i32) {
    %c0_i32 = arith.constant 0 : i32
    %c0_i32_0 = arith.constant 0 : i32
    %c0_i32_1 = arith.constant 0 : i32
    return %c0_i32, %c0_i32_0 : i32, i32
  }
  func.func @transform_4(%arg0: i32) -> (i32, i32) {
    %c0_i32 = arith.constant 0 : i32
    %c0_i32_0 = arith.constant 0 : i32
    %c0_i32_1 = arith.constant 0 : i32
    return %c0_i32, %c0_i32_0 : i32, i32
  }
  func.func @transform_5(%arg0: i32) -> (i32, i32) {
    %c0_i32 = arith.constant 0 : i32
    %c0_i32_0 = arith.constant 0 : i32
    %c0_i32_1 = arith.constant 0 : i32
    return %c0_i32, %c0_i32_0 : i32, i32
  }
}

</mosaic_0001>

<bundles_post_ra>
// kernel: _forward.12
= control target key start
LH: loop header
LB: loop body
LE: loop exit
PB: predicated region body
PF: predicated region fallthrough
CT: control target
= control target key end

     0   :  { %s983_s1 = inlined_call_operand.vmem [shape: bf16[128,128], index: 1, kind: input, shape index: {}]   ;;  %s984_s2 = inlined_call_operand.vmem [shape: f32[1,128], index: 2, kind: input, shape index: {}]   ;;  %s985_s0 = inlined_call_operand.vmem [shape: bf16[256,128], index: 0, kind: input, shape index: {}]   ;;  %s986_s3 = inlined_call_operand.vmem [shape: bf16[256,128], index: 3, kind: output, shape index: {}]  }
   0x1   :  { %v685_v0 = vld [vmem:[%s983_s1 + $0x38] sm:$0xff]  ;;  %v684_v1 = vld [vmem:[%s983_s1 + $0x30] sm:$0xff]  ;;  %v683_v2 = vld [vmem:[%s983_s1 + $0x28] sm:$0xff] }
   0x2   :  { %274 = vmatpush.bf16.msra.mxu0 %v685_v0  ;;  %781 = vmatpush.bf16.msra.mxu1 %v685_v0  ;;  %v682_v3 = vld [vmem:[%s983_s1 + $0x20] sm:$0xff]  ;;  %v681_v4 = vld [vmem:[%s983_s1 + $0x18] sm:$0xff]  ;;  %v680_v5 = vld [vmem:[%s983_s1 + $0x10] sm:$0xff] }
   0x3   :  { %782 = vmatpush.bf16.msra.mxu2 %v685_v0  ;;  %783 = vmatpush.bf16.msra.mxu3 %v685_v0  ;;  %v679_v6 = vld [vmem:[%s983_s1 + $0x8] sm:$0xff]  ;;  %v678_v7 = vld [vmem:[%s983_s1] sm:$0xff]  ;;  %v664_v16 = vld [vmem:[%s985_s0 + $0x10] sm:$0xff] }
   0x4   :  { %v662_v8 = vld [vmem:[%s985_s0] sm:$0xff]  ;;  %v663_v12 = vld [vmem:[%s985_s0 + $0x8] sm:$0xff]  ;;  %v668_v17 = vld [vmem:[%s985_s0 + $0x30] sm:$0xff] }
   0x5   :  { %v666_v9 = vld [vmem:[%s985_s0 + $0x20] sm:$0xff]  ;;  %v667_v13 = vld [vmem:[%s985_s0 + $0x28] sm:$0xff]  ;;  %v672_v18 = vld [vmem:[%s985_s0 + $0x50] sm:$0xff] }
   0x6   :  { %275 = vmatpush.bf16.msra.mxu0 %v684_v1  ;;  %784 = vmatpush.bf16.msra.mxu1 %v684_v1  ;;  %v670_v10 = vld [vmem:[%s985_s0 + $0x40] sm:$0xff]  ;;  %v671_v14 = vld [vmem:[%s985_s0 + $0x48] sm:$0xff]  ;;  %v676_v19 = vld [vmem:[%s985_s0 + $0x70] sm:$0xff] }
   0x7   :  { %785 = vmatpush.bf16.msra.mxu2 %v684_v1  ;;  %786 = vmatpush.bf16.msra.mxu3 %v684_v1  ;;  %v674_v11 = vld [vmem:[%s985_s0 + $0x60] sm:$0xff]  ;;  %v675_v15 = vld [vmem:[%s985_s0 + $0x68] sm:$0xff]  ;;  %v665_v20 = vld [vmem:[%s985_s0 + $0x18] sm:$0xff] }
   0x8   :  { %v669_v21 = vld [vmem:[%s985_s0 + $0x38] sm:$0xff]  ;;  %v901_v26 = vld [vmem:[%s984_s2] ss:$0 sm:$0xff] }
   0x9   :  { %v673_v22 = vld [vmem:[%s985_s0 + $0x58] sm:$0xff] }
   0xa   :  { %276 = vmatpush.bf16.msra.mxu0 %v683_v2  ;;  %787 = vmatpush.bf16.msra.mxu1 %v683_v2  ;;  %v677_v23 = vld [vmem:[%s985_s0 + $0x78] sm:$0xff] }
   0xb   :  { %788 = vmatpush.bf16.msra.mxu2 %v683_v2  ;;  %789 = vmatpush.bf16.msra.mxu3 %v683_v2 }
   0xe   :  { %277 = vmatpush.bf16.msra.mxu0 %v682_v3  ;;  %790 = vmatpush.bf16.msra.mxu1 %v682_v3 }
   0xf   :  { %791 = vmatpush.bf16.msra.mxu2 %v682_v3  ;;  %792 = vmatpush.bf16.msra.mxu3 %v682_v3 }
  0x12   :  { %278 = vmatpush.bf16.msra.mxu0 %v681_v4  ;;  %793 = vmatpush.bf16.msra.mxu1 %v681_v4 }
  0x13   :  { %794 = vmatpush.bf16.msra.mxu2 %v681_v4  ;;  %795 = vmatpush.bf16.msra.mxu3 %v681_v4 }
  0x16   :  { %279 = vmatpush.bf16.msra.mxu0 %v680_v5  ;;  %796 = vmatpush.bf16.msra.mxu1 %v680_v5 }
  0x17   :  { %797 = vmatpush.bf16.msra.mxu2 %v680_v5  ;;  %798 = vmatpush.bf16.msra.mxu3 %v680_v5 }
  0x1a   :  { %280 = vmatpush.bf16.msra.mxu0 %v679_v6  ;;  %799 = vmatpush.bf16.msra.mxu1 %v679_v6 }
  0x1b   :  { %800 = vmatpush.bf16.msra.mxu2 %v679_v6  ;;  %801 = vmatpush.bf16.msra.mxu3 %v679_v6 }
  0x1e   :  { %281 = vmatpush.bf16.msra.mxu0 %v678_v7  ;;  %802 = vmatpush.bf16.msra.mxu1 %v678_v7 }
  0x1f   :  { %803 = vmatpush.bf16.msra.mxu2 %v678_v7  ;;  %804 = vmatpush.bf16.msra.mxu3 %v678_v7 }
  0x21   :  { %282 = vmatmul.bf16.vlgmr.msra.gmra.mxu0 %v662_v8  ;;  %302 = vmatmul.bf16.vlgmr.msra.gmra.mxu1 %v666_v9 }
  0x22   :  { %322 = vmatmul.bf16.vlgmr.msra.gmra.mxu2 %v670_v10  ;;  %342 = vmatmul.bf16.vlgmr.msra.gmra.mxu3 %v674_v11 }
  0x31   :  { %287 = vmatmul.bf16.gmra.mxu0 %v663_v12  ;;  %307 = vmatmul.bf16.gmra.mxu1 %v667_v13 }
  0x32   :  { %327 = vmatmul.bf16.gmra.mxu2 %v671_v14  ;;  %347 = vmatmul.bf16.gmra.mxu3 %v675_v15 }
  0x41   :  { %292 = vmatmul.bf16.gmra.mxu0 %v664_v16  ;;  %312 = vmatmul.bf16.gmra.mxu1 %v668_v17 }
  0x42   :  { %332 = vmatmul.bf16.gmra.mxu2 %v672_v18  ;;  %352 = vmatmul.bf16.gmra.mxu3 %v676_v19 }
  0x51   :  { %297 = vmatmul.bf16.gmra.mxu0 %v665_v20  ;;  %317 = vmatmul.bf16.gmra.mxu1 %v669_v21 }
  0x52   :  { %337 = vmatmul.bf16.gmra.mxu2 %v673_v22  ;;  %357 = vmatmul.bf16.gmra.mxu3 %v677_v23 }
  0x9e   :  { %v283_v24 = vpop.f32.mrf.mxu0  ;;  %v303_v25 = vpop.f32.mrf.mxu1 }
  0x9f   :  { %v466_v31 = vadd.f32 %v901_v26, %v283_v24  ;;  %v474_v32 = vadd.f32 %v901_v26, %v303_v25 }
  0xa5   :  { %v323_v27 = vpop.f32.mrf.mxu2  ;;  %v343_v28 = vpop.f32.mrf.mxu3 }
  0xa6   :  { %v285_v29 = vpop.f32.mrf.mxu0  ;;  %v305_v30 = vpop.f32.mrf.mxu1  ;;  %v482_v39 = vadd.f32 %v901_v26, %v323_v27  ;;  %v490_v40 = vadd.f32 %v901_v26, %v343_v28 }
  0xa7   :  { %v467_v33 = vadd.f32 %v901_v26, %v285_v29  ;;  %v475_v34 = vadd.f32 %v901_v26, %v305_v30 }
  0xa9   :  { %v689_v35 = vpack.c.bf16 %v467_v33, %v466_v31  ;;  %v709_v36 = vpack.c.bf16 %v475_v34, %v474_v32 }
  0xab   :  { %690 = vst [vmem:[%s986_s3] sm:$0xff] %v689_v35  }
  0xac   :  { %769 = vst [vmem:[%s986_s3 + $0x20] sm:$0xff] %v709_v36  }
  0xad   :  { %v325_v37 = vpop.f32.mrf.mxu2  ;;  %v345_v38 = vpop.f32.mrf.mxu3 }
  0xae   :  { %v483_v41 = vadd.f32 %v901_v26, %v325_v37  ;;  %v491_v42 = vadd.f32 %v901_v26, %v345_v38  ;;  %v288_v43 = vpop.f32.mrf.mxu0  ;;  %v308_v44 = vpop.f32.mrf.mxu1 }
  0xaf   :  { %v468_v51 = vadd.f32 %v901_v26, %v288_v43  ;;  %v476_v52 = vadd.f32 %v901_v26, %v308_v44 }
  0xb0   :  { %v729_v45 = vpack.c.bf16 %v483_v41, %v482_v39  ;;  %v749_v46 = vpack.c.bf16 %v491_v42, %v490_v40 }
  0xb2   :  { %773 = vst [vmem:[%s986_s3 + $0x40] sm:$0xff] %v729_v45  }
  0xb3   :  { %777 = vst [vmem:[%s986_s3 + $0x60] sm:$0xff] %v749_v46  }
  0xb5   :  { %v328_v47 = vpop.f32.mrf.mxu2  ;;  %v348_v48 = vpop.f32.mrf.mxu3 }
  0xb6   :  { %v290_v49 = vpop.f32.mrf.mxu0  ;;  %v310_v50 = vpop.f32.mrf.mxu1  ;;  %v484_v59 = vadd.f32 %v901_v26, %v328_v47  ;;  %v492_v60 = vadd.f32 %v901_v26, %v348_v48 }
  0xb7   :  { %v469_v53 = vadd.f32 %v901_v26, %v290_v49  ;;  %v477_v54 = vadd.f32 %v901_v26, %v310_v50 }
  0xb9   :  { %v694_v55 = vpack.c.bf16 %v469_v53, %v468_v51  ;;  %v714_v56 = vpack.c.bf16 %v477_v54, %v476_v52 }
  0xbb   :  { %766 = vst [vmem:[%s986_s3 + $0x8] sm:$0xff] %v694_v55  }
  0xbc   :  { %770 = vst [vmem:[%s986_s3 + $0x28] sm:$0xff] %v714_v56  }
  0xbd   :  { %v330_v57 = vpop.f32.mrf.mxu2  ;;  %v350_v58 = vpop.f32.mrf.mxu3 }
  0xbe   :  { %v485_v61 = vadd.f32 %v901_v26, %v330_v57  ;;  %v493_v62 = vadd.f32 %v901_v26, %v350_v58  ;;  %v293_v63 = vpop.f32.mrf.mxu0  ;;  %v313_v0 = vpop.f32.mrf.mxu1 }
  0xbf   :  { %v470_v7 = vadd.f32 %v901_v26, %v293_v63  ;;  %v478_v8 = vadd.f32 %v901_v26, %v313_v0 }
  0xc0   :  { %v734_v1 = vpack.c.bf16 %v485_v61, %v484_v59  ;;  %v754_v2 = vpack.c.bf16 %v493_v62, %v492_v60 }
  0xc2   :  { %774 = vst [vmem:[%s986_s3 + $0x48] sm:$0xff] %v734_v1  }
  0xc3   :  { %778 = vst [vmem:[%s986_s3 + $0x68] sm:$0xff] %v754_v2  }
  0xc5   :  { %v333_v3 = vpop.f32.mrf.mxu2  ;;  %v353_v4 = vpop.f32.mrf.mxu3 }
  0xc6   :  { %v295_v5 = vpop.f32.mrf.mxu0  ;;  %v315_v6 = vpop.f32.mrf.mxu1  ;;  %v486_v15 = vadd.f32 %v901_v26, %v333_v3  ;;  %v494_v16 = vadd.f32 %v901_v26, %v353_v4 }
  0xc7   :  { %v471_v9 = vadd.f32 %v901_v26, %v295_v5  ;;  %v479_v10 = vadd.f32 %v901_v26, %v315_v6 }
  0xc9   :  { %v699_v11 = vpack.c.bf16 %v471_v9, %v470_v7  ;;  %v719_v12 = vpack.c.bf16 %v479_v10, %v478_v8 }
  0xcb   :  { %767 = vst [vmem:[%s986_s3 + $0x10] sm:$0xff] %v699_v11  }
  0xcc   :  { %771 = vst [vmem:[%s986_s3 + $0x30] sm:$0xff] %v719_v12  }
  0xcd   :  { %v335_v13 = vpop.f32.mrf.mxu2  ;;  %v355_v14 = vpop.f32.mrf.mxu3 }
  0xce   :  { %v487_v17 = vadd.f32 %v901_v26, %v335_v13  ;;  %v495_v18 = vadd.f32 %v901_v26, %v355_v14  ;;  %v298_v19 = vpop.f32.mrf.mxu0  ;;  %v318_v20 = vpop.f32.mrf.mxu1 }
  0xcf   :  { %v472_v28 = vadd.f32 %v901_v26, %v298_v19  ;;  %v480_v29 = vadd.f32 %v901_v26, %v318_v20 }
  0xd0   :  { %v739_v21 = vpack.c.bf16 %v487_v17, %v486_v15  ;;  %v759_v22 = vpack.c.bf16 %v495_v18, %v494_v16 }
  0xd2   :  { %775 = vst [vmem:[%s986_s3 + $0x50] sm:$0xff] %v739_v21  }
  0xd3   :  { %779 = vst [vmem:[%s986_s3 + $0x70] sm:$0xff] %v759_v22  }
  0xd5   :  { %v338_v23 = vpop.f32.mrf.mxu2  ;;  %v358_v24 = vpop.f32.mrf.mxu3 }
  0xd6   :  { %v300_v25 = vpop.f32.mrf.mxu0  ;;  %v320_v27 = vpop.f32.mrf.mxu1  ;;  %v488_v36 = vadd.f32 %v901_v26, %v338_v23  ;;  %v496_v37 = vadd.f32 %v901_v26, %v358_v24 }
  0xd7   :  { %v473_v30 = vadd.f32 %v901_v26, %v300_v25  ;;  %v481_v31 = vadd.f32 %v901_v26, %v320_v27 }
  0xd9   :  { %v704_v32 = vpack.c.bf16 %v473_v30, %v472_v28  ;;  %v724_v33 = vpack.c.bf16 %v481_v31, %v480_v29 }
  0xdb   :  { %768 = vst [vmem:[%s986_s3 + $0x18] sm:$0xff] %v704_v32  }
  0xdc   :  { %772 = vst [vmem:[%s986_s3 + $0x38] sm:$0xff] %v724_v33  }
  0xdd   :  { %v340_v34 = vpop.f32.mrf.mxu2  ;;  %v360_v35 = vpop.f32.mrf.mxu3 }
  0xde   :  { %v489_v38 = vadd.f32 %v901_v26, %v340_v34  ;;  %v497_v39 = vadd.f32 %v901_v26, %v360_v35 }
  0xe0   :  { %v744_v40 = vpack.c.bf16 %v489_v38, %v488_v36  ;;  %v764_v41 = vpack.c.bf16 %v497_v39, %v496_v37 }
  0xe2   :  { %776 = vst [vmem:[%s986_s3 + $0x58] sm:$0xff] %v744_v40  }
  0xe3   :  { %780 = vst [vmem:[%s986_s3 + $0x78] sm:$0xff] %v764_v41  }

// kernel: _forward.13
= control target key start
LH: loop header
LB: loop body
LE: loop exit
PB: predicated region body
PF: predicated region fallthrough
CT: control target
= control target key end

     0   :  { %s1879_s12 = smov 0   ;;  %s1881_s13 = smov 0   ;;  %s2083_s0 = inlined_call_operand.vmem [shape: bf16[1024,128], index: 0, kind: input, shape index: {}]   ;;  %s2084_s1 = inlined_call_operand.vmem [shape: bf16[128,128], index: 1, kind: input, shape index: {}]   ;;  %s2085_s2 = inlined_call_operand.vmem [shape: f32[1,128], index: 2, kind: input, shape index: {}]   ;;  %s2086_s3 = inlined_call_operand.vmem [shape: bf16[1024,128], index: 3, kind: output, shape index: {}]  }
   0x1   :  { %s1883_s14 = smov 0  }
   0x2 LB: > { %s32_s15 = sadd.s32 1, %s1853_s13  ;;  %p1388_p0 = scmp.ge.s32.totalorder %s1857_s14, 1  ;;  %s1857_s14 = sphi %s1883_s14, %s13_s14   ;;  %s1853_s13 = sphi %s1881_s13, %s2088_s13   ;;  %s1849_s12 = sphi %s1879_s12, %s2087_s12  }
   0x3   : > { %p34_p1 = scmp.ge.s32.totalorder %s32_s15, 2  ;;  %p188_p2 = scmp.lt.s32.totalorder %s1857_s14, 3 }
   0x5   : > { %s2090_s15 = smov (%p34_p1, %s32_s15), 0  ;;  %p189_p3 = pnand %p1388_p0, %p188_p2 }
   0x6   : > { %s1389_s24 = sshll.u32 (!%p189_p3), %s1849_s12, 6 }
   0x7   : > { %192 = sbr.rel (%p189_p3) target bundleno = 303 (0x12f), region = 32  ;;  %p230_p4 = scmp.lt.s32.totalorder (!%p189_p3), %s1389_s24, 127 }
   0xc   : > { %v1594_v0 = vld [vmem:[%s2084_s1 + $0x38] sm:$0xff]  ;;  %v1593_v1 = vld [vmem:[%s2084_s1 + $0x30] sm:$0xff]  ;;  %v1592_v2 = vld [vmem:[%s2084_s1 + $0x28] sm:$0xff]  ;;  %s2092_s24 = smov (!%p230_p4, %s1389_s24), 127 }
   0xd   : > { %711 = vmatpush.bf16.msra.mxu0 %v1594_v0  ;;  %1786 = vmatpush.bf16.msra.mxu1 %v1594_v0  ;;  %v1591_v3 = vld [vmem:[%s2084_s1 + $0x20] sm:$0xff]  ;;  %v1590_v4 = vld [vmem:[%s2084_s1 + $0x18] sm:$0xff]  ;;  %v1589_v5 = vld [vmem:[%s2084_s1 + $0x10] sm:$0xff]  ;;  %s1390_s4 = sshll.u32 %s2092_s24, 2 }
   0xe   : > { %1787 = vmatpush.bf16.msra.mxu2 %v1594_v0  ;;  %1788 = vmatpush.bf16.msra.mxu3 %v1594_v0  ;;  %v1588_v6 = vld [vmem:[%s2084_s1 + $0x8] sm:$0xff]  ;;  %v1587_v7 = vld [vmem:[%s2084_s1] sm:$0xff]  ;;  %s1932_s9 = scalar_lea.vmem %s2083_s0, %s1390_s4  ;;  %s1980_s17 = scalar_lea.vmem %s2086_s3, %s1390_s4 }
   0xf   : > { %v1555_v8 = vld [vmem:[%s1932_s9] sm:$0xff]  ;;  %v1556_v12 = vld [vmem:[%s1932_s9 + $0x8] sm:$0xff]  ;;  %v1557_v16 = vld [vmem:[%s1932_s9 + $0x10] sm:$0xff] }
  0x10   : > { %v1563_v9 = vld [vmem:[%s1932_s9 + $0x40] sm:$0xff]  ;;  %v1564_v13 = vld [vmem:[%s1932_s9 + $0x48] sm:$0xff]  ;;  %v1565_v17 = vld [vmem:[%s1932_s9 + $0x50] sm:$0xff] }
  0x11   : > { %712 = vmatpush.bf16.msra.mxu0 %v1593_v1  ;;  %1789 = vmatpush.bf16.msra.mxu1 %v1593_v1  ;;  %v1571_v10 = vld [vmem:[%s1932_s9 + $0x80] sm:$0xff]  ;;  %v1572_v14 = vld [vmem:[%s1932_s9 + $0x88] sm:$0xff]  ;;  %v1573_v18 = vld [vmem:[%s1932_s9 + $0x90] sm:$0xff] }
  0x12   : > { %1790 = vmatpush.bf16.msra.mxu2 %v1593_v1  ;;  %1791 = vmatpush.bf16.msra.mxu3 %v1593_v1  ;;  %v1579_v11 = vld [vmem:[%s1932_s9 + $0xc0] sm:$0xff]  ;;  %v1580_v15 = vld [vmem:[%s1932_s9 + $0xc8] sm:$0xff]  ;;  %v1581_v19 = vld [vmem:[%s1932_s9 + $0xd0] sm:$0xff] }
  0x13   : > { %v1558_v20 = vld [vmem:[%s1932_s9 + $0x18] sm:$0xff]  ;;  %v1559_v24 = vld [vmem:[%s1932_s9 + $0x20] sm:$0xff]  ;;  %v1560_v28 = vld [vmem:[%s1932_s9 + $0x28] sm:$0xff] }
  0x14   : > { %v1566_v21 = vld [vmem:[%s1932_s9 + $0x58] sm:$0xff]  ;;  %v1567_v25 = vld [vmem:[%s1932_s9 + $0x60] sm:$0xff]  ;;  %v1568_v29 = vld [vmem:[%s1932_s9 + $0x68] sm:$0xff] }
  0x15   : > { %713 = vmatpush.bf16.msra.mxu0 %v1592_v2  ;;  %1792 = vmatpush.bf16.msra.mxu1 %v1592_v2  ;;  %v1574_v22 = vld [vmem:[%s1932_s9 + $0x98] sm:$0xff]  ;;  %v1575_v26 = vld [vmem:[%s1932_s9 + $0xa0] sm:$0xff]  ;;  %v1576_v30 = vld [vmem:[%s1932_s9 + $0xa8] sm:$0xff] }
  0x16   : > { %1793 = vmatpush.bf16.msra.mxu2 %v1592_v2  ;;  %1794 = vmatpush.bf16.msra.mxu3 %v1592_v2  ;;  %v1582_v23 = vld [vmem:[%s1932_s9 + $0xd8] sm:$0xff]  ;;  %v1583_v27 = vld [vmem:[%s1932_s9 + $0xe0] sm:$0xff]  ;;  %v1584_v31 = vld [vmem:[%s1932_s9 + $0xe8] sm:$0xff] }
  0x17   : > { %v1561_v32 = vld [vmem:[%s1932_s9 + $0x30] sm:$0xff]  ;;  %v1562_v36 = vld [vmem:[%s1932_s9 + $0x38] sm:$0xff]  ;;  %v1969_v42 = vld [vmem:[%s2085_s2] ss:$0 sm:$0xff] }
  0x18   : > { %v1569_v33 = vld [vmem:[%s1932_s9 + $0x70] sm:$0xff]  ;;  %v1570_v37 = vld [vmem:[%s1932_s9 + $0x78] sm:$0xff] }
  0x19   : > { %714 = vmatpush.bf16.msra.mxu0 %v1591_v3  ;;  %1795 = vmatpush.bf16.msra.mxu1 %v1591_v3  ;;  %v1577_v34 = vld [vmem:[%s1932_s9 + $0xb0] sm:$0xff]  ;;  %v1578_v38 = vld [vmem:[%s1932_s9 + $0xb8] sm:$0xff] }
  0x1a   : > { %1796 = vmatpush.bf16.msra.mxu2 %v1591_v3  ;;  %1797 = vmatpush.bf16.msra.mxu3 %v1591_v3  ;;  %v1585_v35 = vld [vmem:[%s1932_s9 + $0xf0] sm:$0xff]  ;;  %v1586_v39 = vld [vmem:[%s1932_s9 + $0xf8] sm:$0xff] }
  0x1d   : > { %715 = vmatpush.bf16.msra.mxu0 %v1590_v4  ;;  %1798 = vmatpush.bf16.msra.mxu1 %v1590_v4 }
  0x1e   : > { %1799 = vmatpush.bf16.msra.mxu2 %v1590_v4  ;;  %1800 = vmatpush.bf16.msra.mxu3 %v1590_v4 }
  0x21   : > { %716 = vmatpush.bf16.msra.mxu0 %v1589_v5  ;;  %1801 = vmatpush.bf16.msra.mxu1 %v1589_v5 }
  0x22   : > { %1802 = vmatpush.bf16.msra.mxu2 %v1589_v5  ;;  %1803 = vmatpush.bf16.msra.mxu3 %v1589_v5 }
  0x25   : > { %717 = vmatpush.bf16.msra.mxu0 %v1588_v6  ;;  %1804 = vmatpush.bf16.msra.mxu1 %v1588_v6 }
  0x26   : > { %1805 = vmatpush.bf16.msra.mxu2 %v1588_v6  ;;  %1806 = vmatpush.bf16.msra.mxu3 %v1588_v6 }
  0x29   : > { %718 = vmatpush.bf16.msra.mxu0 %v1587_v7  ;;  %1807 = vmatpush.bf16.msra.mxu1 %v1587_v7 }
  0x2a   : > { %1808 = vmatpush.bf16.msra.mxu2 %v1587_v7  ;;  %1809 = vmatpush.bf16.msra.mxu3 %v1587_v7 }
  0x2c   : > { %719 = vmatmul.bf16.vlgmr.msra.gmra.mxu0 %v1555_v8  ;;  %759 = vmatmul.bf16.vlgmr.msra.gmra.mxu1 %v1563_v9 }
  0x2d   : > { %799 = vmatmul.bf16.vlgmr.msra.gmra.mxu2 %v1571_v10  ;;  %839 = vmatmul.bf16.vlgmr.msra.gmra.mxu3 %v1579_v11 }
  0x3c   : > { %724 = vmatmul.bf16.gmra.mxu0 %v1556_v12  ;;  %764 = vmatmul.bf16.gmra.mxu1 %v1564_v13 }
  0x3d   : > { %804 = vmatmul.bf16.gmra.mxu2 %v1572_v14  ;;  %844 = vmatmul.bf16.gmra.mxu3 %v1580_v15 }
  0x4c   : > { %729 = vmatmul.bf16.gmra.mxu0 %v1557_v16  ;;  %769 = vmatmul.bf16.gmra.mxu1 %v1565_v17 }
  0x4d   : > { %809 = vmatmul.bf16.gmra.mxu2 %v1573_v18  ;;  %849 = vmatmul.bf16.gmra.mxu3 %v1581_v19 }
  0x5c   : > { %734 = vmatmul.bf16.gmra.mxu0 %v1558_v20  ;;  %774 = vmatmul.bf16.gmra.mxu1 %v1566_v21 }
  0x5d   : > { %814 = vmatmul.bf16.gmra.mxu2 %v1574_v22  ;;  %854 = vmatmul.bf16.gmra.mxu3 %v1582_v23 }
  0x6c   : > { %739 = vmatmul.bf16.gmra.mxu0 %v1559_v24  ;;  %779 = vmatmul.bf16.gmra.mxu1 %v1567_v25 }
  0x6d   : > { %819 = vmatmul.bf16.gmra.mxu2 %v1575_v26  ;;  %859 = vmatmul.bf16.gmra.mxu3 %v1583_v27 }
  0x7c   : > { %744 = vmatmul.bf16.gmra.mxu0 %v1560_v28  ;;  %784 = vmatmul.bf16.gmra.mxu1 %v1568_v29 }
  0x7d   : > { %824 = vmatmul.bf16.gmra.mxu2 %v1576_v30  ;;  %864 = vmatmul.bf16.gmra.mxu3 %v1584_v31 }
  0x8c   : > { %749 = vmatmul.bf16.gmra.mxu0 %v1561_v32  ;;  %789 = vmatmul.bf16.gmra.mxu1 %v1569_v33 }
  0x8d   : > { %829 = vmatmul.bf16.gmra.mxu2 %v1577_v34  ;;  %869 = vmatmul.bf16.gmra.mxu3 %v1585_v35 }
  0x9c   : > { %754 = vmatmul.bf16.gmra.mxu0 %v1562_v36  ;;  %794 = vmatmul.bf16.gmra.mxu1 %v1570_v37 }
  0x9d   : > { %834 = vmatmul.bf16.gmra.mxu2 %v1578_v38  ;;  %874 = vmatmul.bf16.gmra.mxu3 %v1586_v39 }
  0xa9   : > { %v720_v40 = vpop.f32.mrf.mxu0  ;;  %v760_v41 = vpop.f32.mrf.mxu1 }
  0xaa   : > { %v1079_v47 = vadd.f32 %v1969_v42, %v720_v40  ;;  %v1095_v48 = vadd.f32 %v1969_v42, %v760_v41 }
  0xb0   : > { %v800_v43 = vpop.f32.mrf.mxu2  ;;  %v840_v44 = vpop.f32.mrf.mxu3 }
  0xb1   : > { %v722_v45 = vpop.f32.mrf.mxu0  ;;  %v762_v46 = vpop.f32.mrf.mxu1  ;;  %v1111_v55 = vadd.f32 %v1969_v42, %v800_v43  ;;  %v1127_v56 = vadd.f32 %v1969_v42, %v840_v44 }
  0xb2   : > { %v1080_v49 = vadd.f32 %v1969_v42, %v722_v45  ;;  %v1096_v50 = vadd.f32 %v1969_v42, %v762_v46 }
  0xb4   : > { %v1598_v51 = vpack.c.bf16 %v1080_v49, %v1079_v47  ;;  %v1638_v52 = vpack.c.bf16 %v1096_v50, %v1095_v48 }
  0xb6   : > { %1599 = vst [vmem:[%s1980_s17] sm:$0xff] %v1598_v51  }
  0xb7   : > { %1762 = vst [vmem:[%s1980_s17 + $0x40] sm:$0xff] %v1638_v52  }
  0xb8   : > { %v802_v53 = vpop.f32.mrf.mxu2  ;;  %v842_v54 = vpop.f32.mrf.mxu3 }
  0xb9   : > { %v1112_v57 = vadd.f32 %v1969_v42, %v802_v53  ;;  %v1128_v58 = vadd.f32 %v1969_v42, %v842_v54  ;;  %v725_v59 = vpop.f32.mrf.mxu0  ;;  %v765_v60 = vpop.f32.mrf.mxu1 }
  0xba   : > { %v1081_v3 = vadd.f32 %v1969_v42, %v725_v59  ;;  %v1097_v4 = vadd.f32 %v1969_v42, %v765_v60 }
  0xbb   : > { %v1678_v61 = vpack.c.bf16 %v1112_v57, %v1111_v55  ;;  %v1718_v62 = vpack.c.bf16 %v1128_v58, %v1127_v56 }
  0xbd   : > { %1770 = vst [vmem:[%s1980_s17 + $0x80] sm:$0xff] %v1678_v61  }
  0xbe   : > { %1778 = vst [vmem:[%s1980_s17 + $0xc0] sm:$0xff] %v1718_v62  }
  0xc0   : > { %v805_v63 = vpop.f32.mrf.mxu2  ;;  %v845_v0 = vpop.f32.mrf.mxu3 }
  0xc1   : > { %v727_v1 = vpop.f32.mrf.mxu0  ;;  %v767_v2 = vpop.f32.mrf.mxu1  ;;  %v1113_v11 = vadd.f32 %v1969_v42, %v805_v63  ;;  %v1129_v12 = vadd.f32 %v1969_v42, %v845_v0 }
  0xc2   : > { %v1082_v5 = vadd.f32 %v1969_v42, %v727_v1  ;;  %v1098_v6 = vadd.f32 %v1969_v42, %v767_v2 }
  0xc4   : > { %v1603_v7 = vpack.c.bf16 %v1082_v5, %v1081_v3  ;;  %v1643_v8 = vpack.c.bf16 %v1098_v6, %v1097_v4 }
  0xc6   : > { %1755 = vst [vmem:[%s1980_s17 + $0x8] sm:$0xff] %v1603_v7  }
  0xc7   : > { %1763 = vst [vmem:[%s1980_s17 + $0x48] sm:$0xff] %v1643_v8  }
  0xc8   : > { %v807_v9 = vpop.f32.mrf.mxu2  ;;  %v847_v10 = vpop.f32.mrf.mxu3 }
  0xc9   : > { %v1114_v13 = vadd.f32 %v1969_v42, %v807_v9  ;;  %v1130_v14 = vadd.f32 %v1969_v42, %v847_v10  ;;  %v730_v15 = vpop.f32.mrf.mxu0  ;;  %v770_v16 = vpop.f32.mrf.mxu1 }
  0xca   : > { %v1083_v23 = vadd.f32 %v1969_v42, %v730_v15  ;;  %v1099_v24 = vadd.f32 %v1969_v42, %v770_v16 }
  0xcb   : > { %v1683_v17 = vpack.c.bf16 %v1114_v13, %v1113_v11  ;;  %v1723_v18 = vpack.c.bf16 %v1130_v14, %v1129_v12 }
  0xcd   : > { %1771 = vst [vmem:[%s1980_s17 + $0x88] sm:$0xff] %v1683_v17  }
  0xce   : > { %1779 = vst [vmem:[%s1980_s17 + $0xc8] sm:$0xff] %v1723_v18  }
  0xd0   : > { %v810_v19 = vpop.f32.mrf.mxu2  ;;  %v850_v20 = vpop.f32.mrf.mxu3 }
  0xd1   : > { %v732_v21 = vpop.f32.mrf.mxu0  ;;  %v772_v22 = vpop.f32.mrf.mxu1  ;;  %v1115_v31 = vadd.f32 %v1969_v42, %v810_v19  ;;  %v1131_v32 = vadd.f32 %v1969_v42, %v850_v20 }
  0xd2   : > { %v1084_v25 = vadd.f32 %v1969_v42, %v732_v21  ;;  %v1100_v26 = vadd.f32 %v1969_v42, %v772_v22 }
  0xd4   : > { %v1608_v27 = vpack.c.bf16 %v1084_v25, %v1083_v23  ;;  %v1648_v28 = vpack.c.bf16 %v1100_v26, %v1099_v24 }
  0xd6   : > { %1756 = vst [vmem:[%s1980_s17 + $0x10] sm:$0xff] %v1608_v27  }
  0xd7   : > { %1764 = vst [vmem:[%s1980_s17 + $0x50] sm:$0xff] %v1648_v28  }
  0xd8   : > { %v812_v29 = vpop.f32.mrf.mxu2  ;;  %v852_v30 = vpop.f32.mrf.mxu3 }
  0xd9   : > { %v1116_v33 = vadd.f32 %v1969_v42, %v812_v29  ;;  %v1132_v34 = vadd.f32 %v1969_v42, %v852_v30  ;;  %v735_v35 = vpop.f32.mrf.mxu0  ;;  %v775_v36 = vpop.f32.mrf.mxu1 }
  0xda   : > { %v1085_v44 = vadd.f32 %v1969_v42, %v735_v35  ;;  %v1101_v45 = vadd.f32 %v1969_v42, %v775_v36 }
  0xdb   : > { %v1688_v37 = vpack.c.bf16 %v1116_v33, %v1115_v31  ;;  %v1728_v38 = vpack.c.bf16 %v1132_v34, %v1131_v32 }
  0xdd   : > { %1772 = vst [vmem:[%s1980_s17 + $0x90] sm:$0xff] %v1688_v37  }
  0xde   : > { %1780 = vst [vmem:[%s1980_s17 + $0xd0] sm:$0xff] %v1728_v38  }
  0xe0   : > { %v815_v39 = vpop.f32.mrf.mxu2  ;;  %v855_v40 = vpop.f32.mrf.mxu3 }
  0xe1   : > { %v737_v41 = vpop.f32.mrf.mxu0  ;;  %v777_v43 = vpop.f32.mrf.mxu1  ;;  %v1117_v52 = vadd.f32 %v1969_v42, %v815_v39  ;;  %v1133_v53 = vadd.f32 %v1969_v42, %v855_v40 }
  0xe2   : > { %v1086_v46 = vadd.f32 %v1969_v42, %v737_v41  ;;  %v1102_v47 = vadd.f32 %v1969_v42, %v777_v43 }
  0xe4   : > { %v1613_v48 = vpack.c.bf16 %v1086_v46, %v1085_v44  ;;  %v1653_v49 = vpack.c.bf16 %v1102_v47, %v1101_v45 }
  0xe6   : > { %1757 = vst [vmem:[%s1980_s17 + $0x18] sm:$0xff] %v1613_v48  }
  0xe7   : > { %1765 = vst [vmem:[%s1980_s17 + $0x58] sm:$0xff] %v1653_v49  }
  0xe8   : > { %v817_v50 = vpop.f32.mrf.mxu2  ;;  %v857_v51 = vpop.f32.mrf.mxu3 }
  0xe9   : > { %v1118_v54 = vadd.f32 %v1969_v42, %v817_v50  ;;  %v1134_v55 = vadd.f32 %v1969_v42, %v857_v51  ;;  %v740_v56 = vpop.f32.mrf.mxu0  ;;  %v780_v57 = vpop.f32.mrf.mxu1 }
  0xea   : > { %v1087_v0 = vadd.f32 %v1969_v42, %v740_v56  ;;  %v1103_v1 = vadd.f32 %v1969_v42, %v780_v57 }
  0xeb   : > { %v1693_v58 = vpack.c.bf16 %v1118_v54, %v1117_v52  ;;  %v1733_v59 = vpack.c.bf16 %v1134_v55, %v1133_v53 }
  0xed   : > { %1773 = vst [vmem:[%s1980_s17 + $0x98] sm:$0xff] %v1693_v58  }
  0xee   : > { %1781 = vst [vmem:[%s1980_s17 + $0xd8] sm:$0xff] %v1733_v59  }
  0xf0   : > { %v820_v60 = vpop.f32.mrf.mxu2  ;;  %v860_v61 = vpop.f32.mrf.mxu3 }
  0xf1   : > { %v742_v62 = vpop.f32.mrf.mxu0  ;;  %v782_v63 = vpop.f32.mrf.mxu1  ;;  %v1119_v8 = vadd.f32 %v1969_v42, %v820_v60  ;;  %v1135_v9 = vadd.f32 %v1969_v42, %v860_v61 }
  0xf2   : > { %v1088_v2 = vadd.f32 %v1969_v42, %v742_v62  ;;  %v1104_v3 = vadd.f32 %v1969_v42, %v782_v63 }
  0xf4   : > { %v1618_v4 = vpack.c.bf16 %v1088_v2, %v1087_v0  ;;  %v1658_v5 = vpack.c.bf16 %v1104_v3, %v1103_v1 }
  0xf6   : > { %1758 = vst [vmem:[%s1980_s17 + $0x20] sm:$0xff] %v1618_v4  }
  0xf7   : > { %1766 = vst [vmem:[%s1980_s17 + $0x60] sm:$0xff] %v1658_v5  }
  0xf8   : > { %v822_v6 = vpop.f32.mrf.mxu2  ;;  %v862_v7 = vpop.f32.mrf.mxu3 }
  0xf9   : > { %v1120_v10 = vadd.f32 %v1969_v42, %v822_v6  ;;  %v1136_v11 = vadd.f32 %v1969_v42, %v862_v7  ;;  %v745_v12 = vpop.f32.mrf.mxu0  ;;  %v785_v13 = vpop.f32.mrf.mxu1 }
  0xfa   : > { %v1089_v20 = vadd.f32 %v1969_v42, %v745_v12  ;;  %v1105_v21 = vadd.f32 %v1969_v42, %v785_v13 }
  0xfb   : > { %v1698_v14 = vpack.c.bf16 %v1120_v10, %v1119_v8  ;;  %v1738_v15 = vpack.c.bf16 %v1136_v11, %v1135_v9 }
  0xfd   : > { %1774 = vst [vmem:[%s1980_s17 + $0xa0] sm:$0xff] %v1698_v14  }
  0xfe   : > { %1782 = vst [vmem:[%s1980_s17 + $0xe0] sm:$0xff] %v1738_v15  }
 0x100   : > { %v825_v16 = vpop.f32.mrf.mxu2  ;;  %v865_v17 = vpop.f32.mrf.mxu3 }
 0x101   : > { %v747_v18 = vpop.f32.mrf.mxu0  ;;  %v787_v19 = vpop.f32.mrf.mxu1  ;;  %v1121_v28 = vadd.f32 %v1969_v42, %v825_v16  ;;  %v1137_v29 = vadd.f32 %v1969_v42, %v865_v17 }
 0x102   : > { %v1090_v22 = vadd.f32 %v1969_v42, %v747_v18  ;;  %v1106_v23 = vadd.f32 %v1969_v42, %v787_v19 }
 0x104   : > { %v1623_v24 = vpack.c.bf16 %v1090_v22, %v1089_v20  ;;  %v1663_v25 = vpack.c.bf16 %v1106_v23, %v1105_v21 }
 0x106   : > { %1759 = vst [vmem:[%s1980_s17 + $0x28] sm:$0xff] %v1623_v24  }
 0x107   : > { %1767 = vst [vmem:[%s1980_s17 + $0x68] sm:$0xff] %v1663_v25  }
 0x108   : > { %v827_v26 = vpop.f32.mrf.mxu2  ;;  %v867_v27 = vpop.f32.mrf.mxu3 }
 0x109   : > { %v1122_v30 = vadd.f32 %v1969_v42, %v827_v26  ;;  %v1138_v31 = vadd.f32 %v1969_v42, %v867_v27  ;;  %v750_v32 = vpop.f32.mrf.mxu0  ;;  %v790_v33 = vpop.f32.mrf.mxu1 }
 0x10a   : > { %v1091_v40 = vadd.f32 %v1969_v42, %v750_v32  ;;  %v1107_v41 = vadd.f32 %v1969_v42, %v790_v33 }
 0x10b   : > { %v1703_v34 = vpack.c.bf16 %v1122_v30, %v1121_v28  ;;  %v1743_v35 = vpack.c.bf16 %v1138_v31, %v1137_v29 }
 0x10d   : > { %1775 = vst [vmem:[%s1980_s17 + $0xa8] sm:$0xff] %v1703_v34  }
 0x10e   : > { %1783 = vst [vmem:[%s1980_s17 + $0xe8] sm:$0xff] %v1743_v35  }
 0x110   : > { %v830_v36 = vpop.f32.mrf.mxu2  ;;  %v870_v37 = vpop.f32.mrf.mxu3 }
 0x111   : > { %v752_v38 = vpop.f32.mrf.mxu0  ;;  %v792_v39 = vpop.f32.mrf.mxu1  ;;  %v1123_v49 = vadd.f32 %v1969_v42, %v830_v36  ;;  %v1139_v50 = vadd.f32 %v1969_v42, %v870_v37 }
 0x112   : > { %v1092_v43 = vadd.f32 %v1969_v42, %v752_v38  ;;  %v1108_v44 = vadd.f32 %v1969_v42, %v792_v39 }
 0x114   : > { %v1628_v45 = vpack.c.bf16 %v1092_v43, %v1091_v40  ;;  %v1668_v46 = vpack.c.bf16 %v1108_v44, %v1107_v41 }
 0x116   : > { %1760 = vst [vmem:[%s1980_s17 + $0x30] sm:$0xff] %v1628_v45  }
 0x117   : > { %1768 = vst [vmem:[%s1980_s17 + $0x70] sm:$0xff] %v1668_v46  }
 0x118   : > { %v832_v47 = vpop.f32.mrf.mxu2  ;;  %v872_v48 = vpop.f32.mrf.mxu3 }
 0x119   : > { %v1124_v51 = vadd.f32 %v1969_v42, %v832_v47  ;;  %v1140_v52 = vadd.f32 %v1969_v42, %v872_v48  ;;  %v755_v53 = vpop.f32.mrf.mxu0  ;;  %v795_v54 = vpop.f32.mrf.mxu1 }
 0x11a   : > { %v1093_v61 = vadd.f32 %v1969_v42, %v755_v53  ;;  %v1109_v62 = vadd.f32 %v1969_v42, %v795_v54 }
 0x11b   : > { %v1708_v55 = vpack.c.bf16 %v1124_v51, %v1123_v49  ;;  %v1748_v56 = vpack.c.bf16 %v1140_v52, %v1139_v50 }
 0x11d   : > { %1776 = vst [vmem:[%s1980_s17 + $0xb0] sm:$0xff] %v1708_v55  }
 0x11e   : > { %1784 = vst [vmem:[%s1980_s17 + $0xf0] sm:$0xff] %v1748_v56  }
 0x120   : > { %v835_v57 = vpop.f32.mrf.mxu2  ;;  %v875_v58 = vpop.f32.mrf.mxu3 }
 0x121   : > { %v757_v59 = vpop.f32.mrf.mxu0  ;;  %v797_v60 = vpop.f32.mrf.mxu1  ;;  %v1125_v5 = vadd.f32 %v1969_v42, %v835_v57  ;;  %v1141_v6 = vadd.f32 %v1969_v42, %v875_v58 }
 0x122   : > { %v1094_v63 = vadd.f32 %v1969_v42, %v757_v59  ;;  %v1110_v0 = vadd.f32 %v1969_v42, %v797_v60 }
 0x124   : > { %v1633_v1 = vpack.c.bf16 %v1094_v63, %v1093_v61  ;;  %v1673_v2 = vpack.c.bf16 %v1110_v0, %v1109_v62 }
 0x126   : > { %1761 = vst [vmem:[%s1980_s17 + $0x38] sm:$0xff] %v1633_v1  }
 0x127   : > { %1769 = vst [vmem:[%s1980_s17 + $0x78] sm:$0xff] %v1673_v2  }
 0x128   : > { %v837_v3 = vpop.f32.mrf.mxu2  ;;  %v877_v4 = vpop.f32.mrf.mxu3 }
 0x129   : > { %v1126_v7 = vadd.f32 %v1969_v42, %v837_v3  ;;  %v1142_v8 = vadd.f32 %v1969_v42, %v877_v4 }
 0x12b   : > { %v1713_v9 = vpack.c.bf16 %v1126_v7, %v1125_v5  ;;  %v1753_v10 = vpack.c.bf16 %v1142_v8, %v1141_v6 }
 0x12d   : > { %1777 = vst [vmem:[%s1980_s17 + $0xb8] sm:$0xff] %v1713_v9  }
 0x12e   : > { %1785 = vst [vmem:[%s1980_s17 + $0xf8] sm:$0xff] %v1753_v10  }
 0x12f PF: > { %s13_s14 = sadd.s32 1, %s1857_s14   ;;  %s2087_s12 = smov %s1853_s13 }
 0x130   : > { %p10_p5 = scmp.ge.s32.totalorder %s13_s14, 4   ;;  %s2088_s13 = smov %s2090_s15 }
 0x132   :  { %12 = sbr.rel (!%p10_p5) target bundleno = 2 (0x2), region = 76 }

// kernel: _forward.15
= control target key start
LH: loop header
LB: loop body
LE: loop exit
PB: predicated region body
PF: predicated region fallthrough
CT: control target
= control target key end

     0   :  { %s1037_s6 = smov 0   ;;  %s1435_s0 = inlined_call_operand.vmem [shape: bf16[4,18,18,32], index: 0, kind: input, shape index: {}]   ;;  %s1436_s1 = inlined_call_operand.vmem [shape: bf16[4,16,16,32], index: 1, kind: output, shape index: {}]  }
   0x1 LB: > { %s955_s7 = sadd.s32 4294967295, %s1025_s6   ;;  %p959_p0 = scmp.ge.s32.totalorder %s1025_s6, 1  ;;  %s1025_s6 = sphi %s1037_s6, %s11_s6  }
   0x2   : > { %p87_p1 = scmp.lt.s32.totalorder %s1025_s6, 5 }
   0x4   : > { %p88_p2 = pnand %p959_p0, %p87_p1 }
   0x5   : > { %p107_p3 = scmp.lt.s32.totalorder (!%p88_p2), %s955_s7, 3 }
   0x6   : > { %91 = sbr.rel (%p88_p2) target bundleno = 159 (0x9f), region = 24 }
   0xb   : > { %s1438_s7 = smov (!%p107_p3, %s955_s7), 3  ;;  %vm658_vm0 = vcmask 1045504   ;;  %vm465_vm1 = vcmask 1046528   ;;  %vm867_vm2 = vcmask 257024  }
   0xc   : > { %s1010_s8 = smul.u32 216, %s1438_s7  ;;  %s965_s12 = sshll.u32 %s1438_s7, 7 }
   0xd   : > { %s1104_s15 = scalar_lea.vmem %s1436_s1, %s965_s12 }
   0xe   : > { %s1051_s11 = scalar_lea.vmem %s1435_s0, %s1010_s8 }
   0xf   : > { %v967_v0 = vld [vmem:[%s1051_s11] sm:$0xff]   ;;  %v120_v1 = vld [vmem:[%s1051_s11 + $0xc] sm:$0xff]   ;;  %v1002_v2 = vld [vmem:[%s1051_s11 + $0x18] sm:$0xff]  }
  0x10   : > { %v968_v3 = vunpack.c.l.bf16 %v967_v0  ;;  %v969_v4 = vunpack.c.h.bf16 %v967_v0  ;;  %v972_v5 = vunpack.c.l.bf16 %v1002_v2  ;;  %v1056_v6 = vunpack.c.h.bf16 %v1002_v2  ;;  %v119_v7 = vld [vmem:[%s1051_s11 + $0x8] sm:$0x1]  ;;  %v122_v8 = vld [vmem:[%s1051_s11 + $0x14] sm:$0x1]  ;;  %v125_v9 = vld [vmem:[%s1051_s11 + $0x20] sm:$0x1] }
  0x11   : > { %v174_v10 = vunpack.c.l.bf16 %v120_v1  ;;  %v175_v11 = vunpack.c.h.bf16 %v120_v1  ;;  %v173_v12 = vunpack.c.l.bf16 %v119_v7  ;;  %v176_v13 = vunpack.c.l.bf16 %v122_v8  ;;  %v126_v14 = vld [vmem:[%s1051_s11 + $0x24] sm:$0xff]   ;;  %v128_v15 = vld [vmem:[%s1051_s11 + $0x2c] sm:$0x1]  ;;  %v1003_v16 = vld [vmem:[%s1051_s11 + $0x30] sm:$0xff]  }
  0x12   : > { %v1064_v17 = vunpack.c.l.bf16 %v125_v9  ;;  %v1066_v18 = vunpack.c.l.bf16 %v126_v14  ;;  %v1068_v19 = vunpack.c.h.bf16 %v126_v14  ;;  %v228_v20 = vmul.f32 2.0, %v972_v5  ;;  %v131_v1 = vld [vmem:[%s1051_s11 + $0x38] sm:$0x1] }
  0x13   : > { %v225_v21 = vmul.f32 2.0, %v174_v10  ;;  %v226_v22 = vmul.f32 2.0, %v175_v11  ;;  %v227_v23 = vmul.f32 2.0, %v176_v13  ;;  %v229_v24 = vmul.f32 2.0, %v1056_v6 }
  0x14   : > { %v276_v25 = vadd.f32 %v228_v20, %v174_v10  ;;  %v1071_v26 = vunpack.c.l.bf16 %v128_v15  ;;  %v230_v27 = vmul.f32 2.0, %v1064_v17  ;;  %v1074_v28 = vunpack.c.l.bf16 %v1003_v16 }
  0x15   : > { %v273_v29 = vadd.f32 %v968_v3, %v225_v21  ;;  %v274_v30 = vadd.f32 %v969_v4, %v226_v22  ;;  %v275_v31 = vadd.f32 %v227_v23, %v173_v12  ;;  %v277_v32 = vadd.f32 %v229_v24, %v175_v11 }
  0x16   : > { %v324_v33 = vadd.f32 %v276_v25, %v1066_v18  ;;  %v278_v34 = vadd.f32 %v230_v27, %v176_v13  ;;  %v1077_v35 = vunpack.c.h.bf16 %v1003_v16  ;;  %v231_v36 = vmul.f32 2.0, %v1066_v18 }
  0x17   : > { %v321_v37 = vadd.f32 %v972_v5, %v273_v29  ;;  %v322_v38 = vadd.f32 %v1056_v6, %v274_v30  ;;  %v323_v39 = vadd.f32 %v275_v31, %v1064_v17  ;;  %v325_v40 = vadd.f32 %v277_v32, %v1068_v19  ;;  %v132_v31 = vld [vmem:[%s1051_s11 + $0x3c] sm:$0xff]  }
  0x18   : > { %v372_v41 = vmul.f32 2.0, %v324_v33  ;;  %v664_v42 = vrot.slane %v324_v33, 2  ;;  %v326_v43 = vadd.f32 %v278_v34, %v1071_v26  ;;  %v232_v44 = vmul.f32 2.0, %v1068_v19 }
  0x19   : > { %v369_v45 = vmul.f32 2.0, %v321_v37  ;;  %v370_v46 = vmul.f32 2.0, %v322_v38  ;;  %v659_v47 = vrot.slane %v321_v37, 2  ;;  %v660_v48 = vrot.slane %v322_v38, 2 }
  0x1a   : > { %v371_v49 = vmul.f32 2.0, %v323_v39  ;;  %v662_v50 = vrot.slane %v323_v39, 2  ;;  %v373_v51 = vmul.f32 2.0, %v325_v40  ;;  %v471_v52 = vrot.slane %v372_v41, 1  ;;  %v134_v41 = vld [vmem:[%s1051_s11 + $0x44] sm:$0x1] }
  0x1b   : > { %v466_v53 = vrot.slane %v369_v45, 1  ;;  %v467_v54 = vrot.slane %v370_v46, 1  ;;  %v661_v55 = vsel %vm658_vm0, %v659_v47, %v660_v48  ;;  %v665_v56 = vrot.slane %v325_v40, 2  ;;  %v1004_v46 = vld [vmem:[%s1051_s11 + $0x48] sm:$0xff]  }
  0x1c   : > { %v469_v57 = vrot.slane %v371_v49, 1  ;;  %v663_v58 = vsel %vm658_vm0, %v660_v48, %v662_v50  ;;  %v472_v59 = vrot.slane %v373_v51, 1  ;;  %v374_v60 = vmul.f32 2.0, %v326_v43 }
  0x1d   : > { %v468_v61 = vsel %vm465_vm1, %v466_v53, %v467_v54  ;;  %v666_v62 = vsel %vm658_vm0, %v664_v42, %v665_v56  ;;  %v667_v63 = vrot.slane %v326_v43, 2  ;;  %v279_v0 = vadd.f32 %v972_v5, %v231_v36 }
  0x1e   : > { %v578_v2 = vadd.f32 %v468_v61, %v321_v37  ;;  %v470_v3 = vsel %vm465_vm1, %v467_v54, %v469_v57  ;;  %v473_v4 = vsel %vm465_vm1, %v471_v52, %v472_v59  ;;  %v474_v7 = vrot.slane %v374_v60, 1 }
  0x1f   : > { %v579_v8 = vadd.f32 %v470_v3, %v322_v38  ;;  %v580_v9 = vadd.f32 %v473_v4, %v324_v33  ;;  %v668_v10 = vsel %vm658_vm0, %v665_v56, %v667_v63  ;;  %v280_v11 = vadd.f32 %v1056_v6, %v232_v44 }
  0x20   : > { %v771_v12 = vadd.f32 %v661_v55, %v578_v2  ;;  %v475_v13 = vsel %vm465_vm1, %v472_v59, %v474_v7  ;;  %v327_v5 = vadd.f32 %v1074_v28, %v279_v0  ;;  %v1097_v14 = vunpack.c.l.bf16 %v131_v1 }
  0x21   : > { %v772_v15 = vadd.f32 %v663_v58, %v579_v8  ;;  %v773_v16 = vadd.f32 %v666_v62, %v580_v9  ;;  %v581_v20 = vadd.f32 %v475_v13, %v325_v40  ;;  %v328_v21 = vadd.f32 %v1077_v35, %v280_v11  ;;  %v137_v58 = vld [vmem:[%s1051_s11 + $0x50] sm:$0x1] }
  0x22   : > { %v803_v22 = vmul.f32 0.0625, %v771_v12  ;;  %v375_v23 = vmul.f32 2.0, %v327_v5  ;;  %v669_v24 = vrot.slane %v327_v5, 2  ;;  %v233_v6 = vmul.f32 2.0, %v1071_v26 }
  0x23   : > { %v804_v25 = vmul.f32 0.0625, %v772_v15  ;;  %v805_v27 = vmul.f32 0.0625, %v773_v16  ;;  %v774_v29 = vadd.f32 %v668_v10, %v581_v20  ;;  %v376_v30 = vmul.f32 2.0, %v328_v21 }
  0x24   : > { %v835_v32 = vpack.c.bf16 %v803_v22, %v803_v22  ;;  %v476_v33 = vrot.slane %v375_v23, 1  ;;  %v670_v34 = vrot.slane %v328_v21, 2  ;;  %v281_v36 = vadd.f32 %v233_v6, %v1064_v17 }
  0x25   : > { %v836_v37 = vpack.c.bf16 %v804_v25, %v804_v25  ;;  %v837_v38 = vpack.c.bf16 %v805_v27, %v805_v27  ;;  %v806_v39 = vmul.f32 0.0625, %v774_v29  ;;  %v477_v40 = vrot.slane %v376_v30, 1 }
  0x26   : > { %868 = vst.msk [vmem:[%s1104_s15] sm:$0xf] %vm867_vm2, %v835_v32  ;;  %v671_v42 = vsel %vm658_vm0, %v669_v24, %v670_v34  ;;  %v329_v43 = vadd.f32 %v281_v36, %v1097_v14  ;;  %v1113_v44 = vunpack.c.l.bf16 %v132_v31  ;;  %v1115_v45 = vunpack.c.h.bf16 %v132_v31  ;;  %v138_v32 = vld [vmem:[%s1051_s11 + $0x54] sm:$0xff]  }
  0x27   : > { %869 = vst.msk [vmem:[%s1104_s15 + $0x4] sm:$0xf] %vm867_vm2, %v836_v37  ;;  %v838_v17 = vpack.c.bf16 %v806_v39, %v806_v39  ;;  %v478_v47 = vsel %vm465_vm1, %v476_v33, %v477_v40  ;;  %v234_v48 = vmul.f32 2.0, %v1074_v28  ;;  %v235_v49 = vmul.f32 2.0, %v1077_v35 }
  0x28   : > { %870 = vst.msk [vmem:[%s1104_s15 + $0x8] sm:$0xf] %vm867_vm2, %v837_v38  ;;  %v582_v50 = vadd.f32 %v478_v47, %v327_v5  ;;  %v377_v51 = vmul.f32 2.0, %v329_v43  ;;  %v672_v52 = vrot.slane %v329_v43, 2  ;;  %v1125_v53 = vunpack.c.l.bf16 %v134_v41 }
  0x29   : > { %871 = vst.msk [vmem:[%s1104_s15 + $0xc] sm:$0xf] %vm867_vm2, %v838_v17  ;;  %v282_v54 = vadd.f32 %v234_v48, %v1066_v18  ;;  %v283_v55 = vadd.f32 %v235_v49, %v1068_v19  ;;  %v236_v56 = vmul.f32 2.0, %v1097_v14  ;;  %v1132_v57 = vunpack.c.l.bf16 %v1004_v46 }
  0x2a   : > { %v775_v59 = vadd.f32 %v671_v42, %v582_v50  ;;  %v479_v60 = vrot.slane %v377_v51, 1  ;;  %v673_v61 = vsel %vm658_vm0, %v670_v34, %v672_v52  ;;  %v1136_v62 = vunpack.c.h.bf16 %v1004_v46  ;;  %v140_v42 = vld [vmem:[%s1051_s11 + $0x5c] sm:$0x1] }
  0x2b   : > { %v330_v63 = vadd.f32 %v282_v54, %v1113_v44  ;;  %v331_v0 = vadd.f32 %v283_v55, %v1115_v45  ;;  %v284_v1 = vadd.f32 %v236_v56, %v1071_v26  ;;  %v237_v18 = vmul.f32 2.0, %v1113_v44  ;;  %v1005_v56 = vld [vmem:[%s1051_s11 + $0x60] sm:$0xff]  }
  0x2c   : > { %v807_v19 = vmul.f32 0.0625, %v775_v59  ;;  %v480_v2 = vsel %vm465_vm1, %v477_v40, %v479_v60  ;;  %v238_v3 = vmul.f32 2.0, %v1115_v45  ;;  %v1144_v4 = vunpack.c.l.bf16 %v137_v58 }
  0x2d   : > { %v583_v7 = vadd.f32 %v480_v2, %v328_v21  ;;  %v378_v8 = vmul.f32 2.0, %v330_v63  ;;  %v379_v9 = vmul.f32 2.0, %v331_v0  ;;  %v674_v10 = vrot.slane %v330_v63, 2 }
  0x2e   : > { %v839_v11 = vpack.c.bf16 %v807_v19, %v807_v19  ;;  %v675_v12 = vrot.slane %v331_v0, 2  ;;  %v332_v13 = vadd.f32 %v284_v1, %v1125_v53  ;;  %v285_v26 = vadd.f32 %v1074_v28, %v237_v18 }
  0x2f   : > { %v776_v5 = vadd.f32 %v673_v61, %v583_v7  ;;  %v481_v15 = vrot.slane %v378_v8, 1  ;;  %v482_v16 = vrot.slane %v379_v9, 1  ;;  %v286_v20 = vadd.f32 %v1077_v35, %v238_v3 }
  0x30   : > { %872 = vst.msk [vmem:[%s1104_s15 + $0x10] sm:$0xf] %vm867_vm2, %v839_v11  ;;  %v676_v22 = vsel %vm658_vm0, %v674_v10, %v675_v12  ;;  %v380_v21 = vmul.f32 2.0, %v332_v13  ;;  %v677_v23 = vrot.slane %v332_v13, 2  ;;  %v333_v24 = vadd.f32 %v1132_v57, %v285_v26 }
  0x31   : > { %v808_v6 = vmul.f32 0.0625, %v776_v5  ;;  %v483_v25 = vsel %vm465_vm1, %v481_v15, %v482_v16  ;;  %v334_v28 = vadd.f32 %v1136_v62, %v286_v20  ;;  %v239_v27 = vmul.f32 2.0, %v1125_v53 }
  0x32   : > { %v584_v29 = vadd.f32 %v483_v25, %v330_v63  ;;  %v484_v30 = vrot.slane %v380_v21, 1  ;;  %v678_v35 = vsel %vm658_vm0, %v675_v12, %v677_v23  ;;  %v381_v31 = vmul.f32 2.0, %v333_v24  ;;  %v143_v23 = vld [vmem:[%s1051_s11 + $0x68] sm:$0x1] }
  0x33   : > { %v840_v33 = vpack.c.bf16 %v808_v6, %v808_v6  ;;  %v382_v34 = vmul.f32 2.0, %v334_v28  ;;  %v679_v36 = vrot.slane %v333_v24, 2  ;;  %v680_v37 = vrot.slane %v334_v28, 2 }
  0x34   : > { %v777_v38 = vadd.f32 %v676_v22, %v584_v29  ;;  %v485_v39 = vsel %vm465_vm1, %v482_v16, %v484_v30  ;;  %v486_v40 = vrot.slane %v381_v31, 1  ;;  %v287_v41 = vadd.f32 %v239_v27, %v1097_v14 }
  0x35   : > { %873 = vst.msk [vmem:[%s1104_s15 + $0x14] sm:$0xf] %vm867_vm2, %v840_v33  ;;  %v585_v43 = vadd.f32 %v485_v39, %v331_v0  ;;  %v487_v46 = vrot.slane %v382_v34, 1  ;;  %v681_v17 = vsel %vm658_vm0, %v679_v36, %v680_v37  ;;  %v1164_v47 = vunpack.c.l.bf16 %v138_v32  ;;  %v144_v39 = vld [vmem:[%s1051_s11 + $0x6c] sm:$0xff]  }
  0x36   : > { %v809_v48 = vmul.f32 0.0625, %v777_v38  ;;  %v335_v49 = vadd.f32 %v287_v41, %v1144_v4  ;;  %v1167_v50 = vunpack.c.h.bf16 %v138_v32  ;;  %v240_v51 = vmul.f32 2.0, %v1132_v57 }
  0x37   : > { %v778_v52 = vadd.f32 %v678_v35, %v585_v43  ;;  %v488_v14 = vsel %vm465_vm1, %v486_v40, %v487_v46  ;;  %v241_v54 = vmul.f32 2.0, %v1136_v62  ;;  %v1172_v55 = vunpack.c.l.bf16 %v140_v42 }
  0x38   : > { %v841_v58 = vpack.c.bf16 %v809_v48, %v809_v48  ;;  %v586_v59 = vadd.f32 %v488_v14, %v333_v24  ;;  %v383_v60 = vmul.f32 2.0, %v335_v49  ;;  %v682_v61 = vrot.slane %v335_v49, 2 }
  0x39   : > { %v810_v63 = vmul.f32 0.0625, %v778_v52  ;;  %v288_v0 = vadd.f32 %v240_v51, %v1113_v44  ;;  %v289_v1 = vadd.f32 %v241_v54, %v1115_v45  ;;  %v242_v18 = vmul.f32 2.0, %v1144_v4  ;;  %v146_v54 = vld [vmem:[%s1051_s11 + $0x74] sm:$0x1] }
  0x3a   : > { %874 = vst.msk [vmem:[%s1104_s15 + $0x18] sm:$0xf] %vm867_vm2, %v841_v58  ;;  %v779_v19 = vadd.f32 %v681_v17, %v586_v59  ;;  %v489_v2 = vrot.slane %v383_v60, 1  ;;  %v683_v3 = vsel %vm658_vm0, %v680_v37, %v682_v61  ;;  %v1181_v7 = vunpack.c.l.bf16 %v1005_v56 }
  0x3b   : > { %v842_v8 = vpack.c.bf16 %v810_v63, %v810_v63  ;;  %v336_v9 = vadd.f32 %v288_v0, %v1164_v47  ;;  %v337_v10 = vadd.f32 %v289_v1, %v1167_v50  ;;  %v290_v44 = vadd.f32 %v242_v18, %v1125_v53  ;;  %v1006_v18 = vld [vmem:[%s1051_s11 + $0x78] sm:$0xff]  }
  0x3c   : > { %v811_v11 = vmul.f32 0.0625, %v779_v19  ;;  %v490_v45 = vsel %vm465_vm1, %v487_v46, %v489_v2  ;;  %v1187_v12 = vunpack.c.h.bf16 %v1005_v56  ;;  %v243_v13 = vmul.f32 2.0, %v1164_v47 }
  0x3d   : > { %875 = vst.msk [vmem:[%s1104_s15 + $0x1c] sm:$0xf] %vm867_vm2, %v842_v8  ;;  %v587_v26 = vadd.f32 %v490_v45, %v334_v28  ;;  %v384_v5 = vmul.f32 2.0, %v336_v9  ;;  %v385_v15 = vmul.f32 2.0, %v337_v10  ;;  %v684_v16 = vrot.slane %v336_v9, 2 }
  0x3e   : > { %v843_v20 = vpack.c.bf16 %v811_v11, %v811_v11  ;;  %v685_v22 = vrot.slane %v337_v10, 2  ;;  %v338_v21 = vadd.f32 %v290_v44, %v1172_v55  ;;  %v244_v53 = vmul.f32 2.0, %v1167_v50 }
  0x3f   : > { %v780_v24 = vadd.f32 %v683_v3, %v587_v26  ;;  %v491_v6 = vrot.slane %v384_v5, 1  ;;  %v492_v25 = vrot.slane %v385_v15, 1  ;;  %v291_v27 = vadd.f32 %v1132_v57, %v243_v13 }
  0x40   : > { %876 = vst.msk [vmem:[%s1104_s15 + $0x20] sm:$0xf] %vm867_vm2, %v843_v20  ;;  %v686_v28 = vsel %vm658_vm0, %v684_v16, %v685_v22  ;;  %v386_v29 = vmul.f32 2.0, %v338_v21  ;;  %v687_v30 = vrot.slane %v338_v21, 2  ;;  %v292_v35 = vadd.f32 %v1136_v62, %v244_v53 }
  0x41   : > { %v812_v31 = vmul.f32 0.0625, %v780_v24  ;;  %v493_v32 = vsel %vm465_vm1, %v491_v6, %v492_v25  ;;  %v339_v33 = vadd.f32 %v1181_v7, %v291_v27  ;;  %v1202_v34 = vunpack.c.l.bf16 %v143_v23 }
  0x42   : > { %v588_v36 = vadd.f32 %v493_v32, %v336_v9  ;;  %v494_v37 = vrot.slane %v386_v29, 1  ;;  %v688_v57 = vsel %vm658_vm0, %v685_v22, %v687_v30  ;;  %v340_v38 = vadd.f32 %v1187_v12, %v292_v35  ;;  %v149_v32 = vld [vmem:[%s1051_s11 + $0x80] sm:$0x1] }
  0x43   : > { %v844_v40 = vpack.c.bf16 %v812_v31, %v812_v31  ;;  %v387_v41 = vmul.f32 2.0, %v339_v33  ;;  %v689_v42 = vrot.slane %v339_v33, 2  ;;  %v245_v62 = vmul.f32 2.0, %v1172_v55 }
  0x44   : > { %v781_v43 = vadd.f32 %v686_v28, %v588_v36  ;;  %v495_v46 = vsel %vm465_vm1, %v492_v25, %v494_v37  ;;  %v388_v17 = vmul.f32 2.0, %v340_v38  ;;  %v690_v48 = vrot.slane %v340_v38, 2 }
  0x45   : > { %877 = vst.msk [vmem:[%s1104_s15 + $0x24] sm:$0xf] %vm867_vm2, %v844_v40  ;;  %v589_v49 = vadd.f32 %v495_v46, %v337_v10  ;;  %v496_v51 = vrot.slane %v387_v41, 1  ;;  %v293_v52 = vadd.f32 %v245_v62, %v1144_v4  ;;  %v1212_v14 = vunpack.c.l.bf16 %v144_v39 }
  0x46   : > { %v813_v56 = vmul.f32 0.0625, %v781_v43  ;;  %v497_v58 = vrot.slane %v388_v17, 1  ;;  %v691_v59 = vsel %vm658_vm0, %v689_v42, %v690_v48  ;;  %v1216_v60 = vunpack.c.h.bf16 %v144_v39 }
  0x47   : > { %v782_v61 = vadd.f32 %v688_v57, %v589_v49  ;;  %v341_v63 = vadd.f32 %v293_v52, %v1202_v34  ;;  %v246_v0 = vmul.f32 2.0, %v1181_v7  ;;  %v247_v1 = vmul.f32 2.0, %v1187_v12 }
  0x48   : > { %v845_v19 = vpack.c.bf16 %v813_v56, %v813_v56  ;;  %v498_v4 = vsel %vm465_vm1, %v496_v51, %v497_v58  ;;  %v1223_v2 = vunpack.c.l.bf16 %v146_v54  ;;  %v248_v3 = vmul.f32 2.0, %v1202_v34  ;;  %v150_v51 = vld [vmem:[%s1051_s11 + $0x84] sm:$0xff]  }
  0x49   : > { %v814_v8 = vmul.f32 0.0625, %v782_v61  ;;  %v590_v9 = vadd.f32 %v498_v4, %v339_v33  ;;  %v389_v10 = vmul.f32 2.0, %v341_v63  ;;  %v692_v44 = vrot.slane %v341_v63, 2 }
  0x4a   : > { %878 = vst.msk [vmem:[%s1104_s15 + $0x28] sm:$0xf] %vm867_vm2, %v845_v19  ;;  %v294_v11 = vadd.f32 %v246_v0, %v1164_v47  ;;  %v295_v45 = vadd.f32 %v247_v1, %v1167_v50  ;;  %v296_v13 = vadd.f32 %v248_v3, %v1172_v55  ;;  %v1231_v26 = vunpack.c.l.bf16 %v1006_v18  ;;  %v152_v0 = vld [vmem:[%s1051_s11 + $0x8c] sm:$0x1] }
  0x4b   : > { %v846_v5 = vpack.c.bf16 %v814_v8, %v814_v8  ;;  %v783_v15 = vadd.f32 %v691_v59, %v590_v9  ;;  %v499_v16 = vrot.slane %v389_v10, 1  ;;  %v693_v20 = vsel %vm658_vm0, %v690_v48, %v692_v44 }
  0x4c   : > { %v342_v22 = vadd.f32 %v294_v11, %v1212_v14  ;;  %v343_v21 = vadd.f32 %v295_v45, %v1216_v60  ;;  %v344_v53 = vadd.f32 %v296_v13, %v1223_v2  ;;  %v1237_v23 = vunpack.c.h.bf16 %v1006_v18  ;;  %v1007_v13 = vld [vmem:[%s1051_s11 + $0x90] sm:$0xff]  }
  0x4d   : > { %879 = vst.msk [vmem:[%s1104_s15 + $0x2c] sm:$0xf] %vm867_vm2, %v846_v5  ;;  %v815_v47 = vmul.f32 0.0625, %v783_v15  ;;  %v500_v50 = vsel %vm465_vm1, %v497_v58, %v499_v16  ;;  %v249_v55 = vmul.f32 2.0, %v1212_v14  ;;  %v250_v24 = vmul.f32 2.0, %v1216_v60 }
  0x4e   : > { %v591_v6 = vadd.f32 %v500_v50, %v340_v38  ;;  %v390_v25 = vmul.f32 2.0, %v342_v22  ;;  %v391_v27 = vmul.f32 2.0, %v343_v21  ;;  %v694_v28 = vrot.slane %v342_v22, 2 }
  0x4f   : > { %v847_v29 = vpack.c.bf16 %v815_v47, %v815_v47  ;;  %v695_v30 = vrot.slane %v343_v21, 2  ;;  %v392_v35 = vmul.f32 2.0, %v344_v53  ;;  %v697_v31 = vrot.slane %v344_v53, 2 }
  0x50   : > { %v784_v33 = vadd.f32 %v693_v20, %v591_v6  ;;  %v501_v36 = vrot.slane %v390_v25, 1  ;;  %v502_v37 = vrot.slane %v391_v27, 1  ;;  %v297_v57 = vadd.f32 %v1181_v7, %v249_v55 }
  0x51   : > { %880 = vst.msk [vmem:[%s1104_s15 + $0x30] sm:$0xf] %vm867_vm2, %v847_v29  ;;  %v696_v39 = vsel %vm658_vm0, %v694_v28, %v695_v30  ;;  %v504_v40 = vrot.slane %v392_v35, 1  ;;  %v698_v38 = vsel %vm658_vm0, %v695_v30, %v697_v31  ;;  %v298_v41 = vadd.f32 %v1187_v12, %v250_v24 }
  0x52   : > { %v816_v42 = vmul.f32 0.0625, %v784_v33  ;;  %v503_v62 = vsel %vm465_vm1, %v501_v36, %v502_v37  ;;  %v345_v43 = vadd.f32 %v1231_v26, %v297_v57  ;;  %v1253_v46 = vunpack.c.l.bf16 %v149_v32 }
  0x53   : > { %v592_v17 = vadd.f32 %v503_v62, %v342_v22  ;;  %v505_v7 = vsel %vm465_vm1, %v502_v37, %v504_v40  ;;  %v346_v48 = vadd.f32 %v1237_v23, %v298_v41  ;;  %v251_v49 = vmul.f32 2.0, %v1223_v2 }
  0x54   : > { %v848_v52 = vpack.c.bf16 %v816_v42, %v816_v42  ;;  %v593_v54 = vadd.f32 %v505_v7, %v343_v21  ;;  %v393_v12 = vmul.f32 2.0, %v345_v43  ;;  %v699_v56 = vrot.slane %v345_v43, 2 }
  0x55   : > { %v785_v58 = vadd.f32 %v696_v39, %v592_v17  ;;  %v394_v59 = vmul.f32 2.0, %v346_v48  ;;  %v700_v61 = vrot.slane %v346_v48, 2  ;;  %v299_v63 = vadd.f32 %v251_v49, %v1202_v34 }
  0x56   : > { %881 = vst.msk [vmem:[%s1104_s15 + $0x34] sm:$0xf] %vm867_vm2, %v848_v52  ;;  %v786_v1 = vadd.f32 %v698_v38, %v593_v54  ;;  %v506_v18 = vrot.slane %v393_v12, 1  ;;  %v1263_v19 = vunpack.c.l.bf16 %v150_v51  ;;  %v1265_v4 = vunpack.c.h.bf16 %v150_v51  ;;  %v155_v38 = vld [vmem:[%s1051_s11 + $0x98] sm:$0x1] }
  0x57   : > { %v817_v3 = vmul.f32 0.0625, %v785_v58  ;;  %v507_v8 = vrot.slane %v394_v59, 1  ;;  %v701_v9 = vsel %vm658_vm0, %v699_v56, %v700_v61  ;;  %v347_v10 = vadd.f32 %v299_v63, %v1253_v46  ;;  %v156_v59 = vld [vmem:[%s1051_s11 + $0x9c] sm:$0xff]  }
  0x58   : > { %v818_v44 = vmul.f32 0.0625, %v786_v1  ;;  %v252_v11 = vmul.f32 2.0, %v1231_v26  ;;  %v253_v34 = vmul.f32 2.0, %v1237_v23  ;;  %v1271_v45 = vunpack.c.l.bf16 %v152_v0 }
  0x59   : > { %v849_v5 = vpack.c.bf16 %v817_v3, %v817_v3  ;;  %v508_v15 = vsel %vm465_vm1, %v506_v18, %v507_v8  ;;  %v395_v16 = vmul.f32 2.0, %v347_v10  ;;  %v702_v20 = vrot.slane %v347_v10, 2 }
  0x5a   : > { %v850_v22 = vpack.c.bf16 %v818_v44, %v818_v44  ;;  %v594_v21 = vadd.f32 %v508_v15, %v345_v43  ;;  %v300_v53 = vadd.f32 %v252_v11, %v1212_v14  ;;  %v301_v47 = vadd.f32 %v253_v34, %v1216_v60  ;;  %v158_v34 = vld [vmem:[%s1051_s11 + $0xa4] sm:$0x1] }
  0x5b   : > { %882 = vst.msk [vmem:[%s1104_s15 + $0x38] sm:$0xf] %vm867_vm2, %v849_v5  ;;  %v509_v50 = vrot.slane %v395_v16, 1  ;;  %v703_v55 = vsel %vm658_vm0, %v700_v61, %v702_v20  ;;  %v254_v24 = vmul.f32 2.0, %v1253_v46  ;;  %v1281_v6 = vunpack.c.l.bf16 %v1007_v13 }
  0x5c   : > { %883 = vst.msk [vmem:[%s1104_s15 + $0x3c] sm:$0xf] %vm867_vm2, %v850_v22  ;;  %v787_v25 = vadd.f32 %v701_v9, %v594_v21  ;;  %v348_v27 = vadd.f32 %v300_v53, %v1263_v19  ;;  %v349_v28 = vadd.f32 %v301_v47, %v1265_v4  ;;  %v1287_v14 = vunpack.c.h.bf16 %v1007_v13  ;;  %v1008_v47 = vld [vmem:[%s1051_s11 + $0xa8] sm:$0xff]  }
  0x5d   : > { %v510_v60 = vsel %vm465_vm1, %v507_v8, %v509_v50  ;;  %v302_v29 = vadd.f32 %v254_v24, %v1223_v2  ;;  %v255_v30 = vmul.f32 2.0, %v1263_v19  ;;  %v256_v35 = vmul.f32 2.0, %v1265_v4 }
  0x5e   : > { %v819_v31 = vmul.f32 0.0625, %v787_v25  ;;  %v595_v32 = vadd.f32 %v510_v60, %v346_v48  ;;  %v396_v33 = vmul.f32 2.0, %v348_v27  ;;  %v397_v36 = vmul.f32 2.0, %v349_v28 }
  0x5f   : > { %v704_v37 = vrot.slane %v348_v27, 2  ;;  %v705_v57 = vrot.slane %v349_v28, 2  ;;  %v350_v39 = vadd.f32 %v302_v29, %v1271_v45  ;;  %v303_v40 = vadd.f32 %v1231_v26, %v255_v30 }
  0x60   : > { %v851_v41 = vpack.c.bf16 %v819_v31, %v819_v31  ;;  %v788_v42 = vadd.f32 %v703_v55, %v595_v32  ;;  %v511_v2 = vrot.slane %v396_v33, 1  ;;  %v512_v62 = vrot.slane %v397_v36, 1 }
  0x61   : > { %v706_v43 = vsel %vm658_vm0, %v704_v37, %v705_v57  ;;  %v398_v17 = vmul.f32 2.0, %v350_v39  ;;  %v707_v7 = vrot.slane %v350_v39, 2  ;;  %v304_v48 = vadd.f32 %v1237_v23, %v256_v35 }
  0x62   : > { %884 = vst.msk [vmem:[%s1104_s15 + $0x40] sm:$0xf] %vm867_vm2, %v851_v41  ;;  %v820_v49 = vmul.f32 0.0625, %v788_v42  ;;  %v513_v51 = vsel %vm465_vm1, %v511_v2, %v512_v62  ;;  %v351_v26 = vadd.f32 %v1281_v6, %v303_v40  ;;  %v1302_v52 = vunpack.c.l.bf16 %v155_v38 }
  0x63   : > { %v596_v54 = vadd.f32 %v513_v51, %v348_v27  ;;  %v514_v12 = vrot.slane %v398_v17, 1  ;;  %v708_v56 = vsel %vm658_vm0, %v705_v57, %v707_v7  ;;  %v352_v58 = vadd.f32 %v1287_v14, %v304_v48  ;;  %v161_v51 = vld [vmem:[%s1051_s11 + $0xb0] sm:$0x1] }
  0x64   : > { %v852_v61 = vpack.c.bf16 %v820_v49, %v820_v49  ;;  %v399_v23 = vmul.f32 2.0, %v351_v26  ;;  %v709_v63 = vrot.slane %v351_v26, 2  ;;  %v257_v0 = vmul.f32 2.0, %v1271_v45 }
  0x65   : > { %v789_v1 = vadd.f32 %v706_v43, %v596_v54  ;;  %v515_v18 = vsel %vm465_vm1, %v512_v62, %v514_v12  ;;  %v400_v3 = vmul.f32 2.0, %v352_v58  ;;  %v710_v8 = vrot.slane %v352_v58, 2 }
  0x66   : > { %885 = vst.msk [vmem:[%s1104_s15 + $0x44] sm:$0xf] %vm867_vm2, %v852_v61  ;;  %v597_v9 = vadd.f32 %v515_v18, %v349_v28  ;;  %v516_v10 = vrot.slane %v399_v23, 1  ;;  %v305_v44 = vadd.f32 %v257_v0, %v1253_v46  ;;  %v1312_v11 = vunpack.c.l.bf16 %v156_v59 }
  0x67   : > { %v821_v13 = vmul.f32 0.0625, %v789_v1  ;;  %v517_v5 = vrot.slane %v400_v3, 1  ;;  %v711_v15 = vsel %vm658_vm0, %v709_v63, %v710_v8  ;;  %v1316_v16 = vunpack.c.h.bf16 %v156_v59 }
  0x68   : > { %v790_v20 = vadd.f32 %v708_v56, %v597_v9  ;;  %v353_v22 = vadd.f32 %v305_v44, %v1302_v52  ;;  %v258_v21 = vmul.f32 2.0, %v1281_v6  ;;  %v259_v53 = vmul.f32 2.0, %v1287_v14 }
  0x69   : > { %v853_v50 = vpack.c.bf16 %v821_v13, %v821_v13  ;;  %v518_v46 = vsel %vm465_vm1, %v516_v10, %v517_v5  ;;  %v1323_v55 = vunpack.c.l.bf16 %v158_v34  ;;  %v260_v24 = vmul.f32 2.0, %v1302_v52  ;;  %v162_v10 = vld [vmem:[%s1051_s11 + $0xb4] sm:$0xff]  }
  0x6a   : > { %v822_v25 = vmul.f32 0.0625, %v790_v20  ;;  %v598_v27 = vadd.f32 %v518_v46, %v351_v26  ;;  %v401_v28 = vmul.f32 2.0, %v353_v22  ;;  %v712_v60 = vrot.slane %v353_v22, 2 }
  0x6b   : > { %886 = vst.msk [vmem:[%s1104_s15 + $0x48] sm:$0xf] %vm867_vm2, %v853_v50  ;;  %v306_v29 = vadd.f32 %v258_v21, %v1263_v19  ;;  %v307_v30 = vadd.f32 %v259_v53, %v1265_v4  ;;  %v308_v35 = vadd.f32 %v260_v24, %v1271_v45  ;;  %v1331_v31 = vunpack.c.l.bf16 %v1008_v47  ;;  %v164_v21 = vld [vmem:[%s1051_s11 + $0xbc] sm:$0x1] }
  0x6c   : > { %v854_v32 = vpack.c.bf16 %v822_v25, %v822_v25  ;;  %v791_v33 = vadd.f32 %v711_v15, %v598_v27  ;;  %v519_v36 = vrot.slane %v401_v28, 1  ;;  %v713_v37 = vsel %vm658_vm0, %v710_v8, %v712_v60 }
  0x6d   : > { %v354_v57 = vadd.f32 %v306_v29, %v1312_v11  ;;  %v355_v39 = vadd.f32 %v307_v30, %v1316_v16  ;;  %v356_v40 = vadd.f32 %v308_v35, %v1323_v55  ;;  %v1337_v38 = vunpack.c.h.bf16 %v1008_v47  ;;  %v1374_v35 = vld [vmem:[%s1051_s11 + $0xc0] sm:$0xff]  }
  0x6e   : > { %887 = vst.msk [vmem:[%s1104_s15 + $0x4c] sm:$0xf] %vm867_vm2, %v854_v32  ;;  %v823_v19 = vmul.f32 0.0625, %v791_v33  ;;  %v520_v4 = vsel %vm465_vm1, %v517_v5, %v519_v36  ;;  %v261_v45 = vmul.f32 2.0, %v1312_v11  ;;  %v262_v41 = vmul.f32 2.0, %v1316_v16 }
  0x6f   : > { %v599_v42 = vadd.f32 %v520_v4, %v352_v58  ;;  %v402_v2 = vmul.f32 2.0, %v354_v57  ;;  %v403_v62 = vmul.f32 2.0, %v355_v39  ;;  %v714_v43 = vrot.slane %v354_v57, 2 }
  0x70   : > { %v855_v17 = vpack.c.bf16 %v823_v19, %v823_v19  ;;  %v715_v7 = vrot.slane %v355_v39, 2  ;;  %v404_v48 = vmul.f32 2.0, %v356_v40  ;;  %v717_v49 = vrot.slane %v356_v40, 2 }
  0x71   : > { %v792_v26 = vadd.f32 %v713_v37, %v599_v42  ;;  %v521_v54 = vrot.slane %v402_v2, 1  ;;  %v522_v12 = vrot.slane %v403_v62, 1  ;;  %v309_v56 = vadd.f32 %v1281_v6, %v261_v45 }
  0x72   : > { %888 = vst.msk [vmem:[%s1104_s15 + $0x50] sm:$0xf] %vm867_vm2, %v855_v17  ;;  %v716_v59 = vsel %vm658_vm0, %v714_v43, %v715_v7  ;;  %v524_v61 = vrot.slane %v404_v48, 1  ;;  %v718_v58 = vsel %vm658_vm0, %v715_v7, %v717_v49  ;;  %v310_v23 = vadd.f32 %v1287_v14, %v262_v41 }
  0x73   : > { %v824_v63 = vmul.f32 0.0625, %v792_v26  ;;  %v523_v0 = vsel %vm465_vm1, %v521_v54, %v522_v12  ;;  %v357_v1 = vadd.f32 %v1331_v31, %v309_v56  ;;  %v1353_v18 = vunpack.c.l.bf16 %v161_v51 }
  0x74   : > { %v600_v3 = vadd.f32 %v523_v0, %v354_v57  ;;  %v525_v6 = vsel %vm465_vm1, %v522_v12, %v524_v61  ;;  %v358_v8 = vadd.f32 %v1337_v38, %v310_v23  ;;  %v263_v9 = vmul.f32 2.0, %v1323_v55 }
  0x75   : > { %v856_v44 = vpack.c.bf16 %v824_v63, %v824_v63  ;;  %v601_v34 = vadd.f32 %v525_v6, %v355_v39  ;;  %v405_v14 = vmul.f32 2.0, %v357_v1  ;;  %v719_v13 = vrot.slane %v357_v1, 2 }
  0x76   : > { %v793_v5 = vadd.f32 %v716_v59, %v600_v3  ;;  %v406_v15 = vmul.f32 2.0, %v358_v8  ;;  %v720_v20 = vrot.slane %v358_v8, 2  ;;  %v311_v22 = vadd.f32 %v263_v9, %v1302_v52  ;;  %v168_v9 = vld [vmem:[%s1051_s11 + $0xcc] sm:$0xff]  }
  0x77   : > { %889 = vst.msk [vmem:[%s1104_s15 + $0x54] sm:$0xf] %vm867_vm2, %v856_v44  ;;  %v794_v53 = vadd.f32 %v718_v58, %v601_v34  ;;  %v526_v47 = vrot.slane %v405_v14, 1  ;;  %v1363_v50 = vunpack.c.l.bf16 %v162_v10  ;;  %v1365_v46 = vunpack.c.h.bf16 %v162_v10  ;;  %v167_v58 = vld [vmem:[%s1051_s11 + $0xc8] sm:$0x1] }
  0x78   : > { %v825_v24 = vmul.f32 0.0625, %v793_v5  ;;  %v527_v25 = vrot.slane %v406_v15, 1  ;;  %v721_v27 = vsel %vm658_vm0, %v719_v13, %v720_v20  ;;  %v359_v28 = vadd.f32 %v311_v22, %v1353_v18 }
  0x79   : > { %v826_v60 = vmul.f32 0.0625, %v794_v53  ;;  %v264_v29 = vmul.f32 2.0, %v1331_v31  ;;  %v265_v52 = vmul.f32 2.0, %v1337_v38  ;;  %v1371_v30 = vunpack.c.l.bf16 %v164_v21 }
  0x7a   : > { %v857_v32 = vpack.c.bf16 %v825_v24, %v825_v24  ;;  %v528_v33 = vsel %vm465_vm1, %v526_v47, %v527_v25  ;;  %v407_v36 = vmul.f32 2.0, %v359_v28  ;;  %v722_v37 = vrot.slane %v359_v28, 2 }
  0x7b   : > { %v858_v57 = vpack.c.bf16 %v826_v60, %v826_v60  ;;  %v602_v39 = vadd.f32 %v528_v33, %v357_v1  ;;  %v312_v40 = vadd.f32 %v264_v29, %v1312_v11  ;;  %v313_v19 = vadd.f32 %v265_v52, %v1316_v16 }
  0x7c   : > { %890 = vst.msk [vmem:[%s1104_s15 + $0x58] sm:$0xf] %vm867_vm2, %v857_v32  ;;  %v529_v4 = vrot.slane %v407_v36, 1  ;;  %v723_v45 = vsel %vm658_vm0, %v720_v20, %v722_v37  ;;  %v266_v41 = vmul.f32 2.0, %v1353_v18  ;;  %v1000_v42 = vunpack.c.l.bf16 %v1374_v35 }
  0x7d   : > { %891 = vst.msk [vmem:[%s1104_s15 + $0x5c] sm:$0xf] %vm867_vm2, %v858_v57  ;;  %v795_v2 = vadd.f32 %v721_v27, %v602_v39  ;;  %v360_v62 = vadd.f32 %v312_v40, %v1363_v50  ;;  %v361_v43 = vadd.f32 %v313_v19, %v1365_v46  ;;  %v1001_v11 = vunpack.c.h.bf16 %v1374_v35 }
  0x7e   : > { %v530_v16 = vsel %vm465_vm1, %v527_v25, %v529_v4  ;;  %v314_v17 = vadd.f32 %v266_v41, %v1323_v55  ;;  %v267_v7 = vmul.f32 2.0, %v1363_v50  ;;  %v268_v48 = vmul.f32 2.0, %v1365_v46 }
  0x7f   : > { %v827_v49 = vmul.f32 0.0625, %v795_v2  ;;  %v603_v51 = vadd.f32 %v530_v16, %v358_v8  ;;  %v408_v26 = vmul.f32 2.0, %v360_v62  ;;  %v409_v54 = vmul.f32 2.0, %v361_v43 }
  0x80   : > { %v724_v12 = vrot.slane %v360_v62, 2  ;;  %v725_v56 = vrot.slane %v361_v43, 2  ;;  %v362_v59 = vadd.f32 %v314_v17, %v1371_v30  ;;  %v271_v61 = vmul.f32 2.0, %v1001_v11 }
  0x81   : > { %v859_v23 = vpack.c.bf16 %v827_v49, %v827_v49  ;;  %v796_v63 = vadd.f32 %v723_v45, %v603_v51  ;;  %v531_v0 = vrot.slane %v408_v26, 1  ;;  %v532_v55 = vrot.slane %v409_v54, 1  ;;  %v170_v45 = vld [vmem:[%s1051_s11 + $0xd4] sm:$0x1] }
  0x82   : > { %v726_v1 = vsel %vm658_vm0, %v724_v12, %v725_v56  ;;  %v410_v3 = vmul.f32 2.0, %v362_v59  ;;  %v727_v6 = vrot.slane %v362_v59, 2  ;;  %v315_v8 = vadd.f32 %v1331_v31, %v267_v7 }
  0x83   : > { %892 = vst.msk [vmem:[%s1104_s15 + $0x60] sm:$0xf] %vm867_vm2, %v859_v23  ;;  %v828_v10 = vmul.f32 0.0625, %v796_v63  ;;  %v533_v44 = vsel %vm465_vm1, %v531_v0, %v532_v55  ;;  %v316_v34 = vadd.f32 %v1337_v38, %v268_v48  ;;  %v221_v14 = vunpack.c.l.bf16 %v167_v58 }
  0x84   : > { %v604_v13 = vadd.f32 %v533_v44, %v360_v62  ;;  %v534_v5 = vrot.slane %v410_v3, 1  ;;  %v728_v15 = vsel %vm658_vm0, %v725_v56, %v727_v6  ;;  %v363_v20 = vadd.f32 %v1000_v42, %v315_v8 }
  0x85   : > { %v860_v22 = vpack.c.bf16 %v828_v10, %v828_v10  ;;  %v364_v21 = vadd.f32 %v1001_v11, %v316_v34  ;;  %v269_v53 = vmul.f32 2.0, %v1371_v30  ;;  %v222_v31 = vunpack.c.l.bf16 %v168_v9 }
  0x86   : > { %v797_v47 = vadd.f32 %v726_v1, %v604_v13  ;;  %v535_v24 = vsel %vm465_vm1, %v532_v55, %v534_v5  ;;  %v411_v25 = vmul.f32 2.0, %v363_v20  ;;  %v729_v27 = vrot.slane %v363_v20, 2 }
  0x87   : > { %893 = vst.msk [vmem:[%s1104_s15 + $0x64] sm:$0xf] %vm867_vm2, %v860_v22  ;;  %v605_v38 = vadd.f32 %v535_v24, %v361_v43  ;;  %v412_v28 = vmul.f32 2.0, %v364_v21  ;;  %v730_v60 = vrot.slane %v364_v21, 2  ;;  %v317_v29 = vadd.f32 %v269_v53, %v1353_v18 }
  0x88   : > { %v829_v52 = vmul.f32 0.0625, %v797_v47  ;;  %v536_v35 = vrot.slane %v411_v25, 1  ;;  %v223_v32 = vunpack.c.h.bf16 %v168_v9  ;;  %v270_v33 = vmul.f32 2.0, %v1000_v42 }
  0x89   : > { %v798_v36 = vadd.f32 %v728_v15, %v605_v38  ;;  %v537_v37 = vrot.slane %v412_v28, 1  ;;  %v365_v57 = vadd.f32 %v317_v29, %v221_v14  ;;  %v731_v40 = vsel %vm658_vm0, %v729_v27, %v730_v60 }
  0x8a   : > { %v861_v39 = vpack.c.bf16 %v829_v52, %v829_v52  ;;  %v318_v19 = vadd.f32 %v270_v33, %v1363_v50  ;;  %v319_v4 = vadd.f32 %v271_v61, %v1365_v46  ;;  %v272_v16 = vmul.f32 2.0, %v221_v14 }
  0x8b   : > { %v830_v41 = vmul.f32 0.0625, %v798_v36  ;;  %v538_v18 = vsel %vm465_vm1, %v536_v35, %v537_v37  ;;  %v413_v2 = vmul.f32 2.0, %v365_v57  ;;  %v732_v62 = vrot.slane %v365_v57, 2 }
  0x8c   : > { %894 = vst.msk [vmem:[%s1104_s15 + $0x68] sm:$0xf] %vm867_vm2, %v861_v39  ;;  %v606_v42 = vadd.f32 %v538_v18, %v363_v20  ;;  %v366_v43 = vadd.f32 %v318_v19, %v222_v31  ;;  %v367_v11 = vadd.f32 %v319_v4, %v223_v32  ;;  %v224_v48 = vunpack.c.l.bf16 %v170_v45 }
  0x8d   : > { %v862_v17 = vpack.c.bf16 %v830_v41, %v830_v41  ;;  %v539_v7 = vrot.slane %v413_v2, 1  ;;  %v733_v54 = vsel %vm658_vm0, %v730_v60, %v732_v62  ;;  %v320_v56 = vadd.f32 %v272_v16, %v1371_v30 }
  0x8e   : > { %v799_v49 = vadd.f32 %v731_v40, %v606_v42  ;;  %v414_v50 = vmul.f32 2.0, %v366_v43  ;;  %v415_v51 = vmul.f32 2.0, %v367_v11  ;;  %v734_v46 = vrot.slane %v366_v43, 2 }
  0x8f   : > { %895 = vst.msk [vmem:[%s1104_s15 + $0x6c] sm:$0xf] %vm867_vm2, %v862_v17  ;;  %v540_v26 = vsel %vm465_vm1, %v537_v37, %v539_v7  ;;  %v735_v12 = vrot.slane %v367_v11, 2  ;;  %v368_v63 = vadd.f32 %v320_v56, %v224_v48 }
  0x90   : > { %v831_v59 = vmul.f32 0.0625, %v799_v49  ;;  %v607_v61 = vadd.f32 %v540_v26, %v364_v21  ;;  %v541_v58 = vrot.slane %v414_v50, 1  ;;  %v542_v23 = vrot.slane %v415_v51, 1 }
  0x91   : > { %v736_v3 = vsel %vm658_vm0, %v734_v46, %v735_v12  ;;  %v416_v8 = vmul.f32 2.0, %v368_v63  ;;  %v737_v9 = vrot.slane %v368_v63, 2 }
  0x92   : > { %v863_v0 = vpack.c.bf16 %v831_v59, %v831_v59  ;;  %v800_v55 = vadd.f32 %v733_v54, %v607_v61  ;;  %v543_v1 = vsel %vm465_vm1, %v541_v58, %v542_v23 }
  0x93   : > { %v608_v6 = vadd.f32 %v543_v1, %v366_v43  ;;  %v544_v44 = vrot.slane %v416_v8, 1  ;;  %v738_v5 = vsel %vm658_vm0, %v735_v12, %v737_v9 }
  0x94   : > { %896 = vst.msk [vmem:[%s1104_s15 + $0x70] sm:$0xf] %vm867_vm2, %v863_v0  ;;  %v832_v30 = vmul.f32 0.0625, %v800_v55 }
  0x95   : > { %v801_v10 = vadd.f32 %v736_v3, %v608_v6  ;;  %v545_v13 = vsel %vm465_vm1, %v542_v23, %v544_v44 }
  0x96   : > { %v864_v34 = vpack.c.bf16 %v832_v30, %v832_v30  ;;  %v609_v15 = vadd.f32 %v545_v13, %v367_v11 }
  0x97   : > { %v833_v14 = vmul.f32 0.0625, %v801_v10 }
  0x98   : > { %897 = vst.msk [vmem:[%s1104_s15 + $0x74] sm:$0xf] %vm867_vm2, %v864_v34  ;;  %v802_v22 = vadd.f32 %v738_v5, %v609_v15 }
  0x99   : > { %v865_v20 = vpack.c.bf16 %v833_v14, %v833_v14 }
  0x9a   : > { %v834_v21 = vmul.f32 0.0625, %v802_v22 }
  0x9b   : > { %898 = vst.msk [vmem:[%s1104_s15 + $0x78] sm:$0xf] %vm867_vm2, %v865_v20 }
  0x9c   : > { %v866_v53 = vpack.c.bf16 %v834_v21, %v834_v21 }
  0x9e   : > { %899 = vst.msk [vmem:[%s1104_s15 + $0x7c] sm:$0xf] %vm867_vm2, %v866_v53 }
  0x9f PF: > { %s11_s6 = sadd.s32 1, %s1025_s6  }
  0xa0   : > { %p8_p4 = scmp.ge.s32.totalorder %s11_s6, 6  }
  0xa2   :  { %10 = sbr.rel (!%p8_p4) target bundleno = 1 (0x1), region = 54 }

// kernel: _forward.14
= control target key start
LH: loop header
LB: loop body
LE: loop exit
PB: predicated region body
PF: predicated region fallthrough
CT: control target
= control target key end

     0   :  { %s3334_s12 = smov 0   ;;  %s3336_s13 = smov 0   ;;  %s3892_s0 = inlined_call_operand.vmem [shape: bf16[1024,384], index: 0, kind: input, shape index: {}]   ;;  %s3893_s1 = inlined_call_operand.vmem [shape: bf16[384,128], index: 1, kind: input, shape index: {}]   ;;  %s3894_s2 = inlined_call_operand.vmem [shape: f32[1,128], index: 2, kind: input, shape index: {}]   ;;  %s3895_s3 = inlined_call_operand.vmem [shape: bf16[1024,128], index: 3, kind: output, shape index: {}]  }
   0x1   :  { %s3338_s14 = smov 0  }
   0x2 LB: > { %s32_s15 = sadd.s32 1, %s3308_s13  ;;  %p2441_p0 = scmp.ge.s32.totalorder %s3312_s14, 1  ;;  %s3312_s14 = sphi %s3338_s14, %s13_s14   ;;  %s3308_s13 = sphi %s3336_s13, %s3897_s13   ;;  %s3304_s12 = sphi %s3334_s12, %s3896_s12  }
   0x3   : > { %p34_p1 = scmp.ge.s32.totalorder %s32_s15, 2  ;;  %p191_p2 = scmp.lt.s32.totalorder %s3312_s14, 3 }
   0x5   : > { %s3899_s15 = smov (%p34_p1, %s32_s15), 0  ;;  %p192_p3 = pnand %p2441_p0, %p191_p2 }
   0x6   : > { %s2442_s7 = sshll.u32 (!%p192_p3), %s3304_s12, 6 }
   0x7   : > { %195 = sbr.rel (%p192_p3) target bundleno = 564 (0x234), region = 32  ;;  %p236_p4 = scmp.lt.s32.totalorder (!%p192_p3), %s2442_s7, 127 }
   0xc   : > { %v3031_v0 = vld [vmem:[%s3893_s1 + $0x38] sm:$0xff]  ;;  %v3030_v3 = vld [vmem:[%s3893_s1 + $0x30] sm:$0xff]  ;;  %v3029_v6 = vld [vmem:[%s3893_s1 + $0x28] sm:$0xff]  ;;  %s3901_s7 = smov (!%p236_p4, %s2442_s7), 127 }
   0xd   : > { %v3360_v1 = vld [vmem:[%s3893_s1 + $0x78] sm:$0xff]  ;;  %1231 = vmatpush.bf16.msra.mxu0 %v3031_v0  ;;  %3239 = vmatpush.bf16.msra.mxu3 %v3031_v0  ;;  %v3375_v4 = vld [vmem:[%s3893_s1 + $0x70] sm:$0xff]  ;;  %v3390_v7 = vld [vmem:[%s3893_s1 + $0x68] sm:$0xff]  ;;  %s3263_s25 = smul.u32 12, %s3901_s7  ;;  %s2445_s24 = sshll.u32 %s3901_s7, 2 }
   0xe   : > { %v3365_v2 = vld [vmem:[%s3893_s1 + $0xb8] sm:$0xff]  ;;  %1400 = vmatpush.bf16.msra.mxu1 %v3360_v1  ;;  %v3380_v5 = vld [vmem:[%s3893_s1 + $0xb0] sm:$0xff]  ;;  %v3395_v8 = vld [vmem:[%s3893_s1 + $0xa8] sm:$0xff]  ;;  %s3578_s27 = scalar_lea.vmem %s3895_s3, %s2445_s24 }
   0xf   : > { %1569 = vmatpush.bf16.msra.mxu2 %v3365_v2  ;;  %v3028_v9 = vld [vmem:[%s3893_s1 + $0x20] sm:$0xff]  ;;  %v3027_v12 = vld [vmem:[%s3893_s1 + $0x18] sm:$0xff]  ;;  %v3026_v15 = vld [vmem:[%s3893_s1 + $0x10] sm:$0xff]  ;;  %s3447_s8 = scalar_lea.vmem %s3892_s0, %s3263_s25 }
  0x10   : > { %v3406_v10 = vld [vmem:[%s3893_s1 + $0x60] sm:$0xff]  ;;  %v3035_v13 = vld [vmem:[%s3893_s1 + $0x58] sm:$0xff]  ;;  %v3034_v16 = vld [vmem:[%s3893_s1 + $0x50] sm:$0xff] }
  0x11   : > { %1232 = vmatpush.bf16.msra.mxu0 %v3030_v3  ;;  %3240 = vmatpush.bf16.msra.mxu3 %v3030_v3  ;;  %v3411_v11 = vld [vmem:[%s3893_s1 + $0xa0] sm:$0xff]  ;;  %v3426_v14 = vld [vmem:[%s3893_s1 + $0x98] sm:$0xff]  ;;  %v3439_v17 = vld [vmem:[%s3893_s1 + $0x90] sm:$0xff] }
  0x12   : > { %1401 = vmatpush.bf16.msra.mxu1 %v3375_v4  ;;  %v3025_v18 = vld [vmem:[%s3893_s1 + $0x8] sm:$0xff]  ;;  %v3024_v21 = vld [vmem:[%s3893_s1] sm:$0xff]  ;;  %v2450_v29 = vld [vmem:[%s3447_s8 + $0xc] sm:$0xf0] }
  0x13   : > { %1570 = vmatpush.bf16.msra.mxu2 %v3380_v5  ;;  %v3033_v19 = vld [vmem:[%s3893_s1 + $0x48] sm:$0xff]  ;;  %v3032_v22 = vld [vmem:[%s3893_s1 + $0x40] sm:$0xff]  ;;  %v2930_v31 = vld [vmem:[%s3447_s8 + $0x10] sm:$0xf0] }
  0x14   : > { %v3456_v20 = vld [vmem:[%s3893_s1 + $0x88] sm:$0xff]  ;;  %v3467_v23 = vld [vmem:[%s3893_s1 + $0x80] sm:$0xff]  ;;  %v2460_v36 = vld [vmem:[%s3447_s8 + $0x18] sm:$0xf] }
  0x15   : > { %1233 = vmatpush.bf16.msra.mxu0 %v3029_v6  ;;  %3241 = vmatpush.bf16.msra.mxu3 %v3029_v6  ;;  %v2448_v24 = vld [vmem:[%s3447_s8] sm:$0xf]  ;;  %v2929_v25 = vld [vmem:[%s3447_s8 + $0x8] sm:$0xf0]  ;;  %v2928_v28 = vld [vmem:[%s3447_s8 + $0x4] sm:$0xf] }
  0x16   : > { %1402 = vmatpush.bf16.msra.mxu1 %v3390_v7  ;;  %v2736_v26 = vld [vmem:[%s3447_s8 + $0x240] sm:$0xf]  ;;  %v3001_v27 = vld [vmem:[%s3447_s8 + $0x248] sm:$0xf0]  ;;  %v2456_v30 = vld [vmem:[%s3447_s8 + $0x8] sm:$0xf]  ;;  %v2449_v32 = vor.u32 %v2929_v25, %v2448_v24  ;;  %v2453_v34 = vor.u32 %v2928_v28, %v2450_v29 }
  0x17   : > { %1571 = vmatpush.bf16.msra.mxu2 %v3395_v8  ;;  %v2737_v33 = vor.u32 %v3001_v27, %v2736_v26  ;;  %v2457_v35 = vor.u32 %v2930_v31, %v2456_v30  ;;  %v2932_v37 = vld [vmem:[%s3447_s8 + $0x20] sm:$0xf0]  ;;  %v2748_v38 = vld [vmem:[%s3447_s8 + $0x258] sm:$0xf]  ;;  %v2931_v40 = vld [vmem:[%s3447_s8 + $0x1c] sm:$0xf] }
  0x18   : > { %v3004_v39 = vld [vmem:[%s3447_s8 + $0x260] sm:$0xf0]  ;;  %v2462_v41 = vld [vmem:[%s3447_s8 + $0x24] sm:$0xf0]  ;;  %v2468_v42 = vld [vmem:[%s3447_s8 + $0x20] sm:$0xf]  ;;  %v2461_v44 = vor.u32 %v2932_v37, %v2460_v36 }
  0x19   : > { %1234 = vmatpush.bf16.msra.mxu0 %v3028_v9  ;;  %3242 = vmatpush.bf16.msra.mxu3 %v3028_v9  ;;  %v2933_v43 = vld [vmem:[%s3447_s8 + $0x28] sm:$0xf0]  ;;  %v2749_v45 = vor.u32 %v3004_v39, %v2748_v38  ;;  %v2465_v46 = vor.u32 %v2931_v40, %v2462_v41  ;;  %v2472_v48 = vld [vmem:[%s3447_s8 + $0x30] sm:$0xf]  ;;  %v2935_v49 = vld [vmem:[%s3447_s8 + $0x38] sm:$0xf0] }
  0x1a   : > { %1403 = vmatpush.bf16.msra.mxu1 %v3406_v10  ;;  %v2469_v47 = vor.u32 %v2933_v43, %v2468_v42  ;;  %v2760_v50 = vld [vmem:[%s3447_s8 + $0x270] sm:$0xf]  ;;  %v3007_v51 = vld [vmem:[%s3447_s8 + $0x278] sm:$0xf0]  ;;  %v2934_v52 = vld [vmem:[%s3447_s8 + $0x34] sm:$0xf]  ;;  %v2473_v56 = vor.u32 %v2935_v49, %v2472_v48 }
  0x1b   : > { %1572 = vmatpush.bf16.msra.mxu2 %v3411_v11  ;;  %v2474_v53 = vld [vmem:[%s3447_s8 + $0x3c] sm:$0xf0]  ;;  %v2480_v54 = vld [vmem:[%s3447_s8 + $0x38] sm:$0xf]  ;;  %v2936_v55 = vld [vmem:[%s3447_s8 + $0x40] sm:$0xf0]  ;;  %v2761_v57 = vor.u32 %v3007_v51, %v2760_v50 }
  0x1c   : > { %v2477_v58 = vor.u32 %v2934_v52, %v2474_v53  ;;  %v2481_v59 = vor.u32 %v2936_v55, %v2480_v54  ;;  %v2484_v60 = vld [vmem:[%s3447_s8 + $0x48] sm:$0xf]  ;;  %v2938_v61 = vld [vmem:[%s3447_s8 + $0x50] sm:$0xf0]  ;;  %v2937_v0 = vld [vmem:[%s3447_s8 + $0x4c] sm:$0xf] }
  0x1d   : > { %1235 = vmatpush.bf16.msra.mxu0 %v3027_v12  ;;  %3243 = vmatpush.bf16.msra.mxu3 %v3027_v12  ;;  %v2772_v62 = vld [vmem:[%s3447_s8 + $0x288] sm:$0xf]  ;;  %v3010_v63 = vld [vmem:[%s3447_s8 + $0x290] sm:$0xf0]  ;;  %v2939_v3 = vld [vmem:[%s3447_s8 + $0x58] sm:$0xf0] }
  0x1e   : > { %1404 = vmatpush.bf16.msra.mxu1 %v3035_v13  ;;  %v2941_v9 = vld [vmem:[%s3447_s8 + $0x68] sm:$0xf0]  ;;  %v2940_v12 = vld [vmem:[%s3447_s8 + $0x64] sm:$0xf]  ;;  %v2943_v25 = vld [vmem:[%s3447_s8 + $0x7c] sm:$0xf] }
  0x1f   : > { %1573 = vmatpush.bf16.msra.mxu2 %v3426_v14  ;;  %v3016_v24 = vld [vmem:[%s3447_s8 + $0x2c0] sm:$0xf0]  ;;  %v2516_v26 = vld [vmem:[%s3447_s8 + $0x80] sm:$0xf]  ;;  %v2945_v27 = vld [vmem:[%s3447_s8 + $0x88] sm:$0xf0] }
  0x20   : > { %v2517_v31 = vor.u32 %v2945_v27, %v2516_v26  ;;  %v2946_v36 = vld [vmem:[%s3447_s8 + $0x94] sm:$0xf]  ;;  %v2522_v37 = vld [vmem:[%s3447_s8 + $0x9c] sm:$0xf0]  ;;  %v2528_v38 = vld [vmem:[%s3447_s8 + $0x98] sm:$0xf] }
  0x21   : > { %1236 = vmatpush.bf16.msra.mxu0 %v3026_v15  ;;  %3244 = vmatpush.bf16.msra.mxu3 %v3026_v15  ;;  %v2942_v15 = vld [vmem:[%s3447_s8 + $0x70] sm:$0xf0]  ;;  %v2948_v39 = vld [vmem:[%s3447_s8 + $0xa0] sm:$0xf0]  ;;  %v2525_v42 = vor.u32 %v2946_v36, %v2522_v37  ;;  %v2949_v48 = vld [vmem:[%s3447_s8 + $0xac] sm:$0xf] }
  0x22   : > { %1405 = vmatpush.bf16.msra.mxu1 %v3034_v16  ;;  %v2529_v43 = vor.u32 %v2948_v39, %v2528_v38  ;;  %v2534_v49 = vld [vmem:[%s3447_s8 + $0xb4] sm:$0xf0]  ;;  %v2540_v50 = vld [vmem:[%s3447_s8 + $0xb0] sm:$0xf]  ;;  %v2951_v51 = vld [vmem:[%s3447_s8 + $0xb8] sm:$0xf0] }
  0x23   : > { %1574 = vmatpush.bf16.msra.mxu2 %v3439_v17  ;;  %v2537_v54 = vor.u32 %v2949_v48, %v2534_v49  ;;  %v2541_v55 = vor.u32 %v2951_v51, %v2540_v50  ;;  %v2762_v48 = vld [vmem:[%s3447_s8 + $0x27c] sm:$0xf0]  ;;  %v2576_v50 = vld [vmem:[%s3447_s8 + $0xf8] sm:$0xf]  ;;  %v2960_v51 = vld [vmem:[%s3447_s8 + $0x100] sm:$0xf0] }
  0x24   : > { %v2570_v49 = vld [vmem:[%s3447_s8 + $0xfc] sm:$0xf0] }
  0x25   : > { %1237 = vmatpush.bf16.msra.mxu0 %v3025_v18  ;;  %3245 = vmatpush.bf16.msra.mxu3 %v3025_v18 }
  0x26   : > { %1406 = vmatpush.bf16.msra.mxu1 %v3033_v19 }
  0x27   : > { %1575 = vmatpush.bf16.msra.mxu2 %v3456_v20 }
  0x29   : > { %1238 = vmatpush.bf16.msra.mxu0 %v3024_v21  ;;  %3246 = vmatpush.bf16.msra.mxu3 %v3024_v21  ;;  %v2944_v21 = vld [vmem:[%s3447_s8 + $0x80] sm:$0xf0] }
  0x2a   : > { %1407 = vmatpush.bf16.msra.mxu1 %v3032_v22 }
  0x2b   : > { %1576 = vmatpush.bf16.msra.mxu2 %v3467_v23 }
  0x2c   : > { %1239 = vmatmul.bf16.vlgmr.msra.gmra.mxu0 %v2449_v32  ;;  %1359 = vmatmul.bf16.vlgmr.msra.gmra.mxu3 %v2737_v33  ;;  %v2520_v32 = vld [vmem:[%s3447_s8 + $0x90] sm:$0xf]  ;;  %v2947_v33 = vld [vmem:[%s3447_s8 + $0x98] sm:$0xf0] }
  0x2d   : > { %3247 = vmatpush.bf16.msrb.mxu3 %v3360_v1  ;;  %1408 = vmatmul.bf16.vlgmr.msra.gmra.mxu1 %v2453_v34  ;;  %v2486_v1 = vld [vmem:[%s3447_s8 + $0x54] sm:$0xf0]  ;;  %v2808_v34 = vld [vmem:[%s3447_s8 + $0x2d0] sm:$0xf]  ;;  %v2521_v40 = vor.u32 %v2947_v33, %v2520_v32 }
  0x2e   : > { %1577 = vmatmul.bf16.vlgmr.msra.gmra.mxu2 %v2457_v35  ;;  %v2489_v6 = vor.u32 %v2937_v0, %v2486_v1  ;;  %v3019_v35 = vld [vmem:[%s3447_s8 + $0x2d8] sm:$0xf0] }
  0x2f   : > { %v2809_v41 = vor.u32 %v3019_v35, %v2808_v34 }
  0x31   : > { %3248 = vmatpush.bf16.msrb.mxu3 %v3375_v4  ;;  %v2485_v4 = vor.u32 %v2938_v61, %v2484_v60  ;;  %v2738_v60 = vld [vmem:[%s3447_s8 + $0x24c] sm:$0xf0] }
  0x32   : > { %v2546_v61 = vld [vmem:[%s3447_s8 + $0xcc] sm:$0xf0] }
  0x35   : > { %3249 = vmatpush.bf16.msrb.mxu3 %v3390_v7 }
  0x39   : > { %3250 = vmatpush.bf16.msrb.mxu3 %v3406_v10  ;;  %v2784_v10 = vld [vmem:[%s3447_s8 + $0x2a0] sm:$0xf] }
  0x3c   : > { %1244 = vmatmul.bf16.gmra.mxu0 %v2461_v44  ;;  %1364 = vmatmul.bf16.gmra.mxu3 %v2749_v45  ;;  %v2532_v44 = vld [vmem:[%s3447_s8 + $0xa8] sm:$0xf]  ;;  %v2950_v45 = vld [vmem:[%s3447_s8 + $0xb0] sm:$0xf0] }
  0x3d   : > { %3251 = vmatpush.bf16.msrb.mxu3 %v3035_v13  ;;  %1413 = vmatmul.bf16.gmra.mxu1 %v2465_v46  ;;  %v2498_v13 = vld [vmem:[%s3447_s8 + $0x6c] sm:$0xf0]  ;;  %v2820_v46 = vld [vmem:[%s3447_s8 + $0x2e8] sm:$0xf]  ;;  %v2533_v52 = vor.u32 %v2950_v45, %v2532_v44  ;;  %v2959_v45 = vld [vmem:[%s3447_s8 + $0xf8] sm:$0xf0] }
  0x3e   : > { %1582 = vmatmul.bf16.gmra.mxu2 %v2469_v47  ;;  %v2501_v18 = vor.u32 %v2940_v12, %v2498_v13  ;;  %v3022_v47 = vld [vmem:[%s3447_s8 + $0x2f0] sm:$0xf0]  ;;  %v3560_v12 = vld [vmem:[%s3894_s2] ss:$0 sm:$0xff]  ;;  %v2556_v13 = vld [vmem:[%s3447_s8 + $0xd8] sm:$0xf] }
  0x3f   : > { %v2821_v53 = vor.u32 %v3022_v47, %v2820_v46  ;;  %v2568_v44 = vld [vmem:[%s3447_s8 + $0xf0] sm:$0xf]  ;;  %v2958_v46 = vld [vmem:[%s3447_s8 + $0xf4] sm:$0xf] }
  0x40   : > { %v3006_v47 = vld [vmem:[%s3447_s8 + $0x274] sm:$0xf] }
  0x41   : > { %3252 = vmatpush.bf16.msrb.mxu3 %v3034_v16 }
  0x45   : > { %3253 = vmatpush.bf16.msrb.mxu3 %v3033_v19 }
  0x49   : > { %3254 = vmatpush.bf16.msrb.mxu3 %v3032_v22  ;;  %v2796_v22 = vld [vmem:[%s3447_s8 + $0x2b8] sm:$0xf] }
  0x4a   : > { %v2797_v29 = vor.u32 %v3016_v24, %v2796_v22 }
  0x4c   : > { %1249 = vmatmul.bf16.gmra.mxu0 %v2473_v56  ;;  %1369 = vmatmul.bf16.gmra.mxu3 %v2761_v57  ;;  %v2544_v56 = vld [vmem:[%s3447_s8 + $0xc0] sm:$0xf]  ;;  %v2953_v57 = vld [vmem:[%s3447_s8 + $0xc8] sm:$0xf0] }
  0x4d   : > { %3255 = vmatpush.bf16.msra.mxu3 %v3365_v2  ;;  %1418 = vmatmul.bf16.gmra.mxu1 %v2477_v58  ;;  %v2492_v2 = vld [vmem:[%s3447_s8 + $0x50] sm:$0xf]  ;;  %v2952_v58 = vld [vmem:[%s3447_s8 + $0xc4] sm:$0xf]  ;;  %v2545_v0 = vor.u32 %v2953_v57, %v2544_v56  ;;  %v2569_v56 = vor.u32 %v2959_v45, %v2568_v44  ;;  %v2765_v57 = vor.u32 %v3006_v47, %v2762_v48  ;;  %v2965_v47 = vld [vmem:[%s3447_s8 + $0x128] sm:$0xf0] }
  0x4e   : > { %1587 = vmatmul.bf16.gmra.mxu2 %v2481_v59  ;;  %v2493_v7 = vor.u32 %v2939_v3, %v2492_v2  ;;  %v3000_v59 = vld [vmem:[%s3447_s8 + $0x244] sm:$0xf]  ;;  %v2549_v3 = vor.u32 %v2952_v58, %v2546_v61  ;;  %v2577_v61 = vor.u32 %v2960_v51, %v2576_v50  ;;  %v2786_v50 = vld [vmem:[%s3447_s8 + $0x2ac] sm:$0xf0] }
  0x4f   : > { %v2741_v1 = vor.u32 %v3000_v59, %v2738_v60  ;;  %v2573_v60 = vor.u32 %v2958_v46, %v2570_v49  ;;  %v2592_v46 = vld [vmem:[%s3447_s8 + $0x120] sm:$0xf]  ;;  %v2964_v48 = vld [vmem:[%s3447_s8 + $0x124] sm:$0xf]  ;;  %v2594_v51 = vld [vmem:[%s3447_s8 + $0x12c] sm:$0xf0] }
  0x50   : > { %v3012_v49 = vld [vmem:[%s3447_s8 + $0x2a4] sm:$0xf] }
  0x51   : > { %3256 = vmatpush.bf16.msra.mxu3 %v3380_v5  ;;  %v2773_v5 = vor.u32 %v3010_v63, %v2772_v62  ;;  %v2552_v62 = vld [vmem:[%s3447_s8 + $0xc8] sm:$0xf]  ;;  %v2954_v63 = vld [vmem:[%s3447_s8 + $0xd0] sm:$0xf0] }
  0x55   : > { %3257 = vmatpush.bf16.msra.mxu3 %v3395_v8  ;;  %v2496_v8 = vld [vmem:[%s3447_s8 + $0x60] sm:$0xf] }
  0x56   : > { %v2497_v16 = vor.u32 %v2941_v9, %v2496_v8 }
  0x59   : > { %3258 = vmatpush.bf16.msra.mxu3 %v3411_v11  ;;  %v3013_v11 = vld [vmem:[%s3447_s8 + $0x2a8] sm:$0xf0] }
  0x5c   : > { %1254 = vmatmul.bf16.gmra.mxu0 %v2485_v4  ;;  %1374 = vmatmul.bf16.gmra.mxu3 %v2773_v5  ;;  %v2553_v4 = vor.u32 %v2954_v63, %v2552_v62 }
  0x5d   : > { %3259 = vmatpush.bf16.msra.mxu3 %v3426_v14  ;;  %1423 = vmatmul.bf16.gmra.mxu1 %v2489_v6  ;;  %v2504_v14 = vld [vmem:[%s3447_s8 + $0x68] sm:$0xf] }
  0x5e   : > { %1592 = vmatmul.bf16.gmra.mxu2 %v2493_v7  ;;  %v2505_v19 = vor.u32 %v2942_v15, %v2504_v14  ;;  %v2956_v14 = vld [vmem:[%s3447_s8 + $0xe0] sm:$0xf0]  ;;  %v2955_v15 = vld [vmem:[%s3447_s8 + $0xdc] sm:$0xf] }
  0x61   : > { %3260 = vmatpush.bf16.msra.mxu3 %v3439_v17  ;;  %v2785_v17 = vor.u32 %v3013_v11, %v2784_v10 }
  0x65   : > { %3261 = vmatpush.bf16.msra.mxu3 %v3456_v20  ;;  %v2508_v20 = vld [vmem:[%s3447_s8 + $0x78] sm:$0xf] }
  0x66   : > { %v2509_v28 = vor.u32 %v2944_v21, %v2508_v20  ;;  %v2957_v20 = vld [vmem:[%s3447_s8 + $0xe8] sm:$0xf0] }
  0x69   : > { %3262 = vmatpush.bf16.msra.mxu3 %v3467_v23  ;;  %v2510_v23 = vld [vmem:[%s3447_s8 + $0x84] sm:$0xf0] }
  0x6a   : > { %v2513_v30 = vor.u32 %v2943_v25, %v2510_v23  ;;  %v2557_v23 = vor.u32 %v2956_v14, %v2556_v13  ;;  %v2580_v13 = vld [vmem:[%s3447_s8 + $0x108] sm:$0xf]  ;;  %v2962_v14 = vld [vmem:[%s3447_s8 + $0x110] sm:$0xf0] }
  0x6c   : > { %1259 = vmatmul.bf16.gmra.mxu0 %v2497_v16  ;;  %1379 = vmatmul.bf16.gmra.mxu3 %v2785_v17  ;;  %v3003_v16 = vld [vmem:[%s3447_s8 + $0x25c] sm:$0xf]  ;;  %v2750_v17 = vld [vmem:[%s3447_s8 + $0x264] sm:$0xf0] }
  0x6d   : > { %1428 = vmatmul.bf16.gmra.mxu1 %v2501_v18  ;;  %v2558_v18 = vld [vmem:[%s3447_s8 + $0xe4] sm:$0xf0]  ;;  %v2753_v26 = vor.u32 %v3003_v16, %v2750_v17  ;;  %v3009_v16 = vld [vmem:[%s3447_s8 + $0x28c] sm:$0xf]  ;;  %v2774_v17 = vld [vmem:[%s3447_s8 + $0x294] sm:$0xf0] }
  0x6e   : > { %1597 = vmatmul.bf16.gmra.mxu2 %v2505_v19  ;;  %v2564_v19 = vld [vmem:[%s3447_s8 + $0xe0] sm:$0xf] }
  0x7c   : > { %1264 = vmatmul.bf16.gmra.mxu0 %v2509_v28  ;;  %1384 = vmatmul.bf16.gmra.mxu3 %v2797_v29  ;;  %v2561_v29 = vor.u32 %v2955_v15, %v2558_v18  ;;  %v2961_v15 = vld [vmem:[%s3447_s8 + $0x10c] sm:$0xf]  ;;  %v2582_v18 = vld [vmem:[%s3447_s8 + $0x114] sm:$0xf0] }
  0x7d   : > { %1433 = vmatmul.bf16.gmra.mxu1 %v2513_v30  ;;  %v2565_v30 = vor.u32 %v2957_v20, %v2564_v19  ;;  %v2588_v19 = vld [vmem:[%s3447_s8 + $0x110] sm:$0xf]  ;;  %v2963_v20 = vld [vmem:[%s3447_s8 + $0x118] sm:$0xf0] }
  0x7e   : > { %1602 = vmatmul.bf16.gmra.mxu2 %v2517_v31 }
  0x8c   : > { %1269 = vmatmul.bf16.gmra.mxu0 %v2521_v40  ;;  %1389 = vmatmul.bf16.gmra.mxu3 %v2809_v41 }
  0x8d   : > { %1438 = vmatmul.bf16.gmra.mxu1 %v2525_v42 }
  0x8e   : > { %1607 = vmatmul.bf16.gmra.mxu2 %v2529_v43 }
  0x9c   : > { %1274 = vmatmul.bf16.gmra.mxu0 %v2533_v52  ;;  %1394 = vmatmul.bf16.gmra.mxu3 %v2821_v53 }
  0x9d   : > { %1443 = vmatmul.bf16.gmra.mxu1 %v2537_v54 }
  0x9e   : > { %1612 = vmatmul.bf16.gmra.mxu2 %v2541_v55 }
  0xa9   : > { %v1240_v2 = vpop.f32.mrf.mxu0 }
  0xaa   : > { %v1409_v5 = vpop.f32.mrf.mxu1 }
  0xab   : > { %v1410_v6 = vadd.f32 %v1409_v5, %v1240_v2 }
  0xac   : > { %1279 = vmatmul.bf16.gmra.mxu0 %v2545_v0  ;;  %1528 = vmatmul.bf16.vlgmr.msrb.gmra.mxu3 %v2741_v1 }
  0xad   : > { %1448 = vmatmul.bf16.gmra.mxu1 %v2549_v3 }
  0xae   : > { %1617 = vmatmul.bf16.gmra.mxu2 %v2553_v4 }
  0xaf   : > { %v3555_v7 = vpop.f32.mrf.mxu3 }
  0xb1   : > { %v1578_v8 = vpop.f32.mrf.mxu2  ;;  %v1242_v9 = vpop.f32.mrf.mxu0 }
  0xb2   : > { %v1411_v10 = vpop.f32.mrf.mxu1  ;;  %v1579_v11 = vadd.f32 %v1578_v8, %v1410_v6 }
  0xb3   : > { %v1412_v22 = vadd.f32 %v1411_v10, %v1242_v9 }
  0xb4   : > { %v1937_v21 = vadd.f32 %v3560_v12, %v1579_v11 }
  0xb6   : > { %v2065_v32 = vmul.f32 0.2, %v1937_v21  ;;  %vm2001_vm0 = vcmp.ge.f32.partialorder %v1937_v21, 0.0 }
  0xb7   : > { %v3571_v24 = vpop.f32.mrf.mxu3 }
  0xb8   : > { %v2129_v35 = vsel %vm2001_vm0, %v1937_v21, %v2065_v32 }
  0xb9   : > { %v1580_v25 = vpop.f32.mrf.mxu2  ;;  %v1245_v28 = vpop.f32.mrf.mxu0 }
  0xba   : > { %v1581_v27 = vadd.f32 %v1580_v25, %v1412_v22  ;;  %v1414_v31 = vpop.f32.mrf.mxu1 }
  0xbb   : > { %v1415_v37 = vadd.f32 %v1414_v31, %v1245_v28  ;;  %v2589_v31 = vor.u32 %v2963_v20, %v2588_v19  ;;  %v2967_v19 = vld [vmem:[%s3447_s8 + $0x13c] sm:$0xf] }
  0xbc   : > { %v1938_v33 = vadd.f32 %v3560_v12, %v1581_v27  ;;  %1284 = vmatmul.bf16.gmra.mxu0 %v2557_v23  ;;  %1533 = vmatmul.bf16.gmra.mxu3 %v2753_v26  ;;  %v2581_v26 = vor.u32 %v2962_v14, %v2580_v13  ;;  %v2777_v27 = vor.u32 %v3009_v16, %v2774_v17  ;;  %v2604_v17 = vld [vmem:[%s3447_s8 + $0x138] sm:$0xf]  ;;  %v3015_v20 = vld [vmem:[%s3447_s8 + $0x2bc] sm:$0xf] }
  0xbd   : > { %1453 = vmatmul.bf16.gmra.mxu1 %v2561_v29 }
  0xbe   : > { %vm2002_vm1 = vcmp.ge.f32.partialorder %v1938_v33, 0.0  ;;  %v2066_v34 = vmul.f32 0.2, %v1938_v33  ;;  %1622 = vmatmul.bf16.gmra.mxu2 %v2565_v30  ;;  %v2585_v30 = vor.u32 %v2961_v15, %v2582_v18  ;;  %v2968_v18 = vld [vmem:[%s3447_s8 + $0x140] sm:$0xf0] }
  0xbf   : > { %v3580_v38 = vpop.f32.mrf.mxu3 }
  0xc0   : > { %v2130_v36 = vsel %vm2002_vm1, %v1938_v33, %v2066_v34 }
  0xc1   : > { %v3051_v39 = vpack.c.bf16 %v2130_v36, %v2129_v35  ;;  %v1583_v40 = vpop.f32.mrf.mxu2  ;;  %v1247_v41 = vpop.f32.mrf.mxu0 }
  0xc2   : > { %v1416_v42 = vpop.f32.mrf.mxu1  ;;  %v1584_v43 = vadd.f32 %v1583_v40, %v1415_v37 }
  0xc3   : > { %3052 = vst [vmem:[%s3578_s27] sm:$0xff] %v3051_v39   ;;  %v1417_v53 = vadd.f32 %v1416_v42, %v1247_v41 }
  0xc4   : > { %v1939_v52 = vadd.f32 %v3560_v12, %v1584_v43 }
  0xc6   : > { %v2067_v63 = vmul.f32 0.2, %v1939_v52  ;;  %vm2003_vm2 = vcmp.ge.f32.partialorder %v1939_v52, 0.0 }
  0xc7   : > { %v3592_v54 = vpop.f32.mrf.mxu3 }
  0xc8   : > { %v2131_v2 = vsel %vm2003_vm2, %v1939_v52, %v2067_v63  ;;  %v2600_v52 = vld [vmem:[%s3447_s8 + $0x128] sm:$0xf]  ;;  %v2597_v63 = vor.u32 %v2964_v48, %v2594_v51 }
  0xc9   : > { %v1585_v55 = vpop.f32.mrf.mxu2  ;;  %v1250_v59 = vpop.f32.mrf.mxu0 }
  0xca   : > { %v1586_v58 = vadd.f32 %v1585_v55, %v1417_v53  ;;  %v1419_v62 = vpop.f32.mrf.mxu1  ;;  %v2966_v53 = vld [vmem:[%s3447_s8 + $0x130] sm:$0xf0] }
  0xcb   : > { %v1420_v4 = vadd.f32 %v1419_v62, %v1250_v59  ;;  %v2593_v59 = vor.u32 %v2965_v47, %v2592_v46 }
  0xcc   : > { %v1940_v0 = vadd.f32 %v3560_v12, %v1586_v58  ;;  %1289 = vmatmul.bf16.gmra.mxu0 %v2569_v56  ;;  %1538 = vmatmul.bf16.gmra.mxu3 %v2765_v57 }
  0xcd   : > { %1458 = vmatmul.bf16.gmra.mxu1 %v2573_v60  ;;  %v2789_v60 = vor.u32 %v3012_v49, %v2786_v50 }
  0xce   : > { %vm2004_vm3 = vcmp.ge.f32.partialorder %v1940_v0, 0.0  ;;  %v2068_v1 = vmul.f32 0.2, %v1940_v0  ;;  %1627 = vmatmul.bf16.gmra.mxu2 %v2577_v61 }
  0xcf   : > { %v3595_v5 = vpop.f32.mrf.mxu3 }
  0xd0   : > { %v2132_v3 = vsel %vm2004_vm3, %v1940_v0, %v2068_v1  ;;  %v2601_v0 = vor.u32 %v2966_v53, %v2600_v52  ;;  %v2616_v52 = vld [vmem:[%s3447_s8 + $0x150] sm:$0xf]  ;;  %v2971_v53 = vld [vmem:[%s3447_s8 + $0x158] sm:$0xf0] }
  0xd1   : > { %v3056_v6 = vpack.c.bf16 %v2132_v3, %v2131_v2  ;;  %v1588_v8 = vpop.f32.mrf.mxu2  ;;  %v1252_v9 = vpop.f32.mrf.mxu0 }
  0xd2   : > { %v1421_v10 = vpop.f32.mrf.mxu1  ;;  %v1589_v11 = vadd.f32 %v1588_v8, %v1420_v4 }
  0xd3   : > { %3208 = vst [vmem:[%s3578_s27 + $0x8] sm:$0xff] %v3056_v6   ;;  %v1422_v22 = vadd.f32 %v1421_v10, %v1252_v9 }
  0xd4   : > { %v1941_v21 = vadd.f32 %v3560_v12, %v1589_v11 }
  0xd6   : > { %v2069_v33 = vmul.f32 0.2, %v1941_v21  ;;  %vm2005_vm4 = vcmp.ge.f32.partialorder %v1941_v21, 0.0 }
  0xd7   : > { %v3607_v25 = vpop.f32.mrf.mxu3 }
  0xd8   : > { %v2133_v36 = vsel %vm2005_vm4, %v1941_v21, %v2069_v33  ;;  %v2798_v21 = vld [vmem:[%s3447_s8 + $0x2c4] sm:$0xf0] }
  0xd9   : > { %v1590_v23 = vpop.f32.mrf.mxu2  ;;  %v1255_v29 = vpop.f32.mrf.mxu0 }
  0xda   : > { %v1591_v28 = vadd.f32 %v1590_v23, %v1422_v22  ;;  %v1424_v32 = vpop.f32.mrf.mxu1  ;;  %v2606_v22 = vld [vmem:[%s3447_s8 + $0x144] sm:$0xf0]  ;;  %v2612_v23 = vld [vmem:[%s3447_s8 + $0x140] sm:$0xf] }
  0xdb   : > { %v1425_v39 = vadd.f32 %v1424_v32, %v1255_v29  ;;  %v2801_v32 = vor.u32 %v3015_v20, %v2798_v21 }
  0xdc   : > { %v1942_v34 = vadd.f32 %v3560_v12, %v1591_v28  ;;  %1294 = vmatmul.bf16.gmra.mxu0 %v2581_v26  ;;  %1543 = vmatmul.bf16.gmra.mxu3 %v2777_v27  ;;  %v2969_v26 = vld [vmem:[%s3447_s8 + $0x148] sm:$0xf0] }
  0xdd   : > { %1463 = vmatmul.bf16.gmra.mxu1 %v2585_v30 }
  0xde   : > { %vm2006_vm5 = vcmp.ge.f32.partialorder %v1942_v34, 0.0  ;;  %v2070_v35 = vmul.f32 0.2, %v1942_v34  ;;  %1632 = vmatmul.bf16.gmra.mxu2 %v2589_v31  ;;  %v2605_v31 = vor.u32 %v2968_v18, %v2604_v17 }
  0xdf   : > { %v3610_v40 = vpop.f32.mrf.mxu3 }
  0xe0   : > { %v2134_v37 = vsel %vm2006_vm5, %v1942_v34, %v2070_v35  ;;  %v2609_v35 = vor.u32 %v2967_v19, %v2606_v22 }
  0xe1   : > { %v3061_v41 = vpack.c.bf16 %v2134_v37, %v2133_v36  ;;  %v1593_v42 = vpop.f32.mrf.mxu2  ;;  %v1257_v43 = vpop.f32.mrf.mxu0  ;;  %v2613_v36 = vor.u32 %v2969_v26, %v2612_v23 }
  0xe2   : > { %v1426_v44 = vpop.f32.mrf.mxu1  ;;  %v1594_v45 = vadd.f32 %v1593_v42, %v1425_v39 }
  0xe3   : > { %3209 = vst [vmem:[%s3578_s27 + $0x10] sm:$0xff] %v3061_v41   ;;  %v1427_v56 = vadd.f32 %v1426_v44, %v1257_v43 }
  0xe4   : > { %v1943_v55 = vadd.f32 %v3560_v12, %v1594_v45 }
  0xe6   : > { %v2071_v2 = vmul.f32 0.2, %v1943_v55  ;;  %vm2007_vm6 = vcmp.ge.f32.partialorder %v1943_v55, 0.0 }
  0xe7   : > { %v3622_v57 = vpop.f32.mrf.mxu3 }
  0xe8   : > { %v2135_v6 = vsel %vm2007_vm6, %v1943_v55, %v2071_v2  ;;  %v2970_v55 = vld [vmem:[%s3447_s8 + $0x154] sm:$0xf]  ;;  %v2617_v2 = vor.u32 %v2971_v53, %v2616_v52 }
  0xe9   : > { %v1595_v58 = vpop.f32.mrf.mxu2  ;;  %v1260_v62 = vpop.f32.mrf.mxu0 }
  0xea   : > { %v1596_v61 = vadd.f32 %v1595_v58, %v1427_v56  ;;  %v1429_v1 = vpop.f32.mrf.mxu1  ;;  %v3018_v56 = vld [vmem:[%s3447_s8 + $0x2d4] sm:$0xf]  ;;  %v2810_v58 = vld [vmem:[%s3447_s8 + $0x2dc] sm:$0xf0] }
  0xeb   : > { %v1430_v9 = vadd.f32 %v1429_v1, %v1260_v62 }
  0xec   : > { %v1944_v3 = vadd.f32 %v3560_v12, %v1596_v61  ;;  %1299 = vmatmul.bf16.gmra.mxu0 %v2593_v59  ;;  %1548 = vmatmul.bf16.gmra.mxu3 %v2789_v60  ;;  %v2618_v59 = vld [vmem:[%s3447_s8 + $0x15c] sm:$0xf0]  ;;  %v2624_v60 = vld [vmem:[%s3447_s8 + $0x158] sm:$0xf]  ;;  %v2972_v61 = vld [vmem:[%s3447_s8 + $0x160] sm:$0xf0] }
  0xed   : > { %1468 = vmatmul.bf16.gmra.mxu1 %v2597_v63 }
  0xee   : > { %vm2008_vm7 = vcmp.ge.f32.partialorder %v1944_v3, 0.0  ;;  %v2072_v4 = vmul.f32 0.2, %v1944_v3  ;;  %1637 = vmatmul.bf16.gmra.mxu2 %v2601_v0 }
  0xef   : > { %v3625_v10 = vpop.f32.mrf.mxu3 }
  0xf0   : > { %v2136_v8 = vsel %vm2008_vm7, %v1944_v3, %v2072_v4  ;;  %v2813_v3 = vor.u32 %v3018_v56, %v2810_v58 }
  0xf1   : > { %v3066_v11 = vpack.c.bf16 %v2136_v8, %v2135_v6  ;;  %v1598_v13 = vpop.f32.mrf.mxu2  ;;  %v1262_v14 = vpop.f32.mrf.mxu0  ;;  %v2621_v8 = vor.u32 %v2970_v55, %v2618_v59 }
  0xf2   : > { %v1431_v15 = vpop.f32.mrf.mxu1  ;;  %v1599_v16 = vadd.f32 %v1598_v13, %v1430_v9  ;;  %v2625_v9 = vor.u32 %v2972_v61, %v2624_v60 }
  0xf3   : > { %3210 = vst [vmem:[%s3578_s27 + $0x18] sm:$0xff] %v3066_v11   ;;  %v1432_v28 = vadd.f32 %v1431_v15, %v1262_v14 }
  0xf4   : > { %v1945_v27 = vadd.f32 %v3560_v12, %v1599_v16 }
  0xf6   : > { %v2073_v39 = vmul.f32 0.2, %v1945_v27  ;;  %vm2009_vm8 = vcmp.ge.f32.partialorder %v1945_v27, 0.0 }
  0xf7   : > { %v3637_v29 = vpop.f32.mrf.mxu3 }
  0xf8   : > { %v2137_v43 = vsel %vm2009_vm8, %v1945_v27, %v2073_v39  ;;  %v2628_v27 = vld [vmem:[%s3447_s8 + $0x168] sm:$0xf] }
  0xf9   : > { %v1600_v30 = vpop.f32.mrf.mxu2  ;;  %v1265_v34 = vpop.f32.mrf.mxu0 }
  0xfa   : > { %v1601_v33 = vadd.f32 %v1600_v30, %v1432_v28  ;;  %v1434_v37 = vpop.f32.mrf.mxu1  ;;  %v2974_v28 = vld [vmem:[%s3447_s8 + $0x170] sm:$0xf0]  ;;  %v2973_v30 = vld [vmem:[%s3447_s8 + $0x16c] sm:$0xf] }
  0xfb   : > { %v1435_v45 = vadd.f32 %v1434_v37, %v1265_v34  ;;  %v2636_v34 = vld [vmem:[%s3447_s8 + $0x170] sm:$0xf] }
  0xfc   : > { %v1946_v41 = vadd.f32 %v3560_v12, %v1601_v33  ;;  %1304 = vmatmul.bf16.gmra.mxu0 %v2605_v31  ;;  %1553 = vmatmul.bf16.gmra.mxu3 %v2801_v32  ;;  %v3021_v31 = vld [vmem:[%s3447_s8 + $0x2ec] sm:$0xf]  ;;  %v2822_v32 = vld [vmem:[%s3447_s8 + $0x2f4] sm:$0xf0] }
  0xfd   : > { %1473 = vmatmul.bf16.gmra.mxu1 %v2609_v35  ;;  %v2630_v33 = vld [vmem:[%s3447_s8 + $0x174] sm:$0xf0]  ;;  %v2975_v35 = vld [vmem:[%s3447_s8 + $0x178] sm:$0xf0] }
  0xfe   : > { %vm2010_vm9 = vcmp.ge.f32.partialorder %v1946_v41, 0.0  ;;  %v2074_v42 = vmul.f32 0.2, %v1946_v41  ;;  %1642 = vmatmul.bf16.gmra.mxu2 %v2613_v36 }
  0xff   : > { %v3640_v46 = vpop.f32.mrf.mxu3 }
 0x100   : > { %v2138_v44 = vsel %vm2010_vm9, %v1946_v41, %v2074_v42  ;;  %v2629_v42 = vor.u32 %v2974_v28, %v2628_v27 }
 0x101   : > { %v3071_v47 = vpack.c.bf16 %v2138_v44, %v2137_v43  ;;  %v1603_v48 = vpop.f32.mrf.mxu2  ;;  %v1267_v49 = vpop.f32.mrf.mxu0  ;;  %v2825_v43 = vor.u32 %v3021_v31, %v2822_v32 }
 0x102   : > { %v1436_v50 = vpop.f32.mrf.mxu1  ;;  %v1604_v51 = vadd.f32 %v1603_v48, %v1435_v45  ;;  %v2637_v48 = vor.u32 %v2975_v35, %v2636_v34 }
 0x103   : > { %3211 = vst [vmem:[%s3578_s27 + $0x20] sm:$0xff] %v3071_v47   ;;  %v1437_v63 = vadd.f32 %v1436_v50, %v1267_v49  ;;  %v2633_v47 = vor.u32 %v2973_v30, %v2630_v33 }
 0x104   : > { %v1947_v62 = vadd.f32 %v3560_v12, %v1604_v51 }
 0x106   : > { %v2075_v13 = vmul.f32 0.2, %v1947_v62  ;;  %vm2011_vm10 = vcmp.ge.f32.partialorder %v1947_v62, 0.0 }
 0x107   : > { %v3652_v0 = vpop.f32.mrf.mxu3 }
 0x108   : > { %v2139_v16 = vsel %vm2011_vm10, %v1947_v62, %v2075_v13 }
 0x109   : > { %v1605_v1 = vpop.f32.mrf.mxu2  ;;  %v1270_v6 = vpop.f32.mrf.mxu0 }
 0x10a   : > { %v1606_v4 = vadd.f32 %v1605_v1, %v1437_v63  ;;  %v1439_v11 = vpop.f32.mrf.mxu1  ;;  %v2640_v1 = vld [vmem:[%s3447_s8 + $0x180] sm:$0xf] }
 0x10b   : > { %v1440_v18 = vadd.f32 %v1439_v11, %v1270_v6  ;;  %v3002_v6 = vld [vmem:[%s3447_s8 + $0x250] sm:$0xf0] }
 0x10c   : > { %v1948_v14 = vadd.f32 %v3560_v12, %v1606_v4  ;;  %1309 = vmatmul.bf16.gmra.mxu0 %v2617_v2  ;;  %1558 = vmatmul.bf16.gmra.mxu3 %v2813_v3  ;;  %v2977_v2 = vld [vmem:[%s3447_s8 + $0x188] sm:$0xf0]  ;;  %v2976_v3 = vld [vmem:[%s3447_s8 + $0x184] sm:$0xf]  ;;  %v2744_v4 = vld [vmem:[%s3447_s8 + $0x248] sm:$0xf] }
 0x10d   : > { %1478 = vmatmul.bf16.gmra.mxu1 %v2621_v8  ;;  %v2642_v8 = vld [vmem:[%s3447_s8 + $0x18c] sm:$0xf0]  ;;  %v2978_v11 = vld [vmem:[%s3447_s8 + $0x190] sm:$0xf0] }
 0x10e   : > { %vm2012_vm11 = vcmp.ge.f32.partialorder %v1948_v14, 0.0  ;;  %v2076_v15 = vmul.f32 0.2, %v1948_v14  ;;  %1647 = vmatmul.bf16.gmra.mxu2 %v2625_v9  ;;  %v2648_v9 = vld [vmem:[%s3447_s8 + $0x188] sm:$0xf] }
 0x10f   : > { %v3655_v19 = vpop.f32.mrf.mxu3 }
 0x110   : > { %v2140_v17 = vsel %vm2012_vm11, %v1948_v14, %v2076_v15 }
 0x111   : > { %v3076_v20 = vpack.c.bf16 %v2140_v17, %v2139_v16  ;;  %v1608_v21 = vpop.f32.mrf.mxu2  ;;  %v1272_v22 = vpop.f32.mrf.mxu0  ;;  %v2641_v17 = vor.u32 %v2977_v2, %v2640_v1 }
 0x112   : > { %v1441_v23 = vpop.f32.mrf.mxu1  ;;  %v1609_v26 = vadd.f32 %v1608_v21, %v1440_v18  ;;  %v2745_v18 = vor.u32 %v3002_v6, %v2744_v4 }
 0x113   : > { %3212 = vst [vmem:[%s3578_s27 + $0x28] sm:$0xff] %v3076_v20   ;;  %v1442_v37 = vadd.f32 %v1441_v23, %v1272_v22  ;;  %v2645_v22 = vor.u32 %v2976_v3, %v2642_v8  ;;  %v2649_v23 = vor.u32 %v2978_v11, %v2648_v9 }
 0x114   : > { %v1949_v36 = vadd.f32 %v3560_v12, %v1609_v26 }
 0x116   : > { %v2077_v50 = vmul.f32 0.2, %v1949_v36  ;;  %vm2013_vm12 = vcmp.ge.f32.partialorder %v1949_v36, 0.0 }
 0x117   : > { %v3667_v39 = vpop.f32.mrf.mxu3 }
 0x118   : > { %v2141_v53 = vsel %vm2013_vm12, %v1949_v36, %v2077_v50  ;;  %v2660_v50 = vld [vmem:[%s3447_s8 + $0x1a0] sm:$0xf] }
 0x119   : > { %v1610_v41 = vpop.f32.mrf.mxu2  ;;  %v1275_v45 = vpop.f32.mrf.mxu0 }
 0x11a   : > { %v1611_v44 = vadd.f32 %v1610_v41, %v1442_v37  ;;  %v1444_v49 = vpop.f32.mrf.mxu1 }
 0x11b   : > { %v1445_v56 = vadd.f32 %v1444_v49, %v1275_v45  ;;  %v2979_v45 = vld [vmem:[%s3447_s8 + $0x19c] sm:$0xf]  ;;  %v2654_v49 = vld [vmem:[%s3447_s8 + $0x1a4] sm:$0xf0] }
 0x11c   : > { %v1950_v51 = vadd.f32 %v3560_v12, %v1611_v44  ;;  %1314 = vmatmul.bf16.gmra.mxu0 %v2629_v42  ;;  %1563 = vmatmul.bf16.gmra.mxu3 %v2825_v43  ;;  %v2652_v43 = vld [vmem:[%s3447_s8 + $0x198] sm:$0xf]  ;;  %v2980_v44 = vld [vmem:[%s3447_s8 + $0x1a0] sm:$0xf0] }
 0x11d   : > { %1483 = vmatmul.bf16.gmra.mxu1 %v2633_v47  ;;  %v2756_v47 = vld [vmem:[%s3447_s8 + $0x260] sm:$0xf] }
 0x11e   : > { %vm2014_vm13 = vcmp.ge.f32.partialorder %v1950_v51, 0.0  ;;  %v2078_v52 = vmul.f32 0.2, %v1950_v51  ;;  %1652 = vmatmul.bf16.gmra.mxu2 %v2637_v48  ;;  %v3005_v48 = vld [vmem:[%s3447_s8 + $0x268] sm:$0xf0] }
 0x11f   : > { %v3670_v58 = vpop.f32.mrf.mxu3 }
 0x120   : > { %v2142_v55 = vsel %vm2014_vm13, %v1950_v51, %v2078_v52  ;;  %v2981_v51 = vld [vmem:[%s3447_s8 + $0x1a8] sm:$0xf0] }
 0x121   : > { %v3081_v59 = vpack.c.bf16 %v2142_v55, %v2141_v53  ;;  %v1613_v60 = vpop.f32.mrf.mxu2  ;;  %v1277_v61 = vpop.f32.mrf.mxu0  ;;  %v2661_v1 = vor.u32 %v2981_v51, %v2660_v50 }
 0x122   : > { %v1446_v62 = vpop.f32.mrf.mxu1  ;;  %v1614_v63 = vadd.f32 %v1613_v60, %v1445_v56  ;;  %v2757_v60 = vor.u32 %v3005_v48, %v2756_v47 }
 0x123   : > { %3213 = vst [vmem:[%s3578_s27 + $0x30] sm:$0xff] %v3081_v59   ;;  %v1447_v14 = vadd.f32 %v1446_v62, %v1277_v61  ;;  %v2653_v59 = vor.u32 %v2980_v44, %v2652_v43 }
 0x124   : > { %v1951_v13 = vadd.f32 %v3560_v12, %v1614_v63  ;;  %v2657_v63 = vor.u32 %v2979_v45, %v2654_v49 }
 0x126   : > { %v2079_v27 = vmul.f32 0.2, %v1951_v13  ;;  %vm2015_vm14 = vcmp.ge.f32.partialorder %v1951_v13, 0.0 }
 0x127   : > { %v3682_v15 = vpop.f32.mrf.mxu3 }
 0x128   : > { %v2143_v31 = vsel %vm2015_vm14, %v1951_v13, %v2079_v27  ;;  %v3008_v27 = vld [vmem:[%s3447_s8 + $0x280] sm:$0xf0] }
 0x129   : > { %v1615_v16 = vpop.f32.mrf.mxu2  ;;  %v1280_v21 = vpop.f32.mrf.mxu0 }
 0x12a   : > { %v1616_v20 = vadd.f32 %v1615_v16, %v1447_v14  ;;  %v1449_v26 = vpop.f32.mrf.mxu1 }
 0x12b   : > { %v1450_v33 = vadd.f32 %v1449_v26, %v1280_v21  ;;  %v2664_v21 = vld [vmem:[%s3447_s8 + $0x1b0] sm:$0xf]  ;;  %v2768_v26 = vld [vmem:[%s3447_s8 + $0x278] sm:$0xf] }
 0x12c   : > { %v1952_v28 = vadd.f32 %v3560_v12, %v1616_v20  ;;  %1319 = vmatmul.bf16.gmra.mxu0 %v2641_v17  ;;  %1697 = vmatmul.bf16.vlgmr.msra.gmra.mxu3 %v2745_v18 }
 0x12d   : > { %1488 = vmatmul.bf16.gmra.mxu1 %v2645_v22  ;;  %v2983_v22 = vld [vmem:[%s3447_s8 + $0x1b8] sm:$0xf0] }
 0x12e   : > { %vm2016_vm15 = vcmp.ge.f32.partialorder %v1952_v28, 0.0  ;;  %v2080_v30 = vmul.f32 0.2, %v1952_v28  ;;  %1657 = vmatmul.bf16.gmra.mxu2 %v2649_v23  ;;  %v2982_v23 = vld [vmem:[%s3447_s8 + $0x1b4] sm:$0xf] }
 0x12f   : > { %v3685_v34 = vpop.f32.mrf.mxu3 }
 0x130   : > { %v2144_v32 = vsel %vm2016_vm15, %v1952_v28, %v2080_v30  ;;  %v2666_v28 = vld [vmem:[%s3447_s8 + $0x1bc] sm:$0xf0]  ;;  %v2672_v30 = vld [vmem:[%s3447_s8 + $0x1b8] sm:$0xf] }
 0x131   : > { %v3086_v35 = vpack.c.bf16 %v2144_v32, %v2143_v31  ;;  %v1618_v36 = vpop.f32.mrf.mxu2  ;;  %v1282_v37 = vpop.f32.mrf.mxu0  ;;  %v2984_v31 = vld [vmem:[%s3447_s8 + $0x1c0] sm:$0xf0]  ;;  %v2669_v44 = vor.u32 %v2982_v23, %v2666_v28 }
 0x132   : > { %v1451_v41 = vpop.f32.mrf.mxu1  ;;  %v1619_v42 = vadd.f32 %v1618_v36, %v1450_v33  ;;  %v2673_v45 = vor.u32 %v2984_v31, %v2672_v30 }
 0x133   : > { %3214 = vst [vmem:[%s3578_s27 + $0x38] sm:$0xff] %v3086_v35   ;;  %v1452_v53 = vadd.f32 %v1451_v41, %v1282_v37  ;;  %v2665_v37 = vor.u32 %v2983_v22, %v2664_v21  ;;  %v2769_v41 = vor.u32 %v3008_v27, %v2768_v26 }
 0x134   : > { %v1953_v52 = vadd.f32 %v3560_v12, %v1619_v42 }
 0x136   : > { %v2081_v3 = vmul.f32 0.2, %v1953_v52  ;;  %vm2017_vm0 = vcmp.ge.f32.partialorder %v1953_v52, 0.0 }
 0x137   : > { %v3697_v55 = vpop.f32.mrf.mxu3 }
 0x138   : > { %v2145_v8 = vsel %vm2017_vm0, %v1953_v52, %v2081_v3  ;;  %v2985_v3 = vld [vmem:[%s3447_s8 + $0x1cc] sm:$0xf] }
 0x139   : > { %v1620_v56 = vpop.f32.mrf.mxu2  ;;  %v1285_v62 = vpop.f32.mrf.mxu0 }
 0x13a   : > { %v1621_v61 = vadd.f32 %v1620_v56, %v1452_v53  ;;  %v1454_v2 = vpop.f32.mrf.mxu1 }
 0x13b   : > { %v1455_v11 = vadd.f32 %v1454_v2, %v1285_v62  ;;  %v2986_v2 = vld [vmem:[%s3447_s8 + $0x1d0] sm:$0xf0] }
 0x13c   : > { %v1954_v4 = vadd.f32 %v3560_v12, %v1621_v61  ;;  %1324 = vmatmul.bf16.gmra.mxu0 %v2653_v59  ;;  %1702 = vmatmul.bf16.gmra.mxu3 %v2757_v60 }
 0x13d   : > { %1493 = vmatmul.bf16.gmra.mxu1 %v2657_v63 }
 0x13e   : > { %vm2018_vm1 = vcmp.ge.f32.partialorder %v1954_v4, 0.0  ;;  %v2082_v6 = vmul.f32 0.2, %v1954_v4  ;;  %1662 = vmatmul.bf16.gmra.mxu2 %v2661_v1  ;;  %v2676_v1 = vld [vmem:[%s3447_s8 + $0x1c8] sm:$0xf] }
 0x13f   : > { %v3700_v13 = vpop.f32.mrf.mxu3 }
 0x140   : > { %v2146_v9 = vsel %vm2018_vm1, %v1954_v4, %v2082_v6  ;;  %v2780_v4 = vld [vmem:[%s3447_s8 + $0x290] sm:$0xf]  ;;  %v3011_v6 = vld [vmem:[%s3447_s8 + $0x298] sm:$0xf0] }
 0x141   : > { %v3091_v14 = vpack.c.bf16 %v2146_v9, %v2145_v8  ;;  %v1623_v16 = vpop.f32.mrf.mxu2  ;;  %v1287_v17 = vpop.f32.mrf.mxu0  ;;  %v2678_v8 = vld [vmem:[%s3447_s8 + $0x1d4] sm:$0xf0]  ;;  %v2684_v9 = vld [vmem:[%s3447_s8 + $0x1d0] sm:$0xf]  ;;  %v2781_v21 = vor.u32 %v3011_v6, %v2780_v4 }
 0x142   : > { %v1456_v18 = vpop.f32.mrf.mxu1  ;;  %v1624_v20 = vadd.f32 %v1623_v16, %v1455_v11  ;;  %v2987_v11 = vld [vmem:[%s3447_s8 + $0x1d8] sm:$0xf0]  ;;  %v2681_v26 = vor.u32 %v2985_v3, %v2678_v8 }
 0x143   : > { %3215 = vst [vmem:[%s3578_s27 + $0x40] sm:$0xff] %v3091_v14   ;;  %v1457_v33 = vadd.f32 %v1456_v18, %v1287_v17  ;;  %v2685_v27 = vor.u32 %v2987_v11, %v2684_v9 }
 0x144   : > { %v1955_v32 = vadd.f32 %v3560_v12, %v1624_v20  ;;  %v2677_v20 = vor.u32 %v2986_v2, %v2676_v1 }
 0x146   : > { %v2083_v48 = vmul.f32 0.2, %v1955_v32  ;;  %vm2019_vm2 = vcmp.ge.f32.partialorder %v1955_v32, 0.0 }
 0x147   : > { %v3712_v35 = vpop.f32.mrf.mxu3 }
 0x148   : > { %v2147_v51 = vsel %vm2019_vm2, %v1955_v32, %v2083_v48  ;;  %v2688_v48 = vld [vmem:[%s3447_s8 + $0x1e0] sm:$0xf] }
 0x149   : > { %v1625_v36 = vpop.f32.mrf.mxu2  ;;  %v1290_v43 = vpop.f32.mrf.mxu0 }
 0x14a   : > { %v1626_v42 = vadd.f32 %v1625_v36, %v1457_v33  ;;  %v1459_v47 = vpop.f32.mrf.mxu1 }
 0x14b   : > { %v1460_v53 = vadd.f32 %v1459_v47, %v1290_v43 }
 0x14c   : > { %v1956_v49 = vadd.f32 %v3560_v12, %v1626_v42  ;;  %1329 = vmatmul.bf16.gmra.mxu0 %v2665_v37  ;;  %1707 = vmatmul.bf16.gmra.mxu3 %v2769_v41 }
 0x14d   : > { %1498 = vmatmul.bf16.gmra.mxu1 %v2669_v44 }
 0x14e   : > { %vm2020_vm3 = vcmp.ge.f32.partialorder %v1956_v49, 0.0  ;;  %v2084_v50 = vmul.f32 0.2, %v1956_v49  ;;  %1667 = vmatmul.bf16.gmra.mxu2 %v2673_v45 }
 0x14f   : > { %v3715_v56 = vpop.f32.mrf.mxu3 }
 0x150   : > { %v2148_v52 = vsel %vm2020_vm3, %v1956_v49, %v2084_v50  ;;  %v2989_v49 = vld [vmem:[%s3447_s8 + $0x1e8] sm:$0xf0]  ;;  %v2988_v50 = vld [vmem:[%s3447_s8 + $0x1e4] sm:$0xf] }
 0x151   : > { %v3096_v59 = vpack.c.bf16 %v2148_v52, %v2147_v51  ;;  %v1628_v60 = vpop.f32.mrf.mxu2  ;;  %v1292_v61 = vpop.f32.mrf.mxu0  ;;  %v2792_v51 = vld [vmem:[%s3447_s8 + $0x2a8] sm:$0xf]  ;;  %v3014_v52 = vld [vmem:[%s3447_s8 + $0x2b0] sm:$0xf0]  ;;  %v2689_v2 = vor.u32 %v2989_v49, %v2688_v48 }
 0x152   : > { %v1461_v62 = vpop.f32.mrf.mxu1  ;;  %v1629_v63 = vadd.f32 %v1628_v60, %v1460_v53  ;;  %v2690_v53 = vld [vmem:[%s3447_s8 + $0x1ec] sm:$0xf0]  ;;  %v2990_v60 = vld [vmem:[%s3447_s8 + $0x1f0] sm:$0xf0]  ;;  %v2793_v3 = vor.u32 %v3014_v52, %v2792_v51 }
 0x153   : > { %3216 = vst [vmem:[%s3578_s27 + $0x48] sm:$0xff] %v3096_v59   ;;  %v1462_v16 = vadd.f32 %v1461_v62, %v1292_v61  ;;  %v2696_v59 = vld [vmem:[%s3447_s8 + $0x1e8] sm:$0xf]  ;;  %v2693_v8 = vor.u32 %v2988_v50, %v2690_v53 }
 0x154   : > { %v1957_v14 = vadd.f32 %v3560_v12, %v1629_v63  ;;  %v2697_v9 = vor.u32 %v2990_v60, %v2696_v59 }
 0x156   : > { %v2085_v30 = vmul.f32 0.2, %v1957_v14  ;;  %vm2021_vm4 = vcmp.ge.f32.partialorder %v1957_v14, 0.0 }
 0x157   : > { %v3727_v17 = vpop.f32.mrf.mxu3 }
 0x158   : > { %v2149_v33 = vsel %vm2021_vm4, %v1957_v14, %v2085_v30 }
 0x159   : > { %v1630_v18 = vpop.f32.mrf.mxu2  ;;  %v1295_v23 = vpop.f32.mrf.mxu0 }
 0x15a   : > { %v1631_v22 = vadd.f32 %v1630_v18, %v1462_v16  ;;  %v1464_v28 = vpop.f32.mrf.mxu1 }
 0x15b   : > { %v1465_v37 = vadd.f32 %v1464_v28, %v1295_v23 }
 0x15c   : > { %v1958_v31 = vadd.f32 %v3560_v12, %v1631_v22  ;;  %1334 = vmatmul.bf16.gmra.mxu0 %v2677_v20  ;;  %1712 = vmatmul.bf16.gmra.mxu3 %v2781_v21 }
 0x15d   : > { %1503 = vmatmul.bf16.gmra.mxu1 %v2681_v26 }
 0x15e   : > { %vm2022_vm5 = vcmp.ge.f32.partialorder %v1958_v31, 0.0  ;;  %v2086_v32 = vmul.f32 0.2, %v1958_v31  ;;  %1672 = vmatmul.bf16.gmra.mxu2 %v2685_v27 }
 0x15f   : > { %v3730_v41 = vpop.f32.mrf.mxu3 }
 0x160   : > { %v2150_v36 = vsel %vm2022_vm5, %v1958_v31, %v2086_v32  ;;  %v2700_v32 = vld [vmem:[%s3447_s8 + $0x1f8] sm:$0xf] }
 0x161   : > { %v3101_v42 = vpack.c.bf16 %v2150_v36, %v2149_v33  ;;  %v1633_v43 = vpop.f32.mrf.mxu2  ;;  %v1297_v44 = vpop.f32.mrf.mxu0  ;;  %v2992_v33 = vld [vmem:[%s3447_s8 + $0x200] sm:$0xf0]  ;;  %v2991_v36 = vld [vmem:[%s3447_s8 + $0x1fc] sm:$0xf] }
 0x162   : > { %v1466_v45 = vpop.f32.mrf.mxu1  ;;  %v1634_v47 = vadd.f32 %v1633_v43, %v1465_v37  ;;  %v2804_v37 = vld [vmem:[%s3447_s8 + $0x2c0] sm:$0xf]  ;;  %v2702_v43 = vld [vmem:[%s3447_s8 + $0x204] sm:$0xf0]  ;;  %v2701_v51 = vor.u32 %v2992_v33, %v2700_v32  ;;  %v2996_v32 = vld [vmem:[%s3447_s8 + $0x220] sm:$0xf0] }
 0x163   : > { %3217 = vst [vmem:[%s3578_s27 + $0x50] sm:$0xff] %v3101_v42   ;;  %v1467_v62 = vadd.f32 %v1466_v45, %v1297_v44  ;;  %v3017_v42 = vld [vmem:[%s3447_s8 + $0x2c8] sm:$0xf0]  ;;  %v2708_v44 = vld [vmem:[%s3447_s8 + $0x200] sm:$0xf]  ;;  %v2705_v60 = vor.u32 %v2991_v36, %v2702_v43 }
 0x164   : > { %v1959_v61 = vadd.f32 %v3560_v12, %v1634_v47  ;;  %v2993_v45 = vld [vmem:[%s3447_s8 + $0x208] sm:$0xf0]  ;;  %v2805_v52 = vor.u32 %v3017_v42, %v2804_v37 }
 0x166   : > { %v2087_v14 = vmul.f32 0.2, %v1959_v61  ;;  %vm2023_vm6 = vcmp.ge.f32.partialorder %v1959_v61, 0.0 }
 0x167   : > { %v3742_v63 = vpop.f32.mrf.mxu3 }
 0x168   : > { %v2151_v20 = vsel %vm2023_vm6, %v1959_v61, %v2087_v14  ;;  %v2709_v61 = vor.u32 %v2993_v45, %v2708_v44 }
 0x169   : > { %v1635_v1 = vpop.f32.mrf.mxu2  ;;  %v1300_v6 = vpop.f32.mrf.mxu0 }
 0x16a   : > { %v1636_v4 = vadd.f32 %v1635_v1, %v1467_v62  ;;  %v1469_v11 = vpop.f32.mrf.mxu1 }
 0x16b   : > { %v1470_v22 = vadd.f32 %v1469_v11, %v1300_v6 }
 0x16c   : > { %v1960_v16 = vadd.f32 %v3560_v12, %v1636_v4  ;;  %1339 = vmatmul.bf16.gmra.mxu0 %v2689_v2  ;;  %1717 = vmatmul.bf16.gmra.mxu3 %v2793_v3 }
 0x16d   : > { %1508 = vmatmul.bf16.gmra.mxu1 %v2693_v8 }
 0x16e   : > { %vm2024_vm7 = vcmp.ge.f32.partialorder %v1960_v16, 0.0  ;;  %v2088_v18 = vmul.f32 0.2, %v1960_v16  ;;  %1677 = vmatmul.bf16.gmra.mxu2 %v2697_v9 }
 0x16f   : > { %v3745_v23 = vpop.f32.mrf.mxu3 }
 0x170   : > { %v2152_v21 = vsel %vm2024_vm7, %v1960_v16, %v2088_v18 }
 0x171   : > { %v3106_v26 = vpack.c.bf16 %v2152_v21, %v2151_v20  ;;  %v1638_v27 = vpop.f32.mrf.mxu2  ;;  %v1302_v28 = vpop.f32.mrf.mxu0  ;;  %v2712_v21 = vld [vmem:[%s3447_s8 + $0x210] sm:$0xf] }
 0x172   : > { %v1471_v30 = vpop.f32.mrf.mxu1  ;;  %v1639_v31 = vadd.f32 %v1638_v27, %v1470_v22  ;;  %v2995_v22 = vld [vmem:[%s3447_s8 + $0x218] sm:$0xf0]  ;;  %v2816_v27 = vld [vmem:[%s3447_s8 + $0x2d8] sm:$0xf] }
 0x173   : > { %3218 = vst [vmem:[%s3578_s27 + $0x58] sm:$0xff] %v3106_v26   ;;  %v1472_v48 = vadd.f32 %v1471_v30, %v1302_v28  ;;  %v2994_v26 = vld [vmem:[%s3447_s8 + $0x214] sm:$0xf]  ;;  %v3020_v28 = vld [vmem:[%s3447_s8 + $0x2e0] sm:$0xf0]  ;;  %v2713_v43 = vor.u32 %v2995_v22, %v2712_v21 }
 0x174   : > { %v1961_v47 = vadd.f32 %v3560_v12, %v1639_v31  ;;  %v2714_v30 = vld [vmem:[%s3447_s8 + $0x21c] sm:$0xf0]  ;;  %v2720_v31 = vld [vmem:[%s3447_s8 + $0x218] sm:$0xf]  ;;  %v2817_v44 = vor.u32 %v3020_v28, %v2816_v27  ;;  %v2732_v22 = vld [vmem:[%s3447_s8 + $0x230] sm:$0xf] }
 0x175   : > { %v2726_v21 = vld [vmem:[%s3447_s8 + $0x234] sm:$0xf0] }
 0x176   : > { %v2089_v1 = vmul.f32 0.2, %v1961_v47  ;;  %vm2025_vm8 = vcmp.ge.f32.partialorder %v1961_v47, 0.0 }
 0x177   : > { %v3757_v49 = vpop.f32.mrf.mxu3 }
 0x178   : > { %v2153_v4 = vsel %vm2025_vm8, %v1961_v47, %v2089_v1 }
 0x179   : > { %v1640_v50 = vpop.f32.mrf.mxu2  ;;  %v1305_v59 = vpop.f32.mrf.mxu0 }
 0x17a   : > { %v1641_v53 = vadd.f32 %v1640_v50, %v1472_v48  ;;  %v1474_v62 = vpop.f32.mrf.mxu1  ;;  %v2717_v48 = vor.u32 %v2994_v26, %v2714_v30  ;;  %v2721_v50 = vor.u32 %v2996_v32, %v2720_v31  ;;  %v2999_v26 = vld [vmem:[%s3447_s8 + $0x238] sm:$0xf0] }
 0x17b   : > { %v1475_v8 = vadd.f32 %v1474_v62, %v1305_v59 }
 0x17c   : > { %v1962_v2 = vadd.f32 %v3560_v12, %v1641_v53  ;;  %1344 = vmatmul.bf16.gmra.mxu0 %v2701_v51  ;;  %1722 = vmatmul.bf16.gmra.mxu3 %v2805_v52  ;;  %v3777_v53 = vld [vmem:[%s3894_s2] ss:$0 sm:$0xff] }
 0x17d   : > { %1513 = vmatmul.bf16.gmra.mxu1 %v2705_v60 }
 0x17e   : > { %vm2026_vm9 = vcmp.ge.f32.partialorder %v1962_v2, 0.0  ;;  %v2090_v3 = vmul.f32 0.2, %v1962_v2  ;;  %1682 = vmatmul.bf16.gmra.mxu2 %v2709_v61 }
 0x17f   : > { %v3760_v9 = vpop.f32.mrf.mxu3 }
 0x180   : > { %v2154_v6 = vsel %vm2026_vm9, %v1962_v2, %v2090_v3 }
 0x181   : > { %v3111_v11 = vpack.c.bf16 %v2154_v6, %v2153_v4  ;;  %v1643_v14 = vpop.f32.mrf.mxu2  ;;  %v1307_v16 = vpop.f32.mrf.mxu0 }
 0x182   : > { %v1476_v18 = vpop.f32.mrf.mxu1  ;;  %v1644_v20 = vadd.f32 %v1643_v14, %v1475_v8  ;;  %v2998_v14 = vld [vmem:[%s3447_s8 + $0x230] sm:$0xf0] }
 0x183   : > { %3219 = vst [vmem:[%s3578_s27 + $0x60] sm:$0xff] %v3111_v11   ;;  %v1477_v36 = vadd.f32 %v1476_v18, %v1307_v16  ;;  %v2724_v11 = vld [vmem:[%s3447_s8 + $0x228] sm:$0xf]  ;;  %v2997_v16 = vld [vmem:[%s3447_s8 + $0x22c] sm:$0xf] }
 0x184   : > { %v1963_v33 = vadd.f32 %v3560_v12, %v1644_v20  ;;  %v2828_v18 = vld [vmem:[%s3447_s8 + $0x2f0] sm:$0xf]  ;;  %v3023_v20 = vld [vmem:[%s3447_s8 + $0x2f8] sm:$0xf0]  ;;  %v2725_v32 = vor.u32 %v2998_v14, %v2724_v11 }
 0x186   : > { %v2091_v52 = vmul.f32 0.2, %v1963_v33  ;;  %vm2027_vm10 = vcmp.ge.f32.partialorder %v1963_v33, 0.0 }
 0x187   : > { %v3772_v37 = vpop.f32.mrf.mxu3 }
 0x188   : > { %v2155_v60 = vsel %vm2027_vm10, %v1963_v33, %v2091_v52  ;;  %v2829_v33 = vor.u32 %v3023_v20, %v2828_v18 }
 0x189   : > { %v1645_v42 = vpop.f32.mrf.mxu2  ;;  %v1310_v47 = vpop.f32.mrf.mxu0 }
 0x18a   : > { %v1646_v45 = vadd.f32 %v1645_v42, %v1477_v36  ;;  %v1479_v51 = vpop.f32.mrf.mxu1 }
 0x18b   : > { %v1480_v62 = vadd.f32 %v1479_v51, %v1310_v47 }
 0x18c   : > { %v1964_v12 = vadd.f32 %v3777_v53, %v1646_v45  ;;  %1349 = vmatmul.bf16.gmra.mxu0 %v2713_v43  ;;  %1727 = vmatmul.bf16.gmra.mxu3 %v2817_v44  ;;  %v2729_v43 = vor.u32 %v2997_v16, %v2726_v21  ;;  %v2733_v44 = vor.u32 %v2999_v26, %v2732_v22 }
 0x18d   : > { %1518 = vmatmul.bf16.gmra.mxu1 %v2717_v48 }
 0x18e   : > { %vm2028_vm11 = vcmp.ge.f32.partialorder %v1964_v12, 0.0  ;;  %v2092_v59 = vmul.f32 0.2, %v1964_v12  ;;  %1687 = vmatmul.bf16.gmra.mxu2 %v2721_v50 }
 0x18f   : > { %v3780_v1 = vpop.f32.mrf.mxu3 }
 0x190   : > { %v2156_v61 = vsel %vm2028_vm11, %v1964_v12, %v2092_v59 }
 0x191   : > { %v3116_v2 = vpack.c.bf16 %v2156_v61, %v2155_v60  ;;  %v1648_v3 = vpop.f32.mrf.mxu2  ;;  %v1312_v4 = vpop.f32.mrf.mxu0 }
 0x192   : > { %v1481_v6 = vpop.f32.mrf.mxu1  ;;  %v1649_v8 = vadd.f32 %v1648_v3, %v1480_v62 }
 0x193   : > { %3220 = vst [vmem:[%s3578_s27 + $0x68] sm:$0xff] %v3116_v2   ;;  %v1482_v28 = vadd.f32 %v1481_v6, %v1312_v4 }
 0x194   : > { %v1965_v27 = vadd.f32 %v3777_v53, %v1649_v8 }
 0x196   : > { %v2093_v47 = vmul.f32 0.2, %v1965_v27  ;;  %vm2029_vm12 = vcmp.ge.f32.partialorder %v1965_v27, 0.0 }
 0x197   : > { %v3792_v30 = vpop.f32.mrf.mxu3 }
 0x198   : > { %v2157_v51 = vsel %vm2029_vm12, %v1965_v27, %v2093_v47  ;;  %v1532_v47 = vadd.f32 %v3697_v55, %v3571_v24 }
 0x199   : > { %v1650_v31 = vpop.f32.mrf.mxu2  ;;  %v1315_v42 = vpop.f32.mrf.mxu0 }
 0x19a   : > { %v1651_v36 = vadd.f32 %v1650_v31, %v1482_v28  ;;  %v1484_v45 = vpop.f32.mrf.mxu1 }
 0x19b   : > { %v1485_v12 = vadd.f32 %v1484_v45, %v1315_v42 }
 0x19c   : > { %v1966_v48 = vadd.f32 %v3777_v53, %v1651_v36  ;;  %1354 = vmatmul.bf16.gmra.mxu0 %v2725_v32  ;;  %1732 = vmatmul.bf16.gmra.mxu3 %v2829_v33  ;;  %v1530_v32 = vadd.f32 %v3685_v34, %v3555_v7 }
 0x19d   : > { %1523 = vmatmul.bf16.gmra.mxu1 %v2729_v43 }
 0x19e   : > { %vm2030_vm13 = vcmp.ge.f32.partialorder %v1966_v48, 0.0  ;;  %v2094_v50 = vmul.f32 0.2, %v1966_v48  ;;  %1692 = vmatmul.bf16.gmra.mxu2 %v2733_v44 }
 0x19f   : > { %v3795_v59 = vpop.f32.mrf.mxu3 }
 0x1a0   : > { %v2158_v52 = vsel %vm2030_vm13, %v1966_v48, %v2094_v50 }
 0x1a1   : > { %v3121_v60 = vpack.c.bf16 %v2158_v52, %v2157_v51  ;;  %v1653_v61 = vpop.f32.mrf.mxu2  ;;  %v1317_v62 = vpop.f32.mrf.mxu0 }
 0x1a2   : > { %v1486_v2 = vpop.f32.mrf.mxu1  ;;  %v1654_v3 = vadd.f32 %v1653_v61, %v1485_v12 }
 0x1a3   : > { %3221 = vst [vmem:[%s3578_s27 + $0x70] sm:$0xff] %v3121_v60   ;;  %v1487_v6 = vadd.f32 %v1486_v2, %v1317_v62 }
 0x1a4   : > { %v1967_v4 = vadd.f32 %v3777_v53, %v1654_v3 }
 0x1a6   : > { %v2095_v20 = vmul.f32 0.2, %v1967_v4  ;;  %vm2031_vm14 = vcmp.ge.f32.partialorder %v1967_v4, 0.0 }
 0x1a7   : > { %v3799_v8 = vpop.f32.mrf.mxu3 }
 0x1a8   : > { %v2159_v26 = vsel %vm2031_vm14, %v1967_v4, %v2095_v20 }
 0x1a9   : > { %v1655_v11 = vpop.f32.mrf.mxu2  ;;  %v1320_v16 = vpop.f32.mrf.mxu0 }
 0x1aa   : > { %v1656_v14 = vadd.f32 %v1655_v11, %v1487_v6  ;;  %v1489_v18 = vpop.f32.mrf.mxu1 }
 0x1ab   : > { %v1490_v28 = vadd.f32 %v1489_v18, %v1320_v16 }
 0x1ac   : > { %v1968_v21 = vadd.f32 %v3777_v53, %v1656_v14 }
 0x1ae   : > { %vm2032_vm15 = vcmp.ge.f32.partialorder %v1968_v21, 0.0  ;;  %v2096_v22 = vmul.f32 0.2, %v1968_v21 }
 0x1af   : > { %v1698_v31 = vpop.f32.mrf.mxu3 }
 0x1b0   : > { %v2160_v27 = vsel %vm2032_vm15, %v1968_v21, %v2096_v22  ;;  %v1699_v43 = vadd.f32 %v1698_v31, %v1530_v32  ;;  %v1535_v22 = vadd.f32 %v3700_v13, %v3580_v38 }
 0x1b1   : > { %v3126_v33 = vpack.c.bf16 %v2160_v27, %v2159_v26  ;;  %v1658_v36 = vpop.f32.mrf.mxu2  ;;  %v1322_v42 = vpop.f32.mrf.mxu0 }
 0x1b2   : > { %v1491_v44 = vpop.f32.mrf.mxu1  ;;  %v1659_v45 = vadd.f32 %v1658_v36, %v1490_v28  ;;  %v1985_v48 = vadd.f32 %v3777_v53, %v1699_v43  ;;  %v1537_v36 = vadd.f32 %v3712_v35, %v3592_v54 }
 0x1b3   : > { %3222 = vst [vmem:[%s3578_s27 + $0x78] sm:$0xff] %v3126_v33   ;;  %v1492_v51 = vadd.f32 %v1491_v44, %v1322_v42 }
 0x1b4   : > { %v1969_v50 = vadd.f32 %v3777_v53, %v1659_v45  ;;  %v2113_v34 = vmul.f32 0.2, %v1985_v48  ;;  %vm2049_vm0 = vcmp.ge.f32.partialorder %v1985_v48, 0.0 }
 0x1b6   : > { %v2097_v3 = vmul.f32 0.2, %v1969_v50  ;;  %vm2033_vm1 = vcmp.ge.f32.partialorder %v1969_v50, 0.0  ;;  %v2177_v6 = vsel %vm2049_vm0, %v1985_v48, %v2113_v34 }
 0x1b7   : > { %v1700_v52 = vpop.f32.mrf.mxu3 }
 0x1b8   : > { %v1701_v60 = vadd.f32 %v1700_v52, %v1532_v47  ;;  %v2161_v14 = vsel %vm2033_vm1, %v1969_v50, %v2097_v3 }
 0x1b9   : > { %v1660_v12 = vpop.f32.mrf.mxu2  ;;  %v1325_v7 = vpop.f32.mrf.mxu0 }
 0x1ba   : > { %v1661_v61 = vadd.f32 %v1660_v12, %v1492_v51  ;;  %v1986_v62 = vadd.f32 %v3777_v53, %v1701_v60  ;;  %v1494_v2 = vpop.f32.mrf.mxu1 }
 0x1bb   : > { %v1495_v20 = vadd.f32 %v1494_v2, %v1325_v7 }
 0x1bc   : > { %v1970_v4 = vadd.f32 %v3777_v53, %v1661_v61  ;;  %vm2050_vm2 = vcmp.ge.f32.partialorder %v1986_v62, 0.0  ;;  %v2114_v24 = vmul.f32 0.2, %v1986_v62 }
 0x1be   : > { %vm2034_vm3 = vcmp.ge.f32.partialorder %v1970_v4, 0.0  ;;  %v2098_v55 = vmul.f32 0.2, %v1970_v4  ;;  %v2178_v11 = vsel %vm2050_vm2, %v1986_v62, %v2114_v24  ;;  %v1540_v24 = vadd.f32 %v3715_v56, %v3595_v5 }
 0x1bf   : > { %v3171_v18 = vpack.c.bf16 %v2178_v11, %v2177_v6  ;;  %v1703_v21 = vpop.f32.mrf.mxu3 }
 0x1c0   : > { %v2162_v16 = vsel %vm2034_vm3, %v1970_v4, %v2098_v55  ;;  %v1704_v31 = vadd.f32 %v1703_v21, %v1535_v22 }
 0x1c1   : > { %v3131_v26 = vpack.c.bf16 %v2162_v16, %v2161_v14  ;;  %v1663_v27 = vpop.f32.mrf.mxu2  ;;  %3231 = vst [vmem:[%s3578_s27 + $0xc0] sm:$0xff] %v3171_v18   ;;  %v1327_v28 = vpop.f32.mrf.mxu0 }
 0x1c2   : > { %v1496_v32 = vpop.f32.mrf.mxu1  ;;  %v1664_v33 = vadd.f32 %v1663_v27, %v1495_v20  ;;  %v1987_v42 = vadd.f32 %v3777_v53, %v1704_v31  ;;  %v1542_v20 = vadd.f32 %v3727_v17, %v3607_v25 }
 0x1c3   : > { %3223 = vst [vmem:[%s3578_s27 + $0x80] sm:$0xff] %v3131_v26   ;;  %v1497_v44 = vadd.f32 %v1496_v32, %v1327_v28 }
 0x1c4   : > { %v1971_v43 = vadd.f32 %v3777_v53, %v1664_v33  ;;  %v2115_v50 = vmul.f32 0.2, %v1987_v42  ;;  %vm2051_vm4 = vcmp.ge.f32.partialorder %v1987_v42, 0.0 }
 0x1c6   : > { %v2099_v12 = vmul.f32 0.2, %v1971_v43  ;;  %vm2035_vm5 = vcmp.ge.f32.partialorder %v1971_v43, 0.0  ;;  %v2179_v61 = vsel %vm2051_vm4, %v1987_v42, %v2115_v50 }
 0x1c7   : > { %v1705_v45 = vpop.f32.mrf.mxu3 }
 0x1c8   : > { %v1706_v48 = vadd.f32 %v1705_v45, %v1537_v36  ;;  %v2163_v34 = vsel %vm2035_vm5, %v1971_v43, %v2099_v12 }
 0x1c9   : > { %v1665_v47 = vpop.f32.mrf.mxu2  ;;  %v1330_v13 = vpop.f32.mrf.mxu0 }
 0x1ca   : > { %v1666_v38 = vadd.f32 %v1665_v47, %v1497_v44  ;;  %v1988_v51 = vadd.f32 %v3777_v53, %v1706_v48  ;;  %v1499_v52 = vpop.f32.mrf.mxu1 }
 0x1cb   : > { %v1500_v3 = vadd.f32 %v1499_v52, %v1330_v13 }
 0x1cc   : > { %v1972_v60 = vadd.f32 %v3777_v53, %v1666_v38  ;;  %vm2052_vm6 = vcmp.ge.f32.partialorder %v1988_v51, 0.0  ;;  %v2116_v54 = vmul.f32 0.2, %v1988_v51 }
 0x1ce   : > { %vm2036_vm7 = vcmp.ge.f32.partialorder %v1972_v60, 0.0  ;;  %v2100_v35 = vmul.f32 0.2, %v1972_v60  ;;  %v2180_v7 = vsel %vm2052_vm6, %v1988_v51, %v2116_v54  ;;  %v1545_v51 = vadd.f32 %v3730_v41, %v3610_v40 }
 0x1cf   : > { %v3176_v2 = vpack.c.bf16 %v2180_v7, %v2179_v61  ;;  %v1708_v4 = vpop.f32.mrf.mxu3  ;;  %v1547_v7 = vadd.f32 %v3742_v63, %v3622_v57 }
 0x1d0   : > { %v2164_v62 = vsel %vm2036_vm7, %v1972_v60, %v2100_v35  ;;  %v1709_v14 = vadd.f32 %v1708_v4, %v1540_v24 }
 0x1d1   : > { %v3136_v55 = vpack.c.bf16 %v2164_v62, %v2163_v34  ;;  %v1668_v6 = vpop.f32.mrf.mxu2  ;;  %3232 = vst [vmem:[%s3578_s27 + $0xc8] sm:$0xff] %v3176_v2   ;;  %v1332_v11 = vpop.f32.mrf.mxu0 }
 0x1d2   : > { %v1501_v16 = vpop.f32.mrf.mxu1  ;;  %v1669_v18 = vadd.f32 %v1668_v6, %v1500_v3  ;;  %v1989_v21 = vadd.f32 %v3777_v53, %v1709_v14 }
 0x1d3   : > { %3224 = vst [vmem:[%s3578_s27 + $0x88] sm:$0xff] %v3136_v55   ;;  %v1502_v26 = vadd.f32 %v1501_v16, %v1332_v11 }
 0x1d4   : > { %v1973_v22 = vadd.f32 %v3777_v53, %v1669_v18  ;;  %v2117_v32 = vmul.f32 0.2, %v1989_v21  ;;  %vm2053_vm8 = vcmp.ge.f32.partialorder %v1989_v21, 0.0 }
 0x1d6   : > { %v2101_v42 = vmul.f32 0.2, %v1973_v22  ;;  %vm2037_vm9 = vcmp.ge.f32.partialorder %v1973_v22, 0.0  ;;  %v2181_v44 = vsel %vm2053_vm8, %v1989_v21, %v2117_v32 }
 0x1d7   : > { %v1710_v27 = vpop.f32.mrf.mxu3 }
 0x1d8   : > { %v1711_v31 = vadd.f32 %v1710_v27, %v1542_v20  ;;  %v2165_v47 = vsel %vm2037_vm9, %v1973_v22, %v2101_v42 }
 0x1d9   : > { %v1670_v28 = vpop.f32.mrf.mxu2  ;;  %v1335_v56 = vpop.f32.mrf.mxu0 }
 0x1da   : > { %v1671_v5 = vadd.f32 %v1670_v28, %v1502_v26  ;;  %v1990_v33 = vadd.f32 %v3777_v53, %v1711_v31  ;;  %v1504_v36 = vpop.f32.mrf.mxu1  ;;  %v1550_v31 = vadd.f32 %v3745_v23, %v3625_v10 }
 0x1db   : > { %v1505_v13 = vadd.f32 %v1504_v36, %v1335_v56 }
 0x1dc   : > { %v1974_v43 = vadd.f32 %v3777_v53, %v1671_v5  ;;  %vm2054_vm10 = vcmp.ge.f32.partialorder %v1990_v33, 0.0  ;;  %v2118_v25 = vmul.f32 0.2, %v1990_v33 }
 0x1de   : > { %vm2038_vm11 = vcmp.ge.f32.partialorder %v1974_v43, 0.0  ;;  %v2102_v17 = vmul.f32 0.2, %v1974_v43  ;;  %v2182_v45 = vsel %vm2054_vm10, %v1990_v33, %v2118_v25 }
 0x1df   : > { %v3181_v38 = vpack.c.bf16 %v2182_v45, %v2181_v44  ;;  %v1713_v50 = vpop.f32.mrf.mxu3 }
 0x1e0   : > { %v2166_v48 = vsel %vm2038_vm11, %v1974_v43, %v2102_v17  ;;  %v1714_v54 = vadd.f32 %v1713_v50, %v1545_v51  ;;  %v1552_v43 = vadd.f32 %v3757_v49, %v3637_v29 }
 0x1e1   : > { %v3141_v52 = vpack.c.bf16 %v2166_v48, %v2165_v47  ;;  %v1673_v12 = vpop.f32.mrf.mxu2  ;;  %3233 = vst [vmem:[%s3578_s27 + $0xd0] sm:$0xff] %v3181_v38   ;;  %v1337_v60 = vpop.f32.mrf.mxu0 }
 0x1e2   : > { %v1506_v35 = vpop.f32.mrf.mxu1  ;;  %v1674_v61 = vadd.f32 %v1673_v12, %v1505_v13  ;;  %v1991_v34 = vadd.f32 %v3777_v53, %v1714_v54 }
 0x1e3   : > { %3225 = vst [vmem:[%s3578_s27 + $0x90] sm:$0xff] %v3141_v52   ;;  %v1507_v2 = vadd.f32 %v1506_v35, %v1337_v60 }
 0x1e4   : > { %v1975_v62 = vadd.f32 %v3777_v53, %v1674_v61  ;;  %v2119_v55 = vmul.f32 0.2, %v1991_v34  ;;  %vm2055_vm12 = vcmp.ge.f32.partialorder %v1991_v34, 0.0 }
 0x1e6   : > { %v2103_v14 = vmul.f32 0.2, %v1975_v62  ;;  %vm2039_vm13 = vcmp.ge.f32.partialorder %v1975_v62, 0.0  ;;  %v2183_v18 = vsel %vm2055_vm12, %v1991_v34, %v2119_v55  ;;  %v1557_v55 = vadd.f32 %v3772_v37, %v3652_v0 }
 0x1e7   : > { %v1715_v3 = vpop.f32.mrf.mxu3 }
 0x1e8   : > { %v1716_v24 = vadd.f32 %v1715_v3, %v1547_v7  ;;  %v2167_v21 = vsel %vm2039_vm13, %v1975_v62, %v2103_v14  ;;  %v1555_v62 = vadd.f32 %v3760_v9, %v3640_v46 }
 0x1e9   : > { %v1675_v4 = vpop.f32.mrf.mxu2  ;;  %v1340_v41 = vpop.f32.mrf.mxu0 }
 0x1ea   : > { %v1676_v40 = vadd.f32 %v1675_v4, %v1507_v2  ;;  %v1992_v6 = vadd.f32 %v3777_v53, %v1716_v24  ;;  %v1509_v11 = vpop.f32.mrf.mxu1 }
 0x1eb   : > { %v1510_v27 = vadd.f32 %v1509_v11, %v1340_v41 }
 0x1ec   : > { %v1976_v16 = vadd.f32 %v3777_v53, %v1676_v40  ;;  %vm2056_vm14 = vcmp.ge.f32.partialorder %v1992_v6, 0.0  ;;  %v2120_v57 = vmul.f32 0.2, %v1992_v6 }
 0x1ee   : > { %vm2040_vm15 = vcmp.ge.f32.partialorder %v1976_v16, 0.0  ;;  %v2104_v63 = vmul.f32 0.2, %v1976_v16  ;;  %v2184_v20 = vsel %vm2056_vm14, %v1992_v6, %v2120_v57 }
 0x1ef   : > { %v3186_v26 = vpack.c.bf16 %v2184_v20, %v2183_v18  ;;  %v1718_v28 = vpop.f32.mrf.mxu3 }
 0x1f0   : > { %v2168_v22 = vsel %vm2040_vm15, %v1976_v16, %v2104_v63  ;;  %v1719_v33 = vadd.f32 %v1718_v28, %v1550_v31 }
 0x1f1   : > { %v3146_v5 = vpack.c.bf16 %v2168_v22, %v2167_v21  ;;  %v1678_v56 = vpop.f32.mrf.mxu2  ;;  %3234 = vst [vmem:[%s3578_s27 + $0xd8] sm:$0xff] %v3186_v26   ;;  %v1342_v32 = vpop.f32.mrf.mxu0 }
 0x1f2   : > { %v1511_v36 = vpop.f32.mrf.mxu1  ;;  %v1679_v42 = vadd.f32 %v1678_v56, %v1510_v27  ;;  %v1993_v25 = vadd.f32 %v3777_v53, %v1719_v33 }
 0x1f3   : > { %3226 = vst [vmem:[%s3578_s27 + $0x98] sm:$0xff] %v3146_v5   ;;  %v1512_v44 = vadd.f32 %v1511_v36, %v1342_v32  ;;  %v1560_v36 = vadd.f32 %v3780_v1, %v3655_v19 }
 0x1f4   : > { %v1977_v17 = vadd.f32 %v3777_v53, %v1679_v42  ;;  %v2121_v38 = vmul.f32 0.2, %v1993_v25  ;;  %vm2057_vm0 = vcmp.ge.f32.partialorder %v1993_v25, 0.0 }
 0x1f6   : > { %v2105_v51 = vmul.f32 0.2, %v1977_v17  ;;  %vm2041_vm1 = vcmp.ge.f32.partialorder %v1977_v17, 0.0  ;;  %v2185_v12 = vsel %vm2057_vm0, %v1993_v25, %v2121_v38 }
 0x1f7   : > { %v1720_v45 = vpop.f32.mrf.mxu3 }
 0x1f8   : > { %v1721_v48 = vadd.f32 %v1720_v45, %v1552_v43  ;;  %v2169_v54 = vsel %vm2041_vm1, %v1977_v17, %v2105_v51 }
 0x1f9   : > { %v1680_v47 = vpop.f32.mrf.mxu2  ;;  %v1345_v23 = vpop.f32.mrf.mxu0 }
 0x1fa   : > { %v1681_v10 = vadd.f32 %v1680_v47, %v1512_v44  ;;  %v1994_v13 = vadd.f32 %v3777_v53, %v1721_v48  ;;  %v1514_v50 = vpop.f32.mrf.mxu1  ;;  %v1562_v47 = vadd.f32 %v3792_v30, %v3667_v39 }
 0x1fb   : > { %v1515_v7 = vadd.f32 %v1514_v50, %v1345_v23 }
 0x1fc   : > { %v1978_v52 = vadd.f32 %v3777_v53, %v1681_v10  ;;  %vm2058_vm2 = vcmp.ge.f32.partialorder %v1994_v13, 0.0  ;;  %v2122_v29 = vmul.f32 0.2, %v1994_v13 }
 0x1fe   : > { %vm2042_vm3 = vcmp.ge.f32.partialorder %v1978_v52, 0.0  ;;  %v2106_v49 = vmul.f32 0.2, %v1978_v52  ;;  %v2186_v60 = vsel %vm2058_vm2, %v1994_v13, %v2122_v29 }
 0x1ff   : > { %v3191_v61 = vpack.c.bf16 %v2186_v60, %v2185_v12  ;;  %v1723_v34 = vpop.f32.mrf.mxu3 }
 0x200   : > { %v2170_v35 = vsel %vm2042_vm3, %v1978_v52, %v2106_v49  ;;  %v1724_v24 = vadd.f32 %v1723_v34, %v1555_v62 }
 0x201   : > { %v3151_v2 = vpack.c.bf16 %v2170_v35, %v2169_v54  ;;  %v1683_v3 = vpop.f32.mrf.mxu2  ;;  %3235 = vst [vmem:[%s3578_s27 + $0xe0] sm:$0xff] %v3191_v61   ;;  %v1347_v4 = vpop.f32.mrf.mxu0 }
 0x202   : > { %v1516_v40 = vpop.f32.mrf.mxu1  ;;  %v1684_v41 = vadd.f32 %v1683_v3, %v1515_v7  ;;  %v1995_v6 = vadd.f32 %v3777_v53, %v1724_v24 }
 0x203   : > { %3227 = vst [vmem:[%s3578_s27 + $0xa0] sm:$0xff] %v3151_v2   ;;  %v1517_v14 = vadd.f32 %v1516_v40, %v1347_v4  ;;  %v1565_v2 = vadd.f32 %v3795_v59, %v3670_v58 }
 0x204   : > { %v1979_v11 = vadd.f32 %v3777_v53, %v1684_v41  ;;  %v2123_v18 = vmul.f32 0.2, %v1995_v6  ;;  %vm2059_vm4 = vcmp.ge.f32.partialorder %v1995_v6, 0.0 }
 0x206   : > { %v2107_v22 = vmul.f32 0.2, %v1979_v11  ;;  %vm2043_vm5 = vcmp.ge.f32.partialorder %v1979_v11, 0.0  ;;  %v2187_v27 = vsel %vm2059_vm4, %v1995_v6, %v2123_v18  ;;  %v1567_v6 = vadd.f32 %v3799_v8, %v3682_v15 }
 0x207   : > { %v1725_v16 = vpop.f32.mrf.mxu3 }
 0x208   : > { %v1726_v63 = vadd.f32 %v1725_v16, %v1557_v55  ;;  %v2171_v31 = vsel %vm2043_vm5, %v1979_v11, %v2107_v22 }
 0x209   : > { %v1685_v57 = vpop.f32.mrf.mxu2  ;;  %v1350_v9 = vpop.f32.mrf.mxu0 }
 0x20a   : > { %v1686_v46 = vadd.f32 %v1685_v57, %v1517_v14  ;;  %v1996_v20 = vadd.f32 %v3777_v53, %v1726_v63  ;;  %v1519_v21 = vpop.f32.mrf.mxu1 }
 0x20b   : > { %v1520_v32 = vadd.f32 %v1519_v21, %v1350_v9 }
 0x20c   : > { %v1980_v26 = vadd.f32 %v3777_v53, %v1686_v46  ;;  %vm2060_vm6 = vcmp.ge.f32.partialorder %v1996_v20, 0.0  ;;  %v2124_v0 = vmul.f32 0.2, %v1996_v20 }
 0x20e   : > { %vm2044_vm7 = vcmp.ge.f32.partialorder %v1980_v26, 0.0  ;;  %v2108_v37 = vmul.f32 0.2, %v1980_v26  ;;  %v2188_v28 = vsel %vm2060_vm6, %v1996_v20, %v2124_v0 }
 0x20f   : > { %v3196_v56 = vpack.c.bf16 %v2188_v28, %v2187_v27  ;;  %v1728_v33 = vpop.f32.mrf.mxu3 }
 0x210   : > { %v2172_v5 = vsel %vm2044_vm7, %v1980_v26, %v2108_v37  ;;  %v1729_v17 = vadd.f32 %v1728_v33, %v1560_v36 }
 0x211   : > { %v3156_v42 = vpack.c.bf16 %v2172_v5, %v2171_v31  ;;  %v1688_v43 = vpop.f32.mrf.mxu2  ;;  %3236 = vst [vmem:[%s3578_s27 + $0xe8] sm:$0xff] %v3196_v56   ;;  %v1352_v25 = vpop.f32.mrf.mxu0 }
 0x212   : > { %v1521_v44 = vpop.f32.mrf.mxu1  ;;  %v1689_v45 = vadd.f32 %v1688_v43, %v1520_v32  ;;  %v1997_v48 = vadd.f32 %v3777_v53, %v1729_v17 }
 0x213   : > { %3228 = vst [vmem:[%s3578_s27 + $0xa8] sm:$0xff] %v3156_v42   ;;  %v1522_v23 = vadd.f32 %v1521_v44, %v1352_v25 }
 0x214   : > { %v1981_v10 = vadd.f32 %v3777_v53, %v1689_v45  ;;  %v2125_v1 = vmul.f32 0.2, %v1997_v48  ;;  %vm2061_vm8 = vcmp.ge.f32.partialorder %v1997_v48, 0.0 }
 0x216   : > { %v2109_v49 = vmul.f32 0.2, %v1981_v10  ;;  %vm2045_vm9 = vcmp.ge.f32.partialorder %v1981_v10, 0.0  ;;  %v2189_v60 = vsel %vm2061_vm8, %v1997_v48, %v2125_v1 }
 0x217   : > { %v1730_v38 = vpop.f32.mrf.mxu3 }
 0x218   : > { %v1731_v50 = vadd.f32 %v1730_v38, %v1562_v47  ;;  %v2173_v35 = vsel %vm2045_vm9, %v1981_v10, %v2109_v49 }
 0x219   : > { %v1690_v13 = vpop.f32.mrf.mxu2  ;;  %v1355_v52 = vpop.f32.mrf.mxu0 }
 0x21a   : > { %v1691_v19 = vadd.f32 %v1690_v13, %v1522_v23  ;;  %v1998_v51 = vadd.f32 %v3777_v53, %v1731_v50  ;;  %v1524_v29 = vpop.f32.mrf.mxu1 }
 0x21b   : > { %v1525_v34 = vadd.f32 %v1524_v29, %v1355_v52 }
 0x21c   : > { %v1982_v12 = vadd.f32 %v3777_v53, %v1691_v19  ;;  %vm2062_vm10 = vcmp.ge.f32.partialorder %v1998_v51, 0.0  ;;  %v2126_v39 = vmul.f32 0.2, %v1998_v51 }
 0x21e   : > { %vm2046_vm11 = vcmp.ge.f32.partialorder %v1982_v12, 0.0  ;;  %v2110_v30 = vmul.f32 0.2, %v1982_v12  ;;  %v2190_v54 = vsel %vm2062_vm10, %v1998_v51, %v2126_v39 }
 0x21f   : > { %v3201_v7 = vpack.c.bf16 %v2190_v54, %v2189_v60  ;;  %v1733_v62 = vpop.f32.mrf.mxu3 }
 0x220   : > { %v2174_v61 = vsel %vm2046_vm11, %v1982_v12, %v2110_v30  ;;  %v1734_v24 = vadd.f32 %v1733_v62, %v1565_v2 }
 0x221   : > { %v3161_v3 = vpack.c.bf16 %v2174_v61, %v2173_v35  ;;  %v1693_v4 = vpop.f32.mrf.mxu2  ;;  %3237 = vst [vmem:[%s3578_s27 + $0xf0] sm:$0xff] %v3201_v7   ;;  %v1357_v41 = vpop.f32.mrf.mxu0 }
 0x222   : > { %v1694_v40 = vadd.f32 %v1693_v4, %v1525_v34  ;;  %v1526_v55 = vpop.f32.mrf.mxu1  ;;  %v1999_v11 = vadd.f32 %v3777_v53, %v1734_v24 }
 0x223   : > { %3229 = vst [vmem:[%s3578_s27 + $0xb0] sm:$0xff] %v3161_v3   ;;  %v1527_v16 = vadd.f32 %v1526_v55, %v1357_v41 }
 0x224   : > { %v1983_v14 = vadd.f32 %v3777_v53, %v1694_v40  ;;  %v2127_v59 = vmul.f32 0.2, %v1999_v11  ;;  %vm2063_vm12 = vcmp.ge.f32.partialorder %v1999_v11, 0.0 }
 0x226   : > { %v2111_v18 = vmul.f32 0.2, %v1983_v14  ;;  %vm2047_vm13 = vcmp.ge.f32.partialorder %v1983_v14, 0.0  ;;  %v2191_v21 = vsel %vm2063_vm12, %v1999_v11, %v2127_v59 }
 0x227   : > { %v1735_v57 = vpop.f32.mrf.mxu3 }
 0x228   : > { %v1736_v46 = vadd.f32 %v1735_v57, %v1567_v6  ;;  %v2175_v26 = vsel %vm2047_vm13, %v1983_v14, %v2111_v18 }
 0x229   : > { %v1695_v63 = vpop.f32.mrf.mxu2 }
 0x22a   : > { %v1696_v58 = vadd.f32 %v1695_v63, %v1527_v16  ;;  %v2000_v9 = vadd.f32 %v3777_v53, %v1736_v46 }
 0x22c   : > { %v1984_v20 = vadd.f32 %v3777_v53, %v1696_v58  ;;  %vm2064_vm14 = vcmp.ge.f32.partialorder %v2000_v9, 0.0  ;;  %v2128_v15 = vmul.f32 0.2, %v2000_v9 }
 0x22e   : > { %vm2048_vm15 = vcmp.ge.f32.partialorder %v1984_v20, 0.0  ;;  %v2112_v8 = vmul.f32 0.2, %v1984_v20  ;;  %v2192_v22 = vsel %vm2064_vm14, %v2000_v9, %v2128_v15 }
 0x22f   : > { %v3206_v37 = vpack.c.bf16 %v2192_v22, %v2191_v21 }
 0x230   : > { %v2176_v0 = vsel %vm2048_vm15, %v1984_v20, %v2112_v8 }
 0x231   : > { %v3166_v27 = vpack.c.bf16 %v2176_v0, %v2175_v26  ;;  %3238 = vst [vmem:[%s3578_s27 + $0xf8] sm:$0xff] %v3206_v37  }
 0x233   : > { %3230 = vst [vmem:[%s3578_s27 + $0xb8] sm:$0xff] %v3166_v27  }
 0x234 PF: > { %s13_s14 = sadd.s32 1, %s3312_s14   ;;  %s3896_s12 = smov %s3308_s13 }
 0x235   : > { %p10_p5 = scmp.ge.s32.totalorder %s13_s14, 4   ;;  %s3897_s13 = smov %s3899_s15 }
 0x237   :  { %12 = sbr.rel (!%p10_p5) target bundleno = 2 (0x2), region = 76 }

// kernel: _forward.17
= control target key start
LH: loop header
LB: loop body
LE: loop exit
PB: predicated region body
PF: predicated region fallthrough
CT: control target
= control target key end

     0   :  { %s141_s0 = inlined_call_operand.<no memory space> [shape: f32[1], index: 0, kind: input, shape index: {}]   ;;  %s142_s1 = inlined_call_operand.vmem [shape: bf16[32,256], index: 1, kind: input, shape index: {}]   ;;  %s143_s2 = inlined_call_operand.vmem [shape: bf16[32,256], index: 2, kind: input, shape index: {}]   ;;  %s144_s3 = inlined_call_operand.vmem [shape: bf16[32,256], index: 3, kind: output, shape index: {}]  }
   0x1   :  { %v16_v0 = vld [vmem:[%s142_s1] sm:$0xff]  ;;  %v40_v2 = vstv %s141_s0  ;;  %s49_s20 = ssub.f32 1.0, %s141_s0  ;;  %v17_v3 = vld [vmem:[%s142_s1 + $0x8] sm:$0xff]  ;;  %v18_v13 = vld [vmem:[%s142_s1 + $0x10] sm:$0xff] }
   0x2   :  { %v28_v1 = vld [vmem:[%s143_s2] sm:$0xff]  ;;  %v20_v4 = vunpack.c.l.bf16 %v16_v0  ;;  %v21_v5 = vunpack.c.h.bf16 %v16_v0  ;;  %v29_v8 = vld [vmem:[%s143_s2 + $0x8] sm:$0xff]  ;;  %v22_v10 = vunpack.c.l.bf16 %v17_v3  ;;  %v23_v11 = vunpack.c.h.bf16 %v17_v3  ;;  %v30_v18 = vld [vmem:[%s143_s2 + $0x10] sm:$0xff] }
   0x3   :  { %v32_v6 = vunpack.c.l.bf16 %v28_v1  ;;  %v33_v7 = vunpack.c.h.bf16 %v28_v1  ;;  %v50_v9 = vstv %s49_s20  ;;  %v34_v12 = vunpack.c.l.bf16 %v29_v8  ;;  %v19_v23 = vld [vmem:[%s142_s1 + $0x18] sm:$0xff] }
   0x4   :  { %v41_v14 = vmul.f32 %v40_v2, %v20_v4  ;;  %v42_v15 = vmul.f32 %v40_v2, %v21_v5  ;;  %v35_v19 = vunpack.c.h.bf16 %v29_v8  ;;  %v43_v20 = vmul.f32 %v40_v2, %v22_v10  ;;  %v31_v32 = vld [vmem:[%s143_s2 + $0x18] sm:$0xff] }
   0x5   :  { %v51_v16 = vmul.f32 %v50_v9, %v32_v6  ;;  %v52_v17 = vmul.f32 %v50_v9, %v33_v7  ;;  %v44_v21 = vmul.f32 %v40_v2, %v23_v11  ;;  %v53_v22 = vmul.f32 %v50_v9, %v34_v12 }
   0x6   :  { %v24_v26 = vunpack.c.l.bf16 %v18_v13  ;;  %v25_v27 = vunpack.c.h.bf16 %v18_v13  ;;  %v54_v28 = vmul.f32 %v50_v9, %v35_v19  ;;  %v36_v30 = vunpack.c.l.bf16 %v30_v18 }
   0x7   :  { %v59_v24 = vadd.f32 %v51_v16, %v41_v14  ;;  %v60_v25 = vadd.f32 %v52_v17, %v42_v15  ;;  %v61_v29 = vadd.f32 %v53_v22, %v43_v20  ;;  %v37_v31 = vunpack.c.h.bf16 %v30_v18 }
   0x8   :  { %v45_v34 = vmul.f32 %v40_v2, %v24_v26  ;;  %v46_v35 = vmul.f32 %v40_v2, %v25_v27  ;;  %v26_v36 = vunpack.c.l.bf16 %v19_v23  ;;  %v62_v37 = vadd.f32 %v54_v28, %v44_v21 }
   0x9   :  { %v67_v33 = vpack.c.bf16 %v60_v25, %v59_v24  ;;  %v55_v38 = vmul.f32 %v50_v9, %v36_v30  ;;  %v56_v39 = vmul.f32 %v50_v9, %v37_v31  ;;  %v27_v40 = vunpack.c.h.bf16 %v19_v23 }
   0xa   :  { %v38_v41 = vunpack.c.l.bf16 %v31_v32  ;;  %v39_v42 = vunpack.c.h.bf16 %v31_v32  ;;  %v47_v43 = vmul.f32 %v40_v2, %v26_v36  ;;  %v68_v44 = vpack.c.bf16 %v62_v37, %v61_v29 }
   0xb   :  { %71 = vst [vmem:[%s144_s3] sm:$0xff] %v67_v33  ;;  %v63_v45 = vadd.f32 %v55_v38, %v45_v34  ;;  %v64_v46 = vadd.f32 %v56_v39, %v46_v35  ;;  %v48_v47 = vmul.f32 %v40_v2, %v27_v40 }
   0xc   :  { %v57_v48 = vmul.f32 %v50_v9, %v38_v41  ;;  %v58_v49 = vmul.f32 %v50_v9, %v39_v42  ;;  %72 = vst [vmem:[%s144_s3 + $0x8] sm:$0xff] %v68_v44 }
   0xd   :  { %v69_v50 = vpack.c.bf16 %v64_v46, %v63_v45 }
   0xe   :  { %v65_v51 = vadd.f32 %v57_v48, %v47_v43  ;;  %v66_v52 = vadd.f32 %v58_v49, %v48_v47 }
   0xf   :  { %73 = vst [vmem:[%s144_s3 + $0x10] sm:$0xff] %v69_v50 }
  0x10   :  { %v70_v53 = vpack.c.bf16 %v66_v52, %v65_v51 }
  0x12   :  { %74 = vst [vmem:[%s144_s3 + $0x18] sm:$0xff] %v70_v53 }

// kernel: _forward.16
= control target key start
LH: loop header
LB: loop body
LE: loop exit
PB: predicated region body
PF: predicated region fallthrough
CT: control target
= control target key end

     0   :  { %s2538_s1 = inlined_call_operand.vmem [shape: bf16[512,128], index: 1, kind: input, shape index: {}]   ;;  %s2539_s0 = inlined_call_operand.vmem [shape: bf16[256,512], index: 0, kind: input, shape index: {}]   ;;  %s2540_s2 = inlined_call_operand.vmem [shape: f32[1,128], index: 2, kind: input, shape index: {}]   ;;  %s2541_s3 = inlined_call_operand.vmem [shape: bf16[256,128], index: 3, kind: output, shape index: {}]  }
   0x1   :  { %v1832_v0 = vld [vmem:[%s2538_s1 + $0x38] sm:$0xff]  ;;  %v1831_v4 = vld [vmem:[%s2538_s1 + $0x30] sm:$0xff]  ;;  %v1830_v8 = vld [vmem:[%s2538_s1 + $0x28] sm:$0xff] }
   0x2   :  { %v1840_v1 = vld [vmem:[%s2538_s1 + $0x78] sm:$0xff]  ;;  %722 = vmatpush.bf16.msra.mxu0 %v1832_v0  ;;  %v1839_v5 = vld [vmem:[%s2538_s1 + $0x70] sm:$0xff]  ;;  %v1838_v9 = vld [vmem:[%s2538_s1 + $0x68] sm:$0xff] }
   0x3   :  { %v1848_v2 = vld [vmem:[%s2538_s1 + $0xb8] sm:$0xff]  ;;  %811 = vmatpush.bf16.msra.mxu1 %v1840_v1  ;;  %v1847_v6 = vld [vmem:[%s2538_s1 + $0xb0] sm:$0xff]  ;;  %v1846_v10 = vld [vmem:[%s2538_s1 + $0xa8] sm:$0xff] }
   0x4   :  { %v1856_v3 = vld [vmem:[%s2538_s1 + $0xf8] sm:$0xff]  ;;  %900 = vmatpush.bf16.msra.mxu2 %v1848_v2  ;;  %v1855_v7 = vld [vmem:[%s2538_s1 + $0xf0] sm:$0xff]  ;;  %v1854_v11 = vld [vmem:[%s2538_s1 + $0xe8] sm:$0xff] }
   0x5   :  { %989 = vmatpush.bf16.msra.mxu3 %v1856_v3  ;;  %v1829_v12 = vld [vmem:[%s2538_s1 + $0x20] sm:$0xff]  ;;  %v1828_v16 = vld [vmem:[%s2538_s1 + $0x18] sm:$0xff]  ;;  %v1827_v20 = vld [vmem:[%s2538_s1 + $0x10] sm:$0xff] }
   0x6   :  { %723 = vmatpush.bf16.msra.mxu0 %v1831_v4  ;;  %v1837_v13 = vld [vmem:[%s2538_s1 + $0x60] sm:$0xff]  ;;  %v1836_v17 = vld [vmem:[%s2538_s1 + $0x58] sm:$0xff]  ;;  %v1835_v21 = vld [vmem:[%s2538_s1 + $0x50] sm:$0xff] }
   0x7   :  { %812 = vmatpush.bf16.msra.mxu1 %v1839_v5  ;;  %v1845_v14 = vld [vmem:[%s2538_s1 + $0xa0] sm:$0xff]  ;;  %v1844_v18 = vld [vmem:[%s2538_s1 + $0x98] sm:$0xff]  ;;  %v1843_v22 = vld [vmem:[%s2538_s1 + $0x90] sm:$0xff] }
   0x8   :  { %901 = vmatpush.bf16.msra.mxu2 %v1847_v6  ;;  %v1853_v15 = vld [vmem:[%s2538_s1 + $0xe0] sm:$0xff]  ;;  %v1852_v19 = vld [vmem:[%s2538_s1 + $0xd8] sm:$0xff]  ;;  %v1851_v23 = vld [vmem:[%s2538_s1 + $0xd0] sm:$0xff] }
   0x9   :  { %990 = vmatpush.bf16.msra.mxu3 %v1855_v7  ;;  %v1826_v24 = vld [vmem:[%s2538_s1 + $0x8] sm:$0xff]  ;;  %v1825_v28 = vld [vmem:[%s2538_s1] sm:$0xff]  ;;  %v1763_v33 = vld [vmem:[%s2539_s0 + $0xc] sm:$0xf0] }
   0xa   :  { %724 = vmatpush.bf16.msra.mxu0 %v1830_v8  ;;  %v1834_v25 = vld [vmem:[%s2538_s1 + $0x48] sm:$0xff]  ;;  %v1833_v29 = vld [vmem:[%s2538_s1 + $0x40] sm:$0xff]  ;;  %v1381_v35 = vld [vmem:[%s2539_s0 + $0x10] sm:$0xf0] }
   0xb   :  { %813 = vmatpush.bf16.msra.mxu1 %v1838_v9  ;;  %v1842_v26 = vld [vmem:[%s2538_s1 + $0x88] sm:$0xff]  ;;  %v1841_v30 = vld [vmem:[%s2538_s1 + $0x80] sm:$0xff]  ;;  %v1764_v37 = vld [vmem:[%s2539_s0 + $0x14] sm:$0xf0] }
   0xc   :  { %902 = vmatpush.bf16.msra.mxu2 %v1846_v10  ;;  %v1850_v27 = vld [vmem:[%s2538_s1 + $0xc8] sm:$0xff]  ;;  %v1849_v31 = vld [vmem:[%s2538_s1 + $0xc0] sm:$0xff]  ;;  %v1389_v39 = vld [vmem:[%s2539_s0 + $0x18] sm:$0xf0] }
   0xd   :  { %991 = vmatpush.bf16.msra.mxu3 %v1854_v11  ;;  %v1379_v32 = vld [vmem:[%s2539_s0] sm:$0xf]  ;;  %v1761_v34 = vld [vmem:[%s2539_s0 + $0x4] sm:$0xf]  ;;  %v1387_v36 = vld [vmem:[%s2539_s0 + $0x8] sm:$0xf] }
   0xe   :  { %725 = vmatpush.bf16.msra.mxu0 %v1829_v12  ;;  %v1762_v38 = vld [vmem:[%s2539_s0 + $0xc] sm:$0xf]  ;;  %v1380_v40 = vor.u32 %v1763_v33, %v1379_v32  ;;  %v1384_v41 = vor.u32 %v1761_v34, %v1381_v35  ;;  %v1388_v42 = vor.u32 %v1764_v37, %v1387_v36  ;;  %v1395_v44 = vld [vmem:[%s2539_s0 + $0x20] sm:$0xf]  ;;  %v1767_v45 = vld [vmem:[%s2539_s0 + $0x2c] sm:$0xf0] }
   0xf   :  { %814 = vmatpush.bf16.msra.mxu1 %v1837_v13  ;;  %v1392_v43 = vor.u32 %v1762_v38, %v1389_v39  ;;  %v1765_v46 = vld [vmem:[%s2539_s0 + $0x24] sm:$0xf]  ;;  %v1397_v47 = vld [vmem:[%s2539_s0 + $0x30] sm:$0xf0]  ;;  %v1403_v48 = vld [vmem:[%s2539_s0 + $0x28] sm:$0xf]  ;;  %v1396_v52 = vor.u32 %v1767_v45, %v1395_v44 }
  0x10   :  { %903 = vmatpush.bf16.msra.mxu2 %v1845_v14  ;;  %v1768_v49 = vld [vmem:[%s2539_s0 + $0x34] sm:$0xf0]  ;;  %v1766_v50 = vld [vmem:[%s2539_s0 + $0x2c] sm:$0xf]  ;;  %v1405_v51 = vld [vmem:[%s2539_s0 + $0x38] sm:$0xf0]  ;;  %v1400_v53 = vor.u32 %v1765_v46, %v1397_v47 }
  0x11   :  { %992 = vmatpush.bf16.msra.mxu3 %v1853_v15  ;;  %v1404_v54 = vor.u32 %v1768_v49, %v1403_v48  ;;  %v1408_v55 = vor.u32 %v1766_v50, %v1405_v51  ;;  %v1411_v56 = vld [vmem:[%s2539_s0 + $0x40] sm:$0xf]  ;;  %v1771_v57 = vld [vmem:[%s2539_s0 + $0x4c] sm:$0xf0]  ;;  %v1769_v58 = vld [vmem:[%s2539_s0 + $0x44] sm:$0xf] }
  0x12   :  { %726 = vmatpush.bf16.msra.mxu0 %v1828_v16  ;;  %v1413_v59 = vld [vmem:[%s2539_s0 + $0x50] sm:$0xf0]  ;;  %v1419_v60 = vld [vmem:[%s2539_s0 + $0x48] sm:$0xf]  ;;  %v1772_v61 = vld [vmem:[%s2539_s0 + $0x54] sm:$0xf0]  ;;  %v1412_v0 = vor.u32 %v1771_v57, %v1411_v56 }
  0x13   :  { %815 = vmatpush.bf16.msra.mxu1 %v1836_v17  ;;  %v1770_v62 = vld [vmem:[%s2539_s0 + $0x4c] sm:$0xf]  ;;  %v1421_v63 = vld [vmem:[%s2539_s0 + $0x58] sm:$0xf0]  ;;  %v1416_v1 = vor.u32 %v1769_v58, %v1413_v59  ;;  %v1420_v2 = vor.u32 %v1772_v61, %v1419_v60  ;;  %v1427_v4 = vld [vmem:[%s2539_s0 + $0x60] sm:$0xf] }
  0x14   :  { %904 = vmatpush.bf16.msra.mxu2 %v1844_v18  ;;  %v1424_v3 = vor.u32 %v1770_v62, %v1421_v63  ;;  %v1775_v5 = vld [vmem:[%s2539_s0 + $0x6c] sm:$0xf0]  ;;  %v1773_v6 = vld [vmem:[%s2539_s0 + $0x64] sm:$0xf]  ;;  %v1429_v7 = vld [vmem:[%s2539_s0 + $0x70] sm:$0xf0] }
  0x15   :  { %993 = vmatpush.bf16.msra.mxu3 %v1852_v19  ;;  %v1435_v8 = vld [vmem:[%s2539_s0 + $0x68] sm:$0xf]  ;;  %v1776_v9 = vld [vmem:[%s2539_s0 + $0x74] sm:$0xf0]  ;;  %v1774_v10 = vld [vmem:[%s2539_s0 + $0x6c] sm:$0xf]  ;;  %v1428_v12 = vor.u32 %v1775_v5, %v1427_v4  ;;  %v1432_v13 = vor.u32 %v1773_v6, %v1429_v7 }
  0x16   :  { %727 = vmatpush.bf16.msra.mxu0 %v1827_v20  ;;  %v1437_v11 = vld [vmem:[%s2539_s0 + $0x78] sm:$0xf0]  ;;  %v1436_v14 = vor.u32 %v1776_v9, %v1435_v8  ;;  %v1443_v16 = vld [vmem:[%s2539_s0 + $0x80] sm:$0xf]  ;;  %v1779_v17 = vld [vmem:[%s2539_s0 + $0x8c] sm:$0xf0] }
  0x17   :  { %816 = vmatpush.bf16.msra.mxu1 %v1835_v21  ;;  %v1440_v15 = vor.u32 %v1774_v10, %v1437_v11  ;;  %v1777_v18 = vld [vmem:[%s2539_s0 + $0x84] sm:$0xf]  ;;  %v1445_v19 = vld [vmem:[%s2539_s0 + $0x90] sm:$0xf0]  ;;  %v1451_v20 = vld [vmem:[%s2539_s0 + $0x88] sm:$0xf] }
  0x18   :  { %905 = vmatpush.bf16.msra.mxu2 %v1843_v22  ;;  %v1780_v21 = vld [vmem:[%s2539_s0 + $0x94] sm:$0xf0]  ;;  %v1778_v22 = vld [vmem:[%s2539_s0 + $0x8c] sm:$0xf]  ;;  %v1467_v32 = vld [vmem:[%s2539_s0 + $0xa8] sm:$0xf] }
  0x19   :  { %994 = vmatpush.bf16.msra.mxu3 %v1851_v23  ;;  %v1453_v23 = vld [vmem:[%s2539_s0 + $0x98] sm:$0xf0]  ;;  %v1784_v33 = vld [vmem:[%s2539_s0 + $0xb4] sm:$0xf0]  ;;  %v1782_v34 = vld [vmem:[%s2539_s0 + $0xac] sm:$0xf] }
  0x1a   :  { %728 = vmatpush.bf16.msra.mxu0 %v1826_v24  ;;  %v1444_v24 = vor.u32 %v1779_v17, %v1443_v16  ;;  %v1469_v35 = vld [vmem:[%s2539_s0 + $0xb8] sm:$0xf0]  ;;  %v1468_v38 = vor.u32 %v1784_v33, %v1467_v32  ;;  %v1483_v44 = vld [vmem:[%s2539_s0 + $0xc8] sm:$0xf]  ;;  %v1788_v45 = vld [vmem:[%s2539_s0 + $0xd4] sm:$0xf0] }
  0x1b   :  { %817 = vmatpush.bf16.msra.mxu1 %v1834_v25  ;;  %v1448_v25 = vor.u32 %v1777_v18, %v1445_v19  ;;  %v1472_v39 = vor.u32 %v1782_v34, %v1469_v35  ;;  %v1786_v46 = vld [vmem:[%s2539_s0 + $0xcc] sm:$0xf]  ;;  %v1485_v47 = vld [vmem:[%s2539_s0 + $0xd8] sm:$0xf0]  ;;  %v1484_v50 = vor.u32 %v1788_v45, %v1483_v44  ;;  %v1499_v56 = vld [vmem:[%s2539_s0 + $0xe8] sm:$0xf] }
  0x1c   :  { %906 = vmatpush.bf16.msra.mxu2 %v1842_v26  ;;  %v1452_v26 = vor.u32 %v1780_v21, %v1451_v20  ;;  %v1488_v51 = vor.u32 %v1786_v46, %v1485_v47  ;;  %v1792_v57 = vld [vmem:[%s2539_s0 + $0xf4] sm:$0xf0]  ;;  %v1790_v58 = vld [vmem:[%s2539_s0 + $0xec] sm:$0xf]  ;;  %v1501_v59 = vld [vmem:[%s2539_s0 + $0xf8] sm:$0xf0] }
  0x1d   :  { %995 = vmatpush.bf16.msra.mxu3 %v1850_v27  ;;  %v1456_v27 = vor.u32 %v1778_v22, %v1453_v23  ;;  %v1500_v62 = vor.u32 %v1792_v57, %v1499_v56  ;;  %v1504_v63 = vor.u32 %v1790_v58, %v1501_v59  ;;  %v1515_v4 = vld [vmem:[%s2539_s0 + $0x108] sm:$0xf]  ;;  %v1796_v5 = vld [vmem:[%s2539_s0 + $0x114] sm:$0xf0]  ;;  %v1794_v6 = vld [vmem:[%s2539_s0 + $0x10c] sm:$0xf] }
  0x1e   :  { %729 = vmatpush.bf16.msra.mxu0 %v1825_v28  ;;  %v1459_v28 = vld [vmem:[%s2539_s0 + $0xa0] sm:$0xf]  ;;  %v1517_v7 = vld [vmem:[%s2539_s0 + $0x118] sm:$0xf0]  ;;  %v1799_v22 = vld [vmem:[%s2539_s0 + $0x12c] sm:$0xf0] }
  0x1f   :  { %818 = vmatpush.bf16.msra.mxu1 %v1833_v29  ;;  %v1783_v29 = vld [vmem:[%s2539_s0 + $0xac] sm:$0xf0]  ;;  %v2288_v20 = vld [vmem:[%s2540_s2] ss:$0 sm:$0xff]  ;;  %v1801_v57 = vld [vmem:[%s2539_s0 + $0x144] sm:$0xf] }
  0x20   :  { %907 = vmatpush.bf16.msra.mxu2 %v1841_v30  ;;  %v1781_v30 = vld [vmem:[%s2539_s0 + $0xa4] sm:$0xf]  ;;  %v1460_v36 = vor.u32 %v1783_v29, %v1459_v28  ;;  %v1523_v21 = vld [vmem:[%s2539_s0 + $0x120] sm:$0xf]  ;;  %v1798_v28 = vld [vmem:[%s2539_s0 + $0x12c] sm:$0xf] }
  0x21   :  { %996 = vmatpush.bf16.msra.mxu3 %v1849_v31  ;;  %730 = vmatmul.bf16.vlgmr.msra.gmra.mxu0 %v1380_v40  ;;  %v1461_v31 = vld [vmem:[%s2539_s0 + $0xb0] sm:$0xf0]  ;;  %v1475_v40 = vld [vmem:[%s2539_s0 + $0xc0] sm:$0xf]  ;;  %v1533_v29 = vld [vmem:[%s2539_s0 + $0x138] sm:$0xf0]  ;;  %v1524_v33 = vor.u32 %v1799_v22, %v1523_v21 }
  0x22   :  { %819 = vmatmul.bf16.vlgmr.msra.gmra.mxu1 %v1384_v41  ;;  %v1464_v37 = vor.u32 %v1781_v30, %v1461_v31  ;;  %v1787_v41 = vld [vmem:[%s2539_s0 + $0xcc] sm:$0xf0]  ;;  %v1541_v58 = vld [vmem:[%s2539_s0 + $0x150] sm:$0xf0]  ;;  %v1547_v59 = vld [vmem:[%s2539_s0 + $0x148] sm:$0xf] }
  0x23   :  { %908 = vmatmul.bf16.vlgmr.msra.gmra.mxu2 %v1388_v42  ;;  %v1785_v42 = vld [vmem:[%s2539_s0 + $0xc4] sm:$0xf]  ;;  %v1476_v48 = vor.u32 %v1787_v41, %v1475_v40  ;;  %v1536_v40 = vor.u32 %v1798_v28, %v1533_v29  ;;  %v1557_v28 = vld [vmem:[%s2539_s0 + $0x170] sm:$0xf0]  ;;  %v1563_v29 = vld [vmem:[%s2539_s0 + $0x168] sm:$0xf] }
  0x24   :  { %997 = vmatmul.bf16.vlgmr.msra.gmra.mxu3 %v1392_v43  ;;  %v1477_v43 = vld [vmem:[%s2539_s0 + $0xd0] sm:$0xf0] }
  0x25   :  { %v1480_v49 = vor.u32 %v1785_v42, %v1477_v43 }
  0x31   :  { %735 = vmatmul.bf16.gmra.mxu0 %v1396_v52  ;;  %v1491_v52 = vld [vmem:[%s2539_s0 + $0xe0] sm:$0xf] }
  0x32   :  { %824 = vmatmul.bf16.gmra.mxu1 %v1400_v53  ;;  %v1791_v53 = vld [vmem:[%s2539_s0 + $0xec] sm:$0xf0] }
  0x33   :  { %913 = vmatmul.bf16.gmra.mxu2 %v1404_v54  ;;  %v1789_v54 = vld [vmem:[%s2539_s0 + $0xe4] sm:$0xf]  ;;  %v1492_v60 = vor.u32 %v1791_v53, %v1491_v52 }
  0x34   :  { %1002 = vmatmul.bf16.gmra.mxu3 %v1408_v55  ;;  %v1493_v55 = vld [vmem:[%s2539_s0 + $0xf0] sm:$0xf0] }
  0x35   :  { %v1496_v61 = vor.u32 %v1789_v54, %v1493_v55  ;;  %v1539_v54 = vld [vmem:[%s2539_s0 + $0x140] sm:$0xf]  ;;  %v1803_v55 = vld [vmem:[%s2539_s0 + $0x14c] sm:$0xf0] }
  0x41   :  { %740 = vmatmul.bf16.gmra.mxu0 %v1412_v0  ;;  %v1507_v0 = vld [vmem:[%s2539_s0 + $0x100] sm:$0xf] }
  0x42   :  { %829 = vmatmul.bf16.gmra.mxu1 %v1416_v1  ;;  %v1795_v1 = vld [vmem:[%s2539_s0 + $0x10c] sm:$0xf0] }
  0x43   :  { %918 = vmatmul.bf16.gmra.mxu2 %v1420_v2  ;;  %v1793_v2 = vld [vmem:[%s2539_s0 + $0x104] sm:$0xf]  ;;  %v1508_v8 = vor.u32 %v1795_v1, %v1507_v0 }
  0x44   :  { %1007 = vmatmul.bf16.gmra.mxu3 %v1424_v3  ;;  %v1509_v3 = vld [vmem:[%s2539_s0 + $0x110] sm:$0xf0] }
  0x45   :  { %v1512_v9 = vor.u32 %v1793_v2, %v1509_v3  ;;  %v1540_v2 = vor.u32 %v1803_v55, %v1539_v54  ;;  %v1544_v3 = vor.u32 %v1801_v57, %v1541_v58  ;;  %v1571_v57 = vld [vmem:[%s2539_s0 + $0x180] sm:$0xf]  ;;  %v1811_v58 = vld [vmem:[%s2539_s0 + $0x18c] sm:$0xf0] }
  0x51   :  { %745 = vmatmul.bf16.gmra.mxu0 %v1428_v12  ;;  %v1516_v12 = vor.u32 %v1796_v5, %v1515_v4 }
  0x52   :  { %834 = vmatmul.bf16.gmra.mxu1 %v1432_v13  ;;  %v1520_v13 = vor.u32 %v1794_v6, %v1517_v7 }
  0x53   :  { %923 = vmatmul.bf16.gmra.mxu2 %v1436_v14 }
  0x54   :  { %1012 = vmatmul.bf16.gmra.mxu3 %v1440_v15 }
  0x61   :  { %750 = vmatmul.bf16.gmra.mxu0 %v1444_v24  ;;  %v1797_v24 = vld [vmem:[%s2539_s0 + $0x124] sm:$0xf] }
  0x62   :  { %839 = vmatmul.bf16.gmra.mxu1 %v1448_v25  ;;  %v1525_v25 = vld [vmem:[%s2539_s0 + $0x130] sm:$0xf0] }
  0x63   :  { %928 = vmatmul.bf16.gmra.mxu2 %v1452_v26  ;;  %v1531_v26 = vld [vmem:[%s2539_s0 + $0x128] sm:$0xf]  ;;  %v1528_v34 = vor.u32 %v1797_v24, %v1525_v25  ;;  %v1555_v24 = vld [vmem:[%s2539_s0 + $0x160] sm:$0xf]  ;;  %v1807_v25 = vld [vmem:[%s2539_s0 + $0x16c] sm:$0xf0] }
  0x64   :  { %1017 = vmatmul.bf16.gmra.mxu3 %v1456_v27  ;;  %v1800_v27 = vld [vmem:[%s2539_s0 + $0x134] sm:$0xf0] }
  0x71   :  { %755 = vmatmul.bf16.gmra.mxu0 %v1460_v36 }
  0x72   :  { %844 = vmatmul.bf16.gmra.mxu1 %v1464_v37 }
  0x73   :  { %933 = vmatmul.bf16.gmra.mxu2 %v1468_v38 }
  0x74   :  { %1022 = vmatmul.bf16.gmra.mxu3 %v1472_v39  ;;  %v1532_v39 = vor.u32 %v1800_v27, %v1531_v26  ;;  %v1805_v27 = vld [vmem:[%s2539_s0 + $0x164] sm:$0xf] }
  0x81   :  { %760 = vmatmul.bf16.gmra.mxu0 %v1476_v48 }
  0x82   :  { %849 = vmatmul.bf16.gmra.mxu1 %v1480_v49 }
  0x83   :  { %938 = vmatmul.bf16.gmra.mxu2 %v1484_v50 }
  0x84   :  { %1027 = vmatmul.bf16.gmra.mxu3 %v1488_v51 }
  0x91   :  { %765 = vmatmul.bf16.gmra.mxu0 %v1492_v60  ;;  %v1804_v60 = vld [vmem:[%s2539_s0 + $0x154] sm:$0xf0] }
  0x92   :  { %854 = vmatmul.bf16.gmra.mxu1 %v1496_v61  ;;  %v1802_v61 = vld [vmem:[%s2539_s0 + $0x14c] sm:$0xf] }
  0x93   :  { %943 = vmatmul.bf16.gmra.mxu2 %v1500_v62  ;;  %v1549_v62 = vld [vmem:[%s2539_s0 + $0x158] sm:$0xf0] }
  0x94   :  { %1032 = vmatmul.bf16.gmra.mxu3 %v1504_v63 }
  0x9e   :  { %v731_v10 = vpop.f32.mrf.mxu0 }
  0x9f   :  { %v820_v11 = vpop.f32.mrf.mxu1 }
  0xa0   :  { %v821_v14 = vadd.f32 %v820_v11, %v731_v10 }
  0xa1   :  { %770 = vmatmul.bf16.gmra.mxu0 %v1508_v8  ;;  %v1548_v8 = vor.u32 %v1804_v60, %v1547_v59  ;;  %v1809_v60 = vld [vmem:[%s2539_s0 + $0x184] sm:$0xf] }
  0xa2   :  { %859 = vmatmul.bf16.gmra.mxu1 %v1512_v9  ;;  %v1552_v9 = vor.u32 %v1802_v61, %v1549_v62  ;;  %v1573_v61 = vld [vmem:[%s2539_s0 + $0x190] sm:$0xf0]  ;;  %v1579_v62 = vld [vmem:[%s2539_s0 + $0x188] sm:$0xf] }
  0xa3   :  { %948 = vmatmul.bf16.gmra.mxu2 %v1516_v12 }
  0xa4   :  { %1037 = vmatmul.bf16.gmra.mxu3 %v1520_v13 }
  0xa6   :  { %v909_v15 = vpop.f32.mrf.mxu2  ;;  %v733_v18 = vpop.f32.mrf.mxu0 }
  0xa7   :  { %v998_v16 = vpop.f32.mrf.mxu3  ;;  %v910_v17 = vadd.f32 %v909_v15, %v821_v14  ;;  %v822_v19 = vpop.f32.mrf.mxu1 }
  0xa8   :  { %v823_v30 = vadd.f32 %v822_v19, %v733_v18 }
  0xa9   :  { %v999_v23 = vadd.f32 %v998_v16, %v910_v17 }
  0xab   :  { %v1181_v35 = vadd.f32 %v2288_v20, %v999_v23 }
  0xad   :  { %v1245_v42 = vmul.f32 0.2, %v1181_v35  ;;  %vm1213_vm0 = vcmp.ge.f32.partialorder %v1181_v35, 0.0 }
  0xae   :  { %v911_v31 = vpop.f32.mrf.mxu2  ;;  %v736_v37 = vpop.f32.mrf.mxu0 }
  0xaf   :  { %v1000_v32 = vpop.f32.mrf.mxu3  ;;  %v912_v36 = vadd.f32 %v911_v31, %v823_v30  ;;  %v825_v38 = vpop.f32.mrf.mxu1  ;;  %v1277_v48 = vsel %vm1213_vm0, %v1181_v35, %v1245_v42  ;;  %v1808_v30 = vld [vmem:[%s2539_s0 + $0x174] sm:$0xf0]  ;;  %v1806_v31 = vld [vmem:[%s2539_s0 + $0x16c] sm:$0xf] }
  0xb0   :  { %v826_v44 = vadd.f32 %v825_v38, %v736_v37  ;;  %v1560_v37 = vor.u32 %v1805_v27, %v1557_v28  ;;  %v1564_v42 = vor.u32 %v1808_v30, %v1563_v29  ;;  %v1587_v27 = vld [vmem:[%s2539_s0 + $0x1a0] sm:$0xf]  ;;  %v1815_v28 = vld [vmem:[%s2539_s0 + $0x1ac] sm:$0xf0]  ;;  %v1813_v30 = vld [vmem:[%s2539_s0 + $0x1a4] sm:$0xf] }
  0xb1   :  { %v1001_v41 = vadd.f32 %v1000_v32, %v912_v36  ;;  %775 = vmatmul.bf16.gmra.mxu0 %v1524_v33  ;;  %v1565_v32 = vld [vmem:[%s2539_s0 + $0x178] sm:$0xf0]  ;;  %v1556_v36 = vor.u32 %v1807_v25, %v1555_v24 }
  0xb2   :  { %864 = vmatmul.bf16.gmra.mxu1 %v1528_v34 }
  0xb3   :  { %v1182_v43 = vadd.f32 %v2288_v20, %v1001_v41  ;;  %953 = vmatmul.bf16.gmra.mxu2 %v1532_v39 }
  0xb4   :  { %1042 = vmatmul.bf16.gmra.mxu3 %v1536_v40 }
  0xb5   :  { %vm1214_vm1 = vcmp.ge.f32.partialorder %v1182_v43, 0.0  ;;  %v1246_v45 = vmul.f32 0.2, %v1182_v43 }
  0xb6   :  { %v914_v46 = vpop.f32.mrf.mxu2  ;;  %v738_v51 = vpop.f32.mrf.mxu0 }
  0xb7   :  { %v1003_v47 = vpop.f32.mrf.mxu3  ;;  %v1278_v49 = vsel %vm1214_vm1, %v1182_v43, %v1246_v45  ;;  %v915_v50 = vadd.f32 %v914_v46, %v826_v44  ;;  %v827_v52 = vpop.f32.mrf.mxu1  ;;  %v1568_v43 = vor.u32 %v1806_v31, %v1565_v32  ;;  %v1589_v31 = vld [vmem:[%s2539_s0 + $0x1b0] sm:$0xf0]  ;;  %v1595_v32 = vld [vmem:[%s2539_s0 + $0x1a8] sm:$0xf] }
  0xb8   :  { %v1860_v53 = vpack.c.bf16 %v1278_v49, %v1277_v48  ;;  %v828_v63 = vadd.f32 %v827_v52, %v738_v51 }
  0xb9   :  { %v1004_v56 = vadd.f32 %v1003_v47, %v915_v50 }
  0xba   :  { %1861 = vst [vmem:[%s2541_s3] sm:$0xff] %v1860_v53  }
  0xbb   :  { %v1183_v4 = vadd.f32 %v2288_v20, %v1004_v56 }
  0xbd   :  { %v1247_v11 = vmul.f32 0.2, %v1183_v4  ;;  %vm1215_vm2 = vcmp.ge.f32.partialorder %v1183_v4, 0.0 }
  0xbe   :  { %v916_v0 = vpop.f32.mrf.mxu2  ;;  %v741_v6 = vpop.f32.mrf.mxu0 }
  0xbf   :  { %v1005_v1 = vpop.f32.mrf.mxu3  ;;  %v917_v5 = vadd.f32 %v916_v0, %v828_v63  ;;  %v830_v7 = vpop.f32.mrf.mxu1  ;;  %v1279_v17 = vsel %vm1215_vm2, %v1183_v4, %v1247_v11  ;;  %v1812_v63 = vld [vmem:[%s2539_s0 + $0x194] sm:$0xf0]  ;;  %v1810_v0 = vld [vmem:[%s2539_s0 + $0x18c] sm:$0xf] }
  0xc0   :  { %v831_v13 = vadd.f32 %v830_v7, %v741_v6  ;;  %v1576_v6 = vor.u32 %v1809_v60, %v1573_v61  ;;  %v1580_v11 = vor.u32 %v1812_v63, %v1579_v62  ;;  %v1603_v60 = vld [vmem:[%s2539_s0 + $0x1c0] sm:$0xf]  ;;  %v1819_v61 = vld [vmem:[%s2539_s0 + $0x1cc] sm:$0xf0]  ;;  %v1817_v63 = vld [vmem:[%s2539_s0 + $0x1c4] sm:$0xf] }
  0xc1   :  { %v1006_v10 = vadd.f32 %v1005_v1, %v917_v5  ;;  %780 = vmatmul.bf16.gmra.mxu0 %v1540_v2  ;;  %v1581_v1 = vld [vmem:[%s2539_s0 + $0x198] sm:$0xf0]  ;;  %v1572_v5 = vor.u32 %v1811_v58, %v1571_v57 }
  0xc2   :  { %869 = vmatmul.bf16.gmra.mxu1 %v1544_v3 }
  0xc3   :  { %v1184_v12 = vadd.f32 %v2288_v20, %v1006_v10  ;;  %958 = vmatmul.bf16.gmra.mxu2 %v1548_v8 }
  0xc4   :  { %1047 = vmatmul.bf16.gmra.mxu3 %v1552_v9 }
  0xc5   :  { %vm1216_vm3 = vcmp.ge.f32.partialorder %v1184_v12, 0.0  ;;  %v1248_v14 = vmul.f32 0.2, %v1184_v12 }
  0xc6   :  { %v919_v15 = vpop.f32.mrf.mxu2  ;;  %v743_v21 = vpop.f32.mrf.mxu0 }
  0xc7   :  { %v1008_v16 = vpop.f32.mrf.mxu3  ;;  %v1280_v18 = vsel %vm1216_vm3, %v1184_v12, %v1248_v14  ;;  %v920_v19 = vadd.f32 %v919_v15, %v831_v13  ;;  %v832_v22 = vpop.f32.mrf.mxu1  ;;  %v1584_v12 = vor.u32 %v1810_v0, %v1581_v1  ;;  %v1605_v0 = vld [vmem:[%s2539_s0 + $0x1d0] sm:$0xf0]  ;;  %v1611_v1 = vld [vmem:[%s2539_s0 + $0x1c8] sm:$0xf] }
  0xc8   :  { %v1865_v23 = vpack.c.bf16 %v1280_v18, %v1279_v17  ;;  %v833_v33 = vadd.f32 %v832_v22, %v743_v21 }
  0xc9   :  { %v1009_v26 = vadd.f32 %v1008_v16, %v920_v19 }
  0xca   :  { %1937 = vst [vmem:[%s2541_s3 + $0x8] sm:$0xff] %v1865_v23  }
  0xcb   :  { %v1185_v38 = vadd.f32 %v2288_v20, %v1009_v26 }
  0xcd   :  { %v1249_v45 = vmul.f32 0.2, %v1185_v38  ;;  %vm1217_vm4 = vcmp.ge.f32.partialorder %v1185_v38, 0.0 }
  0xce   :  { %v921_v34 = vpop.f32.mrf.mxu2  ;;  %v746_v40 = vpop.f32.mrf.mxu0 }
  0xcf   :  { %v1010_v35 = vpop.f32.mrf.mxu3  ;;  %v922_v39 = vadd.f32 %v921_v34, %v833_v33  ;;  %v835_v41 = vpop.f32.mrf.mxu1  ;;  %v1281_v51 = vsel %vm1217_vm4, %v1185_v38, %v1249_v45  ;;  %v1816_v33 = vld [vmem:[%s2539_s0 + $0x1b4] sm:$0xf0]  ;;  %v1814_v34 = vld [vmem:[%s2539_s0 + $0x1ac] sm:$0xf] }
  0xd0   :  { %v836_v47 = vadd.f32 %v835_v41, %v746_v40  ;;  %v1592_v40 = vor.u32 %v1813_v30, %v1589_v31  ;;  %v1596_v45 = vor.u32 %v1816_v33, %v1595_v32  ;;  %v1619_v30 = vld [vmem:[%s2539_s0 + $0x1e0] sm:$0xf]  ;;  %v1823_v31 = vld [vmem:[%s2539_s0 + $0x1ec] sm:$0xf0]  ;;  %v1821_v33 = vld [vmem:[%s2539_s0 + $0x1e4] sm:$0xf] }
  0xd1   :  { %v1011_v44 = vadd.f32 %v1010_v35, %v922_v39  ;;  %785 = vmatmul.bf16.gmra.mxu0 %v1556_v36  ;;  %v1597_v35 = vld [vmem:[%s2539_s0 + $0x1b8] sm:$0xf0]  ;;  %v1588_v39 = vor.u32 %v1815_v28, %v1587_v27 }
  0xd2   :  { %874 = vmatmul.bf16.gmra.mxu1 %v1560_v37 }
  0xd3   :  { %v1186_v46 = vadd.f32 %v2288_v20, %v1011_v44  ;;  %963 = vmatmul.bf16.gmra.mxu2 %v1564_v42 }
  0xd4   :  { %1052 = vmatmul.bf16.gmra.mxu3 %v1568_v43 }
  0xd5   :  { %vm1218_vm5 = vcmp.ge.f32.partialorder %v1186_v46, 0.0  ;;  %v1250_v48 = vmul.f32 0.2, %v1186_v46 }
  0xd6   :  { %v924_v49 = vpop.f32.mrf.mxu2  ;;  %v748_v54 = vpop.f32.mrf.mxu0 }
  0xd7   :  { %v1013_v50 = vpop.f32.mrf.mxu3  ;;  %v1282_v52 = vsel %vm1218_vm5, %v1186_v46, %v1250_v48  ;;  %v925_v53 = vadd.f32 %v924_v49, %v836_v47  ;;  %v837_v55 = vpop.f32.mrf.mxu1  ;;  %v1600_v46 = vor.u32 %v1814_v34, %v1597_v35  ;;  %v1621_v34 = vld [vmem:[%s2539_s0 + $0x1f0] sm:$0xf0]  ;;  %v1627_v35 = vld [vmem:[%s2539_s0 + $0x1e8] sm:$0xf] }
  0xd8   :  { %v1870_v56 = vpack.c.bf16 %v1282_v52, %v1281_v51  ;;  %v838_v2 = vadd.f32 %v837_v55, %v748_v54 }
  0xd9   :  { %v1014_v59 = vadd.f32 %v1013_v50, %v925_v53 }
  0xda   :  { %1938 = vst [vmem:[%s2541_s3 + $0x10] sm:$0xff] %v1870_v56  }
  0xdb   :  { %v1187_v7 = vadd.f32 %v2288_v20, %v1014_v59 }
  0xdd   :  { %v1251_v14 = vmul.f32 0.2, %v1187_v7  ;;  %vm1219_vm6 = vcmp.ge.f32.partialorder %v1187_v7, 0.0 }
  0xde   :  { %v926_v3 = vpop.f32.mrf.mxu2  ;;  %v751_v9 = vpop.f32.mrf.mxu0 }
  0xdf   :  { %v1015_v4 = vpop.f32.mrf.mxu3  ;;  %v927_v8 = vadd.f32 %v926_v3, %v838_v2  ;;  %v840_v10 = vpop.f32.mrf.mxu1  ;;  %v1283_v21 = vsel %vm1219_vm6, %v1187_v7, %v1251_v14  ;;  %v1820_v2 = vld [vmem:[%s2539_s0 + $0x1d4] sm:$0xf0]  ;;  %v1818_v3 = vld [vmem:[%s2539_s0 + $0x1cc] sm:$0xf] }
  0xe0   :  { %v841_v16 = vadd.f32 %v840_v10, %v751_v9  ;;  %v1608_v9 = vor.u32 %v1817_v63, %v1605_v0  ;;  %v1612_v14 = vor.u32 %v1820_v2, %v1611_v1 }
  0xe1   :  { %v1016_v13 = vadd.f32 %v1015_v4, %v927_v8  ;;  %790 = vmatmul.bf16.gmra.mxu0 %v1572_v5  ;;  %v1613_v4 = vld [vmem:[%s2539_s0 + $0x1d8] sm:$0xf0]  ;;  %v1604_v8 = vor.u32 %v1819_v61, %v1603_v60 }
  0xe2   :  { %879 = vmatmul.bf16.gmra.mxu1 %v1576_v6 }
  0xe3   :  { %v1188_v15 = vadd.f32 %v2288_v20, %v1016_v13  ;;  %968 = vmatmul.bf16.gmra.mxu2 %v1580_v11 }
  0xe4   :  { %1057 = vmatmul.bf16.gmra.mxu3 %v1584_v12 }
  0xe5   :  { %vm1220_vm7 = vcmp.ge.f32.partialorder %v1188_v15, 0.0  ;;  %v1252_v17 = vmul.f32 0.2, %v1188_v15 }
  0xe6   :  { %v929_v18 = vpop.f32.mrf.mxu2  ;;  %v753_v24 = vpop.f32.mrf.mxu0 }
  0xe7   :  { %v1018_v19 = vpop.f32.mrf.mxu3  ;;  %v1284_v22 = vsel %vm1220_vm7, %v1188_v15, %v1252_v17  ;;  %v930_v23 = vadd.f32 %v929_v18, %v841_v16  ;;  %v842_v25 = vpop.f32.mrf.mxu1  ;;  %v1616_v15 = vor.u32 %v1818_v3, %v1613_v4 }
  0xe8   :  { %v1875_v26 = vpack.c.bf16 %v1284_v22, %v1283_v21  ;;  %v843_v36 = vadd.f32 %v842_v25, %v753_v24 }
  0xe9   :  { %v1019_v29 = vadd.f32 %v1018_v19, %v930_v23 }
  0xea   :  { %1939 = vst [vmem:[%s2541_s3 + $0x18] sm:$0xff] %v1875_v26  }
  0xeb   :  { %v1189_v41 = vadd.f32 %v2288_v20, %v1019_v29 }
  0xed   :  { %v1253_v48 = vmul.f32 0.2, %v1189_v41  ;;  %vm1221_vm8 = vcmp.ge.f32.partialorder %v1189_v41, 0.0 }
  0xee   :  { %v931_v37 = vpop.f32.mrf.mxu2  ;;  %v756_v43 = vpop.f32.mrf.mxu0 }
  0xef   :  { %v1020_v38 = vpop.f32.mrf.mxu3  ;;  %v932_v42 = vadd.f32 %v931_v37, %v843_v36  ;;  %v845_v44 = vpop.f32.mrf.mxu1  ;;  %v1285_v54 = vsel %vm1221_vm8, %v1189_v41, %v1253_v48  ;;  %v1824_v36 = vld [vmem:[%s2539_s0 + $0x1f4] sm:$0xf0]  ;;  %v1822_v37 = vld [vmem:[%s2539_s0 + $0x1ec] sm:$0xf] }
  0xf0   :  { %v846_v50 = vadd.f32 %v845_v44, %v756_v43  ;;  %v1624_v43 = vor.u32 %v1821_v33, %v1621_v34  ;;  %v1628_v48 = vor.u32 %v1824_v36, %v1627_v35 }
  0xf1   :  { %v1021_v47 = vadd.f32 %v1020_v38, %v932_v42  ;;  %795 = vmatmul.bf16.gmra.mxu0 %v1588_v39  ;;  %v1629_v38 = vld [vmem:[%s2539_s0 + $0x1f8] sm:$0xf0]  ;;  %v1620_v42 = vor.u32 %v1823_v31, %v1619_v30 }
  0xf2   :  { %884 = vmatmul.bf16.gmra.mxu1 %v1592_v40 }
  0xf3   :  { %v1190_v49 = vadd.f32 %v2288_v20, %v1021_v47  ;;  %973 = vmatmul.bf16.gmra.mxu2 %v1596_v45 }
  0xf4   :  { %1062 = vmatmul.bf16.gmra.mxu3 %v1600_v46 }
  0xf5   :  { %vm1222_vm9 = vcmp.ge.f32.partialorder %v1190_v49, 0.0  ;;  %v1254_v51 = vmul.f32 0.2, %v1190_v49 }
  0xf6   :  { %v934_v52 = vpop.f32.mrf.mxu2  ;;  %v758_v57 = vpop.f32.mrf.mxu0 }
  0xf7   :  { %v1023_v53 = vpop.f32.mrf.mxu3  ;;  %v1286_v55 = vsel %vm1222_vm9, %v1190_v49, %v1254_v51  ;;  %v935_v56 = vadd.f32 %v934_v52, %v846_v50  ;;  %v847_v58 = vpop.f32.mrf.mxu1  ;;  %v1632_v49 = vor.u32 %v1822_v37, %v1629_v38 }
  0xf8   :  { %v1880_v59 = vpack.c.bf16 %v1286_v55, %v1285_v54  ;;  %v848_v5 = vadd.f32 %v847_v58, %v758_v57 }
  0xf9   :  { %v1024_v62 = vadd.f32 %v1023_v53, %v935_v56 }
  0xfa   :  { %1940 = vst [vmem:[%s2541_s3 + $0x20] sm:$0xff] %v1880_v59  }
  0xfb   :  { %v1191_v10 = vadd.f32 %v2288_v20, %v1024_v62 }
  0xfd   :  { %v1255_v17 = vmul.f32 0.2, %v1191_v10  ;;  %vm1223_vm10 = vcmp.ge.f32.partialorder %v1191_v10, 0.0 }
  0xfe   :  { %v936_v6 = vpop.f32.mrf.mxu2  ;;  %v761_v12 = vpop.f32.mrf.mxu0 }
  0xff   :  { %v1025_v7 = vpop.f32.mrf.mxu3  ;;  %v937_v11 = vadd.f32 %v936_v6, %v848_v5  ;;  %v850_v13 = vpop.f32.mrf.mxu1  ;;  %v1287_v24 = vsel %vm1223_vm10, %v1191_v10, %v1255_v17 }
 0x100   :  { %v851_v19 = vadd.f32 %v850_v13, %v761_v12 }
 0x101   :  { %v1026_v16 = vadd.f32 %v1025_v7, %v937_v11  ;;  %800 = vmatmul.bf16.gmra.mxu0 %v1604_v8 }
 0x102   :  { %889 = vmatmul.bf16.gmra.mxu1 %v1608_v9 }
 0x103   :  { %v1192_v18 = vadd.f32 %v2288_v20, %v1026_v16  ;;  %978 = vmatmul.bf16.gmra.mxu2 %v1612_v14 }
 0x104   :  { %1067 = vmatmul.bf16.gmra.mxu3 %v1616_v15 }
 0x105   :  { %vm1224_vm11 = vcmp.ge.f32.partialorder %v1192_v18, 0.0  ;;  %v1256_v21 = vmul.f32 0.2, %v1192_v18 }
 0x106   :  { %v939_v22 = vpop.f32.mrf.mxu2  ;;  %v763_v27 = vpop.f32.mrf.mxu0 }
 0x107   :  { %v1028_v23 = vpop.f32.mrf.mxu3  ;;  %v1288_v25 = vsel %vm1224_vm11, %v1192_v18, %v1256_v21  ;;  %v940_v26 = vadd.f32 %v939_v22, %v851_v19  ;;  %v852_v28 = vpop.f32.mrf.mxu1 }
 0x108   :  { %v1885_v29 = vpack.c.bf16 %v1288_v25, %v1287_v24  ;;  %v853_v39 = vadd.f32 %v852_v28, %v763_v27 }
 0x109   :  { %v1029_v32 = vadd.f32 %v1028_v23, %v940_v26 }
 0x10a   :  { %1941 = vst [vmem:[%s2541_s3 + $0x28] sm:$0xff] %v1885_v29  }
 0x10b   :  { %v1193_v44 = vadd.f32 %v2288_v20, %v1029_v32 }
 0x10d   :  { %v1257_v51 = vmul.f32 0.2, %v1193_v44  ;;  %vm1225_vm12 = vcmp.ge.f32.partialorder %v1193_v44, 0.0 }
 0x10e   :  { %v941_v40 = vpop.f32.mrf.mxu2  ;;  %v766_v46 = vpop.f32.mrf.mxu0 }
 0x10f   :  { %v1030_v41 = vpop.f32.mrf.mxu3  ;;  %v942_v45 = vadd.f32 %v941_v40, %v853_v39  ;;  %v855_v47 = vpop.f32.mrf.mxu1  ;;  %v1289_v57 = vsel %vm1225_vm12, %v1193_v44, %v1257_v51 }
 0x110   :  { %v856_v53 = vadd.f32 %v855_v47, %v766_v46 }
 0x111   :  { %v1031_v50 = vadd.f32 %v1030_v41, %v942_v45  ;;  %805 = vmatmul.bf16.gmra.mxu0 %v1620_v42 }
 0x112   :  { %894 = vmatmul.bf16.gmra.mxu1 %v1624_v43 }
 0x113   :  { %v1194_v52 = vadd.f32 %v2288_v20, %v1031_v50  ;;  %983 = vmatmul.bf16.gmra.mxu2 %v1628_v48 }
 0x114   :  { %1072 = vmatmul.bf16.gmra.mxu3 %v1632_v49 }
 0x115   :  { %vm1226_vm13 = vcmp.ge.f32.partialorder %v1194_v52, 0.0  ;;  %v1258_v54 = vmul.f32 0.2, %v1194_v52 }
 0x116   :  { %v944_v55 = vpop.f32.mrf.mxu2  ;;  %v768_v60 = vpop.f32.mrf.mxu0 }
 0x117   :  { %v1033_v56 = vpop.f32.mrf.mxu3  ;;  %v1290_v58 = vsel %vm1226_vm13, %v1194_v52, %v1258_v54  ;;  %v945_v59 = vadd.f32 %v944_v55, %v856_v53  ;;  %v857_v61 = vpop.f32.mrf.mxu1 }
 0x118   :  { %v1890_v62 = vpack.c.bf16 %v1290_v58, %v1289_v57  ;;  %v858_v0 = vadd.f32 %v857_v61, %v768_v60 }
 0x119   :  { %v1034_v63 = vadd.f32 %v1033_v56, %v945_v59 }
 0x11a   :  { %1942 = vst [vmem:[%s2541_s3 + $0x30] sm:$0xff] %v1890_v62  }
 0x11b   :  { %v1195_v3 = vadd.f32 %v2288_v20, %v1034_v63 }
 0x11d   :  { %v1259_v8 = vmul.f32 0.2, %v1195_v3  ;;  %vm1227_vm14 = vcmp.ge.f32.partialorder %v1195_v3, 0.0 }
 0x11e   :  { %v946_v1 = vpop.f32.mrf.mxu2  ;;  %v771_v5 = vpop.f32.mrf.mxu0 }
 0x11f   :  { %v1035_v2 = vpop.f32.mrf.mxu3  ;;  %v947_v4 = vadd.f32 %v946_v1, %v858_v0  ;;  %v860_v6 = vpop.f32.mrf.mxu1  ;;  %v1291_v14 = vsel %vm1227_vm14, %v1195_v3, %v1259_v8 }
 0x120   :  { %v861_v10 = vadd.f32 %v860_v6, %v771_v5 }
 0x121   :  { %v1036_v7 = vadd.f32 %v1035_v2, %v947_v4 }
 0x123   :  { %v1196_v9 = vadd.f32 %v2288_v20, %v1036_v7 }
 0x125   :  { %vm1228_vm15 = vcmp.ge.f32.partialorder %v1196_v9, 0.0  ;;  %v1260_v11 = vmul.f32 0.2, %v1196_v9 }
 0x126   :  { %v949_v12 = vpop.f32.mrf.mxu2  ;;  %v773_v17 = vpop.f32.mrf.mxu0 }
 0x127   :  { %v1038_v13 = vpop.f32.mrf.mxu3  ;;  %v1292_v15 = vsel %vm1228_vm15, %v1196_v9, %v1260_v11  ;;  %v950_v16 = vadd.f32 %v949_v12, %v861_v10  ;;  %v862_v18 = vpop.f32.mrf.mxu1 }
 0x128   :  { %v1895_v19 = vpack.c.bf16 %v1292_v15, %v1291_v14  ;;  %v863_v22 = vadd.f32 %v862_v18, %v773_v17 }
 0x129   :  { %v1039_v21 = vadd.f32 %v1038_v13, %v950_v16 }
 0x12a   :  { %1943 = vst [vmem:[%s2541_s3 + $0x38] sm:$0xff] %v1895_v19  }
 0x12b   :  { %v1197_v25 = vadd.f32 %v2288_v20, %v1039_v21 }
 0x12d   :  { %v1261_v30 = vmul.f32 0.2, %v1197_v25  ;;  %vm1229_vm0 = vcmp.ge.f32.partialorder %v1197_v25, 0.0 }
 0x12e   :  { %v951_v23 = vpop.f32.mrf.mxu2  ;;  %v776_v27 = vpop.f32.mrf.mxu0 }
 0x12f   :  { %v1040_v24 = vpop.f32.mrf.mxu3  ;;  %v952_v26 = vadd.f32 %v951_v23, %v863_v22  ;;  %v865_v28 = vpop.f32.mrf.mxu1  ;;  %v1293_v36 = vsel %vm1229_vm0, %v1197_v25, %v1261_v30 }
 0x130   :  { %v866_v32 = vadd.f32 %v865_v28, %v776_v27 }
 0x131   :  { %v1041_v29 = vadd.f32 %v1040_v24, %v952_v26 }
 0x133   :  { %v1198_v31 = vadd.f32 %v2288_v20, %v1041_v29 }
 0x135   :  { %vm1230_vm1 = vcmp.ge.f32.partialorder %v1198_v31, 0.0  ;;  %v1262_v33 = vmul.f32 0.2, %v1198_v31 }
 0x136   :  { %v954_v34 = vpop.f32.mrf.mxu2  ;;  %v778_v39 = vpop.f32.mrf.mxu0 }
 0x137   :  { %v1043_v35 = vpop.f32.mrf.mxu3  ;;  %v1294_v37 = vsel %vm1230_vm1, %v1198_v31, %v1262_v33  ;;  %v955_v38 = vadd.f32 %v954_v34, %v866_v32  ;;  %v867_v40 = vpop.f32.mrf.mxu1 }
 0x138   :  { %v1900_v41 = vpack.c.bf16 %v1294_v37, %v1293_v36  ;;  %v868_v43 = vadd.f32 %v867_v40, %v778_v39 }
 0x139   :  { %v1044_v42 = vadd.f32 %v1043_v35, %v955_v38 }
 0x13a   :  { %1944 = vst [vmem:[%s2541_s3 + $0x40] sm:$0xff] %v1900_v41  }
 0x13b   :  { %v1199_v46 = vadd.f32 %v2288_v20, %v1044_v42 }
 0x13d   :  { %v1263_v51 = vmul.f32 0.2, %v1199_v46  ;;  %vm1231_vm2 = vcmp.ge.f32.partialorder %v1199_v46, 0.0 }
 0x13e   :  { %v956_v44 = vpop.f32.mrf.mxu2  ;;  %v781_v48 = vpop.f32.mrf.mxu0 }
 0x13f   :  { %v1045_v45 = vpop.f32.mrf.mxu3  ;;  %v957_v47 = vadd.f32 %v956_v44, %v868_v43  ;;  %v870_v49 = vpop.f32.mrf.mxu1  ;;  %v1295_v57 = vsel %vm1231_vm2, %v1199_v46, %v1263_v51 }
 0x140   :  { %v871_v53 = vadd.f32 %v870_v49, %v781_v48 }
 0x141   :  { %v1046_v50 = vadd.f32 %v1045_v45, %v957_v47 }
 0x143   :  { %v1200_v52 = vadd.f32 %v2288_v20, %v1046_v50 }
 0x145   :  { %vm1232_vm3 = vcmp.ge.f32.partialorder %v1200_v52, 0.0  ;;  %v1264_v54 = vmul.f32 0.2, %v1200_v52 }
 0x146   :  { %v959_v55 = vpop.f32.mrf.mxu2  ;;  %v783_v60 = vpop.f32.mrf.mxu0 }
 0x147   :  { %v1048_v56 = vpop.f32.mrf.mxu3  ;;  %v1296_v58 = vsel %vm1232_vm3, %v1200_v52, %v1264_v54  ;;  %v960_v59 = vadd.f32 %v959_v55, %v871_v53  ;;  %v872_v61 = vpop.f32.mrf.mxu1 }
 0x148   :  { %v1905_v62 = vpack.c.bf16 %v1296_v58, %v1295_v57  ;;  %v873_v0 = vadd.f32 %v872_v61, %v783_v60 }
 0x149   :  { %v1049_v63 = vadd.f32 %v1048_v56, %v960_v59 }
 0x14a   :  { %1945 = vst [vmem:[%s2541_s3 + $0x48] sm:$0xff] %v1905_v62  }
 0x14b   :  { %v1201_v3 = vadd.f32 %v2288_v20, %v1049_v63 }
 0x14d   :  { %v1265_v8 = vmul.f32 0.2, %v1201_v3  ;;  %vm1233_vm4 = vcmp.ge.f32.partialorder %v1201_v3, 0.0 }
 0x14e   :  { %v961_v1 = vpop.f32.mrf.mxu2  ;;  %v786_v5 = vpop.f32.mrf.mxu0 }
 0x14f   :  { %v1050_v2 = vpop.f32.mrf.mxu3  ;;  %v962_v4 = vadd.f32 %v961_v1, %v873_v0  ;;  %v875_v6 = vpop.f32.mrf.mxu1  ;;  %v1297_v14 = vsel %vm1233_vm4, %v1201_v3, %v1265_v8 }
 0x150   :  { %v876_v10 = vadd.f32 %v875_v6, %v786_v5 }
 0x151   :  { %v1051_v7 = vadd.f32 %v1050_v2, %v962_v4 }
 0x153   :  { %v1202_v9 = vadd.f32 %v2288_v20, %v1051_v7 }
 0x155   :  { %vm1234_vm5 = vcmp.ge.f32.partialorder %v1202_v9, 0.0  ;;  %v1266_v11 = vmul.f32 0.2, %v1202_v9 }
 0x156   :  { %v964_v12 = vpop.f32.mrf.mxu2  ;;  %v788_v17 = vpop.f32.mrf.mxu0 }
 0x157   :  { %v1053_v13 = vpop.f32.mrf.mxu3  ;;  %v1298_v15 = vsel %vm1234_vm5, %v1202_v9, %v1266_v11  ;;  %v965_v16 = vadd.f32 %v964_v12, %v876_v10  ;;  %v877_v18 = vpop.f32.mrf.mxu1 }
 0x158   :  { %v1910_v19 = vpack.c.bf16 %v1298_v15, %v1297_v14  ;;  %v878_v22 = vadd.f32 %v877_v18, %v788_v17 }
 0x159   :  { %v1054_v21 = vadd.f32 %v1053_v13, %v965_v16 }
 0x15a   :  { %1946 = vst [vmem:[%s2541_s3 + $0x50] sm:$0xff] %v1910_v19  }
 0x15b   :  { %v1203_v25 = vadd.f32 %v2288_v20, %v1054_v21 }
 0x15d   :  { %v1267_v30 = vmul.f32 0.2, %v1203_v25  ;;  %vm1235_vm6 = vcmp.ge.f32.partialorder %v1203_v25, 0.0 }
 0x15e   :  { %v966_v23 = vpop.f32.mrf.mxu2  ;;  %v791_v27 = vpop.f32.mrf.mxu0 }
 0x15f   :  { %v1055_v24 = vpop.f32.mrf.mxu3  ;;  %v967_v26 = vadd.f32 %v966_v23, %v878_v22  ;;  %v880_v28 = vpop.f32.mrf.mxu1  ;;  %v1299_v36 = vsel %vm1235_vm6, %v1203_v25, %v1267_v30 }
 0x160   :  { %v881_v32 = vadd.f32 %v880_v28, %v791_v27 }
 0x161   :  { %v1056_v29 = vadd.f32 %v1055_v24, %v967_v26 }
 0x163   :  { %v1204_v31 = vadd.f32 %v2288_v20, %v1056_v29 }
 0x165   :  { %vm1236_vm7 = vcmp.ge.f32.partialorder %v1204_v31, 0.0  ;;  %v1268_v33 = vmul.f32 0.2, %v1204_v31 }
 0x166   :  { %v969_v34 = vpop.f32.mrf.mxu2  ;;  %v793_v39 = vpop.f32.mrf.mxu0 }
 0x167   :  { %v1058_v35 = vpop.f32.mrf.mxu3  ;;  %v1300_v37 = vsel %vm1236_vm7, %v1204_v31, %v1268_v33  ;;  %v970_v38 = vadd.f32 %v969_v34, %v881_v32  ;;  %v882_v40 = vpop.f32.mrf.mxu1 }
 0x168   :  { %v1915_v41 = vpack.c.bf16 %v1300_v37, %v1299_v36  ;;  %v883_v43 = vadd.f32 %v882_v40, %v793_v39 }
 0x169   :  { %v1059_v42 = vadd.f32 %v1058_v35, %v970_v38 }
 0x16a   :  { %1947 = vst [vmem:[%s2541_s3 + $0x58] sm:$0xff] %v1915_v41  }
 0x16b   :  { %v1205_v46 = vadd.f32 %v2288_v20, %v1059_v42 }
 0x16d   :  { %v1269_v51 = vmul.f32 0.2, %v1205_v46  ;;  %vm1237_vm8 = vcmp.ge.f32.partialorder %v1205_v46, 0.0 }
 0x16e   :  { %v971_v44 = vpop.f32.mrf.mxu2  ;;  %v796_v48 = vpop.f32.mrf.mxu0 }
 0x16f   :  { %v1060_v45 = vpop.f32.mrf.mxu3  ;;  %v972_v47 = vadd.f32 %v971_v44, %v883_v43  ;;  %v885_v49 = vpop.f32.mrf.mxu1  ;;  %v1301_v57 = vsel %vm1237_vm8, %v1205_v46, %v1269_v51 }
 0x170   :  { %v886_v53 = vadd.f32 %v885_v49, %v796_v48 }
 0x171   :  { %v1061_v50 = vadd.f32 %v1060_v45, %v972_v47 }
 0x173   :  { %v1206_v52 = vadd.f32 %v2288_v20, %v1061_v50 }
 0x175   :  { %vm1238_vm9 = vcmp.ge.f32.partialorder %v1206_v52, 0.0  ;;  %v1270_v54 = vmul.f32 0.2, %v1206_v52 }
 0x176   :  { %v974_v55 = vpop.f32.mrf.mxu2  ;;  %v798_v60 = vpop.f32.mrf.mxu0 }
 0x177   :  { %v1063_v56 = vpop.f32.mrf.mxu3  ;;  %v1302_v58 = vsel %vm1238_vm9, %v1206_v52, %v1270_v54  ;;  %v975_v59 = vadd.f32 %v974_v55, %v886_v53  ;;  %v887_v61 = vpop.f32.mrf.mxu1 }
 0x178   :  { %v1920_v62 = vpack.c.bf16 %v1302_v58, %v1301_v57  ;;  %v888_v0 = vadd.f32 %v887_v61, %v798_v60 }
 0x179   :  { %v1064_v63 = vadd.f32 %v1063_v56, %v975_v59 }
 0x17a   :  { %1948 = vst [vmem:[%s2541_s3 + $0x60] sm:$0xff] %v1920_v62  }
 0x17b   :  { %v1207_v3 = vadd.f32 %v2288_v20, %v1064_v63 }
 0x17d   :  { %v1271_v8 = vmul.f32 0.2, %v1207_v3  ;;  %vm1239_vm10 = vcmp.ge.f32.partialorder %v1207_v3, 0.0 }
 0x17e   :  { %v976_v1 = vpop.f32.mrf.mxu2  ;;  %v801_v5 = vpop.f32.mrf.mxu0 }
 0x17f   :  { %v1065_v2 = vpop.f32.mrf.mxu3  ;;  %v977_v4 = vadd.f32 %v976_v1, %v888_v0  ;;  %v890_v6 = vpop.f32.mrf.mxu1  ;;  %v1303_v14 = vsel %vm1239_vm10, %v1207_v3, %v1271_v8 }
 0x180   :  { %v891_v10 = vadd.f32 %v890_v6, %v801_v5 }
 0x181   :  { %v1066_v7 = vadd.f32 %v1065_v2, %v977_v4 }
 0x183   :  { %v1208_v9 = vadd.f32 %v2288_v20, %v1066_v7 }
 0x185   :  { %vm1240_vm11 = vcmp.ge.f32.partialorder %v1208_v9, 0.0  ;;  %v1272_v11 = vmul.f32 0.2, %v1208_v9 }
 0x186   :  { %v979_v12 = vpop.f32.mrf.mxu2  ;;  %v803_v17 = vpop.f32.mrf.mxu0 }
 0x187   :  { %v1068_v13 = vpop.f32.mrf.mxu3  ;;  %v1304_v15 = vsel %vm1240_vm11, %v1208_v9, %v1272_v11  ;;  %v980_v16 = vadd.f32 %v979_v12, %v891_v10  ;;  %v892_v18 = vpop.f32.mrf.mxu1 }
 0x188   :  { %v1925_v19 = vpack.c.bf16 %v1304_v15, %v1303_v14  ;;  %v893_v22 = vadd.f32 %v892_v18, %v803_v17 }
 0x189   :  { %v1069_v21 = vadd.f32 %v1068_v13, %v980_v16 }
 0x18a   :  { %1949 = vst [vmem:[%s2541_s3 + $0x68] sm:$0xff] %v1925_v19  }
 0x18b   :  { %v1209_v25 = vadd.f32 %v2288_v20, %v1069_v21 }
 0x18d   :  { %v1273_v30 = vmul.f32 0.2, %v1209_v25  ;;  %vm1241_vm12 = vcmp.ge.f32.partialorder %v1209_v25, 0.0 }
 0x18e   :  { %v981_v23 = vpop.f32.mrf.mxu2  ;;  %v806_v27 = vpop.f32.mrf.mxu0 }
 0x18f   :  { %v1070_v24 = vpop.f32.mrf.mxu3  ;;  %v982_v26 = vadd.f32 %v981_v23, %v893_v22  ;;  %v895_v28 = vpop.f32.mrf.mxu1  ;;  %v1305_v36 = vsel %vm1241_vm12, %v1209_v25, %v1273_v30 }
 0x190   :  { %v896_v32 = vadd.f32 %v895_v28, %v806_v27 }
 0x191   :  { %v1071_v29 = vadd.f32 %v1070_v24, %v982_v26 }
 0x193   :  { %v1210_v31 = vadd.f32 %v2288_v20, %v1071_v29 }
 0x195   :  { %vm1242_vm13 = vcmp.ge.f32.partialorder %v1210_v31, 0.0  ;;  %v1274_v33 = vmul.f32 0.2, %v1210_v31 }
 0x196   :  { %v984_v34 = vpop.f32.mrf.mxu2  ;;  %v808_v40 = vpop.f32.mrf.mxu0 }
 0x197   :  { %v1073_v35 = vpop.f32.mrf.mxu3  ;;  %v1306_v37 = vsel %vm1242_vm13, %v1210_v31, %v1274_v33  ;;  %v985_v38 = vadd.f32 %v984_v34, %v896_v32  ;;  %v897_v41 = vpop.f32.mrf.mxu1 }
 0x198   :  { %v1930_v39 = vpack.c.bf16 %v1306_v37, %v1305_v36  ;;  %v898_v43 = vadd.f32 %v897_v41, %v808_v40 }
 0x199   :  { %v1074_v42 = vadd.f32 %v1073_v35, %v985_v38 }
 0x19a   :  { %1950 = vst [vmem:[%s2541_s3 + $0x70] sm:$0xff] %v1930_v39  }
 0x19b   :  { %v1211_v45 = vadd.f32 %v2288_v20, %v1074_v42 }
 0x19d   :  { %v1275_v49 = vmul.f32 0.2, %v1211_v45  ;;  %vm1243_vm14 = vcmp.ge.f32.partialorder %v1211_v45, 0.0 }
 0x19e   :  { %v986_v44 = vpop.f32.mrf.mxu2 }
 0x19f   :  { %v987_v46 = vadd.f32 %v986_v44, %v898_v43  ;;  %v1075_v47 = vpop.f32.mrf.mxu3  ;;  %v1307_v52 = vsel %vm1243_vm14, %v1211_v45, %v1275_v49 }
 0x1a1   :  { %v1076_v48 = vadd.f32 %v1075_v47, %v987_v46 }
 0x1a3   :  { %v1212_v50 = vadd.f32 %v2288_v20, %v1076_v48 }
 0x1a5   :  { %vm1244_vm15 = vcmp.ge.f32.partialorder %v1212_v50, 0.0  ;;  %v1276_v51 = vmul.f32 0.2, %v1212_v50 }
 0x1a7   :  { %v1308_v53 = vsel %vm1244_vm15, %v1212_v50, %v1276_v51 }
 0x1a8   :  { %v1935_v54 = vpack.c.bf16 %v1308_v53, %v1307_v52 }
 0x1aa   :  { %1951 = vst [vmem:[%s2541_s3 + $0x78] sm:$0xff] %v1935_v54  }

// kernel: _forward.19
= control target key start
LH: loop header
LB: loop body
LE: loop exit
PB: predicated region body
PF: predicated region fallthrough
CT: control target
= control target key end

     0   :  { %s453_s6 = smov 0   ;;  %s560_s0 = inlined_call_operand.vmem [shape: bf16[4,10,10,32], index: 0, kind: input, shape index: {}]   ;;  %s561_s1 = inlined_call_operand.vmem [shape: bf16[4,8,8,32], index: 1, kind: output, shape index: {}]  }
   0x1 LB: > { %s415_s7 = sadd.s32 4294967295, %s441_s6   ;;  %p419_p0 = scmp.ge.s32.totalorder %s441_s6, 1  ;;  %s441_s6 = sphi %s453_s6, %s11_s6  }
   0x2   : > { %p87_p1 = scmp.lt.s32.totalorder %s441_s6, 5 }
   0x4   : > { %p88_p2 = pnand %p419_p0, %p87_p1 }
   0x5   : > { %p107_p3 = scmp.lt.s32.totalorder (!%p88_p2), %s415_s7, 3 }
   0x6   : > { %91 = sbr.rel (%p88_p2) target bundleno = 68 (0x44), region = 24 }
   0xb   : > { %s563_s7 = smov (!%p107_p3, %s415_s7), 3  ;;  %vm294_vm0 = vcmask 1045504   ;;  %vm237_vm1 = vcmask 1046528   ;;  %vm351_vm2 = vcmask 257024  }
   0xc   : > { %s426_s8 = smul.u32 80, %s563_s7  ;;  %s425_s12 = sshll.u32 %s563_s7, 5 }
   0xd   : > { %s513_s15 = scalar_lea.vmem %s561_s1, %s425_s12 }
   0xe   : > { %s467_s11 = scalar_lea.vmem %s560_s0, %s426_s8 }
   0xf   : > { %v117_v0 = vld [vmem:[%s467_s11] sm:$0xf]  ;;  %v118_v1 = vld [vmem:[%s467_s11 + $0x4] sm:$0x1]  ;;  %v119_v2 = vld [vmem:[%s467_s11 + $0x8] sm:$0xf] }
  0x10   : > { %v120_v3 = vld [vmem:[%s467_s11 + $0xc] sm:$0x1]  ;;  %v121_v4 = vld [vmem:[%s467_s11 + $0x10] sm:$0xf]  ;;  %v122_v5 = vld [vmem:[%s467_s11 + $0x14] sm:$0x1]  ;;  %v137_v6 = vunpack.c.l.bf16 %v117_v0  ;;  %v139_v7 = vunpack.c.l.bf16 %v119_v2  ;;  %v138_v8 = vunpack.c.l.bf16 %v118_v1 }
  0x11   : > { %v140_v9 = vunpack.c.l.bf16 %v120_v3  ;;  %v141_v10 = vunpack.c.l.bf16 %v121_v4  ;;  %v142_v11 = vunpack.c.l.bf16 %v122_v5  ;;  %v123_v12 = vld [vmem:[%s467_s11 + $0x18] sm:$0xf]  ;;  %v124_v13 = vld [vmem:[%s467_s11 + $0x1c] sm:$0x1]  ;;  %v125_v14 = vld [vmem:[%s467_s11 + $0x20] sm:$0xf] }
  0x12   : > { %v157_v15 = vmul.f32 2.0, %v139_v7  ;;  %v143_v16 = vunpack.c.l.bf16 %v123_v12  ;;  %v144_v17 = vunpack.c.l.bf16 %v124_v13  ;;  %v126_v18 = vld [vmem:[%s467_s11 + $0x24] sm:$0x1]  ;;  %v479_v19 = vunpack.c.l.bf16 %v125_v14  ;;  %v127_v20 = vld [vmem:[%s467_s11 + $0x28] sm:$0xf] }
  0x13   : > { %v158_v21 = vmul.f32 2.0, %v140_v9  ;;  %v159_v22 = vmul.f32 2.0, %v141_v10  ;;  %v160_v23 = vmul.f32 2.0, %v142_v11  ;;  %v482_v24 = vunpack.c.l.bf16 %v126_v18  ;;  %v128_v25 = vld [vmem:[%s467_s11 + $0x2c] sm:$0x1] }
  0x14   : > { %v173_v26 = vadd.f32 %v157_v15, %v137_v6  ;;  %v161_v27 = vmul.f32 2.0, %v143_v16  ;;  %v162_v28 = vmul.f32 2.0, %v144_v17  ;;  %v485_v29 = vunpack.c.l.bf16 %v127_v20  ;;  %v129_v58 = vld [vmem:[%s467_s11 + $0x30] sm:$0xf]  ;;  %v130_v63 = vld [vmem:[%s467_s11 + $0x34] sm:$0x1] }
  0x15   : > { %v174_v30 = vadd.f32 %v158_v21, %v138_v8  ;;  %v175_v31 = vadd.f32 %v159_v22, %v139_v7  ;;  %v176_v32 = vadd.f32 %v160_v23, %v140_v9  ;;  %v487_v33 = vunpack.c.l.bf16 %v128_v25 }
  0x16   : > { %v189_v34 = vadd.f32 %v173_v26, %v141_v10  ;;  %v177_v35 = vadd.f32 %v161_v27, %v141_v10  ;;  %v178_v36 = vadd.f32 %v162_v28, %v142_v11  ;;  %v163_v37 = vmul.f32 2.0, %v479_v19  ;;  %v131_v26 = vld [vmem:[%s467_s11 + $0x38] sm:$0xf] }
  0x17   : > { %v190_v38 = vadd.f32 %v174_v30, %v142_v11  ;;  %v191_v39 = vadd.f32 %v175_v31, %v143_v16  ;;  %v192_v40 = vadd.f32 %v176_v32, %v144_v17  ;;  %v164_v41 = vmul.f32 2.0, %v482_v24  ;;  %v132_v32 = vld [vmem:[%s467_s11 + $0x3c] sm:$0x1] }
  0x18   : > { %v205_v42 = vmul.f32 2.0, %v189_v34  ;;  %v295_v43 = vrot.slane %v189_v34, 2  ;;  %v193_v44 = vadd.f32 %v177_v35, %v479_v19  ;;  %v194_v45 = vadd.f32 %v178_v36, %v482_v24 }
  0x19   : > { %v206_v46 = vmul.f32 2.0, %v190_v38  ;;  %v296_v47 = vrot.slane %v190_v38, 2  ;;  %v207_v48 = vmul.f32 2.0, %v191_v39  ;;  %v208_v49 = vmul.f32 2.0, %v192_v40 }
  0x1a   : > { %v238_v50 = vrot.slane %v205_v42, 1  ;;  %v298_v51 = vrot.slane %v191_v39, 2  ;;  %v299_v52 = vrot.slane %v192_v40, 2  ;;  %v209_v53 = vmul.f32 2.0, %v193_v44  ;;  %v133_v42 = vld [vmem:[%s467_s11 + $0x40] sm:$0xf] }
  0x1b   : > { %v239_v54 = vrot.slane %v206_v46, 1  ;;  %v297_v55 = vsel %vm294_vm0, %v295_v43, %v296_v47  ;;  %v241_v56 = vrot.slane %v207_v48, 1  ;;  %v242_v57 = vrot.slane %v208_v49, 1  ;;  %v134_v49 = vld [vmem:[%s467_s11 + $0x44] sm:$0x1] }
  0x1c   : > { %v300_v59 = vsel %vm294_vm0, %v298_v51, %v299_v52  ;;  %v210_v60 = vmul.f32 2.0, %v194_v45  ;;  %v244_v61 = vrot.slane %v209_v53, 1  ;;  %v301_v62 = vrot.slane %v193_v44, 2 }
  0x1d   : > { %v240_v0 = vsel %vm237_vm1, %v238_v50, %v239_v54  ;;  %v243_v1 = vsel %vm237_vm1, %v241_v56, %v242_v57  ;;  %v302_v2 = vrot.slane %v194_v45, 2  ;;  %v179_v3 = vadd.f32 %v163_v37, %v143_v16 }
  0x1e   : > { %v270_v4 = vadd.f32 %v240_v0, %v189_v34  ;;  %v271_v5 = vadd.f32 %v243_v1, %v191_v39  ;;  %v245_v6 = vrot.slane %v210_v60, 1  ;;  %v180_v7 = vadd.f32 %v164_v41, %v144_v17  ;;  %v135_v1 = vld [vmem:[%s467_s11 + $0x48] sm:$0xf] }
  0x1f   : > { %v303_v8 = vsel %vm294_vm0, %v301_v62, %v302_v2  ;;  %v195_v9 = vadd.f32 %v179_v3, %v485_v29  ;;  %v501_v10 = vunpack.c.l.bf16 %v129_v58  ;;  %v503_v11 = vunpack.c.l.bf16 %v130_v63 }
  0x20   : > { %v327_v12 = vadd.f32 %v297_v55, %v270_v4  ;;  %v328_v13 = vadd.f32 %v300_v59, %v271_v5  ;;  %v246_v14 = vsel %vm237_vm1, %v244_v61, %v245_v6  ;;  %v196_v15 = vadd.f32 %v180_v7, %v487_v33  ;;  %v136_v5 = vld [vmem:[%s467_s11 + $0x4c] sm:$0x1] }
  0x21   : > { %v272_v16 = vadd.f32 %v246_v14, %v193_v44  ;;  %v211_v18 = vmul.f32 2.0, %v195_v9  ;;  %v304_v17 = vrot.slane %v195_v9, 2  ;;  %v165_v20 = vmul.f32 2.0, %v485_v29 }
  0x22   : > { %v335_v21 = vmul.f32 0.0625, %v327_v12  ;;  %v336_v22 = vmul.f32 0.0625, %v328_v13  ;;  %v212_v23 = vmul.f32 2.0, %v196_v15  ;;  %v305_v25 = vrot.slane %v196_v15, 2 }
  0x23   : > { %v329_v27 = vadd.f32 %v303_v8, %v272_v16  ;;  %v247_v28 = vrot.slane %v211_v18, 1  ;;  %v166_v30 = vmul.f32 2.0, %v487_v33  ;;  %v181_v31 = vadd.f32 %v165_v20, %v479_v19 }
  0x24   : > { %v343_v34 = vpack.c.bf16 %v335_v21, %v335_v21  ;;  %v344_v35 = vpack.c.bf16 %v336_v22, %v336_v22  ;;  %v248_v36 = vrot.slane %v212_v23, 1  ;;  %v306_v37 = vsel %vm294_vm0, %v304_v17, %v305_v25 }
  0x25   : > { %v337_v38 = vmul.f32 0.0625, %v329_v27  ;;  %v182_v39 = vadd.f32 %v166_v30, %v482_v24  ;;  %v197_v40 = vadd.f32 %v181_v31, %v501_v10  ;;  %v151_v41 = vunpack.c.l.bf16 %v131_v26 }
  0x26   : > { %352 = vst.msk [vmem:[%s513_s15] sm:$0xf] %vm351_vm2, %v343_v34  ;;  %v249_v19 = vsel %vm237_vm1, %v247_v28, %v248_v36  ;;  %v152_v43 = vunpack.c.l.bf16 %v132_v32  ;;  %v167_v44 = vmul.f32 2.0, %v501_v10  ;;  %v168_v45 = vmul.f32 2.0, %v503_v11 }
  0x27   : > { %353 = vst.msk [vmem:[%s513_s15 + $0x4] sm:$0xf] %vm351_vm2, %v344_v35  ;;  %v345_v46 = vpack.c.bf16 %v337_v38, %v337_v38  ;;  %v273_v47 = vadd.f32 %v249_v19, %v195_v9  ;;  %v198_v24 = vadd.f32 %v182_v39, %v503_v11  ;;  %v213_v48 = vmul.f32 2.0, %v197_v40 }
  0x28   : > { %v307_v50 = vrot.slane %v197_v40, 2  ;;  %v183_v51 = vadd.f32 %v167_v44, %v485_v29  ;;  %v184_v52 = vadd.f32 %v168_v45, %v487_v33  ;;  %v153_v53 = vunpack.c.l.bf16 %v133_v42 }
  0x29   : > { %354 = vst.msk [vmem:[%s513_s15 + $0x8] sm:$0xf] %vm351_vm2, %v345_v46  ;;  %v330_v54 = vadd.f32 %v306_v37, %v273_v47  ;;  %v214_v55 = vmul.f32 2.0, %v198_v24  ;;  %v250_v56 = vrot.slane %v213_v48, 1  ;;  %v308_v57 = vrot.slane %v198_v24, 2 }
  0x2a   : > { %v199_v58 = vadd.f32 %v183_v51, %v151_v41  ;;  %v200_v59 = vadd.f32 %v184_v52, %v152_v43  ;;  %v154_v60 = vunpack.c.l.bf16 %v134_v49  ;;  %v169_v61 = vmul.f32 2.0, %v151_v41 }
  0x2b   : > { %v338_v62 = vmul.f32 0.0625, %v330_v54  ;;  %v251_v63 = vrot.slane %v214_v55, 1  ;;  %v309_v0 = vsel %vm294_vm0, %v307_v50, %v308_v57  ;;  %v170_v29 = vmul.f32 2.0, %v152_v43 }
  0x2c   : > { %v215_v33 = vmul.f32 2.0, %v199_v58  ;;  %v216_v2 = vmul.f32 2.0, %v200_v59  ;;  %v310_v3 = vrot.slane %v199_v58, 2  ;;  %v311_v4 = vrot.slane %v200_v59, 2 }
  0x2d   : > { %v346_v6 = vpack.c.bf16 %v338_v62, %v338_v62  ;;  %v252_v7 = vsel %vm237_vm1, %v250_v56, %v251_v63  ;;  %v185_v8 = vadd.f32 %v169_v61, %v501_v10  ;;  %v186_v9 = vadd.f32 %v170_v29, %v503_v11 }
  0x2e   : > { %v274_v12 = vadd.f32 %v252_v7, %v197_v40  ;;  %v253_v13 = vrot.slane %v215_v33, 1  ;;  %v254_v14 = vrot.slane %v216_v2, 1  ;;  %v312_v15 = vsel %vm294_vm0, %v310_v3, %v311_v4 }
  0x2f   : > { %355 = vst.msk [vmem:[%s513_s15 + $0xc] sm:$0xf] %vm351_vm2, %v346_v6  ;;  %v201_v16 = vadd.f32 %v185_v8, %v153_v53  ;;  %v202_v18 = vadd.f32 %v186_v9, %v154_v60  ;;  %v155_v17 = vunpack.c.l.bf16 %v135_v1  ;;  %v156_v20 = vunpack.c.l.bf16 %v136_v5 }
  0x30   : > { %v331_v21 = vadd.f32 %v309_v0, %v274_v12  ;;  %v255_v22 = vsel %vm237_vm1, %v253_v13, %v254_v14  ;;  %v171_v23 = vmul.f32 2.0, %v153_v53  ;;  %v172_v25 = vmul.f32 2.0, %v154_v60 }
  0x31   : > { %v275_v26 = vadd.f32 %v255_v22, %v199_v58  ;;  %v217_v10 = vmul.f32 2.0, %v201_v16  ;;  %v218_v11 = vmul.f32 2.0, %v202_v18  ;;  %v313_v27 = vrot.slane %v201_v16, 2 }
  0x32   : > { %v339_v28 = vmul.f32 0.0625, %v331_v21  ;;  %v314_v30 = vrot.slane %v202_v18, 2  ;;  %v187_v31 = vadd.f32 %v171_v23, %v151_v41  ;;  %v188_v32 = vadd.f32 %v172_v25, %v152_v43 }
  0x33   : > { %v332_v34 = vadd.f32 %v312_v15, %v275_v26  ;;  %v256_v35 = vrot.slane %v217_v10, 1  ;;  %v257_v36 = vrot.slane %v218_v11, 1 }
  0x34   : > { %v347_v37 = vpack.c.bf16 %v339_v28, %v339_v28  ;;  %v203_v38 = vadd.f32 %v187_v31, %v155_v17  ;;  %v204_v39 = vadd.f32 %v188_v32, %v156_v20  ;;  %v315_v19 = vsel %vm294_vm0, %v313_v27, %v314_v30 }
  0x35   : > { %v340_v40 = vmul.f32 0.0625, %v332_v34  ;;  %v258_v42 = vsel %vm237_vm1, %v256_v35, %v257_v36 }
  0x36   : > { %356 = vst.msk [vmem:[%s513_s15 + $0x10] sm:$0xf] %vm351_vm2, %v347_v37  ;;  %v276_v44 = vadd.f32 %v258_v42, %v201_v16  ;;  %v219_v45 = vmul.f32 2.0, %v203_v38  ;;  %v220_v46 = vmul.f32 2.0, %v204_v39  ;;  %v316_v41 = vrot.slane %v203_v38, 2 }
  0x37   : > { %v348_v43 = vpack.c.bf16 %v340_v40, %v340_v40  ;;  %v317_v47 = vrot.slane %v204_v39, 2 }
  0x38   : > { %v333_v24 = vadd.f32 %v315_v19, %v276_v44  ;;  %v259_v48 = vrot.slane %v219_v45, 1  ;;  %v260_v49 = vrot.slane %v220_v46, 1 }
  0x39   : > { %357 = vst.msk [vmem:[%s513_s15 + $0x14] sm:$0xf] %vm351_vm2, %v348_v43  ;;  %v318_v52 = vsel %vm294_vm0, %v316_v41, %v317_v47 }
  0x3a   : > { %v341_v50 = vmul.f32 0.0625, %v333_v24  ;;  %v261_v51 = vsel %vm237_vm1, %v259_v48, %v260_v49 }
  0x3b   : > { %v277_v53 = vadd.f32 %v261_v51, %v203_v38 }
  0x3c   : > { %v349_v54 = vpack.c.bf16 %v341_v50, %v341_v50 }
  0x3d   : > { %v334_v55 = vadd.f32 %v318_v52, %v277_v53 }
  0x3e   : > { %358 = vst.msk [vmem:[%s513_s15 + $0x18] sm:$0xf] %vm351_vm2, %v349_v54 }
  0x3f   : > { %v342_v56 = vmul.f32 0.0625, %v334_v55 }
  0x41   : > { %v350_v57 = vpack.c.bf16 %v342_v56, %v342_v56 }
  0x43   : > { %359 = vst.msk [vmem:[%s513_s15 + $0x1c] sm:$0xf] %vm351_vm2, %v350_v57 }
  0x44 PF: > { %s11_s6 = sadd.s32 1, %s441_s6  }
  0x45   : > { %p8_p4 = scmp.ge.s32.totalorder %s11_s6, 6  }
  0x47   :  { %10 = sbr.rel (!%p8_p4) target bundleno = 1 (0x1), region = 54 }

// kernel: _forward.18
= control target key start
LH: loop header
LB: loop body
LE: loop exit
PB: predicated region body
PF: predicated region fallthrough
CT: control target
= control target key end

     0   :  { %s2193_s1 = inlined_call_operand.vmem [shape: bf16[384,128], index: 1, kind: input, shape index: {}]   ;;  %s2194_s0 = inlined_call_operand.vmem [shape: bf16[256,384], index: 0, kind: input, shape index: {}]   ;;  %s2195_s2 = inlined_call_operand.vmem [shape: f32[1,128], index: 2, kind: input, shape index: {}]   ;;  %s2196_s3 = inlined_call_operand.vmem [shape: bf16[256,128], index: 3, kind: output, shape index: {}]  }
   0x1   :  { %v1503_v0 = vld [vmem:[%s2193_s1 + $0x38] sm:$0xff]  ;;  %v1502_v3 = vld [vmem:[%s2193_s1 + $0x30] sm:$0xff]  ;;  %v1501_v6 = vld [vmem:[%s2193_s1 + $0x28] sm:$0xff] }
   0x2   :  { %v1666_v1 = vld [vmem:[%s2193_s1 + $0x78] sm:$0xff]  ;;  %594 = vmatpush.bf16.msra.mxu0 %v1503_v0  ;;  %1615 = vmatpush.bf16.msra.mxu3 %v1503_v0  ;;  %v1681_v4 = vld [vmem:[%s2193_s1 + $0x70] sm:$0xff]  ;;  %v1509_v7 = vld [vmem:[%s2193_s1 + $0x68] sm:$0xff] }
   0x3   :  { %v1671_v2 = vld [vmem:[%s2193_s1 + $0xb8] sm:$0xff]  ;;  %683 = vmatpush.bf16.msra.mxu1 %v1666_v1  ;;  %v1686_v5 = vld [vmem:[%s2193_s1 + $0xb0] sm:$0xff]  ;;  %v1699_v8 = vld [vmem:[%s2193_s1 + $0xa8] sm:$0xff] }
   0x4   :  { %772 = vmatpush.bf16.msra.mxu2 %v1671_v2  ;;  %v1500_v9 = vld [vmem:[%s2193_s1 + $0x20] sm:$0xff]  ;;  %v1499_v12 = vld [vmem:[%s2193_s1 + $0x18] sm:$0xff]  ;;  %v1498_v15 = vld [vmem:[%s2193_s1 + $0x10] sm:$0xff] }
   0x5   :  { %v1508_v10 = vld [vmem:[%s2193_s1 + $0x60] sm:$0xff]  ;;  %v1507_v13 = vld [vmem:[%s2193_s1 + $0x58] sm:$0xff]  ;;  %v1506_v16 = vld [vmem:[%s2193_s1 + $0x50] sm:$0xff] }
   0x6   :  { %595 = vmatpush.bf16.msra.mxu0 %v1502_v3  ;;  %1616 = vmatpush.bf16.msra.mxu3 %v1502_v3  ;;  %v1711_v11 = vld [vmem:[%s2193_s1 + $0xa0] sm:$0xff]  ;;  %v1723_v14 = vld [vmem:[%s2193_s1 + $0x98] sm:$0xff]  ;;  %v1735_v17 = vld [vmem:[%s2193_s1 + $0x90] sm:$0xff] }
   0x7   :  { %684 = vmatpush.bf16.msra.mxu1 %v1681_v4  ;;  %v1497_v18 = vld [vmem:[%s2193_s1 + $0x8] sm:$0xff]  ;;  %v1496_v21 = vld [vmem:[%s2193_s1] sm:$0xff]  ;;  %v1164_v29 = vld [vmem:[%s2194_s0 + $0xc] sm:$0xf0] }
   0x8   :  { %773 = vmatpush.bf16.msra.mxu2 %v1686_v5  ;;  %v1505_v19 = vld [vmem:[%s2193_s1 + $0x48] sm:$0xff]  ;;  %v1504_v22 = vld [vmem:[%s2193_s1 + $0x40] sm:$0xff]  ;;  %v1450_v31 = vld [vmem:[%s2194_s0 + $0x10] sm:$0xf0] }
   0x9   :  { %v1747_v20 = vld [vmem:[%s2193_s1 + $0x88] sm:$0xff]  ;;  %v1758_v23 = vld [vmem:[%s2193_s1 + $0x80] sm:$0xff]  ;;  %v1174_v36 = vld [vmem:[%s2194_s0 + $0x18] sm:$0xf] }
   0xa   :  { %596 = vmatpush.bf16.msra.mxu0 %v1501_v6  ;;  %1617 = vmatpush.bf16.msra.mxu3 %v1501_v6  ;;  %v1162_v24 = vld [vmem:[%s2194_s0] sm:$0xf]  ;;  %v1449_v25 = vld [vmem:[%s2194_s0 + $0x8] sm:$0xf0]  ;;  %v1448_v28 = vld [vmem:[%s2194_s0 + $0x4] sm:$0xf] }
   0xb   :  { %685 = vmatpush.bf16.msra.mxu1 %v1509_v7  ;;  %v1306_v26 = vld [vmem:[%s2194_s0 + $0x120] sm:$0xf]  ;;  %v1485_v27 = vld [vmem:[%s2194_s0 + $0x128] sm:$0xf0]  ;;  %v1170_v30 = vld [vmem:[%s2194_s0 + $0x8] sm:$0xf]  ;;  %v1163_v32 = vor.u32 %v1449_v25, %v1162_v24  ;;  %v1167_v34 = vor.u32 %v1448_v28, %v1164_v29 }
   0xc   :  { %774 = vmatpush.bf16.msra.mxu2 %v1699_v8  ;;  %v1307_v33 = vor.u32 %v1485_v27, %v1306_v26  ;;  %v1171_v35 = vor.u32 %v1450_v31, %v1170_v30  ;;  %v1452_v37 = vld [vmem:[%s2194_s0 + $0x20] sm:$0xf0]  ;;  %v1318_v38 = vld [vmem:[%s2194_s0 + $0x138] sm:$0xf]  ;;  %v1451_v40 = vld [vmem:[%s2194_s0 + $0x1c] sm:$0xf] }
   0xd   :  { %v1488_v39 = vld [vmem:[%s2194_s0 + $0x140] sm:$0xf0]  ;;  %v1176_v41 = vld [vmem:[%s2194_s0 + $0x24] sm:$0xf0]  ;;  %v1182_v42 = vld [vmem:[%s2194_s0 + $0x20] sm:$0xf]  ;;  %v1175_v44 = vor.u32 %v1452_v37, %v1174_v36 }
   0xe   :  { %597 = vmatpush.bf16.msra.mxu0 %v1500_v9  ;;  %1618 = vmatpush.bf16.msra.mxu3 %v1500_v9  ;;  %v1453_v43 = vld [vmem:[%s2194_s0 + $0x28] sm:$0xf0]  ;;  %v1319_v45 = vor.u32 %v1488_v39, %v1318_v38  ;;  %v1179_v46 = vor.u32 %v1451_v40, %v1176_v41  ;;  %v1186_v48 = vld [vmem:[%s2194_s0 + $0x30] sm:$0xf]  ;;  %v1455_v49 = vld [vmem:[%s2194_s0 + $0x38] sm:$0xf0] }
   0xf   :  { %686 = vmatpush.bf16.msra.mxu1 %v1508_v10  ;;  %v1183_v47 = vor.u32 %v1453_v43, %v1182_v42  ;;  %v1330_v50 = vld [vmem:[%s2194_s0 + $0x150] sm:$0xf]  ;;  %v1491_v51 = vld [vmem:[%s2194_s0 + $0x158] sm:$0xf0]  ;;  %v1454_v52 = vld [vmem:[%s2194_s0 + $0x34] sm:$0xf]  ;;  %v1187_v56 = vor.u32 %v1455_v49, %v1186_v48 }
  0x10   :  { %775 = vmatpush.bf16.msra.mxu2 %v1711_v11  ;;  %v1188_v53 = vld [vmem:[%s2194_s0 + $0x3c] sm:$0xf0]  ;;  %v1194_v54 = vld [vmem:[%s2194_s0 + $0x38] sm:$0xf]  ;;  %v1456_v55 = vld [vmem:[%s2194_s0 + $0x40] sm:$0xf0]  ;;  %v1331_v57 = vor.u32 %v1491_v51, %v1330_v50 }
  0x11   :  { %v1191_v58 = vor.u32 %v1454_v52, %v1188_v53  ;;  %v1195_v59 = vor.u32 %v1456_v55, %v1194_v54  ;;  %v1198_v60 = vld [vmem:[%s2194_s0 + $0x48] sm:$0xf]  ;;  %v1458_v61 = vld [vmem:[%s2194_s0 + $0x50] sm:$0xf0]  ;;  %v1457_v0 = vld [vmem:[%s2194_s0 + $0x4c] sm:$0xf] }
  0x12   :  { %598 = vmatpush.bf16.msra.mxu0 %v1499_v12  ;;  %1619 = vmatpush.bf16.msra.mxu3 %v1499_v12  ;;  %v1342_v62 = vld [vmem:[%s2194_s0 + $0x168] sm:$0xf]  ;;  %v1494_v63 = vld [vmem:[%s2194_s0 + $0x170] sm:$0xf0]  ;;  %v1459_v3 = vld [vmem:[%s2194_s0 + $0x58] sm:$0xf0] }
  0x13   :  { %687 = vmatpush.bf16.msra.mxu1 %v1507_v13  ;;  %v1461_v9 = vld [vmem:[%s2194_s0 + $0x68] sm:$0xf0]  ;;  %v1308_v12 = vld [vmem:[%s2194_s0 + $0x12c] sm:$0xf0]  ;;  %v1320_v24 = vld [vmem:[%s2194_s0 + $0x144] sm:$0xf0] }
  0x14   :  { %776 = vmatpush.bf16.msra.mxu2 %v1723_v14  ;;  %v1224_v25 = vld [vmem:[%s2194_s0 + $0x84] sm:$0xf0]  ;;  %v1230_v26 = vld [vmem:[%s2194_s0 + $0x80] sm:$0xf]  ;;  %v1465_v27 = vld [vmem:[%s2194_s0 + $0x88] sm:$0xf0] }
  0x15   :  { %v1231_v31 = vor.u32 %v1465_v27, %v1230_v26  ;;  %v1332_v36 = vld [vmem:[%s2194_s0 + $0x15c] sm:$0xf0]  ;;  %v1242_v38 = vld [vmem:[%s2194_s0 + $0x98] sm:$0xf]  ;;  %v1468_v39 = vld [vmem:[%s2194_s0 + $0xa0] sm:$0xf0] }
  0x16   :  { %599 = vmatpush.bf16.msra.mxu0 %v1498_v15  ;;  %1620 = vmatpush.bf16.msra.mxu3 %v1498_v15  ;;  %v1462_v15 = vld [vmem:[%s2194_s0 + $0x70] sm:$0xf0]  ;;  %v1236_v37 = vld [vmem:[%s2194_s0 + $0x9c] sm:$0xf0]  ;;  %v1243_v43 = vor.u32 %v1468_v39, %v1242_v38  ;;  %v1344_v48 = vld [vmem:[%s2194_s0 + $0x174] sm:$0xf0] }
  0x17   :  { %688 = vmatpush.bf16.msra.mxu1 %v1506_v16  ;;  %v1248_v49 = vld [vmem:[%s2194_s0 + $0xb4] sm:$0xf0]  ;;  %v1254_v50 = vld [vmem:[%s2194_s0 + $0xb0] sm:$0xf]  ;;  %v1471_v51 = vld [vmem:[%s2194_s0 + $0xb8] sm:$0xf0] }
  0x18   :  { %777 = vmatpush.bf16.msra.mxu2 %v1735_v17  ;;  %v1255_v55 = vor.u32 %v1471_v51, %v1254_v50  ;;  %v1290_v50 = vld [vmem:[%s2194_s0 + $0xf8] sm:$0xf]  ;;  %v1480_v51 = vld [vmem:[%s2194_s0 + $0x100] sm:$0xf0] }
  0x1a   :  { %600 = vmatpush.bf16.msra.mxu0 %v1497_v18  ;;  %1621 = vmatpush.bf16.msra.mxu3 %v1497_v18 }
  0x1b   :  { %689 = vmatpush.bf16.msra.mxu1 %v1505_v19 }
  0x1c   :  { %778 = vmatpush.bf16.msra.mxu2 %v1747_v20 }
  0x1e   :  { %601 = vmatpush.bf16.msra.mxu0 %v1496_v21  ;;  %1622 = vmatpush.bf16.msra.mxu3 %v1496_v21  ;;  %v1464_v21 = vld [vmem:[%s2194_s0 + $0x80] sm:$0xf0] }
  0x1f   :  { %690 = vmatpush.bf16.msra.mxu1 %v1504_v22 }
  0x20   :  { %779 = vmatpush.bf16.msra.mxu2 %v1758_v23 }
  0x21   :  { %602 = vmatmul.bf16.vlgmr.msra.gmra.mxu0 %v1163_v32  ;;  %662 = vmatmul.bf16.vlgmr.msra.gmra.mxu3 %v1307_v33  ;;  %v1234_v32 = vld [vmem:[%s2194_s0 + $0x90] sm:$0xf]  ;;  %v1467_v33 = vld [vmem:[%s2194_s0 + $0x98] sm:$0xf0] }
  0x22   :  { %1623 = vmatpush.bf16.msrb.mxu3 %v1666_v1  ;;  %691 = vmatmul.bf16.vlgmr.msra.gmra.mxu1 %v1167_v34  ;;  %v1200_v1 = vld [vmem:[%s2194_s0 + $0x54] sm:$0xf0]  ;;  %v1466_v34 = vld [vmem:[%s2194_s0 + $0x94] sm:$0xf]  ;;  %v1235_v40 = vor.u32 %v1467_v33, %v1234_v32 }
  0x23   :  { %780 = vmatmul.bf16.vlgmr.msra.gmra.mxu2 %v1171_v35  ;;  %v1203_v6 = vor.u32 %v1457_v0, %v1200_v1  ;;  %v1490_v35 = vld [vmem:[%s2194_s0 + $0x154] sm:$0xf]  ;;  %v1239_v42 = vor.u32 %v1466_v34, %v1236_v37 }
  0x24   :  { %v1335_v41 = vor.u32 %v1490_v35, %v1332_v36 }
  0x26   :  { %1624 = vmatpush.bf16.msrb.mxu3 %v1681_v4  ;;  %v1199_v4 = vor.u32 %v1458_v61, %v1198_v60  ;;  %v1486_v60 = vld [vmem:[%s2194_s0 + $0x130] sm:$0xf0]  ;;  %v1260_v61 = vld [vmem:[%s2194_s0 + $0xcc] sm:$0xf0] }
  0x2a   :  { %1625 = vmatpush.bf16.msrb.mxu3 %v1509_v7 }
  0x2e   :  { %1626 = vmatpush.bf16.msrb.mxu3 %v1508_v10  ;;  %v1460_v10 = vld [vmem:[%s2194_s0 + $0x64] sm:$0xf] }
  0x31   :  { %607 = vmatmul.bf16.gmra.mxu0 %v1175_v44  ;;  %667 = vmatmul.bf16.gmra.mxu3 %v1319_v45  ;;  %v1246_v44 = vld [vmem:[%s2194_s0 + $0xa8] sm:$0xf]  ;;  %v1470_v45 = vld [vmem:[%s2194_s0 + $0xb0] sm:$0xf0] }
  0x32   :  { %1627 = vmatpush.bf16.msrb.mxu3 %v1507_v13  ;;  %696 = vmatmul.bf16.gmra.mxu1 %v1179_v46  ;;  %v1212_v13 = vld [vmem:[%s2194_s0 + $0x6c] sm:$0xf0]  ;;  %v1469_v46 = vld [vmem:[%s2194_s0 + $0xac] sm:$0xf]  ;;  %v1247_v52 = vor.u32 %v1470_v45, %v1246_v44  ;;  %v1479_v45 = vld [vmem:[%s2194_s0 + $0xf8] sm:$0xf0] }
  0x33   :  { %785 = vmatmul.bf16.gmra.mxu2 %v1183_v47  ;;  %v1215_v18 = vor.u32 %v1460_v10, %v1212_v13  ;;  %v1493_v47 = vld [vmem:[%s2194_s0 + $0x16c] sm:$0xf]  ;;  %v1251_v54 = vor.u32 %v1469_v46, %v1248_v49  ;;  %v1270_v13 = vld [vmem:[%s2194_s0 + $0xd8] sm:$0xf]  ;;  %v1282_v44 = vld [vmem:[%s2194_s0 + $0xf0] sm:$0xf] }
  0x34   :  { %v1347_v53 = vor.u32 %v1493_v47, %v1344_v48  ;;  %v1478_v46 = vld [vmem:[%s2194_s0 + $0xf4] sm:$0xf]  ;;  %v1338_v47 = vld [vmem:[%s2194_s0 + $0x158] sm:$0xf]  ;;  %v1492_v48 = vld [vmem:[%s2194_s0 + $0x160] sm:$0xf0] }
  0x35   :  { %v1284_v49 = vld [vmem:[%s2194_s0 + $0xfc] sm:$0xf0] }
  0x36   :  { %1628 = vmatpush.bf16.msrb.mxu3 %v1506_v16 }
  0x3a   :  { %1629 = vmatpush.bf16.msrb.mxu3 %v1505_v19 }
  0x3e   :  { %1630 = vmatpush.bf16.msrb.mxu3 %v1504_v22  ;;  %v1463_v22 = vld [vmem:[%s2194_s0 + $0x7c] sm:$0xf] }
  0x3f   :  { %v1227_v30 = vor.u32 %v1463_v22, %v1224_v25 }
  0x41   :  { %612 = vmatmul.bf16.gmra.mxu0 %v1187_v56  ;;  %672 = vmatmul.bf16.gmra.mxu3 %v1331_v57  ;;  %v1258_v56 = vld [vmem:[%s2194_s0 + $0xc0] sm:$0xf]  ;;  %v1473_v57 = vld [vmem:[%s2194_s0 + $0xc8] sm:$0xf0] }
  0x42   :  { %1631 = vmatpush.bf16.msra.mxu3 %v1671_v2  ;;  %701 = vmatmul.bf16.gmra.mxu1 %v1191_v58  ;;  %v1206_v2 = vld [vmem:[%s2194_s0 + $0x50] sm:$0xf]  ;;  %v1472_v58 = vld [vmem:[%s2194_s0 + $0xc4] sm:$0xf]  ;;  %v1259_v0 = vor.u32 %v1473_v57, %v1258_v56  ;;  %v1283_v56 = vor.u32 %v1479_v45, %v1282_v44  ;;  %v1339_v57 = vor.u32 %v1492_v48, %v1338_v47 }
  0x43   :  { %790 = vmatmul.bf16.gmra.mxu2 %v1195_v59  ;;  %v1207_v7 = vor.u32 %v1459_v3, %v1206_v2  ;;  %v1314_v59 = vld [vmem:[%s2194_s0 + $0x128] sm:$0xf]  ;;  %v1263_v3 = vor.u32 %v1472_v58, %v1260_v61  ;;  %v1291_v61 = vor.u32 %v1480_v51, %v1290_v50 }
  0x44   :  { %v1315_v1 = vor.u32 %v1486_v60, %v1314_v59  ;;  %v1287_v60 = vor.u32 %v1478_v46, %v1284_v49 }
  0x46   :  { %1632 = vmatpush.bf16.msra.mxu3 %v1686_v5  ;;  %v1343_v5 = vor.u32 %v1494_v63, %v1342_v62  ;;  %v1266_v62 = vld [vmem:[%s2194_s0 + $0xc8] sm:$0xf]  ;;  %v1474_v63 = vld [vmem:[%s2194_s0 + $0xd0] sm:$0xf0] }
  0x4a   :  { %1633 = vmatpush.bf16.msra.mxu3 %v1699_v8  ;;  %v1210_v8 = vld [vmem:[%s2194_s0 + $0x60] sm:$0xf] }
  0x4b   :  { %v1211_v16 = vor.u32 %v1461_v9, %v1210_v8 }
  0x4e   :  { %1634 = vmatpush.bf16.msra.mxu3 %v1711_v11  ;;  %v1484_v11 = vld [vmem:[%s2194_s0 + $0x124] sm:$0xf] }
  0x51   :  { %617 = vmatmul.bf16.gmra.mxu0 %v1199_v4  ;;  %677 = vmatmul.bf16.gmra.mxu3 %v1343_v5  ;;  %v1267_v4 = vor.u32 %v1474_v63, %v1266_v62 }
  0x52   :  { %1635 = vmatpush.bf16.msra.mxu3 %v1723_v14  ;;  %706 = vmatmul.bf16.gmra.mxu1 %v1203_v6  ;;  %v1218_v14 = vld [vmem:[%s2194_s0 + $0x68] sm:$0xf] }
  0x53   :  { %795 = vmatmul.bf16.gmra.mxu2 %v1207_v7  ;;  %v1219_v19 = vor.u32 %v1462_v15, %v1218_v14  ;;  %v1476_v14 = vld [vmem:[%s2194_s0 + $0xe0] sm:$0xf0]  ;;  %v1475_v15 = vld [vmem:[%s2194_s0 + $0xdc] sm:$0xf] }
  0x54   :  { %v1271_v25 = vor.u32 %v1476_v14, %v1270_v13  ;;  %v1294_v13 = vld [vmem:[%s2194_s0 + $0x108] sm:$0xf]  ;;  %v1482_v14 = vld [vmem:[%s2194_s0 + $0x110] sm:$0xf0] }
  0x56   :  { %1636 = vmatpush.bf16.msra.mxu3 %v1735_v17  ;;  %v1311_v17 = vor.u32 %v1484_v11, %v1308_v12  ;;  %v1993_v12 = vld [vmem:[%s2195_s2] ss:$0 sm:$0xff] }
  0x5a   :  { %1637 = vmatpush.bf16.msra.mxu3 %v1747_v20  ;;  %v1222_v20 = vld [vmem:[%s2194_s0 + $0x78] sm:$0xf] }
  0x5b   :  { %v1223_v28 = vor.u32 %v1464_v21, %v1222_v20  ;;  %v1477_v20 = vld [vmem:[%s2194_s0 + $0xe8] sm:$0xf0] }
  0x5e   :  { %1638 = vmatpush.bf16.msra.mxu3 %v1758_v23  ;;  %v1487_v23 = vld [vmem:[%s2194_s0 + $0x13c] sm:$0xf] }
  0x5f   :  { %v1323_v29 = vor.u32 %v1487_v23, %v1320_v24 }
  0x61   :  { %622 = vmatmul.bf16.gmra.mxu0 %v1211_v16  ;;  %751 = vmatmul.bf16.vlgmr.msrb.gmra.mxu3 %v1311_v17  ;;  %v1326_v16 = vld [vmem:[%s2194_s0 + $0x140] sm:$0xf]  ;;  %v1489_v17 = vld [vmem:[%s2194_s0 + $0x148] sm:$0xf0] }
  0x62   :  { %711 = vmatmul.bf16.gmra.mxu1 %v1215_v18  ;;  %v1272_v18 = vld [vmem:[%s2194_s0 + $0xe4] sm:$0xf0]  ;;  %v1327_v26 = vor.u32 %v1489_v17, %v1326_v16  ;;  %v1350_v16 = vld [vmem:[%s2194_s0 + $0x170] sm:$0xf]  ;;  %v1495_v17 = vld [vmem:[%s2194_s0 + $0x178] sm:$0xf0] }
  0x63   :  { %800 = vmatmul.bf16.gmra.mxu2 %v1219_v19  ;;  %v1278_v19 = vld [vmem:[%s2194_s0 + $0xe0] sm:$0xf] }
  0x71   :  { %627 = vmatmul.bf16.gmra.mxu0 %v1223_v28  ;;  %756 = vmatmul.bf16.gmra.mxu3 %v1323_v29  ;;  %v1275_v29 = vor.u32 %v1475_v15, %v1272_v18  ;;  %v1481_v15 = vld [vmem:[%s2194_s0 + $0x10c] sm:$0xf]  ;;  %v1296_v18 = vld [vmem:[%s2194_s0 + $0x114] sm:$0xf0] }
  0x72   :  { %716 = vmatmul.bf16.gmra.mxu1 %v1227_v30  ;;  %v1279_v30 = vor.u32 %v1477_v20, %v1278_v19  ;;  %v1302_v19 = vld [vmem:[%s2194_s0 + $0x110] sm:$0xf]  ;;  %v1483_v20 = vld [vmem:[%s2194_s0 + $0x118] sm:$0xf0] }
  0x73   :  { %805 = vmatmul.bf16.gmra.mxu2 %v1231_v31 }
  0x81   :  { %632 = vmatmul.bf16.gmra.mxu0 %v1235_v40  ;;  %761 = vmatmul.bf16.gmra.mxu3 %v1335_v41 }
  0x82   :  { %721 = vmatmul.bf16.gmra.mxu1 %v1239_v42 }
  0x83   :  { %810 = vmatmul.bf16.gmra.mxu2 %v1243_v43 }
  0x91   :  { %637 = vmatmul.bf16.gmra.mxu0 %v1247_v52  ;;  %766 = vmatmul.bf16.gmra.mxu3 %v1347_v53 }
  0x92   :  { %726 = vmatmul.bf16.gmra.mxu1 %v1251_v54 }
  0x93   :  { %815 = vmatmul.bf16.gmra.mxu2 %v1255_v55 }
  0x9e   :  { %v603_v2 = vpop.f32.mrf.mxu0 }
  0x9f   :  { %v692_v5 = vpop.f32.mrf.mxu1 }
  0xa0   :  { %v693_v6 = vadd.f32 %v692_v5, %v603_v2 }
  0xa1   :  { %642 = vmatmul.bf16.gmra.mxu0 %v1259_v0  ;;  %840 = vmatmul.bf16.vlgmr.msra.gmra.mxu3 %v1315_v1 }
  0xa2   :  { %731 = vmatmul.bf16.gmra.mxu1 %v1263_v3 }
  0xa3   :  { %820 = vmatmul.bf16.gmra.mxu2 %v1267_v4 }
  0xa4   :  { %v1988_v7 = vpop.f32.mrf.mxu3 }
  0xa6   :  { %v781_v8 = vpop.f32.mrf.mxu2  ;;  %v605_v9 = vpop.f32.mrf.mxu0 }
  0xa7   :  { %v694_v10 = vpop.f32.mrf.mxu1  ;;  %v782_v11 = vadd.f32 %v781_v8, %v693_v6 }
  0xa8   :  { %v695_v22 = vadd.f32 %v694_v10, %v605_v9 }
  0xa9   :  { %v964_v21 = vadd.f32 %v1993_v12, %v782_v11 }
  0xab   :  { %v1028_v32 = vmul.f32 0.2, %v964_v21  ;;  %vm996_vm0 = vcmp.ge.f32.partialorder %v964_v21, 0.0 }
  0xac   :  { %v2020_v23 = vpop.f32.mrf.mxu3 }
  0xad   :  { %v1060_v35 = vsel %vm996_vm0, %v964_v21, %v1028_v32 }
  0xae   :  { %v783_v24 = vpop.f32.mrf.mxu2  ;;  %v608_v28 = vpop.f32.mrf.mxu0 }
  0xaf   :  { %v784_v27 = vadd.f32 %v783_v24, %v695_v22  ;;  %v697_v31 = vpop.f32.mrf.mxu1 }
  0xb0   :  { %v698_v37 = vadd.f32 %v697_v31, %v608_v28  ;;  %v1303_v31 = vor.u32 %v1483_v20, %v1302_v19 }
  0xb1   :  { %v965_v33 = vadd.f32 %v1993_v12, %v784_v27  ;;  %647 = vmatmul.bf16.gmra.mxu0 %v1271_v25  ;;  %845 = vmatmul.bf16.gmra.mxu3 %v1327_v26  ;;  %v1295_v26 = vor.u32 %v1482_v14, %v1294_v13  ;;  %v1351_v27 = vor.u32 %v1495_v17, %v1350_v16 }
  0xb2   :  { %736 = vmatmul.bf16.gmra.mxu1 %v1275_v29 }
  0xb3   :  { %vm997_vm1 = vcmp.ge.f32.partialorder %v965_v33, 0.0  ;;  %v1029_v34 = vmul.f32 0.2, %v965_v33  ;;  %825 = vmatmul.bf16.gmra.mxu2 %v1279_v30  ;;  %v1299_v30 = vor.u32 %v1481_v15, %v1296_v18 }
  0xb4   :  { %v2023_v38 = vpop.f32.mrf.mxu3 }
  0xb5   :  { %v1061_v36 = vsel %vm997_vm1, %v965_v33, %v1029_v34 }
  0xb6   :  { %v1523_v39 = vpack.c.bf16 %v1061_v36, %v1060_v35  ;;  %v786_v40 = vpop.f32.mrf.mxu2  ;;  %v610_v41 = vpop.f32.mrf.mxu0 }
  0xb7   :  { %v699_v42 = vpop.f32.mrf.mxu1  ;;  %v787_v43 = vadd.f32 %v786_v40, %v698_v37 }
  0xb8   :  { %1524 = vst [vmem:[%s2196_s3] sm:$0xff] %v1523_v39   ;;  %v700_v53 = vadd.f32 %v699_v42, %v610_v41 }
  0xb9   :  { %v966_v52 = vadd.f32 %v1993_v12, %v787_v43 }
  0xbb   :  { %v1030_v63 = vmul.f32 0.2, %v966_v52  ;;  %vm998_vm2 = vcmp.ge.f32.partialorder %v966_v52, 0.0 }
  0xbc   :  { %v2053_v54 = vpop.f32.mrf.mxu3 }
  0xbd   :  { %v1062_v2 = vsel %vm998_vm2, %v966_v52, %v1030_v63 }
  0xbe   :  { %v788_v55 = vpop.f32.mrf.mxu2  ;;  %v613_v59 = vpop.f32.mrf.mxu0 }
  0xbf   :  { %v789_v58 = vadd.f32 %v788_v55, %v700_v53  ;;  %v702_v62 = vpop.f32.mrf.mxu1 }
  0xc0   :  { %v703_v4 = vadd.f32 %v702_v62, %v613_v59 }
  0xc1   :  { %v967_v0 = vadd.f32 %v1993_v12, %v789_v58  ;;  %652 = vmatmul.bf16.gmra.mxu0 %v1283_v56  ;;  %850 = vmatmul.bf16.gmra.mxu3 %v1339_v57 }
  0xc2   :  { %741 = vmatmul.bf16.gmra.mxu1 %v1287_v60 }
  0xc3   :  { %vm999_vm3 = vcmp.ge.f32.partialorder %v967_v0, 0.0  ;;  %v1031_v1 = vmul.f32 0.2, %v967_v0  ;;  %830 = vmatmul.bf16.gmra.mxu2 %v1291_v61 }
  0xc4   :  { %v2056_v5 = vpop.f32.mrf.mxu3 }
  0xc5   :  { %v1063_v3 = vsel %vm999_vm3, %v967_v0, %v1031_v1 }
  0xc6   :  { %v1528_v6 = vpack.c.bf16 %v1063_v3, %v1062_v2  ;;  %v791_v8 = vpop.f32.mrf.mxu2  ;;  %v615_v9 = vpop.f32.mrf.mxu0 }
  0xc7   :  { %v704_v10 = vpop.f32.mrf.mxu1  ;;  %v792_v11 = vadd.f32 %v791_v8, %v703_v4 }
  0xc8   :  { %1600 = vst [vmem:[%s2196_s3 + $0x8] sm:$0xff] %v1528_v6   ;;  %v705_v22 = vadd.f32 %v704_v10, %v615_v9 }
  0xc9   :  { %v968_v21 = vadd.f32 %v1993_v12, %v792_v11 }
  0xcb   :  { %v1032_v33 = vmul.f32 0.2, %v968_v21  ;;  %vm1000_vm4 = vcmp.ge.f32.partialorder %v968_v21, 0.0 }
  0xcc   :  { %v2086_v24 = vpop.f32.mrf.mxu3 }
  0xcd   :  { %v1064_v36 = vsel %vm1000_vm4, %v968_v21, %v1032_v33 }
  0xce   :  { %v793_v25 = vpop.f32.mrf.mxu2  ;;  %v618_v29 = vpop.f32.mrf.mxu0 }
  0xcf   :  { %v794_v28 = vadd.f32 %v793_v25, %v705_v22  ;;  %v707_v32 = vpop.f32.mrf.mxu1 }
  0xd0   :  { %v708_v39 = vadd.f32 %v707_v32, %v618_v29 }
  0xd1   :  { %v969_v34 = vadd.f32 %v1993_v12, %v794_v28  ;;  %657 = vmatmul.bf16.gmra.mxu0 %v1295_v26  ;;  %855 = vmatmul.bf16.gmra.mxu3 %v1351_v27 }
  0xd2   :  { %746 = vmatmul.bf16.gmra.mxu1 %v1299_v30 }
  0xd3   :  { %vm1001_vm5 = vcmp.ge.f32.partialorder %v969_v34, 0.0  ;;  %v1033_v35 = vmul.f32 0.2, %v969_v34  ;;  %835 = vmatmul.bf16.gmra.mxu2 %v1303_v31 }
  0xd4   :  { %v2089_v40 = vpop.f32.mrf.mxu3 }
  0xd5   :  { %v1065_v37 = vsel %vm1001_vm5, %v969_v34, %v1033_v35 }
  0xd6   :  { %v1533_v41 = vpack.c.bf16 %v1065_v37, %v1064_v36  ;;  %v796_v42 = vpop.f32.mrf.mxu2  ;;  %v620_v43 = vpop.f32.mrf.mxu0 }
  0xd7   :  { %v709_v44 = vpop.f32.mrf.mxu1  ;;  %v797_v45 = vadd.f32 %v796_v42, %v708_v39 }
  0xd8   :  { %1601 = vst [vmem:[%s2196_s3 + $0x10] sm:$0xff] %v1533_v41   ;;  %v710_v47 = vadd.f32 %v709_v44, %v620_v43 }
  0xd9   :  { %v970_v46 = vadd.f32 %v1993_v12, %v797_v45 }
  0xdb   :  { %v1034_v53 = vmul.f32 0.2, %v970_v46  ;;  %vm1002_vm6 = vcmp.ge.f32.partialorder %v970_v46, 0.0 }
  0xdc   :  { %v2095_v48 = vpop.f32.mrf.mxu3 }
  0xdd   :  { %v1066_v57 = vsel %vm1002_vm6, %v970_v46, %v1034_v53 }
  0xde   :  { %v798_v49 = vpop.f32.mrf.mxu2  ;;  %v623_v51 = vpop.f32.mrf.mxu0 }
  0xdf   :  { %v799_v50 = vadd.f32 %v798_v49, %v710_v47  ;;  %v712_v52 = vpop.f32.mrf.mxu1 }
  0xe0   :  { %v713_v59 = vadd.f32 %v712_v52, %v623_v51 }
  0xe1   :  { %v971_v55 = vadd.f32 %v1993_v12, %v799_v50 }
  0xe3   :  { %vm1003_vm7 = vcmp.ge.f32.partialorder %v971_v55, 0.0  ;;  %v1035_v56 = vmul.f32 0.2, %v971_v55 }
  0xe4   :  { %v752_v60 = vpop.f32.mrf.mxu3 }
  0xe5   :  { %v1067_v58 = vsel %vm1003_vm7, %v971_v55, %v1035_v56  ;;  %v2099_v62 = vadd.f32 %v752_v60, %v1988_v7 }
  0xe6   :  { %v1538_v61 = vpack.c.bf16 %v1067_v58, %v1066_v57  ;;  %v801_v63 = vpop.f32.mrf.mxu2  ;;  %v625_v0 = vpop.f32.mrf.mxu0 }
  0xe7   :  { %v714_v1 = vpop.f32.mrf.mxu1  ;;  %v802_v2 = vadd.f32 %v801_v63, %v713_v59 }
  0xe8   :  { %1602 = vst [vmem:[%s2196_s3 + $0x18] sm:$0xff] %v1538_v61   ;;  %v715_v4 = vadd.f32 %v714_v1, %v625_v0 }
  0xe9   :  { %v972_v3 = vadd.f32 %v1993_v12, %v802_v2 }
  0xeb   :  { %v1036_v13 = vmul.f32 0.2, %v972_v3  ;;  %vm1004_vm8 = vcmp.ge.f32.partialorder %v972_v3, 0.0 }
  0xec   :  { %v2105_v6 = vpop.f32.mrf.mxu3 }
  0xed   :  { %v1068_v15 = vsel %vm1004_vm8, %v972_v3, %v1036_v13 }
  0xee   :  { %v803_v8 = vpop.f32.mrf.mxu2  ;;  %v628_v10 = vpop.f32.mrf.mxu0 }
  0xef   :  { %v804_v9 = vadd.f32 %v803_v8, %v715_v4  ;;  %v717_v11 = vpop.f32.mrf.mxu1 }
  0xf0   :  { %v718_v17 = vadd.f32 %v717_v11, %v628_v10 }
  0xf1   :  { %v973_v7 = vadd.f32 %v1993_v12, %v804_v9 }
  0xf3   :  { %vm1005_vm9 = vcmp.ge.f32.partialorder %v973_v7, 0.0  ;;  %v1037_v14 = vmul.f32 0.2, %v973_v7 }
  0xf4   :  { %v757_v18 = vpop.f32.mrf.mxu3 }
  0xf5   :  { %v1069_v16 = vsel %vm1005_vm9, %v973_v7, %v1037_v14  ;;  %v2109_v20 = vadd.f32 %v757_v18, %v2023_v38 }
  0xf6   :  { %v1543_v19 = vpack.c.bf16 %v1069_v16, %v1068_v15  ;;  %v806_v21 = vpop.f32.mrf.mxu2  ;;  %v630_v22 = vpop.f32.mrf.mxu0 }
  0xf7   :  { %v719_v25 = vpop.f32.mrf.mxu1  ;;  %v807_v26 = vadd.f32 %v806_v21, %v718_v17 }
  0xf8   :  { %1603 = vst [vmem:[%s2196_s3 + $0x20] sm:$0xff] %v1543_v19   ;;  %v720_v28 = vadd.f32 %v719_v25, %v630_v22 }
  0xf9   :  { %v974_v27 = vadd.f32 %v1993_v12, %v807_v26 }
  0xfb   :  { %v1038_v34 = vmul.f32 0.2, %v974_v27  ;;  %vm1006_vm10 = vcmp.ge.f32.partialorder %v974_v27, 0.0 }
  0xfc   :  { %v2115_v29 = vpop.f32.mrf.mxu3 }
  0xfd   :  { %v1070_v36 = vsel %vm1006_vm10, %v974_v27, %v1038_v34 }
  0xfe   :  { %v808_v30 = vpop.f32.mrf.mxu2  ;;  %v633_v32 = vpop.f32.mrf.mxu0 }
  0xff   :  { %v809_v31 = vadd.f32 %v808_v30, %v720_v28  ;;  %v722_v33 = vpop.f32.mrf.mxu1 }
 0x100   :  { %v723_v39 = vadd.f32 %v722_v33, %v633_v32  ;;  %v755_v32 = vadd.f32 %v2105_v6, %v2020_v23 }
 0x101   :  { %v975_v38 = vadd.f32 %v1993_v12, %v809_v31 }
 0x103   :  { %vm1007_vm11 = vcmp.ge.f32.partialorder %v975_v38, 0.0  ;;  %v1039_v35 = vmul.f32 0.2, %v975_v38 }
 0x104   :  { %v762_v41 = vpop.f32.mrf.mxu3 }
 0x105   :  { %v1071_v37 = vsel %vm1007_vm11, %v975_v38, %v1039_v35  ;;  %v2119_v43 = vadd.f32 %v762_v41, %v2056_v5 }
 0x106   :  { %v1548_v42 = vpack.c.bf16 %v1071_v37, %v1070_v36  ;;  %v811_v44 = vpop.f32.mrf.mxu2  ;;  %v635_v45 = vpop.f32.mrf.mxu0 }
 0x107   :  { %v724_v46 = vpop.f32.mrf.mxu1  ;;  %v812_v47 = vadd.f32 %v811_v44, %v723_v39 }
 0x108   :  { %1604 = vst [vmem:[%s2196_s3 + $0x28] sm:$0xff] %v1548_v42   ;;  %v725_v50 = vadd.f32 %v724_v46, %v635_v45 }
 0x109   :  { %v976_v49 = vadd.f32 %v1993_v12, %v812_v47 }
 0x10b   :  { %v1040_v57 = vmul.f32 0.2, %v976_v49  ;;  %vm1008_vm12 = vcmp.ge.f32.partialorder %v976_v49, 0.0 }
 0x10c   :  { %v2125_v51 = vpop.f32.mrf.mxu3 }
 0x10d   :  { %v1072_v59 = vsel %vm1008_vm12, %v976_v49, %v1040_v57 }
 0x10e   :  { %v813_v52 = vpop.f32.mrf.mxu2  ;;  %v638_v55 = vpop.f32.mrf.mxu0 }
 0x10f   :  { %v814_v53 = vadd.f32 %v813_v52, %v725_v50  ;;  %v727_v56 = vpop.f32.mrf.mxu1 }
 0x110   :  { %v728_v61 = vadd.f32 %v727_v56, %v638_v55 }
 0x111   :  { %v977_v5 = vadd.f32 %v1993_v12, %v814_v53 }
 0x113   :  { %vm1009_vm13 = vcmp.ge.f32.partialorder %v977_v5, 0.0  ;;  %v1041_v58 = vmul.f32 0.2, %v977_v5 }
 0x114   :  { %v767_v63 = vpop.f32.mrf.mxu3 }
 0x115   :  { %v1073_v60 = vsel %vm1009_vm13, %v977_v5, %v1041_v58  ;;  %v2129_v1 = vadd.f32 %v767_v63, %v2089_v40  ;;  %v760_v63 = vadd.f32 %v2115_v29, %v2053_v54 }
 0x116   :  { %v1553_v0 = vpack.c.bf16 %v1073_v60, %v1072_v59  ;;  %v816_v2 = vpop.f32.mrf.mxu2  ;;  %v640_v3 = vpop.f32.mrf.mxu0 }
 0x117   :  { %v729_v4 = vpop.f32.mrf.mxu1  ;;  %v817_v8 = vadd.f32 %v816_v2, %v728_v61 }
 0x118   :  { %1605 = vst [vmem:[%s2196_s3 + $0x30] sm:$0xff] %v1553_v0   ;;  %v730_v10 = vadd.f32 %v729_v4, %v640_v3 }
 0x119   :  { %v978_v9 = vadd.f32 %v1993_v12, %v817_v8 }
 0x11b   :  { %v1042_v16 = vmul.f32 0.2, %v978_v9  ;;  %vm1010_vm14 = vcmp.ge.f32.partialorder %v978_v9, 0.0 }
 0x11c   :  { %v2135_v11 = vpop.f32.mrf.mxu3 }
 0x11d   :  { %v1074_v18 = vsel %vm1010_vm14, %v978_v9, %v1042_v16 }
 0x11e   :  { %v818_v13 = vpop.f32.mrf.mxu2  ;;  %v643_v14 = vpop.f32.mrf.mxu0 }
 0x11f   :  { %v819_v7 = vadd.f32 %v818_v13, %v730_v10  ;;  %v732_v15 = vpop.f32.mrf.mxu1 }
 0x120   :  { %v733_v21 = vadd.f32 %v732_v15, %v643_v14 }
 0x121   :  { %v979_v40 = vadd.f32 %v1993_v12, %v819_v7 }
 0x123   :  { %vm1011_vm15 = vcmp.ge.f32.partialorder %v979_v40, 0.0  ;;  %v1043_v17 = vmul.f32 0.2, %v979_v40 }
 0x124   :  { %v841_v22 = vpop.f32.mrf.mxu3 }
 0x125   :  { %v1075_v19 = vsel %vm1011_vm15, %v979_v40, %v1043_v17  ;;  %v842_v28 = vadd.f32 %v841_v22, %v2099_v62 }
 0x126   :  { %v1558_v25 = vpack.c.bf16 %v1075_v19, %v1074_v18  ;;  %v821_v26 = vpop.f32.mrf.mxu2  ;;  %v645_v27 = vpop.f32.mrf.mxu0 }
 0x127   :  { %v734_v30 = vpop.f32.mrf.mxu1  ;;  %v822_v31 = vadd.f32 %v821_v26, %v733_v21  ;;  %v988_v33 = vadd.f32 %v1993_v12, %v842_v28 }
 0x128   :  { %1606 = vst [vmem:[%s2196_s3 + $0x38] sm:$0xff] %v1558_v25   ;;  %v735_v38 = vadd.f32 %v734_v30, %v645_v27 }
 0x129   :  { %v980_v34 = vadd.f32 %v1993_v12, %v822_v31  ;;  %v1052_v42 = vmul.f32 0.2, %v988_v33  ;;  %vm1020_vm0 = vcmp.ge.f32.partialorder %v988_v33, 0.0 }
 0x12b   :  { %v1044_v62 = vmul.f32 0.2, %v980_v34  ;;  %vm1012_vm1 = vcmp.ge.f32.partialorder %v980_v34, 0.0  ;;  %v1084_v47 = vsel %vm1020_vm0, %v988_v33, %v1052_v42  ;;  %v765_v33 = vadd.f32 %v2125_v51, %v2086_v24 }
 0x12c   :  { %v843_v35 = vpop.f32.mrf.mxu3 }
 0x12d   :  { %v844_v37 = vadd.f32 %v843_v35, %v755_v32  ;;  %v1076_v50 = vsel %vm1012_vm1, %v980_v34, %v1044_v62 }
 0x12e   :  { %v823_v36 = vpop.f32.mrf.mxu2  ;;  %v648_v41 = vpop.f32.mrf.mxu0 }
 0x12f   :  { %v824_v39 = vadd.f32 %v823_v36, %v735_v38  ;;  %v989_v44 = vadd.f32 %v1993_v12, %v844_v37  ;;  %v737_v45 = vpop.f32.mrf.mxu1 }
 0x130   :  { %v738_v55 = vadd.f32 %v737_v45, %v648_v41 }
 0x131   :  { %v981_v46 = vadd.f32 %v1993_v12, %v824_v39  ;;  %vm1021_vm2 = vcmp.ge.f32.partialorder %v989_v44, 0.0  ;;  %v1053_v23 = vmul.f32 0.2, %v989_v44 }
 0x133   :  { %vm1013_vm3 = vcmp.ge.f32.partialorder %v981_v46, 0.0  ;;  %v1045_v6 = vmul.f32 0.2, %v981_v46  ;;  %v1085_v49 = vsel %vm1021_vm2, %v989_v44, %v1053_v23 }
 0x134   :  { %v1583_v53 = vpack.c.bf16 %v1085_v49, %v1084_v47  ;;  %v846_v56 = vpop.f32.mrf.mxu3 }
 0x135   :  { %v1077_v52 = vsel %vm1013_vm3, %v981_v46, %v1045_v6  ;;  %v847_v59 = vadd.f32 %v846_v56, %v2109_v20 }
 0x136   :  { %v1563_v57 = vpack.c.bf16 %v1077_v52, %v1076_v50  ;;  %v826_v5 = vpop.f32.mrf.mxu2  ;;  %1611 = vst [vmem:[%s2196_s3 + $0x60] sm:$0xff] %v1583_v53   ;;  %v650_v58 = vpop.f32.mrf.mxu0 }
 0x137   :  { %v739_v60 = vpop.f32.mrf.mxu1  ;;  %v827_v61 = vadd.f32 %v826_v5, %v738_v55  ;;  %v990_v0 = vadd.f32 %v1993_v12, %v847_v59 }
 0x138   :  { %1607 = vst [vmem:[%s2196_s3 + $0x40] sm:$0xff] %v1563_v57   ;;  %v740_v3 = vadd.f32 %v739_v60, %v650_v58  ;;  %v770_v60 = vadd.f32 %v2135_v11, %v2095_v48 }
 0x139   :  { %v982_v2 = vadd.f32 %v1993_v12, %v827_v61  ;;  %v1054_v7 = vmul.f32 0.2, %v990_v0  ;;  %vm1022_vm4 = vcmp.ge.f32.partialorder %v990_v0, 0.0 }
 0x13b   :  { %v1046_v20 = vmul.f32 0.2, %v982_v2  ;;  %vm1014_vm5 = vcmp.ge.f32.partialorder %v982_v2, 0.0  ;;  %v1086_v40 = vsel %vm1022_vm4, %v990_v0, %v1054_v7 }
 0x13c   :  { %v848_v4 = vpop.f32.mrf.mxu3 }
 0x13d   :  { %v849_v9 = vadd.f32 %v848_v4, %v760_v63  ;;  %v1078_v18 = vsel %vm1014_vm5, %v982_v2, %v1046_v20 }
 0x13e   :  { %v828_v8 = vpop.f32.mrf.mxu2  ;;  %v653_v13 = vpop.f32.mrf.mxu0 }
 0x13f   :  { %v829_v10 = vadd.f32 %v828_v8, %v740_v3  ;;  %v991_v14 = vadd.f32 %v1993_v12, %v849_v9  ;;  %v742_v15 = vpop.f32.mrf.mxu1 }
 0x140   :  { %v743_v22 = vadd.f32 %v742_v15, %v653_v13 }
 0x141   :  { %v983_v16 = vadd.f32 %v1993_v12, %v829_v10  ;;  %vm1023_vm6 = vcmp.ge.f32.partialorder %v991_v14, 0.0  ;;  %v1055_v54 = vmul.f32 0.2, %v991_v14 }
 0x143   :  { %vm1015_vm7 = vcmp.ge.f32.partialorder %v983_v16, 0.0  ;;  %v1047_v29 = vmul.f32 0.2, %v983_v16  ;;  %v1087_v17 = vsel %vm1023_vm6, %v991_v14, %v1055_v54 }
 0x144   :  { %v1588_v21 = vpack.c.bf16 %v1087_v17, %v1086_v40  ;;  %v851_v25 = vpop.f32.mrf.mxu3 }
 0x145   :  { %v1079_v19 = vsel %vm1015_vm7, %v983_v16, %v1047_v29  ;;  %v852_v30 = vadd.f32 %v851_v25, %v2119_v43 }
 0x146   :  { %v1568_v26 = vpack.c.bf16 %v1079_v19, %v1078_v18  ;;  %v831_v27 = vpop.f32.mrf.mxu2  ;;  %1612 = vst [vmem:[%s2196_s3 + $0x68] sm:$0xff] %v1588_v21   ;;  %v655_v28 = vpop.f32.mrf.mxu0 }
 0x147   :  { %v744_v31 = vpop.f32.mrf.mxu1  ;;  %v832_v32 = vadd.f32 %v831_v27, %v743_v22  ;;  %v992_v34 = vadd.f32 %v1993_v12, %v852_v30 }
 0x148   :  { %1608 = vst [vmem:[%s2196_s3 + $0x48] sm:$0xff] %v1568_v26   ;;  %v745_v35 = vadd.f32 %v744_v31, %v655_v28 }
 0x149   :  { %v984_v38 = vadd.f32 %v1993_v12, %v832_v32  ;;  %v1056_v42 = vmul.f32 0.2, %v992_v34  ;;  %vm1024_vm8 = vcmp.ge.f32.partialorder %v992_v34, 0.0 }
 0x14b   :  { %v1048_v43 = vmul.f32 0.2, %v984_v38  ;;  %vm1016_vm9 = vcmp.ge.f32.partialorder %v984_v38, 0.0  ;;  %v1088_v23 = vsel %vm1024_vm8, %v992_v34, %v1056_v42 }
 0x14c   :  { %v853_v36 = vpop.f32.mrf.mxu3 }
 0x14d   :  { %v854_v39 = vadd.f32 %v853_v36, %v765_v33  ;;  %v1080_v47 = vsel %vm1016_vm9, %v984_v38, %v1048_v43 }
 0x14e   :  { %v833_v37 = vpop.f32.mrf.mxu2  ;;  %v658_v45 = vpop.f32.mrf.mxu0 }
 0x14f   :  { %v834_v41 = vadd.f32 %v833_v37, %v745_v35  ;;  %v993_v44 = vadd.f32 %v1993_v12, %v854_v39  ;;  %v747_v62 = vpop.f32.mrf.mxu1 }
 0x150   :  { %v748_v52 = vadd.f32 %v747_v62, %v658_v45 }
 0x151   :  { %v985_v46 = vadd.f32 %v1993_v12, %v834_v41  ;;  %vm1025_vm10 = vcmp.ge.f32.partialorder %v993_v44, 0.0  ;;  %v1057_v24 = vmul.f32 0.2, %v993_v44 }
 0x153   :  { %vm1017_vm11 = vcmp.ge.f32.partialorder %v985_v46, 0.0  ;;  %v1049_v51 = vmul.f32 0.2, %v985_v46  ;;  %v1089_v6 = vsel %vm1025_vm10, %v993_v44, %v1057_v24 }
 0x154   :  { %v1593_v50 = vpack.c.bf16 %v1089_v6, %v1088_v23  ;;  %v856_v53 = vpop.f32.mrf.mxu3 }
 0x155   :  { %v1081_v49 = vsel %vm1017_vm11, %v985_v46, %v1049_v51  ;;  %v857_v57 = vadd.f32 %v856_v53, %v2129_v1 }
 0x156   :  { %v1573_v55 = vpack.c.bf16 %v1081_v49, %v1080_v47  ;;  %v836_v56 = vpop.f32.mrf.mxu2  ;;  %1613 = vst [vmem:[%s2196_s3 + $0x70] sm:$0xff] %v1593_v50   ;;  %v660_v58 = vpop.f32.mrf.mxu0 }
 0x157   :  { %v837_v5 = vadd.f32 %v836_v56, %v748_v52  ;;  %v749_v59 = vpop.f32.mrf.mxu1  ;;  %v994_v61 = vadd.f32 %v1993_v12, %v857_v57 }
 0x158   :  { %1609 = vst [vmem:[%s2196_s3 + $0x50] sm:$0xff] %v1573_v55   ;;  %v750_v0 = vadd.f32 %v749_v59, %v660_v58 }
 0x159   :  { %v986_v63 = vadd.f32 %v1993_v12, %v837_v5  ;;  %v1058_v9 = vmul.f32 0.2, %v994_v61  ;;  %vm1026_vm12 = vcmp.ge.f32.partialorder %v994_v61, 0.0 }
 0x15b   :  { %v1050_v13 = vmul.f32 0.2, %v986_v63  ;;  %vm1018_vm13 = vcmp.ge.f32.partialorder %v986_v63, 0.0  ;;  %v1090_v11 = vsel %vm1026_vm12, %v994_v61, %v1058_v9 }
 0x15c   :  { %v858_v2 = vpop.f32.mrf.mxu3 }
 0x15d   :  { %v859_v4 = vadd.f32 %v858_v2, %v770_v60  ;;  %v1082_v15 = vsel %vm1018_vm13, %v986_v63, %v1050_v13 }
 0x15e   :  { %v838_v3 = vpop.f32.mrf.mxu2 }
 0x15f   :  { %v839_v8 = vadd.f32 %v838_v3, %v750_v0  ;;  %v995_v10 = vadd.f32 %v1993_v12, %v859_v4 }
 0x161   :  { %v987_v1 = vadd.f32 %v1993_v12, %v839_v8  ;;  %vm1027_vm14 = vcmp.ge.f32.partialorder %v995_v10, 0.0  ;;  %v1059_v7 = vmul.f32 0.2, %v995_v10 }
 0x163   :  { %vm1019_vm15 = vcmp.ge.f32.partialorder %v987_v1, 0.0  ;;  %v1051_v48 = vmul.f32 0.2, %v987_v1  ;;  %v1091_v14 = vsel %vm1027_vm14, %v995_v10, %v1059_v7 }
 0x164   :  { %v1598_v16 = vpack.c.bf16 %v1091_v14, %v1090_v11 }
 0x165   :  { %v1083_v20 = vsel %vm1019_vm15, %v987_v1, %v1051_v48 }
 0x166   :  { %v1578_v54 = vpack.c.bf16 %v1083_v20, %v1082_v15  ;;  %1614 = vst [vmem:[%s2196_s3 + $0x78] sm:$0xff] %v1598_v16  }
 0x168   :  { %1610 = vst [vmem:[%s2196_s3 + $0x58] sm:$0xff] %v1578_v54  }

// kernel: _forward.21
= control target key start
LH: loop header
LB: loop body
LE: loop exit
PB: predicated region body
PF: predicated region fallthrough
CT: control target
= control target key end

     0   :  { %6 = vsyncpa [#allocation3], 0  ;;  %vm49_vm0 = vcmask 1040384   ;;  %v306_v20 = vmov 4.0   ;;  %vm97_vm2 = vcmask 1042434   ;;  %vm99_vm3 = vcmask 1041408   ;;  %s405_s0 = inlined_call_operand.vmem [shape: f32[4,1,512], index: 0, kind: input, shape index: {}]   ;;  %s406_s1 = inlined_call_operand.hbm [shape: f32[1,1,1], index: 1, kind: output, shape index: {}]  }
   0x1   :  { %v322_v0 = vld [vmem:[%s405_s0] sm:$0xf]  ;;  %v327_v1 = vld [vmem:[%s405_s0 + $0x4] sm:$0xf]  ;;  %v334_v4 = vld [vmem:[%s405_s0 + $0x8] sm:$0xf]  ;;  %268 = vrcp.f32 %v306_v20 }
   0x2   :  { %v17_v2 = vperm.slane %v322_v0, 0  ;;  %v18_v3 = vperm.slane %v322_v0, 1  ;;  %v19_v5 = vperm.slane %v322_v0, 2  ;;  %v20_v6 = vperm.slane %v322_v0, 3  ;;  %v12_v16 = vld [vmem:[%s405_s0 + $0xc] sm:$0xf] }
   0x3   :  { %v21_v7 = vperm.slane %v327_v1, 0  ;;  %v22_v8 = vperm.slane %v327_v1, 1  ;;  %v23_v9 = vperm.slane %v327_v1, 2  ;;  %v24_v10 = vperm.slane %v327_v1, 3  ;;  %s308_s0 = smov [#allocation2]   ;;  %s256_s17 = sshll.u32 %s406_s1, 4  ;;  %s257_s17 = int_to_ptr.hbm [resolvable:$true] %s256_s17 }
   0x4   :  { %v25_v11 = vperm.slane %v334_v4, 0  ;;  %v26_v12 = vperm.slane %v334_v4, 1  ;;  %v27_v13 = vperm.slane %v334_v4, 2  ;;  %v28_v14 = vperm.slane %v334_v4, 3  ;;  %s254_s14 = sshll.u32 %s308_s0, 4  ;;  %s255_s14 = int_to_ptr.vmem [resolvable:$true] %s254_s14 }
   0x5   :  { %v50_v15 = vsel %vm49_vm0, %v17_v2, 0.0  ;;  %v51_v17 = vsel %vm49_vm0, %v21_v7, 0.0  ;;  %v57_v18 = vsel %vm49_vm0, %v18_v3, 0.0  ;;  %v58_v19 = vsel %vm49_vm0, %v22_v8, 0.0 }
   0x6   :  { %v64_v21 = vsel %vm49_vm0, %v19_v5, 0.0  ;;  %v65_v22 = vsel %vm49_vm0, %v23_v9, 0.0  ;;  %v71_v23 = vsel %vm49_vm0, %v20_v6, 0.0  ;;  %v72_v24 = vsel %vm49_vm0, %v24_v10, 0.0 }
   0x7   :  { %v29_v25 = vperm.slane %v12_v16, 0  ;;  %v30_v26 = vperm.slane %v12_v16, 1  ;;  %v31_v27 = vperm.slane %v12_v16, 2  ;;  %v52_v28 = vadd.f32 %v51_v17, %v50_v15  ;;  %v269_v37 = vpop.eup %268 }
   0x8   :  { %v53_v29 = vsel %vm49_vm0, %v25_v11, 0.0  ;;  %v59_v30 = vadd.f32 %v58_v19, %v57_v18  ;;  %v66_v31 = vadd.f32 %v65_v22, %v64_v21  ;;  %v73_v32 = vadd.f32 %v72_v24, %v71_v23 }
   0x9   :  { %v32_v33 = vperm.slane %v12_v16, 3  ;;  %v60_v34 = vsel %vm49_vm0, %v26_v12, 0.0  ;;  %v67_v35 = vsel %vm49_vm0, %v27_v13, 0.0  ;;  %v74_v36 = vsel %vm49_vm0, %v28_v14, 0.0 }
   0xa   :  { %v54_v38 = vadd.f32 %v53_v29, %v52_v28  ;;  %v79_v39 = vmul.f32 4.0, %v269_v37  ;;  %v55_v40 = vsel %vm49_vm0, %v29_v25, 0.0  ;;  %v61_v41 = vadd.f32 %v60_v34, %v59_v30 }
   0xb   :  { %v68_v42 = vadd.f32 %v67_v35, %v66_v31  ;;  %v75_v43 = vadd.f32 %v74_v36, %v73_v32  ;;  %v62_v44 = vsel %vm49_vm0, %v30_v26, 0.0  ;;  %v69_v45 = vsel %vm49_vm0, %v31_v27, 0.0 }
   0xc   :  { %v76_v46 = vsel %vm49_vm0, %v32_v33, 0.0  ;;  %v80_v47 = vsub.f32 1.0, %v79_v39  ;;  %v56_v48 = vadd.f32 %v55_v40, %v54_v38  ;;  %v63_v50 = vadd.f32 %v62_v44, %v61_v41 }
   0xd   :  { %v70_v51 = vadd.f32 %v69_v45, %v68_v42  ;;  %v77_v52 = vadd.f32 %v76_v46, %v75_v43  ;;  %vm83_vm1 = vweird.f32 %v269_v37  ;;  %vm247_vm13 = vcmask 0  }
   0xe   :  { %v81_v49 = vmul.f32 %v269_v37, %v80_v47 }
  0x10   :  { %v82_v53 = vadd.f32 %v269_v37, %v81_v49 }
  0x12   :  { %v365_v54 = vsel %vm83_vm1, %v269_v37, %v82_v53 }
  0x13   :  { %v85_v55 = vmul.f32 %v365_v54, %v56_v48  ;;  %v86_v56 = vmul.f32 %v365_v54, %v63_v50  ;;  %v87_v57 = vmul.f32 %v365_v54, %v70_v51  ;;  %v88_v58 = vmul.f32 %v365_v54, %v77_v52 }
  0x15   :  { %v93_v59 = vrot.slane %v86_v56, 7  ;;  %v94_v60 = vrot.slane %v87_v57, 6  ;;  %v95_v61 = vrot.slane %v88_v58, 5 }
  0x17   :  { %v96_v62 = vsel %vm49_vm0, %v85_v55, %v93_v59  ;;  %v98_v63 = vsel %vm97_vm2, %v94_v60, %v95_v61 }
  0x18   :  { %v100_v2 = vsel %vm99_vm3, %v96_v62, %v98_v63 }
  0x19   :  { %v102_v3 = vsub.f32 %v322_v0, %v100_v2  ;;  %v103_v5 = vsub.f32 %v327_v1, %v100_v2  ;;  %v104_v6 = vsub.f32 %v334_v4, %v100_v2  ;;  %v105_v7 = vsub.f32 %v12_v16, %v100_v2 }
  0x1b   :  { %v106_v8 = vmul.f32 %v102_v3, %v102_v3  ;;  %v107_v9 = vmul.f32 %v103_v5, %v103_v5  ;;  %v108_v10 = vmul.f32 %v104_v6, %v104_v6  ;;  %v109_v11 = vmul.f32 %v105_v7, %v105_v7 }
  0x1d   :  { %v114_v12 = vperm.slane %v106_v8, 0  ;;  %v115_v13 = vperm.slane %v106_v8, 1  ;;  %v116_v14 = vperm.slane %v106_v8, 2  ;;  %v117_v15 = vperm.slane %v106_v8, 3 }
  0x1e   :  { %v118_v17 = vperm.slane %v107_v9, 0  ;;  %v119_v18 = vperm.slane %v107_v9, 1  ;;  %v120_v19 = vperm.slane %v107_v9, 2  ;;  %v121_v20 = vperm.slane %v107_v9, 3 }
  0x1f   :  { %v122_v21 = vperm.slane %v108_v10, 0  ;;  %v123_v22 = vperm.slane %v108_v10, 1  ;;  %v124_v0 = vperm.slane %v108_v10, 2  ;;  %v125_v23 = vperm.slane %v108_v10, 3 }
  0x20   :  { %v126_v1 = vperm.slane %v109_v11, 0  ;;  %v127_v24 = vperm.slane %v109_v11, 1  ;;  %v128_v4 = vperm.slane %v109_v11, 2  ;;  %v129_v16 = vperm.slane %v109_v11, 3 }
  0x21   :  { %v146_v25 = vsel %vm49_vm0, %v114_v12, 0.0  ;;  %v147_v26 = vsel %vm49_vm0, %v118_v17, 0.0  ;;  %v149_v27 = vsel %vm49_vm0, %v122_v21, 0.0  ;;  %v153_v28 = vsel %vm49_vm0, %v115_v13, 0.0 }
  0x22   :  { %v148_v29 = vadd.f32 %v147_v26, %v146_v25  ;;  %v151_v30 = vsel %vm49_vm0, %v126_v1, 0.0  ;;  %v154_v31 = vsel %vm49_vm0, %v119_v18, 0.0  ;;  %v156_v32 = vsel %vm49_vm0, %v123_v22, 0.0 }
  0x23   :  { %v155_v33 = vadd.f32 %v154_v31, %v153_v28  ;;  %v158_v34 = vsel %vm49_vm0, %v127_v24, 0.0  ;;  %v160_v35 = vsel %vm49_vm0, %v116_v14, 0.0  ;;  %v161_v36 = vsel %vm49_vm0, %v120_v19, 0.0 }
  0x24   :  { %v150_v37 = vadd.f32 %v149_v27, %v148_v29  ;;  %v162_v38 = vadd.f32 %v161_v36, %v160_v35  ;;  %v163_v39 = vsel %vm49_vm0, %v124_v0, 0.0  ;;  %v165_v40 = vsel %vm49_vm0, %v128_v4, 0.0 }
  0x25   :  { %v157_v41 = vadd.f32 %v156_v32, %v155_v33  ;;  %v167_v42 = vsel %vm49_vm0, %v117_v15, 0.0  ;;  %v168_v43 = vsel %vm49_vm0, %v121_v20, 0.0  ;;  %v170_v44 = vsel %vm49_vm0, %v125_v23, 0.0 }
  0x26   :  { %v152_v45 = vadd.f32 %v151_v30, %v150_v37  ;;  %v164_v46 = vadd.f32 %v163_v39, %v162_v38  ;;  %v169_v47 = vadd.f32 %v168_v43, %v167_v42  ;;  %v172_v49 = vsel %vm49_vm0, %v129_v16, 0.0 }
  0x27   :  { %v159_v48 = vadd.f32 %v158_v34, %v157_v41 }
  0x28   :  { %v166_v50 = vadd.f32 %v165_v40, %v164_v46  ;;  %v171_v51 = vadd.f32 %v170_v44, %v169_v47  ;;  %v174_v52 = vmul.f32 %v152_v45, %v365_v54  ;;  %v307_v44 = vmov 512.0  }
  0x29   :  { %v175_v53 = vmul.f32 %v159_v48, %v365_v54 }
  0x2a   :  { %v173_v55 = vadd.f32 %v172_v49, %v171_v51  ;;  %v176_v56 = vmul.f32 %v166_v50, %v365_v54  ;;  %v178_v57 = vadd.f32 1e-08, %v174_v52 }
  0x2b   :  { %v179_v58 = vadd.f32 1e-08, %v175_v53 }
  0x2c   :  { %v177_v59 = vmul.f32 %v173_v55, %v365_v54  ;;  %v180_v60 = vadd.f32 1e-08, %v176_v56  ;;  %270 = vrsqrt.f32 %v178_v57  ;;  %vm189_vm4 = vcmp.eq.f32.partialorder %v178_v57, inf }
  0x2d   :  { %272 = vrsqrt.f32 %v179_v58  ;;  %vm191_vm5 = vcmp.eq.f32.partialorder %v178_v57, 0.0  ;;  %v192_v21 = vand.u32 2147483648, %v178_v57  ;;  %vm201_vm6 = vcmp.eq.f32.partialorder %v179_v58, inf }
  0x2e   :  { %v181_v61 = vadd.f32 1e-08, %v177_v59  ;;  %274 = vrsqrt.f32 %v180_v60  ;;  %vm203_vm7 = vcmp.eq.f32.partialorder %v179_v58, 0.0  ;;  %v204_v23 = vand.u32 2147483648, %v179_v58 }
  0x2f   :  { %vm213_vm8 = vcmp.eq.f32.partialorder %v180_v60, inf  ;;  %vm215_vm9 = vcmp.eq.f32.partialorder %v180_v60, 0.0  ;;  %v216_v16 = vand.u32 2147483648, %v180_v60 }
  0x30   :  { %276 = vrsqrt.f32 %v181_v61  ;;  %vm225_vm10 = vcmp.eq.f32.partialorder %v181_v61, inf  ;;  %vm227_vm11 = vcmp.eq.f32.partialorder %v181_v61, 0.0  ;;  %v228_v30 = vand.u32 2147483648, %v181_v61 }
  0x31   :  { %278 = vrcp.f32 %v307_v44 }
  0x32   :  { %v271_v62 = vpop.eup %270 }
  0x33   :  { %v273_v63 = vpop.eup %272  ;;  %v183_v2 = vmul.f32 %v271_v62, %v178_v57 }
  0x34   :  { %v275_v3 = vpop.eup %274  ;;  %v195_v5 = vmul.f32 %v273_v63, %v179_v58 }
  0x35   :  { %v184_v6 = vmul.f32 %v271_v62, %v183_v2  ;;  %v207_v7 = vmul.f32 %v275_v3, %v180_v60 }
  0x36   :  { %v277_v8 = vpop.eup %276  ;;  %v196_v9 = vmul.f32 %v273_v63, %v195_v5 }
  0x37   :  { %v185_v10 = vmul.f32 0.5, %v184_v6  ;;  %v208_v11 = vmul.f32 %v275_v3, %v207_v7  ;;  %v219_v12 = vmul.f32 %v277_v8, %v181_v61  ;;  %v279_v45 = vpop.eup %278 }
  0x38   :  { %v197_v13 = vmul.f32 0.5, %v196_v9  ;;  %v240_v46 = vmul.f32 512.0, %v279_v45  ;;  %vm244_vm12 = vweird.f32 %v279_v45 }
  0x39   :  { %v186_v54 = vsub.f32 1.5, %v185_v10  ;;  %v209_v14 = vmul.f32 0.5, %v208_v11  ;;  %v220_v15 = vmul.f32 %v277_v8, %v219_v12 }
  0x3a   :  { %v198_v17 = vsub.f32 1.5, %v197_v13  ;;  %v241_v47 = vsub.f32 1.0, %v240_v46 }
  0x3b   :  { %v187_v18 = vmul.f32 %v271_v62, %v186_v54  ;;  %v210_v19 = vsub.f32 1.5, %v209_v14  ;;  %v221_v20 = vmul.f32 0.5, %v220_v15 }
  0x3c   :  { %v199_v22 = vmul.f32 %v273_v63, %v198_v17  ;;  %v242_v48 = vmul.f32 %v279_v45, %v241_v47 }
  0x3d   :  { %v188_v0 = vmul.f32 %v187_v18, %v178_v57  ;;  %v211_v1 = vmul.f32 %v275_v3, %v210_v19  ;;  %v222_v24 = vsub.f32 1.5, %v221_v20 }
  0x3e   :  { %v200_v4 = vmul.f32 %v199_v22, %v179_v58  ;;  %v243_v49 = vadd.f32 %v279_v45, %v242_v48 }
  0x3f   :  { %v190_v25 = vsel %vm189_vm4, %v178_v57, %v188_v0  ;;  %v212_v26 = vmul.f32 %v211_v1, %v180_v60  ;;  %v223_v27 = vmul.f32 %v277_v8, %v222_v24 }
  0x40   :  { %v193_v28 = vsel %vm191_vm5, %v192_v21, %v190_v25  ;;  %v202_v29 = vsel %vm201_vm6, %v179_v58, %v200_v4  ;;  %v245_v50 = vsel %vm244_vm12, %v279_v45, %v243_v49 }
  0x41   :  { %v205_v31 = vsel %vm203_vm7, %v204_v23, %v202_v29  ;;  %v214_v32 = vsel %vm213_vm8, %v180_v60, %v212_v26  ;;  %v224_v33 = vmul.f32 %v223_v27, %v181_v61  ;;  %v230_v34 = vsel %vm49_vm0, %v193_v28, 0.0 }
  0x42   :  { %v217_v35 = vsel %vm215_vm9, %v216_v16, %v214_v32  ;;  %v231_v36 = vsel %vm49_vm0, %v205_v31, 0.0 }
  0x43   :  { %v226_v37 = vsel %vm225_vm10, %v181_v61, %v224_v33  ;;  %v232_v38 = vadd.f32 %v231_v36, %v230_v34  ;;  %v233_v39 = vsel %vm49_vm0, %v217_v35, 0.0 }
  0x44   :  { %v229_v40 = vsel %vm227_vm11, %v228_v30, %v226_v37 }
  0x45   :  { %v234_v41 = vadd.f32 %v233_v39, %v232_v38  ;;  %v235_v42 = vsel %vm49_vm0, %v229_v40, 0.0 }
  0x47   :  { %v236_v43 = vadd.f32 %v235_v42, %v234_v41 }
  0x49   :  { %237 = vadd.xlane.f32.xlu0 %v236_v43 }
  0xbc   :  { %v238_v51 = vpop.xlane.xlu0 %237 }
  0xbd   :  { %v246_v52 = vmul.f32 %v245_v50, %v238_v51 }
  0xbf   :  { %248 = vst.msk [vmem:[#allocation2] sm:$0x1] %vm247_vm13, %v246_v52 }
  0xc0   :  { %259 = dma.vmem_to_hbm [thread:$0]  %s255_s14, 16, %s257_s17, [#allocation3]  }
  0xc1   :  { %304 = dma.done.wait [#allocation3], 16  }
  0xc2   :  { %305 = vsyncadd [#allocation3], 4294967280 }
  0xc3   :  { %264 = vsyncpa [#allocation3], 1 }

// kernel: _forward.20
= control target key start
LH: loop header
LB: loop body
LE: loop exit
PB: predicated region body
PF: predicated region fallthrough
CT: control target
= control target key end

     0   :  { %s1086_s1 = inlined_call_operand.vmem [shape: bf16[512,128], index: 1, kind: input, shape index: {}]   ;;  %s1087_s0 = inlined_call_operand.vmem [shape: bf16[64,512], index: 0, kind: input, shape index: {}]   ;;  %s1088_s2 = inlined_call_operand.vmem [shape: f32[1,128], index: 2, kind: input, shape index: {}]   ;;  %s1089_s3 = inlined_call_operand.vmem [shape: bf16[64,128], index: 3, kind: output, shape index: {}]  }
   0x1   :  { %v800_v0 = vld [vmem:[%s1086_s1 + $0x38] sm:$0xff]  ;;  %v799_v4 = vld [vmem:[%s1086_s1 + $0x30] sm:$0xff]  ;;  %v798_v8 = vld [vmem:[%s1086_s1 + $0x28] sm:$0xff] }
   0x2   :  { %v808_v1 = vld [vmem:[%s1086_s1 + $0x78] sm:$0xff]  ;;  %386 = vmatpush.bf16.msra.mxu0 %v800_v0  ;;  %v807_v5 = vld [vmem:[%s1086_s1 + $0x70] sm:$0xff]  ;;  %v806_v9 = vld [vmem:[%s1086_s1 + $0x68] sm:$0xff] }
   0x3   :  { %v816_v2 = vld [vmem:[%s1086_s1 + $0xb8] sm:$0xff]  ;;  %415 = vmatpush.bf16.msra.mxu1 %v808_v1  ;;  %v815_v6 = vld [vmem:[%s1086_s1 + $0xb0] sm:$0xff]  ;;  %v814_v10 = vld [vmem:[%s1086_s1 + $0xa8] sm:$0xff] }
   0x4   :  { %v824_v3 = vld [vmem:[%s1086_s1 + $0xf8] sm:$0xff]  ;;  %444 = vmatpush.bf16.msra.mxu2 %v816_v2  ;;  %v823_v7 = vld [vmem:[%s1086_s1 + $0xf0] sm:$0xff]  ;;  %v822_v11 = vld [vmem:[%s1086_s1 + $0xe8] sm:$0xff] }
   0x5   :  { %473 = vmatpush.bf16.msra.mxu3 %v824_v3  ;;  %v797_v12 = vld [vmem:[%s1086_s1 + $0x20] sm:$0xff]  ;;  %v796_v16 = vld [vmem:[%s1086_s1 + $0x18] sm:$0xff]  ;;  %v795_v20 = vld [vmem:[%s1086_s1 + $0x10] sm:$0xff] }
   0x6   :  { %387 = vmatpush.bf16.msra.mxu0 %v799_v4  ;;  %v805_v13 = vld [vmem:[%s1086_s1 + $0x60] sm:$0xff]  ;;  %v804_v17 = vld [vmem:[%s1086_s1 + $0x58] sm:$0xff]  ;;  %v803_v21 = vld [vmem:[%s1086_s1 + $0x50] sm:$0xff] }
   0x7   :  { %416 = vmatpush.bf16.msra.mxu1 %v807_v5  ;;  %v813_v14 = vld [vmem:[%s1086_s1 + $0xa0] sm:$0xff]  ;;  %v812_v18 = vld [vmem:[%s1086_s1 + $0x98] sm:$0xff]  ;;  %v811_v22 = vld [vmem:[%s1086_s1 + $0x90] sm:$0xff] }
   0x8   :  { %445 = vmatpush.bf16.msra.mxu2 %v815_v6  ;;  %v821_v15 = vld [vmem:[%s1086_s1 + $0xe0] sm:$0xff]  ;;  %v820_v19 = vld [vmem:[%s1086_s1 + $0xd8] sm:$0xff]  ;;  %v819_v23 = vld [vmem:[%s1086_s1 + $0xd0] sm:$0xff] }
   0x9   :  { %474 = vmatpush.bf16.msra.mxu3 %v823_v7  ;;  %v794_v24 = vld [vmem:[%s1086_s1 + $0x8] sm:$0xff]  ;;  %v793_v28 = vld [vmem:[%s1086_s1] sm:$0xff]  ;;  %v779_v33 = vld [vmem:[%s1087_s0 + $0xc] sm:$0xf0] }
   0xa   :  { %388 = vmatpush.bf16.msra.mxu0 %v798_v8  ;;  %v802_v25 = vld [vmem:[%s1086_s1 + $0x48] sm:$0xff]  ;;  %v801_v29 = vld [vmem:[%s1086_s1 + $0x40] sm:$0xff]  ;;  %v589_v35 = vld [vmem:[%s1087_s0 + $0x10] sm:$0xf0] }
   0xb   :  { %417 = vmatpush.bf16.msra.mxu1 %v806_v9  ;;  %v810_v26 = vld [vmem:[%s1086_s1 + $0x88] sm:$0xff]  ;;  %v809_v30 = vld [vmem:[%s1086_s1 + $0x80] sm:$0xff]  ;;  %v780_v37 = vld [vmem:[%s1087_s0 + $0x14] sm:$0xf0] }
   0xc   :  { %446 = vmatpush.bf16.msra.mxu2 %v814_v10  ;;  %v818_v27 = vld [vmem:[%s1086_s1 + $0xc8] sm:$0xff]  ;;  %v817_v31 = vld [vmem:[%s1086_s1 + $0xc0] sm:$0xff]  ;;  %v597_v39 = vld [vmem:[%s1087_s0 + $0x18] sm:$0xf0] }
   0xd   :  { %475 = vmatpush.bf16.msra.mxu3 %v822_v11  ;;  %v587_v32 = vld [vmem:[%s1087_s0] sm:$0xf]  ;;  %v777_v34 = vld [vmem:[%s1087_s0 + $0x4] sm:$0xf]  ;;  %v595_v36 = vld [vmem:[%s1087_s0 + $0x8] sm:$0xf] }
   0xe   :  { %389 = vmatpush.bf16.msra.mxu0 %v797_v12  ;;  %v778_v38 = vld [vmem:[%s1087_s0 + $0xc] sm:$0xf]  ;;  %v588_v40 = vor.u32 %v779_v33, %v587_v32  ;;  %v592_v41 = vor.u32 %v777_v34, %v589_v35  ;;  %v596_v42 = vor.u32 %v780_v37, %v595_v36  ;;  %v603_v44 = vld [vmem:[%s1087_s0 + $0x20] sm:$0xf]  ;;  %v783_v45 = vld [vmem:[%s1087_s0 + $0x2c] sm:$0xf0] }
   0xf   :  { %418 = vmatpush.bf16.msra.mxu1 %v805_v13  ;;  %v600_v43 = vor.u32 %v778_v38, %v597_v39  ;;  %v781_v46 = vld [vmem:[%s1087_s0 + $0x24] sm:$0xf]  ;;  %v605_v47 = vld [vmem:[%s1087_s0 + $0x30] sm:$0xf0]  ;;  %v611_v48 = vld [vmem:[%s1087_s0 + $0x28] sm:$0xf]  ;;  %v604_v52 = vor.u32 %v783_v45, %v603_v44 }
  0x10   :  { %447 = vmatpush.bf16.msra.mxu2 %v813_v14  ;;  %v784_v49 = vld [vmem:[%s1087_s0 + $0x34] sm:$0xf0]  ;;  %v782_v50 = vld [vmem:[%s1087_s0 + $0x2c] sm:$0xf]  ;;  %v613_v51 = vld [vmem:[%s1087_s0 + $0x38] sm:$0xf0]  ;;  %v608_v53 = vor.u32 %v781_v46, %v605_v47 }
  0x11   :  { %476 = vmatpush.bf16.msra.mxu3 %v821_v15  ;;  %v612_v54 = vor.u32 %v784_v49, %v611_v48  ;;  %v616_v55 = vor.u32 %v782_v50, %v613_v51  ;;  %v619_v56 = vld [vmem:[%s1087_s0 + $0x40] sm:$0xf]  ;;  %v787_v57 = vld [vmem:[%s1087_s0 + $0x4c] sm:$0xf0]  ;;  %v785_v58 = vld [vmem:[%s1087_s0 + $0x44] sm:$0xf] }
  0x12   :  { %390 = vmatpush.bf16.msra.mxu0 %v796_v16  ;;  %v621_v59 = vld [vmem:[%s1087_s0 + $0x50] sm:$0xf0]  ;;  %v627_v60 = vld [vmem:[%s1087_s0 + $0x48] sm:$0xf]  ;;  %v788_v61 = vld [vmem:[%s1087_s0 + $0x54] sm:$0xf0]  ;;  %v620_v0 = vor.u32 %v787_v57, %v619_v56 }
  0x13   :  { %419 = vmatpush.bf16.msra.mxu1 %v804_v17  ;;  %v786_v62 = vld [vmem:[%s1087_s0 + $0x4c] sm:$0xf]  ;;  %v629_v63 = vld [vmem:[%s1087_s0 + $0x58] sm:$0xf0]  ;;  %v624_v1 = vor.u32 %v785_v58, %v621_v59  ;;  %v628_v2 = vor.u32 %v788_v61, %v627_v60  ;;  %v635_v4 = vld [vmem:[%s1087_s0 + $0x60] sm:$0xf] }
  0x14   :  { %448 = vmatpush.bf16.msra.mxu2 %v812_v18  ;;  %v632_v3 = vor.u32 %v786_v62, %v629_v63  ;;  %v791_v5 = vld [vmem:[%s1087_s0 + $0x6c] sm:$0xf0]  ;;  %v789_v6 = vld [vmem:[%s1087_s0 + $0x64] sm:$0xf]  ;;  %v637_v7 = vld [vmem:[%s1087_s0 + $0x70] sm:$0xf0] }
  0x15   :  { %477 = vmatpush.bf16.msra.mxu3 %v820_v19  ;;  %v643_v8 = vld [vmem:[%s1087_s0 + $0x68] sm:$0xf]  ;;  %v792_v9 = vld [vmem:[%s1087_s0 + $0x74] sm:$0xf0]  ;;  %v790_v10 = vld [vmem:[%s1087_s0 + $0x6c] sm:$0xf]  ;;  %v636_v12 = vor.u32 %v791_v5, %v635_v4  ;;  %v640_v13 = vor.u32 %v789_v6, %v637_v7 }
  0x16   :  { %391 = vmatpush.bf16.msra.mxu0 %v795_v20  ;;  %v645_v11 = vld [vmem:[%s1087_s0 + $0x78] sm:$0xf0]  ;;  %v644_v14 = vor.u32 %v792_v9, %v643_v8 }
  0x17   :  { %420 = vmatpush.bf16.msra.mxu1 %v803_v21  ;;  %v648_v15 = vor.u32 %v790_v10, %v645_v11 }
  0x18   :  { %449 = vmatpush.bf16.msra.mxu2 %v811_v22 }
  0x19   :  { %478 = vmatpush.bf16.msra.mxu3 %v819_v23 }
  0x1a   :  { %392 = vmatpush.bf16.msra.mxu0 %v794_v24 }
  0x1b   :  { %421 = vmatpush.bf16.msra.mxu1 %v802_v25  ;;  %v1064_v25 = vld [vmem:[%s1088_s2] ss:$0 sm:$0xff] }
  0x1c   :  { %450 = vmatpush.bf16.msra.mxu2 %v810_v26 }
  0x1d   :  { %479 = vmatpush.bf16.msra.mxu3 %v818_v27 }
  0x1e   :  { %393 = vmatpush.bf16.msra.mxu0 %v793_v28 }
  0x1f   :  { %422 = vmatpush.bf16.msra.mxu1 %v801_v29 }
  0x20   :  { %451 = vmatpush.bf16.msra.mxu2 %v809_v30 }
  0x21   :  { %480 = vmatpush.bf16.msra.mxu3 %v817_v31  ;;  %394 = vmatmul.bf16.vlgmr.msra.gmra.mxu0 %v588_v40 }
  0x22   :  { %423 = vmatmul.bf16.vlgmr.msra.gmra.mxu1 %v592_v41 }
  0x23   :  { %452 = vmatmul.bf16.vlgmr.msra.gmra.mxu2 %v596_v42 }
  0x24   :  { %481 = vmatmul.bf16.vlgmr.msra.gmra.mxu3 %v600_v43 }
  0x31   :  { %399 = vmatmul.bf16.gmra.mxu0 %v604_v52 }
  0x32   :  { %428 = vmatmul.bf16.gmra.mxu1 %v608_v53 }
  0x33   :  { %457 = vmatmul.bf16.gmra.mxu2 %v612_v54 }
  0x34   :  { %486 = vmatmul.bf16.gmra.mxu3 %v616_v55 }
  0x41   :  { %404 = vmatmul.bf16.gmra.mxu0 %v620_v0 }
  0x42   :  { %433 = vmatmul.bf16.gmra.mxu1 %v624_v1 }
  0x43   :  { %462 = vmatmul.bf16.gmra.mxu2 %v628_v2 }
  0x44   :  { %491 = vmatmul.bf16.gmra.mxu3 %v632_v3 }
  0x51   :  { %409 = vmatmul.bf16.gmra.mxu0 %v636_v12 }
  0x52   :  { %438 = vmatmul.bf16.gmra.mxu1 %v640_v13 }
  0x53   :  { %467 = vmatmul.bf16.gmra.mxu2 %v644_v14 }
  0x54   :  { %496 = vmatmul.bf16.gmra.mxu3 %v648_v15 }
  0x9e   :  { %v395_v16 = vpop.f32.mrf.mxu0 }
  0x9f   :  { %v424_v17 = vpop.f32.mrf.mxu1 }
  0xa0   :  { %v425_v18 = vadd.f32 %v424_v17, %v395_v16 }
  0xa6   :  { %v453_v19 = vpop.f32.mrf.mxu2  ;;  %v397_v22 = vpop.f32.mrf.mxu0 }
  0xa7   :  { %v482_v20 = vpop.f32.mrf.mxu3  ;;  %v454_v21 = vadd.f32 %v453_v19, %v425_v18  ;;  %v426_v23 = vpop.f32.mrf.mxu1 }
  0xa8   :  { %v427_v26 = vadd.f32 %v426_v23, %v397_v22 }
  0xa9   :  { %v483_v24 = vadd.f32 %v482_v20, %v454_v21 }
  0xab   :  { %v533_v29 = vadd.f32 %v1064_v25, %v483_v24 }
  0xad   :  { %v549_v34 = vmul.f32 0.2, %v533_v29  ;;  %vm541_vm0 = vcmp.ge.f32.partialorder %v533_v29, 0.0 }
  0xae   :  { %v455_v27 = vpop.f32.mrf.mxu2  ;;  %v400_v31 = vpop.f32.mrf.mxu0 }
  0xaf   :  { %v484_v28 = vpop.f32.mrf.mxu3  ;;  %v456_v30 = vadd.f32 %v455_v27, %v427_v26  ;;  %v429_v32 = vpop.f32.mrf.mxu1  ;;  %v557_v40 = vsel %vm541_vm0, %v533_v29, %v549_v34 }
  0xb0   :  { %v430_v36 = vadd.f32 %v429_v32, %v400_v31 }
  0xb1   :  { %v485_v33 = vadd.f32 %v484_v28, %v456_v30 }
  0xb3   :  { %v534_v35 = vadd.f32 %v1064_v25, %v485_v33 }
  0xb5   :  { %vm542_vm1 = vcmp.ge.f32.partialorder %v534_v35, 0.0  ;;  %v550_v37 = vmul.f32 0.2, %v534_v35 }
  0xb6   :  { %v458_v38 = vpop.f32.mrf.mxu2  ;;  %v402_v43 = vpop.f32.mrf.mxu0 }
  0xb7   :  { %v487_v39 = vpop.f32.mrf.mxu3  ;;  %v558_v41 = vsel %vm542_vm1, %v534_v35, %v550_v37  ;;  %v459_v42 = vadd.f32 %v458_v38, %v430_v36  ;;  %v431_v44 = vpop.f32.mrf.mxu1 }
  0xb8   :  { %v828_v45 = vpack.c.bf16 %v558_v41, %v557_v40  ;;  %v432_v47 = vadd.f32 %v431_v44, %v402_v43 }
  0xb9   :  { %v488_v46 = vadd.f32 %v487_v39, %v459_v42 }
  0xba   :  { %829 = vst [vmem:[%s1089_s3] sm:$0xff] %v828_v45  }
  0xbb   :  { %v535_v50 = vadd.f32 %v1064_v25, %v488_v46 }
  0xbd   :  { %v551_v55 = vmul.f32 0.2, %v535_v50  ;;  %vm543_vm2 = vcmp.ge.f32.partialorder %v535_v50, 0.0 }
  0xbe   :  { %v460_v48 = vpop.f32.mrf.mxu2  ;;  %v405_v52 = vpop.f32.mrf.mxu0 }
  0xbf   :  { %v489_v49 = vpop.f32.mrf.mxu3  ;;  %v461_v51 = vadd.f32 %v460_v48, %v432_v47  ;;  %v434_v53 = vpop.f32.mrf.mxu1  ;;  %v559_v61 = vsel %vm543_vm2, %v535_v50, %v551_v55 }
  0xc0   :  { %v435_v57 = vadd.f32 %v434_v53, %v405_v52 }
  0xc1   :  { %v490_v54 = vadd.f32 %v489_v49, %v461_v51 }
  0xc3   :  { %v536_v56 = vadd.f32 %v1064_v25, %v490_v54 }
  0xc5   :  { %vm544_vm3 = vcmp.ge.f32.partialorder %v536_v56, 0.0  ;;  %v552_v58 = vmul.f32 0.2, %v536_v56 }
  0xc6   :  { %v463_v59 = vpop.f32.mrf.mxu2  ;;  %v407_v0 = vpop.f32.mrf.mxu0 }
  0xc7   :  { %v492_v60 = vpop.f32.mrf.mxu3  ;;  %v560_v62 = vsel %vm544_vm3, %v536_v56, %v552_v58  ;;  %v464_v63 = vadd.f32 %v463_v59, %v435_v57  ;;  %v436_v1 = vpop.f32.mrf.mxu1 }
  0xc8   :  { %v833_v2 = vpack.c.bf16 %v560_v62, %v559_v61  ;;  %v437_v4 = vadd.f32 %v436_v1, %v407_v0 }
  0xc9   :  { %v493_v3 = vadd.f32 %v492_v60, %v464_v63 }
  0xca   :  { %845 = vst [vmem:[%s1089_s3 + $0x8] sm:$0xff] %v833_v2  }
  0xcb   :  { %v537_v7 = vadd.f32 %v1064_v25, %v493_v3 }
  0xcd   :  { %v553_v12 = vmul.f32 0.2, %v537_v7  ;;  %vm545_vm4 = vcmp.ge.f32.partialorder %v537_v7, 0.0 }
  0xce   :  { %v465_v5 = vpop.f32.mrf.mxu2  ;;  %v410_v9 = vpop.f32.mrf.mxu0 }
  0xcf   :  { %v494_v6 = vpop.f32.mrf.mxu3  ;;  %v466_v8 = vadd.f32 %v465_v5, %v437_v4  ;;  %v439_v10 = vpop.f32.mrf.mxu1  ;;  %v561_v18 = vsel %vm545_vm4, %v537_v7, %v553_v12 }
  0xd0   :  { %v440_v14 = vadd.f32 %v439_v10, %v410_v9 }
  0xd1   :  { %v495_v11 = vadd.f32 %v494_v6, %v466_v8 }
  0xd3   :  { %v538_v13 = vadd.f32 %v1064_v25, %v495_v11 }
  0xd5   :  { %vm546_vm5 = vcmp.ge.f32.partialorder %v538_v13, 0.0  ;;  %v554_v15 = vmul.f32 0.2, %v538_v13 }
  0xd6   :  { %v468_v16 = vpop.f32.mrf.mxu2  ;;  %v412_v22 = vpop.f32.mrf.mxu0 }
  0xd7   :  { %v497_v17 = vpop.f32.mrf.mxu3  ;;  %v562_v19 = vsel %vm546_vm5, %v538_v13, %v554_v15  ;;  %v469_v20 = vadd.f32 %v468_v16, %v440_v14  ;;  %v441_v23 = vpop.f32.mrf.mxu1 }
  0xd8   :  { %v838_v21 = vpack.c.bf16 %v562_v19, %v561_v18  ;;  %v442_v26 = vadd.f32 %v441_v23, %v412_v22 }
  0xd9   :  { %v498_v24 = vadd.f32 %v497_v17, %v469_v20 }
  0xda   :  { %846 = vst [vmem:[%s1089_s3 + $0x10] sm:$0xff] %v838_v21  }
  0xdb   :  { %v539_v28 = vadd.f32 %v1064_v25, %v498_v24 }
  0xdd   :  { %v555_v32 = vmul.f32 0.2, %v539_v28  ;;  %vm547_vm6 = vcmp.ge.f32.partialorder %v539_v28, 0.0 }
  0xde   :  { %v470_v27 = vpop.f32.mrf.mxu2 }
  0xdf   :  { %v471_v29 = vadd.f32 %v470_v27, %v442_v26  ;;  %v499_v30 = vpop.f32.mrf.mxu3  ;;  %v563_v35 = vsel %vm547_vm6, %v539_v28, %v555_v32 }
  0xe1   :  { %v500_v31 = vadd.f32 %v499_v30, %v471_v29 }
  0xe3   :  { %v540_v33 = vadd.f32 %v1064_v25, %v500_v31 }
  0xe5   :  { %vm548_vm7 = vcmp.ge.f32.partialorder %v540_v33, 0.0  ;;  %v556_v34 = vmul.f32 0.2, %v540_v33 }
  0xe7   :  { %v564_v36 = vsel %vm548_vm7, %v540_v33, %v556_v34 }
  0xe8   :  { %v843_v37 = vpack.c.bf16 %v564_v36, %v563_v35 }
  0xea   :  { %847 = vst [vmem:[%s1089_s3 + $0x18] sm:$0xff] %v843_v37  }

// kernel: _forward.22
= control target key start
LH: loop header
LB: loop body
LE: loop exit
PB: predicated region body
PF: predicated region fallthrough
CT: control target
= control target key end

     0   :  { %s877_s1 = inlined_call_operand.vmem [shape: bf16[384,128], index: 1, kind: input, shape index: {}]   ;;  %s878_s0 = inlined_call_operand.vmem [shape: bf16[64,384], index: 0, kind: input, shape index: {}]   ;;  %s879_s2 = inlined_call_operand.vmem [shape: f32[1,128], index: 2, kind: input, shape index: {}]   ;;  %s880_s3 = inlined_call_operand.vmem [shape: bf16[64,128], index: 3, kind: output, shape index: {}]  }
   0x1   :  { %v639_v0 = vld [vmem:[%s877_s1 + $0x38] sm:$0xff]  ;;  %v638_v3 = vld [vmem:[%s877_s1 + $0x30] sm:$0xff]  ;;  %v637_v6 = vld [vmem:[%s877_s1 + $0x28] sm:$0xff] }
   0x2   :  { %v647_v1 = vld [vmem:[%s877_s1 + $0x78] sm:$0xff]  ;;  %306 = vmatpush.bf16.msra.mxu0 %v639_v0  ;;  %v646_v4 = vld [vmem:[%s877_s1 + $0x70] sm:$0xff]  ;;  %679 = vmatpush.bf16.msra.mxu3 %v639_v0  ;;  %v645_v7 = vld [vmem:[%s877_s1 + $0x68] sm:$0xff] }
   0x3   :  { %v655_v2 = vld [vmem:[%s877_s1 + $0xb8] sm:$0xff]  ;;  %335 = vmatpush.bf16.msra.mxu1 %v647_v1  ;;  %v654_v5 = vld [vmem:[%s877_s1 + $0xb0] sm:$0xff]  ;;  %v653_v8 = vld [vmem:[%s877_s1 + $0xa8] sm:$0xff] }
   0x4   :  { %364 = vmatpush.bf16.msra.mxu2 %v655_v2  ;;  %v636_v9 = vld [vmem:[%s877_s1 + $0x20] sm:$0xff]  ;;  %v635_v12 = vld [vmem:[%s877_s1 + $0x18] sm:$0xff]  ;;  %v634_v15 = vld [vmem:[%s877_s1 + $0x10] sm:$0xff] }
   0x5   :  { %v644_v10 = vld [vmem:[%s877_s1 + $0x60] sm:$0xff]  ;;  %v643_v13 = vld [vmem:[%s877_s1 + $0x58] sm:$0xff]  ;;  %v642_v16 = vld [vmem:[%s877_s1 + $0x50] sm:$0xff] }
   0x6   :  { %307 = vmatpush.bf16.msra.mxu0 %v638_v3  ;;  %680 = vmatpush.bf16.msra.mxu3 %v638_v3  ;;  %v652_v11 = vld [vmem:[%s877_s1 + $0xa0] sm:$0xff]  ;;  %v651_v14 = vld [vmem:[%s877_s1 + $0x98] sm:$0xff]  ;;  %v650_v17 = vld [vmem:[%s877_s1 + $0x90] sm:$0xff] }
   0x7   :  { %336 = vmatpush.bf16.msra.mxu1 %v646_v4  ;;  %v633_v18 = vld [vmem:[%s877_s1 + $0x8] sm:$0xff]  ;;  %v632_v21 = vld [vmem:[%s877_s1] sm:$0xff]  ;;  %v480_v27 = vld [vmem:[%s878_s0 + $0xc] sm:$0xf0] }
   0x8   :  { %365 = vmatpush.bf16.msra.mxu2 %v654_v5  ;;  %v641_v19 = vld [vmem:[%s877_s1 + $0x48] sm:$0xff]  ;;  %v640_v22 = vld [vmem:[%s877_s1 + $0x40] sm:$0xff]  ;;  %v622_v29 = vld [vmem:[%s878_s0 + $0x10] sm:$0xf0] }
   0x9   :  { %v649_v20 = vld [vmem:[%s877_s1 + $0x88] sm:$0xff]  ;;  %v648_v23 = vld [vmem:[%s877_s1 + $0x80] sm:$0xff]  ;;  %v490_v30 = vld [vmem:[%s878_s0 + $0x18] sm:$0xf] }
   0xa   :  { %308 = vmatpush.bf16.msra.mxu0 %v637_v6  ;;  %681 = vmatpush.bf16.msra.mxu3 %v637_v6  ;;  %v478_v24 = vld [vmem:[%s878_s0] sm:$0xf]  ;;  %v621_v25 = vld [vmem:[%s878_s0 + $0x8] sm:$0xf0]  ;;  %v620_v26 = vld [vmem:[%s878_s0 + $0x4] sm:$0xf] }
   0xb   :  { %337 = vmatpush.bf16.msra.mxu1 %v645_v7  ;;  %v486_v28 = vld [vmem:[%s878_s0 + $0x8] sm:$0xf]  ;;  %v624_v31 = vld [vmem:[%s878_s0 + $0x20] sm:$0xf0]  ;;  %v479_v32 = vor.u32 %v621_v25, %v478_v24  ;;  %v483_v33 = vor.u32 %v620_v26, %v480_v27  ;;  %v623_v36 = vld [vmem:[%s878_s0 + $0x1c] sm:$0xf] }
   0xc   :  { %366 = vmatpush.bf16.msra.mxu2 %v653_v8  ;;  %v487_v34 = vor.u32 %v622_v29, %v486_v28  ;;  %v491_v35 = vor.u32 %v624_v31, %v490_v30  ;;  %v492_v37 = vld [vmem:[%s878_s0 + $0x24] sm:$0xf0]  ;;  %v498_v38 = vld [vmem:[%s878_s0 + $0x20] sm:$0xf]  ;;  %v625_v39 = vld [vmem:[%s878_s0 + $0x28] sm:$0xf0] }
   0xd   :  { %v502_v40 = vld [vmem:[%s878_s0 + $0x30] sm:$0xf]  ;;  %v627_v41 = vld [vmem:[%s878_s0 + $0x38] sm:$0xf0]  ;;  %v495_v42 = vor.u32 %v623_v36, %v492_v37  ;;  %v499_v43 = vor.u32 %v625_v39, %v498_v38  ;;  %v626_v45 = vld [vmem:[%s878_s0 + $0x34] sm:$0xf] }
   0xe   :  { %309 = vmatpush.bf16.msra.mxu0 %v636_v9  ;;  %682 = vmatpush.bf16.msra.mxu3 %v636_v9  ;;  %v503_v44 = vor.u32 %v627_v41, %v502_v40  ;;  %v504_v46 = vld [vmem:[%s878_s0 + $0x3c] sm:$0xf0]  ;;  %v510_v47 = vld [vmem:[%s878_s0 + $0x38] sm:$0xf]  ;;  %v628_v48 = vld [vmem:[%s878_s0 + $0x40] sm:$0xf0] }
   0xf   :  { %338 = vmatpush.bf16.msra.mxu1 %v644_v10  ;;  %v514_v49 = vld [vmem:[%s878_s0 + $0x48] sm:$0xf]  ;;  %v630_v50 = vld [vmem:[%s878_s0 + $0x50] sm:$0xf0]  ;;  %v507_v51 = vor.u32 %v626_v45, %v504_v46  ;;  %v511_v52 = vor.u32 %v628_v48, %v510_v47  ;;  %v629_v54 = vld [vmem:[%s878_s0 + $0x4c] sm:$0xf] }
  0x10   :  { %367 = vmatpush.bf16.msra.mxu2 %v652_v11  ;;  %v515_v53 = vor.u32 %v630_v50, %v514_v49  ;;  %v516_v55 = vld [vmem:[%s878_s0 + $0x54] sm:$0xf0]  ;;  %v522_v56 = vld [vmem:[%s878_s0 + $0x50] sm:$0xf]  ;;  %v631_v57 = vld [vmem:[%s878_s0 + $0x58] sm:$0xf0] }
  0x11   :  { %v519_v58 = vor.u32 %v629_v54, %v516_v55  ;;  %v523_v59 = vor.u32 %v631_v57, %v522_v56  ;;  %v855_v2 = vld [vmem:[%s879_s2] ss:$0 sm:$0xff] }
  0x12   :  { %310 = vmatpush.bf16.msra.mxu0 %v635_v12  ;;  %683 = vmatpush.bf16.msra.mxu3 %v635_v12 }
  0x13   :  { %339 = vmatpush.bf16.msra.mxu1 %v643_v13 }
  0x14   :  { %368 = vmatpush.bf16.msra.mxu2 %v651_v14 }
  0x16   :  { %311 = vmatpush.bf16.msra.mxu0 %v634_v15  ;;  %684 = vmatpush.bf16.msra.mxu3 %v634_v15 }
  0x17   :  { %340 = vmatpush.bf16.msra.mxu1 %v642_v16 }
  0x18   :  { %369 = vmatpush.bf16.msra.mxu2 %v650_v17 }
  0x1a   :  { %312 = vmatpush.bf16.msra.mxu0 %v633_v18  ;;  %685 = vmatpush.bf16.msra.mxu3 %v633_v18 }
  0x1b   :  { %341 = vmatpush.bf16.msra.mxu1 %v641_v19 }
  0x1c   :  { %370 = vmatpush.bf16.msra.mxu2 %v649_v20 }
  0x1e   :  { %313 = vmatpush.bf16.msra.mxu0 %v632_v21  ;;  %686 = vmatpush.bf16.msra.mxu3 %v632_v21 }
  0x1f   :  { %342 = vmatpush.bf16.msra.mxu1 %v640_v22 }
  0x20   :  { %371 = vmatpush.bf16.msra.mxu2 %v648_v23 }
  0x21   :  { %314 = vmatmul.bf16.vlgmr.msra.gmra.mxu0 %v479_v32  ;;  %319 = vmatmul.bf16.vlgmr.msra.gmra.mxu3 %v491_v35 }
  0x22   :  { %343 = vmatmul.bf16.vlgmr.msra.gmra.mxu1 %v483_v33 }
  0x23   :  { %372 = vmatmul.bf16.vlgmr.msra.gmra.mxu2 %v487_v34 }
  0x31   :  { %324 = vmatmul.bf16.gmra.mxu3 %v503_v44 }
  0x32   :  { %348 = vmatmul.bf16.gmra.mxu1 %v495_v42 }
  0x33   :  { %377 = vmatmul.bf16.gmra.mxu2 %v499_v43 }
  0x41   :  { %329 = vmatmul.bf16.gmra.mxu3 %v515_v53 }
  0x42   :  { %353 = vmatmul.bf16.gmra.mxu1 %v507_v51 }
  0x43   :  { %382 = vmatmul.bf16.gmra.mxu2 %v511_v52 }
  0x52   :  { %358 = vmatmul.bf16.gmra.mxu1 %v519_v58 }
  0x53   :  { %387 = vmatmul.bf16.gmra.mxu2 %v523_v59 }
  0x9e   :  { %v315_v61 = vpop.f32.mrf.mxu0 }
  0x9f   :  { %v344_v60 = vpop.f32.mrf.mxu1 }
  0xa0   :  { %v345_v62 = vadd.f32 %v344_v60, %v315_v61 }
  0xa4   :  { %v320_v4 = vpop.f32.mrf.mxu3 }
  0xa6   :  { %v373_v63 = vpop.f32.mrf.mxu2  ;;  %v317_v3 = vpop.f32.mrf.mxu0 }
  0xa7   :  { %v346_v0 = vpop.f32.mrf.mxu1  ;;  %v374_v1 = vadd.f32 %v373_v63, %v345_v62 }
  0xa8   :  { %v347_v6 = vadd.f32 %v346_v0, %v317_v3 }
  0xa9   :  { %v424_v5 = vadd.f32 %v855_v2, %v374_v1 }
  0xab   :  { %v440_v10 = vmul.f32 0.2, %v424_v5  ;;  %vm432_vm0 = vcmp.ge.f32.partialorder %v424_v5, 0.0 }
  0xac   :  { %v322_v13 = vpop.f32.mrf.mxu3 }
  0xad   :  { %v448_v14 = vsel %vm432_vm0, %v424_v5, %v440_v10 }
  0xae   :  { %v375_v7 = vpop.f32.mrf.mxu2 }
  0xaf   :  { %v376_v8 = vadd.f32 %v375_v7, %v347_v6  ;;  %v349_v9 = vpop.f32.mrf.mxu1 }
  0xb0   :  { %v350_v16 = vadd.f32 %v349_v9, %v320_v4 }
  0xb1   :  { %v425_v11 = vadd.f32 %v855_v2, %v376_v8 }
  0xb3   :  { %vm433_vm1 = vcmp.ge.f32.partialorder %v425_v11, 0.0  ;;  %v441_v12 = vmul.f32 0.2, %v425_v11 }
  0xb4   :  { %v325_v23 = vpop.f32.mrf.mxu3 }
  0xb5   :  { %v449_v15 = vsel %vm433_vm1, %v425_v11, %v441_v12 }
  0xb6   :  { %v659_v17 = vpack.c.bf16 %v449_v15, %v448_v14  ;;  %v378_v18 = vpop.f32.mrf.mxu2 }
  0xb7   :  { %v351_v19 = vpop.f32.mrf.mxu1  ;;  %v379_v20 = vadd.f32 %v378_v18, %v350_v16 }
  0xb8   :  { %660 = vst [vmem:[%s880_s3] sm:$0xff] %v659_v17   ;;  %v352_v22 = vadd.f32 %v351_v19, %v322_v13 }
  0xb9   :  { %v426_v21 = vadd.f32 %v855_v2, %v379_v20 }
  0xbb   :  { %v442_v27 = vmul.f32 0.2, %v426_v21  ;;  %vm434_vm2 = vcmp.ge.f32.partialorder %v426_v21, 0.0 }
  0xbc   :  { %v327_v36 = vpop.f32.mrf.mxu3 }
  0xbd   :  { %v450_v30 = vsel %vm434_vm2, %v426_v21, %v442_v27 }
  0xbe   :  { %v380_v24 = vpop.f32.mrf.mxu2 }
  0xbf   :  { %v381_v25 = vadd.f32 %v380_v24, %v352_v22  ;;  %v354_v26 = vpop.f32.mrf.mxu1 }
  0xc0   :  { %v355_v32 = vadd.f32 %v354_v26, %v325_v23 }
  0xc1   :  { %v427_v28 = vadd.f32 %v855_v2, %v381_v25 }
  0xc3   :  { %vm435_vm3 = vcmp.ge.f32.partialorder %v427_v28, 0.0  ;;  %v443_v29 = vmul.f32 0.2, %v427_v28 }
  0xc4   :  { %v330_v45 = vpop.f32.mrf.mxu3 }
  0xc5   :  { %v451_v31 = vsel %vm435_vm3, %v427_v28, %v443_v29 }
  0xc6   :  { %v664_v33 = vpack.c.bf16 %v451_v31, %v450_v30  ;;  %v383_v34 = vpop.f32.mrf.mxu2 }
  0xc7   :  { %v356_v35 = vpop.f32.mrf.mxu1  ;;  %v384_v37 = vadd.f32 %v383_v34, %v355_v32 }
  0xc8   :  { %676 = vst [vmem:[%s880_s3 + $0x8] sm:$0xff] %v664_v33   ;;  %v357_v39 = vadd.f32 %v356_v35, %v327_v36 }
  0xc9   :  { %v428_v38 = vadd.f32 %v855_v2, %v384_v37 }
  0xcb   :  { %v444_v43 = vmul.f32 0.2, %v428_v38  ;;  %vm436_vm4 = vcmp.ge.f32.partialorder %v428_v38, 0.0 }
  0xcc   :  { %v332_v54 = vpop.f32.mrf.mxu3 }
  0xcd   :  { %v452_v47 = vsel %vm436_vm4, %v428_v38, %v444_v43 }
  0xce   :  { %v385_v40 = vpop.f32.mrf.mxu2 }
  0xcf   :  { %v386_v41 = vadd.f32 %v385_v40, %v357_v39  ;;  %v359_v42 = vpop.f32.mrf.mxu1 }
  0xd0   :  { %v360_v49 = vadd.f32 %v359_v42, %v330_v45 }
  0xd1   :  { %v429_v44 = vadd.f32 %v855_v2, %v386_v41 }
  0xd3   :  { %vm437_vm5 = vcmp.ge.f32.partialorder %v429_v44, 0.0  ;;  %v445_v46 = vmul.f32 0.2, %v429_v44 }
  0xd5   :  { %v453_v48 = vsel %vm437_vm5, %v429_v44, %v445_v46 }
  0xd6   :  { %v669_v50 = vpack.c.bf16 %v453_v48, %v452_v47  ;;  %v388_v51 = vpop.f32.mrf.mxu2 }
  0xd7   :  { %v389_v52 = vadd.f32 %v388_v51, %v360_v49  ;;  %v361_v53 = vpop.f32.mrf.mxu1 }
  0xd8   :  { %677 = vst [vmem:[%s880_s3 + $0x10] sm:$0xff] %v669_v50   ;;  %v362_v56 = vadd.f32 %v361_v53, %v332_v54 }
  0xd9   :  { %v430_v55 = vadd.f32 %v855_v2, %v389_v52 }
  0xdb   :  { %v446_v59 = vmul.f32 0.2, %v430_v55  ;;  %vm438_vm6 = vcmp.ge.f32.partialorder %v430_v55, 0.0 }
  0xdd   :  { %v454_v62 = vsel %vm438_vm6, %v430_v55, %v446_v59 }
  0xde   :  { %v390_v57 = vpop.f32.mrf.mxu2 }
  0xdf   :  { %v391_v58 = vadd.f32 %v390_v57, %v362_v56 }
  0xe1   :  { %v431_v60 = vadd.f32 %v855_v2, %v391_v58 }
  0xe3   :  { %vm439_vm7 = vcmp.ge.f32.partialorder %v431_v60, 0.0  ;;  %v447_v61 = vmul.f32 0.2, %v431_v60 }
  0xe5   :  { %v455_v63 = vsel %vm439_vm7, %v431_v60, %v447_v61 }
  0xe6   :  { %v674_v0 = vpack.c.bf16 %v455_v63, %v454_v62 }
  0xe8   :  { %678 = vst [vmem:[%s880_s3 + $0x18] sm:$0xff] %v674_v0  }

// kernel: _forward.23
= control target key start
LH: loop header
LB: loop body
LE: loop exit
PB: predicated region body
PF: predicated region fallthrough
CT: control target
= control target key end

     0   :  { %vm374_vm1 = vcmask 261120   ;;  %vm387_vm3 = vcmask 7168   ;;  %s742_s1 = inlined_call_operand.vmem [shape: bf16[512,32], index: 1, kind: input, shape index: {}]   ;;  %s743_s2 = inlined_call_operand.vmem [shape: f32[1,32], index: 2, kind: input, shape index: {}]   ;;  %s744_s0 = inlined_call_operand.vmem [shape: bf16[16,512], index: 0, kind: input, shape index: {}]   ;;  %s745_s3 = inlined_call_operand.vmem [shape: f32[1,32], index: 3, kind: input, shape index: {}]   ;;  %s746_s4 = inlined_call_operand.<no memory space> [shape: f32[1,1], index: 4, kind: input, shape index: {}]   ;;  %s747_s5 = inlined_call_operand.vmem [shape: f32[16,1], index: 5, kind: output, shape index: {}]  }
   0x1   :  { %v549_v0 = vld [vmem:[%s742_s1 + $0x38] sm:$0xff]  ;;  %v548_v4 = vld [vmem:[%s742_s1 + $0x30] sm:$0xff]  ;;  %v547_v8 = vld [vmem:[%s742_s1 + $0x28] sm:$0xff]  ;;  %v10_v44 = vstv %s746_s4 }
   0x2   :  { %v557_v1 = vld [vmem:[%s742_s1 + $0x78] sm:$0xff]  ;;  %306 = vmatpush.bf16.msra.mxu0 %v549_v0  ;;  %v556_v5 = vld [vmem:[%s742_s1 + $0x70] sm:$0xff]  ;;  %v555_v9 = vld [vmem:[%s742_s1 + $0x68] sm:$0xff]  ;;  %11 = vst [vmem:[#allocation2] sm:$0x1] %v10_v44 }
   0x3   :  { %v565_v2 = vld [vmem:[%s742_s1 + $0xb8] sm:$0xff]  ;;  %320 = vmatpush.bf16.msra.mxu1 %v557_v1  ;;  %v564_v6 = vld [vmem:[%s742_s1 + $0xb0] sm:$0xff]  ;;  %v563_v10 = vld [vmem:[%s742_s1 + $0xa8] sm:$0xff] }
   0x4   :  { %v573_v3 = vld [vmem:[%s742_s1 + $0xf8] sm:$0xff]  ;;  %334 = vmatpush.bf16.msra.mxu2 %v565_v2  ;;  %v572_v7 = vld [vmem:[%s742_s1 + $0xf0] sm:$0xff]  ;;  %v571_v11 = vld [vmem:[%s742_s1 + $0xe8] sm:$0xff] }
   0x5   :  { %348 = vmatpush.bf16.msra.mxu3 %v573_v3  ;;  %v546_v12 = vld [vmem:[%s742_s1 + $0x20] sm:$0xff]  ;;  %v545_v16 = vld [vmem:[%s742_s1 + $0x18] sm:$0xff]  ;;  %v544_v20 = vld [vmem:[%s742_s1 + $0x10] sm:$0xff] }
   0x6   :  { %307 = vmatpush.bf16.msra.mxu0 %v548_v4  ;;  %v554_v13 = vld [vmem:[%s742_s1 + $0x60] sm:$0xff]  ;;  %v553_v17 = vld [vmem:[%s742_s1 + $0x58] sm:$0xff]  ;;  %v552_v21 = vld [vmem:[%s742_s1 + $0x50] sm:$0xff] }
   0x7   :  { %321 = vmatpush.bf16.msra.mxu1 %v556_v5  ;;  %v562_v14 = vld [vmem:[%s742_s1 + $0xa0] sm:$0xff]  ;;  %v561_v18 = vld [vmem:[%s742_s1 + $0x98] sm:$0xff]  ;;  %v560_v22 = vld [vmem:[%s742_s1 + $0x90] sm:$0xff] }
   0x8   :  { %335 = vmatpush.bf16.msra.mxu2 %v564_v6  ;;  %v570_v15 = vld [vmem:[%s742_s1 + $0xe0] sm:$0xff]  ;;  %v569_v19 = vld [vmem:[%s742_s1 + $0xd8] sm:$0xff]  ;;  %v568_v23 = vld [vmem:[%s742_s1 + $0xd0] sm:$0xff] }
   0x9   :  { %349 = vmatpush.bf16.msra.mxu3 %v572_v7  ;;  %v543_v24 = vld [vmem:[%s742_s1 + $0x8] sm:$0xff]  ;;  %v542_v28 = vld [vmem:[%s742_s1] sm:$0xff]  ;;  %v540_v33 = vld [vmem:[%s744_s0 + $0xc] sm:$0xf0] }
   0xa   :  { %308 = vmatpush.bf16.msra.mxu0 %v547_v8  ;;  %v551_v25 = vld [vmem:[%s742_s1 + $0x48] sm:$0xff]  ;;  %v550_v29 = vld [vmem:[%s742_s1 + $0x40] sm:$0xff]  ;;  %v398_v35 = vld [vmem:[%s744_s0 + $0x10] sm:$0xf0] }
   0xb   :  { %322 = vmatpush.bf16.msra.mxu1 %v555_v9  ;;  %v559_v26 = vld [vmem:[%s742_s1 + $0x88] sm:$0xff]  ;;  %v558_v30 = vld [vmem:[%s742_s1 + $0x80] sm:$0xff]  ;;  %v541_v37 = vld [vmem:[%s744_s0 + $0x14] sm:$0xf0] }
   0xc   :  { %336 = vmatpush.bf16.msra.mxu2 %v563_v10  ;;  %v567_v27 = vld [vmem:[%s742_s1 + $0xc8] sm:$0xff]  ;;  %v566_v31 = vld [vmem:[%s742_s1 + $0xc0] sm:$0xff]  ;;  %v406_v39 = vld [vmem:[%s744_s0 + $0x18] sm:$0xf0] }
   0xd   :  { %350 = vmatpush.bf16.msra.mxu3 %v571_v11  ;;  %v396_v32 = vld [vmem:[%s744_s0] sm:$0xf]  ;;  %v538_v34 = vld [vmem:[%s744_s0 + $0x4] sm:$0xf]  ;;  %v404_v36 = vld [vmem:[%s744_s0 + $0x8] sm:$0xf] }
   0xe   :  { %309 = vmatpush.bf16.msra.mxu0 %v546_v12  ;;  %v539_v38 = vld [vmem:[%s744_s0 + $0xc] sm:$0xf]  ;;  %v397_v40 = vor.u32 %v540_v33, %v396_v32  ;;  %v401_v41 = vor.u32 %v538_v34, %v398_v35  ;;  %v405_v42 = vor.u32 %v541_v37, %v404_v36  ;;  %v574_v45 = vld [vmem:[%s743_s2] ss:$0 sm:$0xff] }
   0xf   :  { %323 = vmatpush.bf16.msra.mxu1 %v554_v13  ;;  %v409_v43 = vor.u32 %v539_v38, %v406_v39  ;;  %v575_v56 = vld [vmem:[%s745_s3] ss:$0 sm:$0xff] }
  0x10   :  { %337 = vmatpush.bf16.msra.mxu2 %v562_v14  ;;  %v576_v7 = vld [vmem:[#allocation2] ss:$0 sm:$0xff] }
  0x11   :  { %351 = vmatpush.bf16.msra.mxu3 %v570_v15 }
  0x12   :  { %310 = vmatpush.bf16.msra.mxu0 %v545_v16 }
  0x13   :  { %324 = vmatpush.bf16.msra.mxu1 %v553_v17 }
  0x14   :  { %338 = vmatpush.bf16.msra.mxu2 %v561_v18 }
  0x15   :  { %352 = vmatpush.bf16.msra.mxu3 %v569_v19 }
  0x16   :  { %311 = vmatpush.bf16.msra.mxu0 %v544_v20 }
  0x17   :  { %325 = vmatpush.bf16.msra.mxu1 %v552_v21 }
  0x18   :  { %339 = vmatpush.bf16.msra.mxu2 %v560_v22 }
  0x19   :  { %353 = vmatpush.bf16.msra.mxu3 %v568_v23 }
  0x1a   :  { %312 = vmatpush.bf16.msra.mxu0 %v543_v24 }
  0x1b   :  { %326 = vmatpush.bf16.msra.mxu1 %v551_v25 }
  0x1c   :  { %340 = vmatpush.bf16.msra.mxu2 %v559_v26 }
  0x1d   :  { %354 = vmatpush.bf16.msra.mxu3 %v567_v27 }
  0x1e   :  { %313 = vmatpush.bf16.msra.mxu0 %v542_v28 }
  0x1f   :  { %327 = vmatpush.bf16.msra.mxu1 %v550_v29 }
  0x20   :  { %341 = vmatpush.bf16.msra.mxu2 %v558_v30 }
  0x21   :  { %355 = vmatpush.bf16.msra.mxu3 %v566_v31  ;;  %314 = vmatmul.bf16.vlgmr.msra.gmra.mxu0 %v397_v40 }
  0x22   :  { %328 = vmatmul.bf16.vlgmr.msra.gmra.mxu1 %v401_v41 }
  0x23   :  { %342 = vmatmul.bf16.vlgmr.msra.gmra.mxu2 %v405_v42 }
  0x24   :  { %356 = vmatmul.bf16.vlgmr.msra.gmra.mxu3 %v409_v43 }
  0x9e   :  { %v315_v46 = vpop.f32.mrf.mxu0 }
  0x9f   :  { %v316_v47 = vadd.f32 %v574_v45, %v315_v46  ;;  %v329_v48 = vpop.f32.mrf.mxu1 }
  0xa1   :  { %v330_v49 = vadd.f32 %v329_v48, %v316_v47 }
  0xa6   :  { %v343_v50 = vpop.f32.mrf.mxu2  ;;  %v317_v53 = vpop.f32.mrf.mxu0 }
  0xa7   :  { %v357_v51 = vpop.f32.mrf.mxu3  ;;  %v344_v52 = vadd.f32 %v343_v50, %v330_v49  ;;  %v318_v55 = vadd.f32 %v574_v45, %v317_v53  ;;  %v331_v58 = vpop.f32.mrf.mxu1 }
  0xa9   :  { %v358_v54 = vadd.f32 %v357_v51, %v344_v52  ;;  %v332_v59 = vadd.f32 %v331_v58, %v318_v55 }
  0xab   :  { %v364_v57 = vmul.f32 0.2, %v358_v54  ;;  %vm362_vm0 = vcmp.ge.f32.partialorder %v358_v54, 0.0 }
  0xad   :  { %v366_v60 = vsel %vm362_vm0, %v358_v54, %v364_v57 }
  0xae   :  { %v345_v61 = vpop.f32.mrf.mxu2  ;;  %v372_v62 = vmul.f32 %v575_v56, %v366_v60 }
  0xaf   :  { %v346_v63 = vadd.f32 %v345_v61, %v332_v59  ;;  %v359_v0 = vpop.f32.mrf.mxu3 }
  0xb0   :  { %v375_v1 = vsel %vm374_vm1, %v372_v62, 0.0 }
  0xb1   :  { %v360_v2 = vadd.f32 %v359_v0, %v346_v63  ;;  %376 = vadd.xlane.f32.xlu0 %v375_v1 }
  0xb3   :  { %vm363_vm2 = vcmp.ge.f32.partialorder %v360_v2, 0.0  ;;  %v365_v3 = vmul.f32 0.2, %v360_v2 }
  0xb5   :  { %v367_v4 = vsel %vm363_vm2, %v360_v2, %v365_v3 }
  0xb6   :  { %v373_v5 = vmul.f32 %v575_v56, %v367_v4 }
  0xb8   :  { %v378_v6 = vsel %vm374_vm1, %v373_v5, 0.0 }
  0xb9   :  { %379 = vadd.xlane.f32.xlu0 %v378_v6 }
 0x124   :  { %v377_v8 = vpop.xlane.xlu0 %376 }
 0x125   :  { %v385_v9 = vadd.f32 %v576_v7, %v377_v8 }
 0x127   :  { %388 = vst.msk [vmem:[%s747_s5] sm:$0xff] %vm387_vm3, %v385_v9 }
 0x12c   :  { %v380_v10 = vpop.xlane.xlu0 %379 }
 0x12d   :  { %v386_v11 = vadd.f32 %v576_v7, %v380_v10 }
 0x12f   :  { %389 = vst.msk [vmem:[%s747_s5 + $0x8] sm:$0xff] %vm387_vm3, %v386_v11 }

</bundles_post_ra>
